<compile_context>
chip_gen: v5e
topology: v5e:2x2
jax: 0.10.0
libtpu: 0.0.40
codegen_flags: <defaults>
</compile_context>

<pallas_src>
import functools

import jax
import jax.numpy as jnp
import numpy as np
from jax import lax
from jax.experimental import pallas as pl
from jax.experimental.pallas import tpu as pltpu

LANE = 128
BN_EPS = 1e-5
VMEM_LIMIT = 48 * 1024 * 1024  # <= v7x's 64 MiB physical; fine on v5e/v6e too


# --------------------------- kernels ---------------------------------------
def _conv_stats_kernel(x_ref, w_ref, b_ref, ssin_ref, y_ref, stats_ref, xp_ref,
                       *, height, width, fuse_in):
    """One image: (optional fused input BN+ReLU) -> conv3x3(pad=1)+bias.

    Emits the bf16 conv output tile and the per-image (sum, sum-of-squares)
    of the f32 pre-BN activations.  The 3x3 conv is 9 accumulating MXU
    matmuls over a zero-halo scratch buffer (no im2col materialization).
    """
    h, w = height, width
    cin_p = x_ref.shape[-1]
    cout_p = w_ref.shape[-1]

    x = x_ref[0]                                          # (h, w, cin_p) bf16

    if fuse_in:
        # Fused stage-1 BatchNorm (precomputed scale/shift) + ReLU on the
        # loaded tile; VPU filler under the MXU, effectively free.
        ssv = ssin_ref[...]                               # (2, cin_p) f32
        scale_in = ssv[0:1, :].reshape(1, 1, cin_p)
        shift_in = ssv[1:2, :].reshape(1, 1, cin_p)
        xf = x.astype(jnp.float32) * scale_in + shift_in
        x = jnp.maximum(xf, 0.0).astype(jnp.bfloat16)

    # Zero-halo scratch: zero everything, overwrite the interior.
    xp_ref[...] = jnp.zeros_like(xp_ref)
    xp_ref[pl.ds(1, h), pl.ds(1, w), :] = x

    # 9 accumulating matmuls (K = Cin_p per tap); bias folded into the init.
    acc = jnp.broadcast_to(b_ref[...], (h * w, cout_p))   # f32
    for t in range(9):
        dy, dx = divmod(t, 3)
        tap = xp_ref[pl.ds(dy, h), pl.ds(dx, w), :].reshape(h * w, cin_p)
        acc = acc + jnp.dot(tap, w_ref[pl.ds(t * cin_p, cin_p), :],
                            preferred_element_type=jnp.float32)

    y_ref[0] = acc.reshape(h, w, cout_p).astype(jnp.bfloat16)

    # Per-image statistics partials (reduced to scale/shift in the wrapper).
    s = jnp.sum(acc, axis=0, keepdims=True)               # (1, cout_p)
    sq = jnp.sum(acc * acc, axis=0, keepdims=True)        # (1, cout_p)
    stats_ref[0] = jnp.concatenate([s, sq], axis=0)       # (2, cout_p)


def _bn_relu_kernel(y_ref, ss_ref, o_ref):
    """Final-stage BatchNorm (precomputed scale/shift) + ReLU."""
    cout_p = o_ref.shape[-1]
    ssv = ss_ref[...]                                     # (2, cout_p) f32
    scale = ssv[0:1, :].reshape(1, 1, cout_p)
    shift = ssv[1:2, :].reshape(1, 1, cout_p)
    y = y_ref[0].astype(jnp.float32)                      # (h, w, cout_p)
    o_ref[0] = jnp.maximum(y * scale + shift, 0.0).astype(o_ref.dtype)


# --------------------------- wrappers ---------------------------------------
def _round_up(x, m):
    return (x + m - 1) // m * m


def _pack_conv_weight(w_oihw, cin_p, cout_p):
    """OIHW -> HWIO, zero-pad channels to lane-dense sizes, fold to
    (9*Cin_p, Cout_p) bf16 so tap t occupies rows [t*Cin_p, (t+1)*Cin_p)."""
    cout, cin, kh, kw = w_oihw.shape
    w = jnp.transpose(w_oihw, (2, 3, 1, 0))               # (3, 3, cin, cout)
    w = jnp.pad(w, ((0, 0), (0, 0), (0, cin_p - cin), (0, cout_p - cout)))
    return w.reshape(kh * kw * cin_p, cout_p).astype(jnp.bfloat16)


def _pad_row(v, cp):
    return jnp.pad(v, (0, cp - v.shape[0])).reshape(1, cp).astype(jnp.float32)


def _pad1(v, cp):
    return jnp.pad(v, (0, cp - v.shape[0])).astype(jnp.float32)


def _scale_shift(stats, gamma_p, beta_p, count):
    """Reduce per-image (sum, sumsq) partials -> BN scale/shift (2, C_p)."""
    st = jnp.sum(stats, axis=0)                           # (2, c_p) f32
    mean = st[0] * (1.0 / count)
    var = st[1] * (1.0 / count) - mean * mean             # biased variance
    inv = lax.rsqrt(var + BN_EPS)
    scale = gamma_p * inv
    shift = beta_p - mean * scale
    return jnp.stack([scale, shift]).astype(jnp.float32)  # (2, c_p)


def _conv_stage(x, w9, bias_p, ss_in, *, fuse_in):
    """conv3x3(pad=1)+bias (optionally with fused input BN+ReLU).

    x: (N, H, W, Cin_p) bf16.  Returns bf16 conv output and per-image stats.
    """
    n, h, w, cin_p = x.shape
    cout_p = w9.shape[1]
    kernel = functools.partial(_conv_stats_kernel, height=h, width=w,
                               fuse_in=fuse_in)
    y, stats = pl.pallas_call(
        kernel,
        out_shape=(jax.ShapeDtypeStruct((n, h, w, cout_p), jnp.bfloat16),
                   jax.ShapeDtypeStruct((n, 2, cout_p), jnp.float32)),
        grid_spec=pltpu.PrefetchScalarGridSpec(
            num_scalar_prefetch=0,
            grid=(n,),
            in_specs=[
                pl.BlockSpec((1, h, w, cin_p), lambda i: (i, 0, 0, 0)),
                pl.BlockSpec((9 * cin_p, cout_p), lambda i: (0, 0)),
                pl.BlockSpec((1, cout_p), lambda i: (0, 0)),
                pl.BlockSpec((2, cin_p), lambda i: (0, 0)),
            ],
            out_specs=[
                pl.BlockSpec((1, h, w, cout_p), lambda i: (i, 0, 0, 0)),
                pl.BlockSpec((1, 2, cout_p), lambda i: (i, 0, 0)),
            ],
            scratch_shapes=[pltpu.VMEM((h + 2, w + 2, cin_p), jnp.bfloat16)]),
        compiler_params=pltpu.CompilerParams(
            # per-image outputs only -> safe to shard across TCs on v7x
            dimension_semantics=("parallel",),
            vmem_limit_bytes=VMEM_LIMIT),
    )(x, w9, bias_p, ss_in)
    return y, stats


def _bn_relu(y, ss):
    n, h, w, cout_p = y.shape
    return pl.pallas_call(
        _bn_relu_kernel,
        out_shape=jax.ShapeDtypeStruct((n, h, w, cout_p), jnp.float32),
        grid_spec=pltpu.PrefetchScalarGridSpec(
            num_scalar_prefetch=0,
            grid=(n,),
            in_specs=[pl.BlockSpec((1, h, w, cout_p), lambda i: (i, 0, 0, 0)),
                      pl.BlockSpec((2, cout_p), lambda i: (0, 0))],
            out_specs=pl.BlockSpec((1, h, w, cout_p), lambda i: (i, 0, 0, 0))),
        compiler_params=pltpu.CompilerParams(
            dimension_semantics=("parallel",),
            vmem_limit_bytes=VMEM_LIMIT),
    )(y, ss)


def double_conv(x_nchw, params):
    """Forward pass of DoubleConv. NCHW in / NCHW out (PyTorch convention)."""
    w1, b1, g1, be1, w2, b2, g2, be2 = params
    n, cin, h, w = x_nchw.shape
    cmid, cout = w1.shape[0], w2.shape[0]
    cin_p, cmid_p, cout_p = (_round_up(c, LANE) for c in (cin, cmid, cout))
    count = float(n * h * w)             # BatchNorm statistics extent (N, H, W)

    # NCHW -> NHWC, zero-pad channels to a lane-dense multiple of 128, bf16.
    # (padded channels stay exactly zero through conv/BN/ReLU of both stages)
    x = jnp.transpose(x_nchw, (0, 2, 3, 1))
    x = jnp.pad(x, ((0, 0), (0, 0), (0, 0), (0, cin_p - cin))).astype(jnp.bfloat16)

    w1p = _pack_conv_weight(w1, cin_p, cmid_p)
    w2p = _pack_conv_weight(w2, cmid_p, cout_p)

    # Stage 1: conv1 + bias, per-image batch stats.
    dummy_ss = jnp.zeros((2, cin_p), jnp.float32)          # unused (fuse_in=False)
    y1, st1 = _conv_stage(x, w1p, _pad_row(b1, cmid_p), dummy_ss, fuse_in=False)
    ss1 = _scale_shift(st1, _pad1(g1, cmid_p), _pad1(be1, cmid_p), count)

    # Stage 2: BN1+ReLU fused into the conv2 kernel's input path.
    y2, st2 = _conv_stage(y1, w2p, _pad_row(b2, cout_p), ss1, fuse_in=True)
    ss2 = _scale_shift(st2, _pad1(g2, cout_p), _pad1(be2, cout_p), count)

    # Final BN2 + ReLU.
    out = _bn_relu(y2, ss2)                                # (n, h, w, cout_p) f32
    out = out[..., :cout]                                  # strip channel padding
    return jnp.transpose(out, (0, 3, 1, 2))                # NHWC -> NCHW


# ------------------- pure-JAX reference (for correctness) -------------------
def ref_double_conv(x, params, mimic_bf16=False):
    """PyTorch-semantics reference.  With mimic_bf16=True it rounds the conv
    operands and the stored conv outputs to bf16, matching the kernel's
    bf16-operand / f32-accumulate / bf16-intermediate arithmetic."""
    if mimic_bf16:
        q = lambda t: t.astype(jnp.bfloat16).astype(jnp.float32)
    else:
        q = lambda t: t

    def stage(xx, wgt, b, g, be):
        y = lax.conv_general_dilated(
            q(xx), q(wgt), window_strides=(1, 1), padding=((1, 1), (1, 1)),
            dimension_numbers=("NCHW", "OIHW", "NCHW"),
            preferred_element_type=jnp.float32)
        y = y + b[None, :, None, None]
        mean = y.mean(axis=(0, 2, 3), keepdims=True)
        var = (y * y).mean(axis=(0, 2, 3), keepdims=True) - mean * mean
        scale = g[None, :, None, None] * lax.rsqrt(var + BN_EPS)
        shift = be[None, :, None, None] - mean * scale
        return jnp.maximum(q(y) * scale + shift, 0.0)

    w1, b1, g1, be1, w2, b2, g2, be2 = params
    return stage(stage(x, w1, b1, g1, be1), w2, b2, g2, be2)


if __name__ == "__main__":
    N, Cin, H, W = 2, 4, 16, 16
    Cmid = Cout = 8                       # mid_channels defaults to out_channels

    key = jax.random.PRNGKey(0)
    ks = jax.random.split(key, 9)
    x = jax.random.normal(ks[0], (N, Cin, H, W), jnp.float32)

    # Deterministic synthetic parameters (shapes per nn.Conv2d / nn.BatchNorm2d).
    w1 = 0.1 * jax.random.normal(ks[1], (Cmid, Cin, 3, 3), jnp.float32)    # OIHW
    b1 = 0.1 * jax.random.normal(ks[2], (Cmid,), jnp.float32)
    g1 = 1.0 + 0.1 * jax.random.normal(ks[3], (Cmid,), jnp.float32)        # BN gamma
    be1 = 0.1 * jax.random.normal(ks[4], (Cmid,), jnp.float32)             # BN beta
    w2 = 0.1 * jax.random.normal(ks[5], (Cout, Cmid, 3, 3), jnp.float32)
    b2 = 0.1 * jax.random.normal(ks[6], (Cout,), jnp.float32)
    g2 = 1.0 + 0.1 * jax.random.normal(ks[7], (Cout,), jnp.float32)
    be2 = 0.1 * jax.random.normal(ks[8], (Cout,), jnp.float32)
    params = (w1, b1, g1, be1, w2, b2, g2, be2)

    fwd = jax.jit(double_conv)
    out = jax.block_until_ready(fwd(x, params))

    # Tight check vs a reference that mimics the kernel's bf16 MXU operands and
    # bf16 inter-stage storage (f32 accumulation / statistics).
    ref_mimic = jax.block_until_ready(ref_double_conv(x, params, mimic_bf16=True))
    np.testing.assert_allclose(np.asarray(out), np.asarray(ref_mimic),
                               rtol=2e-2, atol=2e-2)

    # Sanity check vs the pure-f32 PyTorch-semantics reference (difference is
    # only bf16 rounding of MXU operands / intermediates).
    ref_f32 = jax.block_until_ready(ref_double_conv(x, params, mimic_bf16=False))
    np.testing.assert_allclose(np.asarray(out), np.asarray(ref_f32),
                               rtol=1e-1, atol=1e-1)

    print("KERNEL_OK")
</pallas_src>

<mosaic_0001>
module attributes {stable_mosaic.version = 11 : i64} {
  func.func @_conv_stats_kernel(%arg0: i32, %arg1: memref<1x16x16x128xbf16, #tpu.memory_space<vmem>>, %arg2: memref<1152x128xbf16, #tpu.memory_space<vmem>>, %arg3: memref<1x128xf32, #tpu.memory_space<vmem>>, %arg4: memref<2x128xf32, #tpu.memory_space<vmem>>, %arg5: memref<1x16x16x128xbf16, #tpu.memory_space<vmem>>, %arg6: memref<1x2x128xf32, #tpu.memory_space<vmem>>, %arg7: memref<18x18x128xbf16, #tpu.memory_space<vmem>>) attributes {dimension_semantics = [#tpu.dimension_semantics<parallel>], iteration_bounds = array<i64: 2>, scalar_prefetch = 0 : i64, scratch_operands = 1 : i64, tpu.core_type = #tpu.core_type<tc>, window_params = [{transform_indices = @transform_0, window_bounds = array<i64: 1, 16, 16, 128>}, {pipeline_mode = #tpu.pipeline_mode<synchronous>, transform_indices = @transform_1, window_bounds = array<i64: 1152, 128>}, {pipeline_mode = #tpu.pipeline_mode<synchronous>, transform_indices = @transform_2, window_bounds = array<i64: 1, 128>}, {pipeline_mode = #tpu.pipeline_mode<synchronous>, transform_indices = @transform_3, window_bounds = array<i64: 2, 128>}, {transform_indices = @transform_4, window_bounds = array<i64: 1, 16, 16, 128>}, {transform_indices = @transform_5, window_bounds = array<i64: 1, 2, 128>}]} {
    %c0 = arith.constant 0 : index
    %c0_0 = arith.constant 0 : index
    %c0_1 = arith.constant 0 : index
    %c0_2 = arith.constant 0 : index
    %0 = vector.load %arg1[%c0, %c0_0, %c0_1, %c0_2] : memref<1x16x16x128xbf16, #tpu.memory_space<vmem>>, vector<1x16x16x128xbf16>
    %1 = vector.shape_cast %0 : vector<1x16x16x128xbf16> to vector<16x16x128xbf16>
    %cst = arith.constant 0.000000e+00 : bf16
    %2 = vector.broadcast %cst : bf16 to vector<18x18x128xbf16>
    %c0_3 = arith.constant 0 : index
    %c0_4 = arith.constant 0 : index
    %c0_5 = arith.constant 0 : index
    %3 = vector.load %arg7[%c0_3, %c0_4, %c0_5] : memref<18x18x128xbf16, #tpu.memory_space<vmem>>, vector<18x18x128xbf16>
    tpu.vector_store %arg7[%c0_3, %c0_4, %c0_5], %2 {strides = array<i32>} : memref<18x18x128xbf16, #tpu.memory_space<vmem>>, vector<18x18x128xbf16>,
    %c1 = arith.constant 1 : index
    %c1_6 = arith.constant 1 : index
    %c0_7 = arith.constant 0 : index
    %4 = vector.load %arg7[%c1, %c1_6, %c0_7] : memref<18x18x128xbf16, #tpu.memory_space<vmem>>, vector<16x16x128xbf16>
    tpu.vector_store %arg7[%c1, %c1_6, %c0_7], %1 {strides = array<i32>} : memref<18x18x128xbf16, #tpu.memory_space<vmem>>, vector<16x16x128xbf16>,
    %c0_8 = arith.constant 0 : index
    %c0_9 = arith.constant 0 : index
    %5 = vector.load %arg3[%c0_8, %c0_9] : memref<1x128xf32, #tpu.memory_space<vmem>>, vector<1x128xf32>
    %6 = vector.shape_cast %5 : vector<1x128xf32> to vector<1x128xf32>
    %7 = vector.broadcast %6 : vector<1x128xf32> to vector<256x128xf32>
    %c0_10 = arith.constant 0 : index
    %c0_11 = arith.constant 0 : index
    %c0_12 = arith.constant 0 : index
    %8 = vector.load %arg7[%c0_10, %c0_11, %c0_12] : memref<18x18x128xbf16, #tpu.memory_space<vmem>>, vector<16x16x128xbf16>
    %9 = vector.shape_cast %8 : vector<16x16x128xbf16> to vector<256x128xbf16>
    %c0_13 = arith.constant 0 : index
    %c0_14 = arith.constant 0 : index
    %10 = vector.load %arg2[%c0_13, %c0_14] : memref<1152x128xbf16, #tpu.memory_space<vmem>>, vector<128x128xbf16>
    %cst_15 = arith.constant dense<0.000000e+00> : vector<256x128xf32>
    %11 = tpu.matmul %9, %10, %cst_15 {dimension_numbers = #tpu.dot_dimension_numbers<[1], [0], [0], [1], [0, 0, 1, 1], [], []>} : vector<256x128xbf16>, vector<128x128xbf16>, vector<256x128xf32> -> vector<256x128xf32>
    %12 = arith.addf %7, %11 : vector<256x128xf32>
    %c0_16 = arith.constant 0 : index
    %c1_17 = arith.constant 1 : index
    %c0_18 = arith.constant 0 : index
    %13 = vector.load %arg7[%c0_16, %c1_17, %c0_18] : memref<18x18x128xbf16, #tpu.memory_space<vmem>>, vector<16x16x128xbf16>
    %14 = vector.shape_cast %13 : vector<16x16x128xbf16> to vector<256x128xbf16>
    %c128 = arith.constant 128 : index
    %c0_19 = arith.constant 0 : index
    %15 = vector.load %arg2[%c128, %c0_19] : memref<1152x128xbf16, #tpu.memory_space<vmem>>, vector<128x128xbf16>
    %cst_20 = arith.constant dense<0.000000e+00> : vector<256x128xf32>
    %16 = tpu.matmul %14, %15, %cst_20 {dimension_numbers = #tpu.dot_dimension_numbers<[1], [0], [0], [1], [0, 0, 1, 1], [], []>} : vector<256x128xbf16>, vector<128x128xbf16>, vector<256x128xf32> -> vector<256x128xf32>
    %17 = arith.addf %12, %16 : vector<256x128xf32>
    %c0_21 = arith.constant 0 : index
    %c2 = arith.constant 2 : index
    %c0_22 = arith.constant 0 : index
    %18 = vector.load %arg7[%c0_21, %c2, %c0_22] : memref<18x18x128xbf16, #tpu.memory_space<vmem>>, vector<16x16x128xbf16>
    %19 = vector.shape_cast %18 : vector<16x16x128xbf16> to vector<256x128xbf16>
    %c256 = arith.constant 256 : index
    %c0_23 = arith.constant 0 : index
    %20 = vector.load %arg2[%c256, %c0_23] : memref<1152x128xbf16, #tpu.memory_space<vmem>>, vector<128x128xbf16>
    %cst_24 = arith.constant dense<0.000000e+00> : vector<256x128xf32>
    %21 = tpu.matmul %19, %20, %cst_24 {dimension_numbers = #tpu.dot_dimension_numbers<[1], [0], [0], [1], [0, 0, 1, 1], [], []>} : vector<256x128xbf16>, vector<128x128xbf16>, vector<256x128xf32> -> vector<256x128xf32>
    %22 = arith.addf %17, %21 : vector<256x128xf32>
    %c1_25 = arith.constant 1 : index
    %c0_26 = arith.constant 0 : index
    %c0_27 = arith.constant 0 : index
    %23 = vector.load %arg7[%c1_25, %c0_26, %c0_27] : memref<18x18x128xbf16, #tpu.memory_space<vmem>>, vector<16x16x128xbf16>
    %24 = vector.shape_cast %23 : vector<16x16x128xbf16> to vector<256x128xbf16>
    %c384 = arith.constant 384 : index
    %c0_28 = arith.constant 0 : index
    %25 = vector.load %arg2[%c384, %c0_28] : memref<1152x128xbf16, #tpu.memory_space<vmem>>, vector<128x128xbf16>
    %cst_29 = arith.constant dense<0.000000e+00> : vector<256x128xf32>
    %26 = tpu.matmul %24, %25, %cst_29 {dimension_numbers = #tpu.dot_dimension_numbers<[1], [0], [0], [1], [0, 0, 1, 1], [], []>} : vector<256x128xbf16>, vector<128x128xbf16>, vector<256x128xf32> -> vector<256x128xf32>
    %27 = arith.addf %22, %26 : vector<256x128xf32>
    %c1_30 = arith.constant 1 : index
    %c1_31 = arith.constant 1 : index
    %c0_32 = arith.constant 0 : index
    %28 = vector.load %arg7[%c1_30, %c1_31, %c0_32] : memref<18x18x128xbf16, #tpu.memory_space<vmem>>, vector<16x16x128xbf16>
    %29 = vector.shape_cast %28 : vector<16x16x128xbf16> to vector<256x128xbf16>
    %c512 = arith.constant 512 : index
    %c0_33 = arith.constant 0 : index
    %30 = vector.load %arg2[%c512, %c0_33] : memref<1152x128xbf16, #tpu.memory_space<vmem>>, vector<128x128xbf16>
    %cst_34 = arith.constant dense<0.000000e+00> : vector<256x128xf32>
    %31 = tpu.matmul %29, %30, %cst_34 {dimension_numbers = #tpu.dot_dimension_numbers<[1], [0], [0], [1], [0, 0, 1, 1], [], []>} : vector<256x128xbf16>, vector<128x128xbf16>, vector<256x128xf32> -> vector<256x128xf32>
    %32 = arith.addf %27, %31 : vector<256x128xf32>
    %c1_35 = arith.constant 1 : index
    %c2_36 = arith.constant 2 : index
    %c0_37 = arith.constant 0 : index
    %33 = vector.load %arg7[%c1_35, %c2_36, %c0_37] : memref<18x18x128xbf16, #tpu.memory_space<vmem>>, vector<16x16x128xbf16>
    %34 = vector.shape_cast %33 : vector<16x16x128xbf16> to vector<256x128xbf16>
    %c640 = arith.constant 640 : index
    %c0_38 = arith.constant 0 : index
    %35 = vector.load %arg2[%c640, %c0_38] : memref<1152x128xbf16, #tpu.memory_space<vmem>>, vector<128x128xbf16>
    %cst_39 = arith.constant dense<0.000000e+00> : vector<256x128xf32>
    %36 = tpu.matmul %34, %35, %cst_39 {dimension_numbers = #tpu.dot_dimension_numbers<[1], [0], [0], [1], [0, 0, 1, 1], [], []>} : vector<256x128xbf16>, vector<128x128xbf16>, vector<256x128xf32> -> vector<256x128xf32>
    %37 = arith.addf %32, %36 : vector<256x128xf32>
    %c2_40 = arith.constant 2 : index
    %c0_41 = arith.constant 0 : index
    %c0_42 = arith.constant 0 : index
    %38 = vector.load %arg7[%c2_40, %c0_41, %c0_42] : memref<18x18x128xbf16, #tpu.memory_space<vmem>>, vector<16x16x128xbf16>
    %39 = vector.shape_cast %38 : vector<16x16x128xbf16> to vector<256x128xbf16>
    %c768 = arith.constant 768 : index
    %c0_43 = arith.constant 0 : index
    %40 = vector.load %arg2[%c768, %c0_43] : memref<1152x128xbf16, #tpu.memory_space<vmem>>, vector<128x128xbf16>
    %cst_44 = arith.constant dense<0.000000e+00> : vector<256x128xf32>
    %41 = tpu.matmul %39, %40, %cst_44 {dimension_numbers = #tpu.dot_dimension_numbers<[1], [0], [0], [1], [0, 0, 1, 1], [], []>} : vector<256x128xbf16>, vector<128x128xbf16>, vector<256x128xf32> -> vector<256x128xf32>
    %42 = arith.addf %37, %41 : vector<256x128xf32>
    %c2_45 = arith.constant 2 : index
    %c1_46 = arith.constant 1 : index
    %c0_47 = arith.constant 0 : index
    %43 = vector.load %arg7[%c2_45, %c1_46, %c0_47] : memref<18x18x128xbf16, #tpu.memory_space<vmem>>, vector<16x16x128xbf16>
    %44 = vector.shape_cast %43 : vector<16x16x128xbf16> to vector<256x128xbf16>
    %c896 = arith.constant 896 : index
    %c0_48 = arith.constant 0 : index
    %45 = vector.load %arg2[%c896, %c0_48] : memref<1152x128xbf16, #tpu.memory_space<vmem>>, vector<128x128xbf16>
    %cst_49 = arith.constant dense<0.000000e+00> : vector<256x128xf32>
    %46 = tpu.matmul %44, %45, %cst_49 {dimension_numbers = #tpu.dot_dimension_numbers<[1], [0], [0], [1], [0, 0, 1, 1], [], []>} : vector<256x128xbf16>, vector<128x128xbf16>, vector<256x128xf32> -> vector<256x128xf32>
    %47 = arith.addf %42, %46 : vector<256x128xf32>
    %c2_50 = arith.constant 2 : index
    %c2_51 = arith.constant 2 : index
    %c0_52 = arith.constant 0 : index
    %48 = vector.load %arg7[%c2_50, %c2_51, %c0_52] : memref<18x18x128xbf16, #tpu.memory_space<vmem>>, vector<16x16x128xbf16>
    %49 = vector.shape_cast %48 : vector<16x16x128xbf16> to vector<256x128xbf16>
    %c1024 = arith.constant 1024 : index
    %c0_53 = arith.constant 0 : index
    %50 = vector.load %arg2[%c1024, %c0_53] : memref<1152x128xbf16, #tpu.memory_space<vmem>>, vector<128x128xbf16>
    %cst_54 = arith.constant dense<0.000000e+00> : vector<256x128xf32>
    %51 = tpu.matmul %49, %50, %cst_54 {dimension_numbers = #tpu.dot_dimension_numbers<[1], [0], [0], [1], [0, 0, 1, 1], [], []>} : vector<256x128xbf16>, vector<128x128xbf16>, vector<256x128xf32> -> vector<256x128xf32>
    %52 = arith.addf %47, %51 : vector<256x128xf32>
    %53 = vector.shape_cast %52 : vector<256x128xf32> to vector<16x16x128xf32>
    %54 = arith.truncf %53 : vector<16x16x128xf32> to vector<16x16x128xbf16>
    %c0_55 = arith.constant 0 : index
    %c0_56 = arith.constant 0 : index
    %c0_57 = arith.constant 0 : index
    %c0_58 = arith.constant 0 : index
    %55 = vector.load %arg5[%c0_55, %c0_56, %c0_57, %c0_58] : memref<1x16x16x128xbf16, #tpu.memory_space<vmem>>, vector<1x16x16x128xbf16>
    %56 = vector.shape_cast %55 : vector<1x16x16x128xbf16> to vector<16x16x128xbf16>
    %57 = vector.shape_cast %54 : vector<16x16x128xbf16> to vector<1x16x16x128xbf16>
    tpu.vector_store %arg5[%c0_55, %c0_56, %c0_57, %c0_58], %57 {strides = array<i32>} : memref<1x16x16x128xbf16, #tpu.memory_space<vmem>>, vector<1x16x16x128xbf16>,
    %cst_59 = arith.constant dense<0.000000e+00> : vector<128xf32>
    %58 = vector.multi_reduction <add>, %52, %cst_59 [0] : vector<256x128xf32> to vector<128xf32>
    %59 = vector.shape_cast %58 : vector<128xf32> to vector<1x128xf32>
    %60 = arith.mulf %52, %52 : vector<256x128xf32>
    %cst_60 = arith.constant dense<0.000000e+00> : vector<128xf32>
    %61 = vector.multi_reduction <add>, %60, %cst_60 [0] : vector<256x128xf32> to vector<128xf32>
    %62 = vector.shape_cast %61 : vector<128xf32> to vector<1x128xf32>
    %63 = tpu.concatenate %59, %62 in 0 : vector<1x128xf32>, vector<1x128xf32> -> vector<2x128xf32>
    %c0_61 = arith.constant 0 : index
    %c0_62 = arith.constant 0 : index
    %c0_63 = arith.constant 0 : index
    %64 = vector.load %arg6[%c0_61, %c0_62, %c0_63] : memref<1x2x128xf32, #tpu.memory_space<vmem>>, vector<1x2x128xf32>
    %65 = vector.shape_cast %64 : vector<1x2x128xf32> to vector<2x128xf32>
    %66 = vector.shape_cast %63 : vector<2x128xf32> to vector<1x2x128xf32>
    tpu.vector_store %arg6[%c0_61, %c0_62, %c0_63], %66 {strides = array<i32>} : memref<1x2x128xf32, #tpu.memory_space<vmem>>, vector<1x2x128xf32>,
    return
  }
  func.func @transform_0(%arg0: i32) -> (i32, i32, i32, i32) {
    %c0_i32 = arith.constant 0 : i32
    %c0_i32_0 = arith.constant 0 : i32
    %c0_i32_1 = arith.constant 0 : i32
    %c0_i32_2 = arith.constant 0 : i32
    return %arg0, %c0_i32, %c0_i32_0, %c0_i32_1 : i32, i32, i32, i32
  }
  func.func @transform_1(%arg0: i32) -> (i32, i32) {
    %c0_i32 = arith.constant 0 : i32
    %c0_i32_0 = arith.constant 0 : i32
    %c0_i32_1 = arith.constant 0 : i32
    return %c0_i32, %c0_i32_0 : i32, i32
  }
  func.func @transform_2(%arg0: i32) -> (i32, i32) {
    %c0_i32 = arith.constant 0 : i32
    %c0_i32_0 = arith.constant 0 : i32
    %c0_i32_1 = arith.constant 0 : i32
    return %c0_i32, %c0_i32_0 : i32, i32
  }
  func.func @transform_3(%arg0: i32) -> (i32, i32) {
    %c0_i32 = arith.constant 0 : i32
    %c0_i32_0 = arith.constant 0 : i32
    %c0_i32_1 = arith.constant 0 : i32
    return %c0_i32, %c0_i32_0 : i32, i32
  }
  func.func @transform_4(%arg0: i32) -> (i32, i32, i32, i32) {
    %c0_i32 = arith.constant 0 : i32
    %c0_i32_0 = arith.constant 0 : i32
    %c0_i32_1 = arith.constant 0 : i32
    %c0_i32_2 = arith.constant 0 : i32
    return %arg0, %c0_i32, %c0_i32_0, %c0_i32_1 : i32, i32, i32, i32
  }
  func.func @transform_5(%arg0: i32) -> (i32, i32, i32) {
    %c0_i32 = arith.constant 0 : i32
    %c0_i32_0 = arith.constant 0 : i32
    %c0_i32_1 = arith.constant 0 : i32
    return %arg0, %c0_i32, %c0_i32_0 : i32, i32, i32
  }
}

module attributes {stable_mosaic.version = 11 : i64} {
  func.func @_bn_relu_kernel(%arg0: i32, %arg1: memref<1x16x16x128xbf16, #tpu.memory_space<vmem>>, %arg2: memref<2x128xf32, #tpu.memory_space<vmem>>, %arg3: memref<1x16x16x128xf32, #tpu.memory_space<vmem>>) attributes {dimension_semantics = [#tpu.dimension_semantics<parallel>], iteration_bounds = array<i64: 2>, scalar_prefetch = 0 : i64, scratch_operands = 0 : i64, tpu.core_type = #tpu.core_type<tc>, window_params = [{transform_indices = @transform_0, window_bounds = array<i64: 1, 16, 16, 128>}, {pipeline_mode = #tpu.pipeline_mode<synchronous>, transform_indices = @transform_1, window_bounds = array<i64: 2, 128>}, {transform_indices = @transform_2, window_bounds = array<i64: 1, 16, 16, 128>}]} {
    %c0 = arith.constant 0 : index
    %c0_0 = arith.constant 0 : index
    %0 = vector.load %arg2[%c0, %c0_0] : memref<2x128xf32, #tpu.memory_space<vmem>>, vector<2x128xf32>
    %1 = vector.extract_strided_slice %0 {offsets = [0, 0], sizes = [1, 128], strides = [1, 1]} : vector<2x128xf32> to vector<1x128xf32>
    %2 = vector.shape_cast %1 : vector<1x128xf32> to vector<1x1x128xf32>
    %3 = vector.extract_strided_slice %0 {offsets = [1, 0], sizes = [1, 128], strides = [1, 1]} : vector<2x128xf32> to vector<1x128xf32>
    %4 = vector.shape_cast %3 : vector<1x128xf32> to vector<1x1x128xf32>
    %c0_1 = arith.constant 0 : index
    %c0_2 = arith.constant 0 : index
    %c0_3 = arith.constant 0 : index
    %c0_4 = arith.constant 0 : index
    %5 = vector.load %arg1[%c0_1, %c0_2, %c0_3, %c0_4] : memref<1x16x16x128xbf16, #tpu.memory_space<vmem>>, vector<1x16x16x128xbf16>
    %6 = vector.shape_cast %5 : vector<1x16x16x128xbf16> to vector<16x16x128xbf16>
    %7 = arith.extf %6 : vector<16x16x128xbf16> to vector<16x16x128xf32>
    %8 = vector.broadcast %2 : vector<1x1x128xf32> to vector<16x16x128xf32>
    %9 = arith.mulf %7, %8 : vector<16x16x128xf32>
    %10 = vector.broadcast %4 : vector<1x1x128xf32> to vector<16x16x128xf32>
    %11 = arith.addf %9, %10 : vector<16x16x128xf32>
    %cst = arith.constant 0.000000e+00 : f32
    %12 = vector.broadcast %cst : f32 to vector<16x16x128xf32>
    %13 = arith.maximumf %11, %12 : vector<16x16x128xf32>
    %c0_5 = arith.constant 0 : index
    %c0_6 = arith.constant 0 : index
    %c0_7 = arith.constant 0 : index
    %c0_8 = arith.constant 0 : index
    %14 = vector.load %arg3[%c0_5, %c0_6, %c0_7, %c0_8] : memref<1x16x16x128xf32, #tpu.memory_space<vmem>>, vector<1x16x16x128xf32>
    %15 = vector.shape_cast %14 : vector<1x16x16x128xf32> to vector<16x16x128xf32>
    %16 = vector.shape_cast %13 : vector<16x16x128xf32> to vector<1x16x16x128xf32>
    tpu.vector_store %arg3[%c0_5, %c0_6, %c0_7, %c0_8], %16 {strides = array<i32>} : memref<1x16x16x128xf32, #tpu.memory_space<vmem>>, vector<1x16x16x128xf32>,
    return
  }
  func.func @transform_0(%arg0: i32) -> (i32, i32, i32, i32) {
    %c0_i32 = arith.constant 0 : i32
    %c0_i32_0 = arith.constant 0 : i32
    %c0_i32_1 = arith.constant 0 : i32
    %c0_i32_2 = arith.constant 0 : i32
    return %arg0, %c0_i32, %c0_i32_0, %c0_i32_1 : i32, i32, i32, i32
  }
  func.func @transform_1(%arg0: i32) -> (i32, i32) {
    %c0_i32 = arith.constant 0 : i32
    %c0_i32_0 = arith.constant 0 : i32
    %c0_i32_1 = arith.constant 0 : i32
    return %c0_i32, %c0_i32_0 : i32, i32
  }
  func.func @transform_2(%arg0: i32) -> (i32, i32, i32, i32) {
    %c0_i32 = arith.constant 0 : i32
    %c0_i32_0 = arith.constant 0 : i32
    %c0_i32_1 = arith.constant 0 : i32
    %c0_i32_2 = arith.constant 0 : i32
    return %arg0, %c0_i32, %c0_i32_0, %c0_i32_1 : i32, i32, i32, i32
  }
}

module attributes {stable_mosaic.version = 11 : i64} {
  func.func @_conv_stats_kernel(%arg0: i32, %arg1: memref<1x16x16x128xbf16, #tpu.memory_space<vmem>>, %arg2: memref<1152x128xbf16, #tpu.memory_space<vmem>>, %arg3: memref<1x128xf32, #tpu.memory_space<vmem>>, %arg4: memref<2x128xf32, #tpu.memory_space<vmem>>, %arg5: memref<1x16x16x128xbf16, #tpu.memory_space<vmem>>, %arg6: memref<1x2x128xf32, #tpu.memory_space<vmem>>, %arg7: memref<18x18x128xbf16, #tpu.memory_space<vmem>>) attributes {dimension_semantics = [#tpu.dimension_semantics<parallel>], iteration_bounds = array<i64: 2>, scalar_prefetch = 0 : i64, scratch_operands = 1 : i64, tpu.core_type = #tpu.core_type<tc>, window_params = [{transform_indices = @transform_0, window_bounds = array<i64: 1, 16, 16, 128>}, {pipeline_mode = #tpu.pipeline_mode<synchronous>, transform_indices = @transform_1, window_bounds = array<i64: 1152, 128>}, {pipeline_mode = #tpu.pipeline_mode<synchronous>, transform_indices = @transform_2, window_bounds = array<i64: 1, 128>}, {pipeline_mode = #tpu.pipeline_mode<synchronous>, transform_indices = @transform_3, window_bounds = array<i64: 2, 128>}, {transform_indices = @transform_4, window_bounds = array<i64: 1, 16, 16, 128>}, {transform_indices = @transform_5, window_bounds = array<i64: 1, 2, 128>}]} {
    %c0 = arith.constant 0 : index
    %c0_0 = arith.constant 0 : index
    %c0_1 = arith.constant 0 : index
    %c0_2 = arith.constant 0 : index
    %0 = vector.load %arg1[%c0, %c0_0, %c0_1, %c0_2] : memref<1x16x16x128xbf16, #tpu.memory_space<vmem>>, vector<1x16x16x128xbf16>
    %1 = vector.shape_cast %0 : vector<1x16x16x128xbf16> to vector<16x16x128xbf16>
    %c0_3 = arith.constant 0 : index
    %c0_4 = arith.constant 0 : index
    %2 = vector.load %arg4[%c0_3, %c0_4] : memref<2x128xf32, #tpu.memory_space<vmem>>, vector<2x128xf32>
    %3 = vector.extract_strided_slice %2 {offsets = [0, 0], sizes = [1, 128], strides = [1, 1]} : vector<2x128xf32> to vector<1x128xf32>
    %4 = vector.shape_cast %3 : vector<1x128xf32> to vector<1x1x128xf32>
    %5 = vector.extract_strided_slice %2 {offsets = [1, 0], sizes = [1, 128], strides = [1, 1]} : vector<2x128xf32> to vector<1x128xf32>
    %6 = vector.shape_cast %5 : vector<1x128xf32> to vector<1x1x128xf32>
    %7 = arith.extf %1 : vector<16x16x128xbf16> to vector<16x16x128xf32>
    %8 = vector.broadcast %4 : vector<1x1x128xf32> to vector<16x16x128xf32>
    %9 = arith.mulf %7, %8 : vector<16x16x128xf32>
    %10 = vector.broadcast %6 : vector<1x1x128xf32> to vector<16x16x128xf32>
    %11 = arith.addf %9, %10 : vector<16x16x128xf32>
    %cst = arith.constant 0.000000e+00 : f32
    %12 = vector.broadcast %cst : f32 to vector<16x16x128xf32>
    %13 = arith.maximumf %11, %12 : vector<16x16x128xf32>
    %14 = arith.truncf %13 : vector<16x16x128xf32> to vector<16x16x128xbf16>
    %cst_5 = arith.constant 0.000000e+00 : bf16
    %15 = vector.broadcast %cst_5 : bf16 to vector<18x18x128xbf16>
    %c0_6 = arith.constant 0 : index
    %c0_7 = arith.constant 0 : index
    %c0_8 = arith.constant 0 : index
    %16 = vector.load %arg7[%c0_6, %c0_7, %c0_8] : memref<18x18x128xbf16, #tpu.memory_space<vmem>>, vector<18x18x128xbf16>
    tpu.vector_store %arg7[%c0_6, %c0_7, %c0_8], %15 {strides = array<i32>} : memref<18x18x128xbf16, #tpu.memory_space<vmem>>, vector<18x18x128xbf16>,
    %c1 = arith.constant 1 : index
    %c1_9 = arith.constant 1 : index
    %c0_10 = arith.constant 0 : index
    %17 = vector.load %arg7[%c1, %c1_9, %c0_10] : memref<18x18x128xbf16, #tpu.memory_space<vmem>>, vector<16x16x128xbf16>
    tpu.vector_store %arg7[%c1, %c1_9, %c0_10], %14 {strides = array<i32>} : memref<18x18x128xbf16, #tpu.memory_space<vmem>>, vector<16x16x128xbf16>,
    %c0_11 = arith.constant 0 : index
    %c0_12 = arith.constant 0 : index
    %18 = vector.load %arg3[%c0_11, %c0_12] : memref<1x128xf32, #tpu.memory_space<vmem>>, vector<1x128xf32>
    %19 = vector.shape_cast %18 : vector<1x128xf32> to vector<1x128xf32>
    %20 = vector.broadcast %19 : vector<1x128xf32> to vector<256x128xf32>
    %c0_13 = arith.constant 0 : index
    %c0_14 = arith.constant 0 : index
    %c0_15 = arith.constant 0 : index
    %21 = vector.load %arg7[%c0_13, %c0_14, %c0_15] : memref<18x18x128xbf16, #tpu.memory_space<vmem>>, vector<16x16x128xbf16>
    %22 = vector.shape_cast %21 : vector<16x16x128xbf16> to vector<256x128xbf16>
    %c0_16 = arith.constant 0 : index
    %c0_17 = arith.constant 0 : index
    %23 = vector.load %arg2[%c0_16, %c0_17] : memref<1152x128xbf16, #tpu.memory_space<vmem>>, vector<128x128xbf16>
    %cst_18 = arith.constant dense<0.000000e+00> : vector<256x128xf32>
    %24 = tpu.matmul %22, %23, %cst_18 {dimension_numbers = #tpu.dot_dimension_numbers<[1], [0], [0], [1], [0, 0, 1, 1], [], []>} : vector<256x128xbf16>, vector<128x128xbf16>, vector<256x128xf32> -> vector<256x128xf32>
    %25 = arith.addf %20, %24 : vector<256x128xf32>
    %c0_19 = arith.constant 0 : index
    %c1_20 = arith.constant 1 : index
    %c0_21 = arith.constant 0 : index
    %26 = vector.load %arg7[%c0_19, %c1_20, %c0_21] : memref<18x18x128xbf16, #tpu.memory_space<vmem>>, vector<16x16x128xbf16>
    %27 = vector.shape_cast %26 : vector<16x16x128xbf16> to vector<256x128xbf16>
    %c128 = arith.constant 128 : index
    %c0_22 = arith.constant 0 : index
    %28 = vector.load %arg2[%c128, %c0_22] : memref<1152x128xbf16, #tpu.memory_space<vmem>>, vector<128x128xbf16>
    %cst_23 = arith.constant dense<0.000000e+00> : vector<256x128xf32>
    %29 = tpu.matmul %27, %28, %cst_23 {dimension_numbers = #tpu.dot_dimension_numbers<[1], [0], [0], [1], [0, 0, 1, 1], [], []>} : vector<256x128xbf16>, vector<128x128xbf16>, vector<256x128xf32> -> vector<256x128xf32>
    %30 = arith.addf %25, %29 : vector<256x128xf32>
    %c0_24 = arith.constant 0 : index
    %c2 = arith.constant 2 : index
    %c0_25 = arith.constant 0 : index
    %31 = vector.load %arg7[%c0_24, %c2, %c0_25] : memref<18x18x128xbf16, #tpu.memory_space<vmem>>, vector<16x16x128xbf16>
    %32 = vector.shape_cast %31 : vector<16x16x128xbf16> to vector<256x128xbf16>
    %c256 = arith.constant 256 : index
    %c0_26 = arith.constant 0 : index
    %33 = vector.load %arg2[%c256, %c0_26] : memref<1152x128xbf16, #tpu.memory_space<vmem>>, vector<128x128xbf16>
    %cst_27 = arith.constant dense<0.000000e+00> : vector<256x128xf32>
    %34 = tpu.matmul %32, %33, %cst_27 {dimension_numbers = #tpu.dot_dimension_numbers<[1], [0], [0], [1], [0, 0, 1, 1], [], []>} : vector<256x128xbf16>, vector<128x128xbf16>, vector<256x128xf32> -> vector<256x128xf32>
    %35 = arith.addf %30, %34 : vector<256x128xf32>
    %c1_28 = arith.constant 1 : index
    %c0_29 = arith.constant 0 : index
    %c0_30 = arith.constant 0 : index
    %36 = vector.load %arg7[%c1_28, %c0_29, %c0_30] : memref<18x18x128xbf16, #tpu.memory_space<vmem>>, vector<16x16x128xbf16>
    %37 = vector.shape_cast %36 : vector<16x16x128xbf16> to vector<256x128xbf16>
    %c384 = arith.constant 384 : index
    %c0_31 = arith.constant 0 : index
    %38 = vector.load %arg2[%c384, %c0_31] : memref<1152x128xbf16, #tpu.memory_space<vmem>>, vector<128x128xbf16>
    %cst_32 = arith.constant dense<0.000000e+00> : vector<256x128xf32>
    %39 = tpu.matmul %37, %38, %cst_32 {dimension_numbers = #tpu.dot_dimension_numbers<[1], [0], [0], [1], [0, 0, 1, 1], [], []>} : vector<256x128xbf16>, vector<128x128xbf16>, vector<256x128xf32> -> vector<256x128xf32>
    %40 = arith.addf %35, %39 : vector<256x128xf32>
    %c1_33 = arith.constant 1 : index
    %c1_34 = arith.constant 1 : index
    %c0_35 = arith.constant 0 : index
    %41 = vector.load %arg7[%c1_33, %c1_34, %c0_35] : memref<18x18x128xbf16, #tpu.memory_space<vmem>>, vector<16x16x128xbf16>
    %42 = vector.shape_cast %41 : vector<16x16x128xbf16> to vector<256x128xbf16>
    %c512 = arith.constant 512 : index
    %c0_36 = arith.constant 0 : index
    %43 = vector.load %arg2[%c512, %c0_36] : memref<1152x128xbf16, #tpu.memory_space<vmem>>, vector<128x128xbf16>
    %cst_37 = arith.constant dense<0.000000e+00> : vector<256x128xf32>
    %44 = tpu.matmul %42, %43, %cst_37 {dimension_numbers = #tpu.dot_dimension_numbers<[1], [0], [0], [1], [0, 0, 1, 1], [], []>} : vector<256x128xbf16>, vector<128x128xbf16>, vector<256x128xf32> -> vector<256x128xf32>
    %45 = arith.addf %40, %44 : vector<256x128xf32>
    %c1_38 = arith.constant 1 : index
    %c2_39 = arith.constant 2 : index
    %c0_40 = arith.constant 0 : index
    %46 = vector.load %arg7[%c1_38, %c2_39, %c0_40] : memref<18x18x128xbf16, #tpu.memory_space<vmem>>, vector<16x16x128xbf16>
    %47 = vector.shape_cast %46 : vector<16x16x128xbf16> to vector<256x128xbf16>
    %c640 = arith.constant 640 : index
    %c0_41 = arith.constant 0 : index
    %48 = vector.load %arg2[%c640, %c0_41] : memref<1152x128xbf16, #tpu.memory_space<vmem>>, vector<128x128xbf16>
    %cst_42 = arith.constant dense<0.000000e+00> : vector<256x128xf32>
    %49 = tpu.matmul %47, %48, %cst_42 {dimension_numbers = #tpu.dot_dimension_numbers<[1], [0], [0], [1], [0, 0, 1, 1], [], []>} : vector<256x128xbf16>, vector<128x128xbf16>, vector<256x128xf32> -> vector<256x128xf32>
    %50 = arith.addf %45, %49 : vector<256x128xf32>
    %c2_43 = arith.constant 2 : index
    %c0_44 = arith.constant 0 : index
    %c0_45 = arith.constant 0 : index
    %51 = vector.load %arg7[%c2_43, %c0_44, %c0_45] : memref<18x18x128xbf16, #tpu.memory_space<vmem>>, vector<16x16x128xbf16>
    %52 = vector.shape_cast %51 : vector<16x16x128xbf16> to vector<256x128xbf16>
    %c768 = arith.constant 768 : index
    %c0_46 = arith.constant 0 : index
    %53 = vector.load %arg2[%c768, %c0_46] : memref<1152x128xbf16, #tpu.memory_space<vmem>>, vector<128x128xbf16>
    %cst_47 = arith.constant dense<0.000000e+00> : vector<256x128xf32>
    %54 = tpu.matmul %52, %53, %cst_47 {dimension_numbers = #tpu.dot_dimension_numbers<[1], [0], [0], [1], [0, 0, 1, 1], [], []>} : vector<256x128xbf16>, vector<128x128xbf16>, vector<256x128xf32> -> vector<256x128xf32>
    %55 = arith.addf %50, %54 : vector<256x128xf32>
    %c2_48 = arith.constant 2 : index
    %c1_49 = arith.constant 1 : index
    %c0_50 = arith.constant 0 : index
    %56 = vector.load %arg7[%c2_48, %c1_49, %c0_50] : memref<18x18x128xbf16, #tpu.memory_space<vmem>>, vector<16x16x128xbf16>
    %57 = vector.shape_cast %56 : vector<16x16x128xbf16> to vector<256x128xbf16>
    %c896 = arith.constant 896 : index
    %c0_51 = arith.constant 0 : index
    %58 = vector.load %arg2[%c896, %c0_51] : memref<1152x128xbf16, #tpu.memory_space<vmem>>, vector<128x128xbf16>
    %cst_52 = arith.constant dense<0.000000e+00> : vector<256x128xf32>
    %59 = tpu.matmul %57, %58, %cst_52 {dimension_numbers = #tpu.dot_dimension_numbers<[1], [0], [0], [1], [0, 0, 1, 1], [], []>} : vector<256x128xbf16>, vector<128x128xbf16>, vector<256x128xf32> -> vector<256x128xf32>
    %60 = arith.addf %55, %59 : vector<256x128xf32>
    %c2_53 = arith.constant 2 : index
    %c2_54 = arith.constant 2 : index
    %c0_55 = arith.constant 0 : index
    %61 = vector.load %arg7[%c2_53, %c2_54, %c0_55] : memref<18x18x128xbf16, #tpu.memory_space<vmem>>, vector<16x16x128xbf16>
    %62 = vector.shape_cast %61 : vector<16x16x128xbf16> to vector<256x128xbf16>
    %c1024 = arith.constant 1024 : index
    %c0_56 = arith.constant 0 : index
    %63 = vector.load %arg2[%c1024, %c0_56] : memref<1152x128xbf16, #tpu.memory_space<vmem>>, vector<128x128xbf16>
    %cst_57 = arith.constant dense<0.000000e+00> : vector<256x128xf32>
    %64 = tpu.matmul %62, %63, %cst_57 {dimension_numbers = #tpu.dot_dimension_numbers<[1], [0], [0], [1], [0, 0, 1, 1], [], []>} : vector<256x128xbf16>, vector<128x128xbf16>, vector<256x128xf32> -> vector<256x128xf32>
    %65 = arith.addf %60, %64 : vector<256x128xf32>
    %66 = vector.shape_cast %65 : vector<256x128xf32> to vector<16x16x128xf32>
    %67 = arith.truncf %66 : vector<16x16x128xf32> to vector<16x16x128xbf16>
    %c0_58 = arith.constant 0 : index
    %c0_59 = arith.constant 0 : index
    %c0_60 = arith.constant 0 : index
    %c0_61 = arith.constant 0 : index
    %68 = vector.load %arg5[%c0_58, %c0_59, %c0_60, %c0_61] : memref<1x16x16x128xbf16, #tpu.memory_space<vmem>>, vector<1x16x16x128xbf16>
    %69 = vector.shape_cast %68 : vector<1x16x16x128xbf16> to vector<16x16x128xbf16>
    %70 = vector.shape_cast %67 : vector<16x16x128xbf16> to vector<1x16x16x128xbf16>
    tpu.vector_store %arg5[%c0_58, %c0_59, %c0_60, %c0_61], %70 {strides = array<i32>} : memref<1x16x16x128xbf16, #tpu.memory_space<vmem>>, vector<1x16x16x128xbf16>,
    %cst_62 = arith.constant dense<0.000000e+00> : vector<128xf32>
    %71 = vector.multi_reduction <add>, %65, %cst_62 [0] : vector<256x128xf32> to vector<128xf32>
    %72 = vector.shape_cast %71 : vector<128xf32> to vector<1x128xf32>
    %73 = arith.mulf %65, %65 : vector<256x128xf32>
    %cst_63 = arith.constant dense<0.000000e+00> : vector<128xf32>
    %74 = vector.multi_reduction <add>, %73, %cst_63 [0] : vector<256x128xf32> to vector<128xf32>
    %75 = vector.shape_cast %74 : vector<128xf32> to vector<1x128xf32>
    %76 = tpu.concatenate %72, %75 in 0 : vector<1x128xf32>, vector<1x128xf32> -> vector<2x128xf32>
    %c0_64 = arith.constant 0 : index
    %c0_65 = arith.constant 0 : index
    %c0_66 = arith.constant 0 : index
    %77 = vector.load %arg6[%c0_64, %c0_65, %c0_66] : memref<1x2x128xf32, #tpu.memory_space<vmem>>, vector<1x2x128xf32>
    %78 = vector.shape_cast %77 : vector<1x2x128xf32> to vector<2x128xf32>
    %79 = vector.shape_cast %76 : vector<2x128xf32> to vector<1x2x128xf32>
    tpu.vector_store %arg6[%c0_64, %c0_65, %c0_66], %79 {strides = array<i32>} : memref<1x2x128xf32, #tpu.memory_space<vmem>>, vector<1x2x128xf32>,
    return
  }
  func.func @transform_0(%arg0: i32) -> (i32, i32, i32, i32) {
    %c0_i32 = arith.constant 0 : i32
    %c0_i32_0 = arith.constant 0 : i32
    %c0_i32_1 = arith.constant 0 : i32
    %c0_i32_2 = arith.constant 0 : i32
    return %arg0, %c0_i32, %c0_i32_0, %c0_i32_1 : i32, i32, i32, i32
  }
  func.func @transform_1(%arg0: i32) -> (i32, i32) {
    %c0_i32 = arith.constant 0 : i32
    %c0_i32_0 = arith.constant 0 : i32
    %c0_i32_1 = arith.constant 0 : i32
    return %c0_i32, %c0_i32_0 : i32, i32
  }
  func.func @transform_2(%arg0: i32) -> (i32, i32) {
    %c0_i32 = arith.constant 0 : i32
    %c0_i32_0 = arith.constant 0 : i32
    %c0_i32_1 = arith.constant 0 : i32
    return %c0_i32, %c0_i32_0 : i32, i32
  }
  func.func @transform_3(%arg0: i32) -> (i32, i32) {
    %c0_i32 = arith.constant 0 : i32
    %c0_i32_0 = arith.constant 0 : i32
    %c0_i32_1 = arith.constant 0 : i32
    return %c0_i32, %c0_i32_0 : i32, i32
  }
  func.func @transform_4(%arg0: i32) -> (i32, i32, i32, i32) {
    %c0_i32 = arith.constant 0 : i32
    %c0_i32_0 = arith.constant 0 : i32
    %c0_i32_1 = arith.constant 0 : i32
    %c0_i32_2 = arith.constant 0 : i32
    return %arg0, %c0_i32, %c0_i32_0, %c0_i32_1 : i32, i32, i32, i32
  }
  func.func @transform_5(%arg0: i32) -> (i32, i32, i32) {
    %c0_i32 = arith.constant 0 : i32
    %c0_i32_0 = arith.constant 0 : i32
    %c0_i32_1 = arith.constant 0 : i32
    return %arg0, %c0_i32, %c0_i32_0 : i32, i32, i32
  }
}

</mosaic_0001>

<bundles_post_ra>
// kernel: double_conv.5
= control target key start
LH: loop header
LB: loop body
LE: loop exit
PB: predicated region body
PF: predicated region fallthrough
CT: control target
= control target key end

     0   :  { %s517_s9 = smov 0   ;;  %s661_s0 = inlined_call_operand.vmem [shape: bf16[2,16,16,128], index: 0, kind: input, shape index: {}]   ;;  %s662_s1 = inlined_call_operand.vmem [shape: f32[2,128], index: 1, kind: input, shape index: {}]   ;;  %s663_s2 = inlined_call_operand.vmem [shape: f32[2,16,16,128], index: 2, kind: output, shape index: {}]  }
   0x1 LB: > { %s394_s10 = sadd.s32 4294967295, %s500_s9   ;;  %p398_p0 = scmp.ge.s32.totalorder %s500_s9, 1  ;;  %s500_s9 = sphi %s517_s9, %s12_s9  }
   0x2   : > { %p112_p1 = scmp.lt.s32.totalorder %s500_s9, 3 }
   0x4   : > { %p113_p2 = pnand %p398_p0, %p112_p1 }
   0x5   : > { %p134_p3 = scmp.lt.s32.totalorder (!%p113_p2), %s394_s10, 1 }
   0x6   : > { %116 = sbr.rel (%p113_p2) target bundleno = 55 (0x37), region = 28 }
   0xb   : > { %s665_s10 = smov (!%p134_p3, %s394_s10), 1  ;;  %v144_v0 = vld [vmem:[%s662_s1] sm:$0x3] }
   0xc   : > { %s405_s13 = sshll.u32 %s665_s10, 7  ;;  %v536_v1 = vperm.slane %v144_v0, 0  ;;  %v539_v3 = vperm.slane %v144_v0, 1  ;;  %s406_s17 = sshll.u32 %s665_s10, 8 }
   0xd   : > { %s534_s16 = scalar_lea.vmem %s661_s0, %s405_s13  ;;  %s560_s20 = scalar_lea.vmem %s663_s2, %s406_s17 }
   0xe   : > { %v408_v2 = vld [vmem:[%s534_s16] sm:$0xff]   ;;  %v471_v4 = vld [vmem:[%s534_s16 + $0x8] sm:$0xff]   ;;  %v472_v5 = vld [vmem:[%s534_s16 + $0x10] sm:$0xff]  }
   0xf   : > { %v409_v6 = vunpack.c.l.bf16 %v408_v2  ;;  %v410_v7 = vunpack.c.h.bf16 %v408_v2  ;;  %v413_v8 = vunpack.c.l.bf16 %v471_v4  ;;  %v414_v9 = vunpack.c.h.bf16 %v471_v4  ;;  %v473_v10 = vld [vmem:[%s534_s16 + $0x18] sm:$0xff]   ;;  %v474_v31 = vld [vmem:[%s534_s16 + $0x20] sm:$0xff]   ;;  %v475_v32 = vld [vmem:[%s534_s16 + $0x28] sm:$0xff]  }
  0x10   : > { %v417_v11 = vunpack.c.l.bf16 %v472_v5  ;;  %v418_v12 = vunpack.c.h.bf16 %v472_v5  ;;  %v421_v13 = vunpack.c.l.bf16 %v473_v10  ;;  %v422_v14 = vunpack.c.h.bf16 %v473_v10  ;;  %v476_v37 = vld [vmem:[%s534_s16 + $0x30] sm:$0xff]   ;;  %v477_v38 = vld [vmem:[%s534_s16 + $0x38] sm:$0xff]   ;;  %v478_v5 = vld [vmem:[%s534_s16 + $0x40] sm:$0xff]  }
  0x11   : > { %v210_v15 = vmul.f32 %v409_v6, %v536_v1  ;;  %v211_v16 = vmul.f32 %v410_v7, %v536_v1  ;;  %v212_v17 = vmul.f32 %v413_v8, %v536_v1  ;;  %v213_v18 = vmul.f32 %v414_v9, %v536_v1  ;;  %v479_v6 = vld [vmem:[%s534_s16 + $0x48] sm:$0xff]   ;;  %v480_v7 = vld [vmem:[%s534_s16 + $0x50] sm:$0xff]  }
  0x12   : > { %v214_v19 = vmul.f32 %v417_v11, %v536_v1  ;;  %v215_v20 = vmul.f32 %v418_v12, %v536_v1  ;;  %v216_v21 = vmul.f32 %v421_v13, %v536_v1  ;;  %v217_v22 = vmul.f32 %v422_v14, %v536_v1  ;;  %v481_v12 = vld [vmem:[%s534_s16 + $0x58] sm:$0xff]  }
  0x13   : > { %v243_v23 = vadd.f32 %v539_v3, %v210_v15  ;;  %v244_v24 = vadd.f32 %v539_v3, %v211_v16  ;;  %v245_v25 = vadd.f32 %v539_v3, %v212_v17  ;;  %v246_v26 = vadd.f32 %v539_v3, %v213_v18 }
  0x14   : > { %v247_v27 = vadd.f32 %v539_v3, %v214_v19  ;;  %v248_v28 = vadd.f32 %v539_v3, %v215_v20  ;;  %v249_v29 = vadd.f32 %v539_v3, %v216_v21  ;;  %v250_v30 = vadd.f32 %v539_v3, %v217_v22 }
  0x15   : > { %v275_v33 = vmax.f32 %v243_v23, 0.0  ;;  %v276_v34 = vmax.f32 %v244_v24, 0.0  ;;  %v277_v35 = vmax.f32 %v245_v25, 0.0  ;;  %v278_v36 = vmax.f32 %v246_v26, 0.0 }
  0x16   : > { %v279_v39 = vmax.f32 %v247_v27, 0.0  ;;  %v280_v40 = vmax.f32 %v248_v28, 0.0  ;;  %v281_v41 = vmax.f32 %v249_v29, 0.0  ;;  %v282_v42 = vmax.f32 %v250_v30, 0.0 }
  0x17   : > { %307 = vst [vmem:[%s560_s20] sm:$0xff] %v275_v33  ;;  %v425_v43 = vunpack.c.l.bf16 %v474_v31  ;;  %v426_v44 = vunpack.c.h.bf16 %v474_v31  ;;  %v429_v45 = vunpack.c.l.bf16 %v475_v32  ;;  %v430_v46 = vunpack.c.h.bf16 %v475_v32 }
  0x18   : > { %308 = vst [vmem:[%s560_s20 + $0x8] sm:$0xff] %v276_v34  ;;  %v433_v47 = vunpack.c.l.bf16 %v476_v37  ;;  %v434_v48 = vunpack.c.h.bf16 %v476_v37  ;;  %v437_v49 = vunpack.c.l.bf16 %v477_v38  ;;  %v438_v50 = vunpack.c.h.bf16 %v477_v38 }
  0x19   : > { %309 = vst [vmem:[%s560_s20 + $0x10] sm:$0xff] %v277_v35  ;;  %v218_v51 = vmul.f32 %v425_v43, %v536_v1  ;;  %v219_v52 = vmul.f32 %v426_v44, %v536_v1  ;;  %v220_v53 = vmul.f32 %v429_v45, %v536_v1  ;;  %v221_v54 = vmul.f32 %v430_v46, %v536_v1  ;;  %v484_v43 = vld [vmem:[%s534_s16 + $0x70] sm:$0xff]  }
  0x1a   : > { %310 = vst [vmem:[%s560_s20 + $0x18] sm:$0xff] %v278_v36  ;;  %v222_v55 = vmul.f32 %v433_v47, %v536_v1  ;;  %v223_v56 = vmul.f32 %v434_v48, %v536_v1  ;;  %v224_v57 = vmul.f32 %v437_v49, %v536_v1  ;;  %v225_v58 = vmul.f32 %v438_v50, %v536_v1  ;;  %v485_v48 = vld [vmem:[%s534_s16 + $0x78] sm:$0xff]  }
  0x1b   : > { %311 = vst [vmem:[%s560_s20 + $0x20] sm:$0xff] %v279_v39  ;;  %v251_v59 = vadd.f32 %v539_v3, %v218_v51  ;;  %v252_v60 = vadd.f32 %v539_v3, %v219_v52  ;;  %v253_v61 = vadd.f32 %v539_v3, %v220_v53  ;;  %v254_v62 = vadd.f32 %v539_v3, %v221_v54 }
  0x1c   : > { %312 = vst [vmem:[%s560_s20 + $0x28] sm:$0xff] %v280_v40  ;;  %v255_v63 = vadd.f32 %v539_v3, %v222_v55  ;;  %v256_v0 = vadd.f32 %v539_v3, %v223_v56  ;;  %v257_v2 = vadd.f32 %v539_v3, %v224_v57  ;;  %v258_v4 = vadd.f32 %v539_v3, %v225_v58 }
  0x1d   : > { %313 = vst [vmem:[%s560_s20 + $0x30] sm:$0xff] %v281_v41  ;;  %v283_v8 = vmax.f32 %v251_v59, 0.0  ;;  %v284_v9 = vmax.f32 %v252_v60, 0.0  ;;  %v285_v10 = vmax.f32 %v253_v61, 0.0  ;;  %v286_v11 = vmax.f32 %v254_v62, 0.0  ;;  %v482_v41 = vld [vmem:[%s534_s16 + $0x60] sm:$0xff]  }
  0x1e   : > { %314 = vst [vmem:[%s560_s20 + $0x38] sm:$0xff] %v282_v42  ;;  %v287_v13 = vmax.f32 %v255_v63, 0.0  ;;  %v288_v14 = vmax.f32 %v256_v0, 0.0  ;;  %v289_v15 = vmax.f32 %v257_v2, 0.0  ;;  %v290_v16 = vmax.f32 %v258_v4, 0.0  ;;  %v483_v42 = vld [vmem:[%s534_s16 + $0x68] sm:$0xff]  }
  0x1f   : > { %315 = vst [vmem:[%s560_s20 + $0x40] sm:$0xff] %v283_v8  ;;  %v441_v17 = vunpack.c.l.bf16 %v478_v5  ;;  %v442_v18 = vunpack.c.h.bf16 %v478_v5  ;;  %v445_v19 = vunpack.c.l.bf16 %v479_v6  ;;  %v446_v20 = vunpack.c.h.bf16 %v479_v6 }
  0x20   : > { %316 = vst [vmem:[%s560_s20 + $0x48] sm:$0xff] %v284_v9  ;;  %v449_v21 = vunpack.c.l.bf16 %v480_v7  ;;  %v450_v22 = vunpack.c.h.bf16 %v480_v7  ;;  %v453_v23 = vunpack.c.l.bf16 %v481_v12  ;;  %v454_v24 = vunpack.c.h.bf16 %v481_v12 }
  0x21   : > { %317 = vst [vmem:[%s560_s20 + $0x50] sm:$0xff] %v285_v10  ;;  %v226_v25 = vmul.f32 %v441_v17, %v536_v1  ;;  %v227_v26 = vmul.f32 %v442_v18, %v536_v1  ;;  %v228_v27 = vmul.f32 %v445_v19, %v536_v1  ;;  %v229_v28 = vmul.f32 %v446_v20, %v536_v1 }
  0x22   : > { %318 = vst [vmem:[%s560_s20 + $0x58] sm:$0xff] %v286_v11  ;;  %v230_v29 = vmul.f32 %v449_v21, %v536_v1  ;;  %v231_v30 = vmul.f32 %v450_v22, %v536_v1  ;;  %v232_v31 = vmul.f32 %v453_v23, %v536_v1  ;;  %v233_v32 = vmul.f32 %v454_v24, %v536_v1 }
  0x23   : > { %319 = vst [vmem:[%s560_s20 + $0x60] sm:$0xff] %v287_v13  ;;  %v259_v33 = vadd.f32 %v539_v3, %v226_v25  ;;  %v260_v34 = vadd.f32 %v539_v3, %v227_v26  ;;  %v261_v35 = vadd.f32 %v539_v3, %v228_v27  ;;  %v262_v36 = vadd.f32 %v539_v3, %v229_v28 }
  0x24   : > { %320 = vst [vmem:[%s560_s20 + $0x68] sm:$0xff] %v288_v14  ;;  %v263_v37 = vadd.f32 %v539_v3, %v230_v29  ;;  %v264_v38 = vadd.f32 %v539_v3, %v231_v30  ;;  %v265_v39 = vadd.f32 %v539_v3, %v232_v31  ;;  %v266_v40 = vadd.f32 %v539_v3, %v233_v32 }
  0x25   : > { %321 = vst [vmem:[%s560_s20 + $0x70] sm:$0xff] %v289_v15  ;;  %v291_v44 = vmax.f32 %v259_v33, 0.0  ;;  %v292_v45 = vmax.f32 %v260_v34, 0.0  ;;  %v293_v46 = vmax.f32 %v261_v35, 0.0  ;;  %v294_v47 = vmax.f32 %v262_v36, 0.0 }
  0x26   : > { %322 = vst [vmem:[%s560_s20 + $0x78] sm:$0xff] %v290_v16  ;;  %v295_v49 = vmax.f32 %v263_v37, 0.0  ;;  %v296_v50 = vmax.f32 %v264_v38, 0.0  ;;  %v297_v51 = vmax.f32 %v265_v39, 0.0  ;;  %v298_v52 = vmax.f32 %v266_v40, 0.0 }
  0x27   : > { %323 = vst [vmem:[%s560_s20 + $0x80] sm:$0xff] %v291_v44  ;;  %v457_v53 = vunpack.c.l.bf16 %v482_v41  ;;  %v458_v54 = vunpack.c.h.bf16 %v482_v41  ;;  %v461_v55 = vunpack.c.l.bf16 %v483_v42  ;;  %v462_v56 = vunpack.c.h.bf16 %v483_v42 }
  0x28   : > { %324 = vst [vmem:[%s560_s20 + $0x88] sm:$0xff] %v292_v45  ;;  %v465_v57 = vunpack.c.l.bf16 %v484_v43  ;;  %v466_v58 = vunpack.c.h.bf16 %v484_v43  ;;  %v469_v59 = vunpack.c.l.bf16 %v485_v48  ;;  %v470_v60 = vunpack.c.h.bf16 %v485_v48 }
  0x29   : > { %325 = vst [vmem:[%s560_s20 + $0x90] sm:$0xff] %v293_v46  ;;  %v234_v61 = vmul.f32 %v457_v53, %v536_v1  ;;  %v235_v62 = vmul.f32 %v458_v54, %v536_v1  ;;  %v236_v63 = vmul.f32 %v461_v55, %v536_v1  ;;  %v237_v0 = vmul.f32 %v462_v56, %v536_v1 }
  0x2a   : > { %326 = vst [vmem:[%s560_s20 + $0x98] sm:$0xff] %v294_v47  ;;  %v238_v2 = vmul.f32 %v465_v57, %v536_v1  ;;  %v239_v4 = vmul.f32 %v466_v58, %v536_v1  ;;  %v240_v5 = vmul.f32 %v469_v59, %v536_v1  ;;  %v241_v6 = vmul.f32 %v470_v60, %v536_v1 }
  0x2b   : > { %327 = vst [vmem:[%s560_s20 + $0xa0] sm:$0xff] %v295_v49  ;;  %v267_v7 = vadd.f32 %v539_v3, %v234_v61  ;;  %v268_v8 = vadd.f32 %v539_v3, %v235_v62  ;;  %v269_v9 = vadd.f32 %v539_v3, %v236_v63  ;;  %v270_v10 = vadd.f32 %v539_v3, %v237_v0 }
  0x2c   : > { %328 = vst [vmem:[%s560_s20 + $0xa8] sm:$0xff] %v296_v50  ;;  %v271_v11 = vadd.f32 %v539_v3, %v238_v2  ;;  %v272_v12 = vadd.f32 %v539_v3, %v239_v4  ;;  %v273_v15 = vadd.f32 %v539_v3, %v240_v5  ;;  %v274_v17 = vadd.f32 %v539_v3, %v241_v6 }
  0x2d   : > { %329 = vst [vmem:[%s560_s20 + $0xb0] sm:$0xff] %v297_v51  ;;  %v299_v1 = vmax.f32 %v267_v7, 0.0  ;;  %v300_v13 = vmax.f32 %v268_v8, 0.0  ;;  %v301_v14 = vmax.f32 %v269_v9, 0.0  ;;  %v302_v16 = vmax.f32 %v270_v10, 0.0 }
  0x2e   : > { %330 = vst [vmem:[%s560_s20 + $0xb8] sm:$0xff] %v298_v52  ;;  %v303_v18 = vmax.f32 %v271_v11, 0.0  ;;  %v304_v19 = vmax.f32 %v272_v12, 0.0  ;;  %v305_v20 = vmax.f32 %v273_v15, 0.0  ;;  %v306_v21 = vmax.f32 %v274_v17, 0.0 }
  0x2f   : > { %331 = vst [vmem:[%s560_s20 + $0xc0] sm:$0xff] %v299_v1 }
  0x30   : > { %332 = vst [vmem:[%s560_s20 + $0xc8] sm:$0xff] %v300_v13 }
  0x31   : > { %333 = vst [vmem:[%s560_s20 + $0xd0] sm:$0xff] %v301_v14 }
  0x32   : > { %334 = vst [vmem:[%s560_s20 + $0xd8] sm:$0xff] %v302_v16 }
  0x33   : > { %335 = vst [vmem:[%s560_s20 + $0xe0] sm:$0xff] %v303_v18 }
  0x34   : > { %336 = vst [vmem:[%s560_s20 + $0xe8] sm:$0xff] %v304_v19 }
  0x35   : > { %337 = vst [vmem:[%s560_s20 + $0xf0] sm:$0xff] %v305_v20 }
  0x36   : > { %338 = vst [vmem:[%s560_s20 + $0xf8] sm:$0xff] %v306_v21 }
  0x37 PF: > { %s12_s9 = sadd.s32 1, %s500_s9  }
  0x38   : > { %p9_p4 = scmp.ge.s32.totalorder %s12_s9, 4  }
  0x3a   :  { %11 = sbr.rel (!%p9_p4) target bundleno = 1 (0x1), region = 58 }

// kernel: double_conv.4
= control target key start
LH: loop header
LB: loop body
LE: loop exit
PB: predicated region body
PF: predicated region fallthrough
CT: control target
= control target key end

     0   :  { %s6397_s18 = smov 0   ;;  %s8284_s0 = inlined_call_operand.vmem [shape: bf16[2,16,16,128], index: 0, kind: input, shape index: {}]   ;;  %s8285_s1 = inlined_call_operand.vmem [shape: bf16[1152,128], index: 1, kind: input, shape index: {}]   ;;  %s8286_s2 = inlined_call_operand.vmem [shape: f32[1,128], index: 2, kind: input, shape index: {}]   ;;  %s8287_s3 = inlined_call_operand.vmem [shape: f32[2,128], index: 3, kind: input, shape index: {}]   ;;  %s8288_s4 = inlined_call_operand.vmem [shape: bf16[2,16,16,128], index: 4, kind: output, shape index: {0}]   ;;  %s8289_s5 = inlined_call_operand.vmem [shape: f32[2,2,128], index: 5, kind: output, shape index: {1}]  }
   0x1 LB: > { %s5454_s19 = sadd.s32 4294967295, %s6364_s18   ;;  %p5458_p0 = scmp.ge.s32.totalorder %s6364_s18, 1  ;;  %s6364_s18 = sphi %s6397_s18, %s16_s18  }
   0x2   : > { %p190_p1 = scmp.lt.s32.totalorder %s6364_s18, 3 }
   0x4   : > { %p191_p2 = pnand %p5458_p0, %p190_p1 }
   0x6   : > { %194 = sbr.rel (%p191_p2) target bundleno = 801 (0x321), region = 36 }
   0xb   : > { %v6019_v0 = vld [vmem:[%s8285_s1 + $0x38] sm:$0xff]  ;;  %p222_p3 = scmp.lt.s32.totalorder %s5454_s19, 1  ;;  %v6366_v1 = vmov 0   ;;  %v6018_v2 = vld [vmem:[%s8285_s1 + $0x30] sm:$0xff]  ;;  %v269_v3 = vld [vmem:[%s8287_s3] sm:$0x3] }
   0xc   : > { %444 = vst [vmem:[#allocation2 + $0x30] sm:$0xf] %v6366_v1  ;;  %6290 = vmatpush.bf16.msra.mxu1 %v6019_v0  ;;  %6291 = vmatpush.bf16.msra.mxu2 %v6019_v0  ;;  %v6426_v4 = vperm.slane %v269_v3, 0  ;;  %v6017_v5 = vld [vmem:[%s8285_s1 + $0x28] sm:$0xff]  ;;  %v6433_v7 = vperm.slane %v269_v3, 1  ;;  %v6016_v17 = vld [vmem:[%s8285_s1 + $0x20] sm:$0xff] }
   0xd   : > { %s8344_s19 = smov (!%p222_p3, %s5454_s19), 1  ;;  %6292 = vmatpush.bf16.msra.mxu3 %v6019_v0  ;;  %1123 = vmatpush.bf16.msra.mxu0 %v6019_v0  ;;  %445 = vst [vmem:[#allocation2 + $0x34] sm:$0xf] %v6366_v1  ;;  %v6015_v26 = vld [vmem:[%s8285_s1 + $0x18] sm:$0xff]  ;;  %vm486_vm0 = vsmask.f32 256 }
   0xe   : > { %s5994_s26 = sshll.u32 %s8344_s19, 7  ;;  %432 = vst [vmem:[#allocation2] sm:$0xf] %v6366_v1  ;;  %vm487_vm1 = vsmask.f32 4368  ;;  %vm810_vm2 = vcmask 1043456  }
   0xf   : > { %s6424_s29 = scalar_lea.vmem %s8284_s0, %s5994_s26  ;;  %433 = vst [vmem:[#allocation2 + $0x4] sm:$0xf] %v6366_v1  ;;  %vm811_vm3 = vsmask.f32 7938  ;;  %v6014_v37 = vld [vmem:[%s8285_s1 + $0x10] sm:$0xff]  ;;  %vm6471_vm4 = vmor %vm486_vm0, %vm487_vm1  ;;  %v6013_v50 = vld [vmem:[%s8285_s1 + $0x8] sm:$0xff]  ;;  %s8094_s30 = scalar_lea.vmem %s8288_s4, %s5994_s26 }
  0x10   : > { %6293 = vmatpush.bf16.msra.mxu1 %v6018_v2  ;;  %6294 = vmatpush.bf16.msra.mxu2 %v6018_v2  ;;  %v6262_v6 = vld [vmem:[%s6424_s29 + $0x18] sm:$0xff]   ;;  %434 = vst [vmem:[#allocation2 + $0x8] sm:$0x1] %v6366_v1  ;;  %vm6482_vm5 = vmand %vm810_vm2, %vm811_vm3  ;;  %v6012_v57 = vld [vmem:[%s8285_s1] sm:$0xff]  ;;  %vm817_vm6 = vcmask 1040384   ;;  %vm1992_vm11 = vcmask 1042432  }
  0x11   : > { %v6266_v8 = vld [vmem:[%s6424_s29 + $0x38] sm:$0xff]   ;;  %6295 = vmatpush.bf16.msra.mxu3 %v6018_v2  ;;  %1124 = vmatpush.bf16.msra.mxu0 %v6018_v2  ;;  %v6130_v9 = vunpack.c.l.bf16 %v6262_v6  ;;  %v6131_v10 = vunpack.c.h.bf16 %v6262_v6  ;;  %435 = vst [vmem:[#allocation2 + $0xc] sm:$0xf] %v6366_v1  ;;  %v6263_v62 = vld [vmem:[%s6424_s29 + $0x20] sm:$0xff]   ;;  %vm6869_vm7 = vmand %vm817_vm6, %vm486_vm0  ;;  %vm1292_vm8 = vsmask.f32 3328 }
  0x12   : > { %v6146_v11 = vunpack.c.l.bf16 %v6266_v8  ;;  %v6147_v12 = vunpack.c.h.bf16 %v6266_v8  ;;  %436 = vst [vmem:[#allocation2 + $0x10] sm:$0xf] %v6366_v1  ;;  %v6270_v18 = vld [vmem:[%s6424_s29 + $0x58] sm:$0xff]   ;;  %v6267_v63 = vld [vmem:[%s6424_s29 + $0x40] sm:$0xff]   ;;  %v6135_v6 = vunpack.c.h.bf16 %v6263_v62  ;;  %vm1293_vm9 = vsmask.f32 7440 }
  0x13   : > { %v309_v13 = vmul.f32 %v6130_v9, %v6426_v4  ;;  %v310_v14 = vmul.f32 %v6131_v10, %v6426_v4  ;;  %437 = vst [vmem:[#allocation2 + $0x14] sm:$0x1] %v6366_v1  ;;  %v6162_v23 = vunpack.c.l.bf16 %v6270_v18  ;;  %v6163_v27 = vunpack.c.h.bf16 %v6270_v18  ;;  %v836_v44 = vld [vmem:[#allocation2 + $0x30] sm:$0xf]  ;;  %v6271_v0 = vld [vmem:[%s6424_s29 + $0x60] sm:$0xff]   ;;  %vm6928_vm10 = vmor %vm1292_vm8, %vm1293_vm9  ;;  %s5463_s26 = sshll.u32 %s8344_s19, 1 }
  0x14   : > { %v317_v15 = vmul.f32 %v6146_v11, %v6426_v4  ;;  %v318_v16 = vmul.f32 %v6147_v12, %v6426_v4  ;;  %6296 = vmatpush.bf16.msra.mxu1 %v6017_v5  ;;  %6297 = vmatpush.bf16.msra.mxu2 %v6017_v5  ;;  %438 = vst [vmem:[#allocation2 + $0x18] sm:$0xf] %v6366_v1  ;;  %v6150_v9 = vunpack.c.l.bf16 %v6267_v63  ;;  %v6151_v10 = vunpack.c.h.bf16 %v6267_v63  ;;  %s235_s8 = scalar_lea.vmem %s8289_s5, %s5463_s26 }
  0x15   : > { %6298 = vmatpush.bf16.msra.mxu3 %v6017_v5  ;;  %1125 = vmatpush.bf16.msra.mxu0 %v6017_v5  ;;  %v342_v19 = vadd.f32 %v6433_v7, %v309_v13  ;;  %v343_v20 = vadd.f32 %v6433_v7, %v310_v14  ;;  %439 = vst [vmem:[#allocation2 + $0x1c] sm:$0xf] %v6366_v1  ;;  %v6134_v5 = vunpack.c.l.bf16 %v6263_v62  ;;  %v6166_v11 = vunpack.c.l.bf16 %v6271_v0 }
  0x16   : > { %v350_v21 = vadd.f32 %v6433_v7, %v317_v15  ;;  %v351_v22 = vadd.f32 %v6433_v7, %v318_v16  ;;  %440 = vst [vmem:[#allocation2 + $0x20] sm:$0x1] %v6366_v1  ;;  %v325_v32 = vmul.f32 %v6162_v23, %v6426_v4  ;;  %v326_v38 = vmul.f32 %v6163_v27, %v6426_v4 }
  0x17   : > { %v374_v24 = vmax.f32 %v342_v19, 0.0  ;;  %v375_v25 = vmax.f32 %v343_v20, 0.0  ;;  %441 = vst [vmem:[#allocation2 + $0x24] sm:$0xf] %v6366_v1  ;;  %v311_v13 = vmul.f32 %v6134_v5, %v6426_v4  ;;  %v312_v14 = vmul.f32 %v6135_v6, %v6426_v4 }
  0x18   : > { %6299 = vmatpush.bf16.msra.mxu1 %v6016_v17  ;;  %6300 = vmatpush.bf16.msra.mxu2 %v6016_v17  ;;  %442 = vst [vmem:[#allocation2 + $0x28] sm:$0xf] %v6366_v1  ;;  %v382_v30 = vmax.f32 %v350_v21, 0.0  ;;  %v383_v31 = vmax.f32 %v351_v22, 0.0  ;;  %v358_v45 = vadd.f32 %v6433_v7, %v325_v32  ;;  %v359_v51 = vadd.f32 %v6433_v7, %v326_v38  ;;  %v6117_v21 = vld [vmem:[%s6424_s29] sm:$0xff]  }
  0x19   : > { %6301 = vmatpush.bf16.msra.mxu3 %v6016_v17  ;;  %1126 = vmatpush.bf16.msra.mxu0 %v6016_v17  ;;  %v406_v28 = vpack.c.bf16 %v374_v24, %v374_v24  ;;  %v407_v29 = vpack.c.bf16 %v375_v25, %v375_v25  ;;  %443 = vst [vmem:[#allocation2 + $0x2c] sm:$0x1] %v6366_v1  ;;  %v6167_v15 = vunpack.c.h.bf16 %v6271_v0  ;;  %v6034_v0 = vld [vmem:[%s8285_s1 + $0xb0] sm:$0xff]  ;;  %vm1993_vm12 = vcmask 1046532  }
  0x1a   : > { %446 = vst [vmem:[#allocation2 + $0x38] sm:$0x1] %v6366_v1  ;;  %v6478_v42 = vpack.c.bf16 %v382_v30, %v382_v30  ;;  %v415_v49 = vpack.c.bf16 %v383_v31, %v383_v31  ;;  %v390_v55 = vmax.f32 %v358_v45, 0.0  ;;  %v391_v58 = vmax.f32 %v359_v51, 0.0  ;;  %v5996_v51 = vld [vmem:[#allocation2] sm:$0xff]  ;;  %vm6952_vm13 = vmor %vm1992_vm11, %vm1993_vm12 }
  0x1b   : > { %v541_v33 = vshrl.u32 %v406_v28, 16  ;;  %v544_v34 = vshll.u32 %v406_v28, 16  ;;  %v549_v35 = vshrl.u32 %v407_v29, 16  ;;  %v552_v36 = vshll.u32 %v407_v29, 16  ;;  %447 = vst [vmem:[#allocation2 + $0x3c] sm:$0xf] %v6366_v1 }
  0x1c   : > { %6302 = vmatpush.bf16.msra.mxu1 %v6015_v26  ;;  %6303 = vmatpush.bf16.msra.mxu2 %v6015_v26  ;;  %448 = vst [vmem:[#allocation2 + $0x40] sm:$0xf] %v6366_v1  ;;  %v609_v54 = vshrl.u32 %v6478_v42, 16  ;;  %v617_v56 = vshrl.u32 %v415_v49, 16  ;;  %v612_v60 = vshll.u32 %v6478_v42, 16  ;;  %v6510_v61 = vpack.c.bf16 %v390_v55, %v390_v55 }
  0x1d   : > { %6304 = vmatpush.bf16.msra.mxu3 %v6015_v26  ;;  %1127 = vmatpush.bf16.msra.mxu0 %v6015_v26  ;;  %v543_v40 = vrot.slane %v541_v33, 7  ;;  %v6475_v41 = vrot.slane %v549_v35, 7  ;;  %449 = vst [vmem:[#allocation2 + $0x44] sm:$0x1] %v6366_v1  ;;  %v620_v3 = vshll.u32 %v415_v49, 16  ;;  %v6519_v8 = vpack.c.bf16 %v391_v58, %v391_v58 }
  0x1e   : > { %450 = vst [vmem:[#allocation2 + $0x48] sm:$0xf] %v6366_v1  ;;  %v6506_v59 = vrot.slane %v609_v54, 7  ;;  %v6516_v2 = vrot.slane %v617_v56, 7  ;;  %v677_v17 = vshrl.u32 %v6510_v61, 16  ;;  %v319_v18 = vmul.f32 %v6150_v9, %v6426_v4  ;;  %v6027_v56 = vld [vmem:[%s8285_s1 + $0x78] sm:$0xff] }
  0x1f   : > { %v546_v46 = vor.u32 %v544_v34, %v543_v40  ;;  %v547_v47 = vrot.slane %v543_v40, 4  ;;  %v554_v48 = vor.u32 %v552_v36, %v6475_v41  ;;  %451 = vst [vmem:[#allocation2 + $0x4c] sm:$0xf] %v6366_v1  ;;  %v320_v19 = vmul.f32 %v6151_v10, %v6426_v4  ;;  %v6058_v9 = vld [vmem:[%s8285_s1 + $0xf0] sm:$0xff] }
  0x20   : > { %6305 = vmatpush.bf16.msra.mxu1 %v6014_v37  ;;  %6306 = vmatpush.bf16.msra.mxu2 %v6014_v37  ;;  %452 = vst [vmem:[#allocation2 + $0x50] sm:$0x1] %v6366_v1  ;;  %v615_v12 = vrot.slane %v6506_v59, 4  ;;  %v327_v20 = vmul.f32 %v6166_v11, %v6426_v4  ;;  %v622_v22 = vor.u32 %v620_v3, %v6516_v2  ;;  %v685_v26 = vshrl.u32 %v6519_v8, 16  ;;  %v6067_v3 = vld [vmem:[%s8285_s1 + $0x138] sm:$0xff]  ;;  %v6026_v10 = vld [vmem:[%s8285_s1 + $0x70] sm:$0xff] }
  0x21   : > { %6307 = vmatpush.bf16.msra.mxu3 %v6014_v37  ;;  %1128 = vmatpush.bf16.msra.mxu0 %v6014_v37  ;;  %v555_v52 = vsel %vm6471_vm4, %v547_v47, %v554_v48  ;;  %v837_v53 = vsel %vm6482_vm5, %v546_v46, %v836_v44  ;;  %453 = vst [vmem:[#allocation2 + $0x54] sm:$0xf] %v6366_v1  ;;  %v6118_v33 = vunpack.c.l.bf16 %v6117_v21  ;;  %v6544_v34 = vrot.slane %v677_v17, 7 }
  0x22   : > { %838 = vst [vmem:[#allocation2 + $0x30] sm:$0xf] %v837_v53  ;;  %v344_v23 = vadd.f32 %v6433_v7, %v311_v13  ;;  %v345_v24 = vadd.f32 %v6433_v7, %v312_v14  ;;  %v328_v25 = vmul.f32 %v6167_v15, %v6426_v4  ;;  %v352_v27 = vadd.f32 %v6433_v7, %v319_v18 }
  0x23   : > { %839 = vst [vmem:[#allocation2 + $0x34] sm:$0xf] %v555_v52  ;;  %v353_v28 = vadd.f32 %v6433_v7, %v320_v19  ;;  %v360_v29 = vadd.f32 %v6433_v7, %v327_v20  ;;  %v680_v35 = vshll.u32 %v6510_v61, 16  ;;  %v688_v38 = vshll.u32 %v6519_v8, 16  ;;  %v6059_v52 = vld [vmem:[%s8285_s1 + $0xf8] sm:$0xff] }
  0x24   : > { %6308 = vmatpush.bf16.msra.mxu1 %v6013_v50  ;;  %6309 = vmatpush.bf16.msra.mxu2 %v6013_v50  ;;  %454 = vst [vmem:[#allocation2 + $0x58] sm:$0xf] %v6366_v1  ;;  %v376_v30 = vmax.f32 %v344_v23, 0.0  ;;  %v377_v31 = vmax.f32 %v345_v24, 0.0  ;;  %v361_v32 = vadd.f32 %v6433_v7, %v328_v25  ;;  %v384_v36 = vmax.f32 %v352_v27, 0.0 }
  0x25   : > { %6310 = vmatpush.bf16.msra.mxu3 %v6013_v50  ;;  %1129 = vmatpush.bf16.msra.mxu0 %v6013_v50  ;;  %455 = vst [vmem:[#allocation2 + $0x5c] sm:$0x1] %v6366_v1  ;;  %v385_v37 = vmax.f32 %v353_v28, 0.0  ;;  %v6119_v45 = vunpack.c.h.bf16 %v6117_v21  ;;  %v6550_v46 = vrot.slane %v685_v26, 7  ;;  %v392_v48 = vmax.f32 %v360_v29, 0.0  ;;  %v6035_v50 = vld [vmem:[%s8285_s1 + $0xb8] sm:$0xff] }
  0x26   : > { %456 = vst [vmem:[#allocation2 + $0x60] sm:$0xf] %v6366_v1  ;;  %v408_v40 = vpack.c.bf16 %v376_v30, %v376_v30  ;;  %v409_v44 = vpack.c.bf16 %v377_v31, %v377_v31  ;;  %v416_v47 = vpack.c.bf16 %v384_v36, %v384_v36  ;;  %v393_v49 = vmax.f32 %v361_v32, 0.0  ;;  %v6611_v23 = vld [vmem:[#allocation2 + $0x3c] sm:$0xf] }
  0x27   : > { %457 = vst [vmem:[#allocation2 + $0x64] sm:$0xf] %v6366_v1  ;;  %v303_v54 = vmul.f32 %v6118_v33, %v6426_v4  ;;  %v683_v55 = vrot.slane %v6544_v34, 4  ;;  %v6565_v58 = vpack.c.bf16 %v385_v37, %v385_v37  ;;  %v6567_v62 = vpack.c.bf16 %v392_v48, %v392_v48 }
  0x28   : > { %6311 = vmatpush.bf16.msra.mxu1 %v6012_v57  ;;  %6312 = vmatpush.bf16.msra.mxu2 %v6012_v57  ;;  %458 = vst [vmem:[#allocation2 + $0x68] sm:$0x1] %v6366_v1  ;;  %v558_v53 = vshrl.u32 %v408_v40, 16  ;;  %v6573_v63 = vor.u32 %v612_v60, %v6506_v59  ;;  %v566_v6 = vshrl.u32 %v409_v44, 16  ;;  %v304_v8 = vmul.f32 %v6119_v45, %v6426_v4 }
  0x29   : > { %6313 = vmatpush.bf16.msra.mxu3 %v6012_v57  ;;  %1130 = vmatpush.bf16.msra.mxu0 %v6012_v57  ;;  %459 = vst [vmem:[#allocation2 + $0x6c] sm:$0xf] %v6366_v1  ;;  %v561_v57 = vshll.u32 %v408_v40, 16  ;;  %v6587_v42 = vsel %vm6471_vm4, %v615_v12, %v622_v22  ;;  %v690_v60 = vor.u32 %v688_v38, %v6550_v46  ;;  %v569_v11 = vshll.u32 %v409_v44, 16  ;;  %v6268_v40 = vld [vmem:[%s6424_s29 + $0x48] sm:$0xff]  }
  0x2a   : > { %v6000_v16 = vld [vmem:[#allocation2 + $0x30] sm:$0xff]  ;;  %460 = vst [vmem:[#allocation2 + $0x70] sm:$0xf] %v6366_v1  ;;  %v560_v5 = vrot.slane %v558_v53, 7  ;;  %v626_v13 = vshrl.u32 %v416_v47, 16  ;;  %v6599_v12 = vrot.slane %v566_v6, 7  ;;  %v425_v15 = vpack.c.bf16 %v393_v49, %v393_v49 }
  0x2b   : > { %1151 = vmatmul.bf16.vlgmr.msra.gmra.mxu1 %v6000_v16  ;;  %461 = vst [vmem:[#allocation2 + $0x74] sm:$0x1] %v6366_v1  ;;  %v629_v14 = vshll.u32 %v416_v47, 16  ;;  %v336_v16 = vadd.f32 %v6433_v7, %v303_v54  ;;  %v634_v19 = vshrl.u32 %v6565_v58, 16  ;;  %v694_v20 = vshrl.u32 %v6567_v62, 16 }
  0x2c   : > { %462 = vst [vmem:[#allocation2 + $0x78] sm:$0xf] %v6366_v1  ;;  %2235 = vmatpush.bf16.msrb.mxu2 %v6035_v50  ;;  %1131 = vmatmul.bf16.vlgmr.msra.gmra.mxu0 %v5996_v51  ;;  %v6603_v17 = vor.u32 %v561_v57, %v560_v5  ;;  %v6605_v18 = vrot.slane %v626_v13, 7  ;;  %v564_v21 = vrot.slane %v560_v5, 4  ;;  %v571_v22 = vor.u32 %v569_v11, %v6599_v12  ;;  %v6272_v5 = vld [vmem:[%s6424_s29 + $0x68] sm:$0xff]  }
  0x2d   : > { %463 = vst [vmem:[#allocation2 + $0x7c] sm:$0xf] %v6366_v1  ;;  %2548 = vmatpush.bf16.msrb.mxu3 %v6059_v52  ;;  %1807 = vmatpush.bf16.msrb.mxu1 %v6027_v56  ;;  %v6597_v59 = vld [vmem:[#allocation2 + $0x60] sm:$0xf]  ;;  %v637_v24 = vshll.u32 %v6565_v58, 16  ;;  %v337_v25 = vadd.f32 %v6433_v7, %v304_v8  ;;  %v6619_v26 = vor.u32 %v680_v35, %v6544_v34  ;;  %v6624_v28 = vrot.slane %v634_v19, 7 }
  0x2e   : > { %464 = vst [vmem:[#allocation2 + $0x80] sm:$0x1] %v6366_v1  ;;  %3229 = vmatpush.bf16.msrb.mxu0 %v6067_v3  ;;  %v6622_v27 = vor.u32 %v629_v14, %v6605_v18  ;;  %v697_v30 = vshll.u32 %v6567_v62, 16  ;;  %v6632_v31 = vsel %vm6471_vm4, %v683_v55, %v690_v60  ;;  %v6634_v61 = vrot.slane %v694_v20, 7  ;;  %v6264_v34 = vld [vmem:[%s6424_s29 + $0x28] sm:$0xff]   ;;  %v6066_v20 = vld [vmem:[%s8285_s1 + $0x130] sm:$0xff] }
  0x2f   : > { %465 = vst [vmem:[#allocation2 + $0x84] sm:$0xf] %v6366_v1  ;;  %v702_v32 = vshrl.u32 %v425_v15, 16  ;;  %v368_v33 = vmax.f32 %v336_v16, 0.0  ;;  %v865_v35 = vsel %vm6482_vm5, %v6573_v63, %v6597_v59  ;;  %v844_v36 = vsel %vm6482_vm5, %v6603_v17, %v6611_v23  ;;  %v6033_v16 = vld [vmem:[%s8285_s1 + $0xa8] sm:$0xff] }
  0x30   : > { %466 = vst [vmem:[#allocation2 + $0x88] sm:$0xf] %v6366_v1  ;;  %2236 = vmatpush.bf16.msrb.mxu2 %v6034_v0  ;;  %v6626_v29 = vld [vmem:[#allocation2 + $0x6c] sm:$0xf]  ;;  %v632_v37 = vrot.slane %v6605_v18, 4  ;;  %v705_v38 = vshll.u32 %v425_v15, 16  ;;  %v6653_v45 = vsel %vm6471_vm4, %v564_v21, %v571_v22  ;;  %v639_v47 = vor.u32 %v637_v24, %v6624_v28 }
  0x31   : > { %467 = vst [vmem:[#allocation2 + $0x8c] sm:$0x1] %v6366_v1  ;;  %2549 = vmatpush.bf16.msrb.mxu3 %v6058_v9  ;;  %1808 = vmatpush.bf16.msrb.mxu1 %v6026_v10  ;;  %v6656_v48 = vrot.slane %v702_v32, 7  ;;  %v369_v49 = vmax.f32 %v337_v25, 0.0  ;;  %v872_v50 = vsel %vm6482_vm5, %v6622_v27, %v6626_v29  ;;  %v400_v51 = vpack.c.bf16 %v368_v33, %v368_v33  ;;  %v6057_v19 = vld [vmem:[%s8285_s1 + $0xe8] sm:$0xff] }
  0x32   : > { %468 = vst [vmem:[#allocation2 + $0x90] sm:$0xf] %v6366_v1  ;;  %v6138_v52 = vunpack.c.l.bf16 %v6264_v34  ;;  %v6139_v53 = vunpack.c.h.bf16 %v6264_v34  ;;  %v6665_v54 = vor.u32 %v697_v30, %v6634_v61  ;;  %v6154_v56 = vunpack.c.l.bf16 %v6268_v40  ;;  %v6706_v30 = vld [vmem:[#allocation2 + $0xc] sm:$0xf]  ;;  %3230 = vmatpush.bf16.msrb.mxu0 %v6066_v20 }
  0x33   : > { %469 = vst [vmem:[#allocation2 + $0x94] sm:$0xf] %v6366_v1  ;;  %v401_v55 = vpack.c.bf16 %v369_v49, %v369_v49  ;;  %v6155_v57 = vunpack.c.h.bf16 %v6268_v40  ;;  %v490_v62 = vshrl.u32 %v400_v51, 16  ;;  %v493_v0 = vshll.u32 %v400_v51, 16  ;;  %v6056_v40 = vld [vmem:[%s8285_s1 + $0xe0] sm:$0xff]  ;;  %v6065_v51 = vld [vmem:[%s8285_s1 + $0x128] sm:$0xff] }
  0x34   : > { %470 = vst [vmem:[#allocation2 + $0x98] sm:$0x1] %v6366_v1  ;;  %v313_v3 = vmul.f32 %v6138_v52, %v6426_v4  ;;  %v700_v6 = vrot.slane %v6634_v61, 4  ;;  %v707_v8 = vor.u32 %v705_v38, %v6656_v48  ;;  %v314_v13 = vmul.f32 %v6139_v53, %v6426_v4  ;;  %v6025_v61 = vld [vmem:[%s8285_s1 + $0x68] sm:$0xff]  ;;  %2237 = vmatpush.bf16.msrb.mxu2 %v6033_v16  ;;  %v6032_v38 = vld [vmem:[%s8285_s1 + $0xa0] sm:$0xff] }
  0x35   : > { %471 = vst [vmem:[#allocation2 + $0x9c] sm:$0xf] %v6366_v1  ;;  %v498_v60 = vshrl.u32 %v401_v55, 16  ;;  %v501_v9 = vshll.u32 %v401_v55, 16  ;;  %v6680_v11 = vrot.slane %v490_v62, 7  ;;  %v321_v15 = vmul.f32 %v6154_v56, %v6426_v4  ;;  %2550 = vmatpush.bf16.msrb.mxu3 %v6057_v19  ;;  %1809 = vmatpush.bf16.msrb.mxu1 %v6025_v61  ;;  %v6024_v52 = vld [vmem:[%s8285_s1 + $0x60] sm:$0xff] }
  0x36   : > { %472 = vst [vmem:[#allocation2 + $0xa0] sm:$0xf] %v6366_v1  ;;  %v346_v14 = vadd.f32 %v6433_v7, %v313_v3  ;;  %v322_v21 = vmul.f32 %v6155_v57, %v6426_v4  ;;  %v6170_v22 = vunpack.c.l.bf16 %v6272_v5  ;;  %v6171_v24 = vunpack.c.h.bf16 %v6272_v5  ;;  %3231 = vmatpush.bf16.msrb.mxu0 %v6065_v51 }
  0x37   : > { %473 = vst [vmem:[#allocation2 + $0xa4] sm:$0x1] %v6366_v1  ;;  %v6689_v18 = vrot.slane %v498_v60, 7  ;;  %v6701_v25 = vsel %vm6471_vm4, %v632_v37, %v639_v47  ;;  %v347_v32 = vadd.f32 %v6433_v7, %v314_v13  ;;  %v354_v33 = vadd.f32 %v6433_v7, %v321_v15 }
  0x38   : > { %474 = vst [vmem:[#allocation2 + $0xa8] sm:$0xf] %v6366_v1  ;;  %v496_v37 = vrot.slane %v6680_v11, 4  ;;  %v355_v47 = vadd.f32 %v6433_v7, %v322_v21  ;;  %v708_v49 = vsel %vm6471_vm4, %v700_v6, %v707_v8  ;;  %v329_v56 = vmul.f32 %v6170_v22, %v6426_v4  ;;  %2238 = vmatpush.bf16.msrb.mxu2 %v6032_v38 }
  0x39   : > { %475 = vst [vmem:[#allocation2 + $0xac] sm:$0xf] %v6366_v1  ;;  %v6649_v44 = vld [vmem:[#allocation2 + $0x90] sm:$0xf]  ;;  %v379_v53 = vmax.f32 %v347_v32, 0.0  ;;  %v386_v55 = vmax.f32 %v354_v33, 0.0  ;;  %2551 = vmatpush.bf16.msrb.mxu3 %v6056_v40  ;;  %1810 = vmatpush.bf16.msrb.mxu1 %v6024_v52 }
  0x3a   : > { %476 = vst [vmem:[#allocation2 + $0xb0] sm:$0x1] %v6366_v1  ;;  %v893_v58 = vsel %vm6482_vm5, %v6619_v26, %v6649_v44  ;;  %v6704_v26 = vor.u32 %v493_v0, %v6680_v11  ;;  %v378_v44 = vmax.f32 %v346_v14, 0.0  ;;  %v387_v62 = vmax.f32 %v355_v47, 0.0  ;;  %v850_v14 = vld [vmem:[#allocation2 + $0x48] sm:$0xf] }
  0x3b   : > { %477 = vst [vmem:[#allocation2 + $0xb4] sm:$0xf] %v6366_v1  ;;  %v330_v0 = vmul.f32 %v6171_v24, %v6426_v4  ;;  %v411_v5 = vpack.c.bf16 %v379_v53, %v379_v53  ;;  %v418_v6 = vpack.c.bf16 %v386_v55, %v386_v55  ;;  %v362_v8 = vadd.f32 %v6433_v7, %v329_v56  ;;  %v6269_v11 = vld [vmem:[%s6424_s29 + $0x50] sm:$0xff]  }
  0x3c   : > { %478 = vst [vmem:[#allocation2 + $0xb8] sm:$0xf] %v6366_v1  ;;  %v6678_v10 = vld [vmem:[#allocation2 + $0x9c] sm:$0xf]  ;;  %v410_v57 = vpack.c.bf16 %v378_v44, %v378_v44  ;;  %v814_v3 = vsel %vm6482_vm5, %v6704_v26, %v6706_v30  ;;  %v6265_v44 = vld [vmem:[%s6424_s29 + $0x30] sm:$0xff]  }
  0x3d   : > { %479 = vst [vmem:[#allocation2 + $0xbc] sm:$0x1] %v6366_v1  ;;  %v900_v34 = vsel %vm6482_vm5, %v6665_v54, %v6678_v10  ;;  %v363_v60 = vadd.f32 %v6433_v7, %v330_v0  ;;  %v586_v13 = vshll.u32 %v411_v5, 16  ;;  %v643_v15 = vshrl.u32 %v418_v6, 16 }
  0x3e   : > { %480 = vst [vmem:[#allocation2 + $0xc0] sm:$0xf] %v6366_v1  ;;  %v575_v63 = vshrl.u32 %v410_v57, 16  ;;  %v578_v59 = vshll.u32 %v410_v57, 16  ;;  %v646_v16 = vshll.u32 %v418_v6, 16  ;;  %v394_v21 = vmax.f32 %v362_v8, 0.0 }
  0x3f   : > { %481 = vst [vmem:[#allocation2 + $0xc4] sm:$0xf] %v6366_v1  ;;  %v645_v22 = vrot.slane %v643_v15, 7  ;;  %v395_v24 = vmax.f32 %v363_v60, 0.0  ;;  %v906_v56 = vld [vmem:[#allocation2 + $0xa8] sm:$0xf]  ;;  %v6142_v57 = vunpack.c.l.bf16 %v6265_v44 }
  0x40   : > { %482 = vst [vmem:[#allocation2 + $0xc8] sm:$0x1] %v6366_v1  ;;  %v426_v61 = vpack.c.bf16 %v394_v21, %v394_v21  ;;  %v6055_v8 = vld [vmem:[%s8285_s1 + $0xd8] sm:$0xff]  ;;  %v6273_v15 = vld [vmem:[%s6424_s29 + $0x70] sm:$0xff]  }
  0x41   : > { %483 = vst [vmem:[#allocation2 + $0xcc] sm:$0xf] %v6366_v1  ;;  %v648_v32 = vor.u32 %v646_v16, %v645_v22  ;;  %v649_v33 = vrot.slane %v645_v22, 4  ;;  %2552 = vmatpush.bf16.msrb.mxu3 %v6055_v8 }
  0x42   : > { %484 = vst [vmem:[#allocation2 + $0xd0] sm:$0xf] %v6366_v1  ;;  %v711_v10 = vshrl.u32 %v426_v61, 16 }
  0x43   : > { %485 = vst [vmem:[#allocation2 + $0xd4] sm:$0x1] %v6366_v1  ;;  %v503_v1 = vor.u32 %v501_v9, %v6689_v18  ;;  %v6260_v9 = vld [vmem:[%s6424_s29 + $0x8] sm:$0xff]  }
  0x44   : > { %866 = vst [vmem:[#allocation2 + $0x60] sm:$0xf] %v865_v35  ;;  %v419_v35 = vpack.c.bf16 %v387_v62, %v387_v62  ;;  %v6122_v26 = vunpack.c.l.bf16 %v6260_v9  ;;  %v6123_v38 = vunpack.c.h.bf16 %v6260_v9  ;;  %v6143_v62 = vunpack.c.h.bf16 %v6265_v44 }
  0x45   : > { %867 = vst [vmem:[#allocation2 + $0x64] sm:$0xf] %v6587_v42  ;;  %v583_v42 = vshrl.u32 %v411_v5, 16  ;;  %v504_v27 = vsel %vm6471_vm4, %v496_v37, %v503_v1 }
  0x46   : > { %894 = vst [vmem:[#allocation2 + $0x90] sm:$0xf] %v893_v58  ;;  %v577_v58 = vrot.slane %v575_v63, 7  ;;  %v651_v19 = vshrl.u32 %v419_v35, 16  ;;  %v654_v20 = vshll.u32 %v419_v35, 16  ;;  %v305_v55 = vmul.f32 %v6122_v26, %v6426_v4  ;;  %v6063_v26 = vld [vmem:[%s8285_s1 + $0x118] sm:$0xff] }
  0x47   : > { %895 = vst [vmem:[#allocation2 + $0x94] sm:$0xf] %v6632_v31  ;;  %v6758_v31 = vrot.slane %v583_v42, 7  ;;  %v306_v1 = vmul.f32 %v6123_v38, %v6426_v4  ;;  %v6158_v63 = vunpack.c.l.bf16 %v6269_v11  ;;  %v6064_v42 = vld [vmem:[%s8285_s1 + $0x120] sm:$0xff] }
  0x48   : > { %845 = vst [vmem:[#allocation2 + $0x3c] sm:$0xf] %v844_v36  ;;  %v580_v30 = vor.u32 %v578_v59, %v577_v58  ;;  %v581_v17 = vrot.slane %v577_v58, 4  ;;  %v6765_v23 = vrot.slane %v651_v19, 7  ;;  %v878_v36 = vld [vmem:[#allocation2 + $0x78] sm:$0xf]  ;;  %v338_v6 = vadd.f32 %v6433_v7, %v305_v55  ;;  %3232 = vmatpush.bf16.msrb.mxu0 %v6064_v42 }
  0x49   : > { %846 = vst [vmem:[#allocation2 + $0x40] sm:$0xf] %v6653_v45  ;;  %v588_v45 = vor.u32 %v586_v13, %v6758_v31  ;;  %v879_v54 = vsel %vm6482_vm5, %v648_v32, %v878_v36  ;;  %v6159_v59 = vunpack.c.h.bf16 %v6269_v11  ;;  %v339_v9 = vadd.f32 %v6433_v7, %v306_v1  ;;  %v6023_v13 = vld [vmem:[%s8285_s1 + $0x58] sm:$0xff]  ;;  %v6030_v19 = vld [vmem:[%s8285_s1 + $0x90] sm:$0xff] }
  0x4a   : > { %873 = vst [vmem:[#allocation2 + $0x6c] sm:$0xf] %v872_v50  ;;  %v851_v29 = vsel %vm6482_vm5, %v580_v30, %v850_v14  ;;  %v656_v50 = vor.u32 %v654_v20, %v6765_v23  ;;  %v315_v14 = vmul.f32 %v6142_v57, %v6426_v4  ;;  %v370_v58 = vmax.f32 %v338_v6, 0.0  ;;  %1811 = vmatpush.bf16.msrb.mxu1 %v6023_v13 }
  0x4b   : > { %874 = vst [vmem:[#allocation2 + $0x70] sm:$0xf] %v6701_v25  ;;  %v427_v25 = vpack.c.bf16 %v395_v24, %v395_v24  ;;  %v589_v47 = vsel %vm6471_vm4, %v581_v17, %v588_v45  ;;  %v316_v20 = vmul.f32 %v6143_v62, %v6426_v4  ;;  %v371_v22 = vmax.f32 %v339_v9, 0.0  ;;  %v6054_v24 = vld [vmem:[%s8285_s1 + $0xd0] sm:$0xff] }
  0x4c   : > { %v6004_v40 = vld [vmem:[#allocation2 + $0x60] sm:$0xff]  ;;  %901 = vst [vmem:[#allocation2 + $0x9c] sm:$0xf] %v900_v34  ;;  %v714_v34 = vshll.u32 %v426_v61, 16  ;;  %v657_v37 = vsel %vm6471_vm4, %v649_v33, %v656_v50  ;;  %v348_v30 = vadd.f32 %v6433_v7, %v315_v14  ;;  %v402_v36 = vpack.c.bf16 %v370_v58, %v370_v58  ;;  %v6022_v61 = vld [vmem:[%s8285_s1 + $0x50] sm:$0xff]  ;;  %2553 = vmatpush.bf16.msrb.mxu3 %v6054_v24 }
  0x4d   : > { %902 = vst [vmem:[#allocation2 + $0xa0] sm:$0xf] %v708_v49  ;;  %1171 = vmatmul.bf16.vlgmr.msra.gmra.mxu2 %v6004_v40  ;;  %v719_v52 = vshrl.u32 %v427_v25, 16  ;;  %v722_v53 = vshll.u32 %v427_v25, 16  ;;  %v713_v49 = vrot.slane %v711_v10, 7  ;;  %v349_v45 = vadd.f32 %v6433_v7, %v316_v20  ;;  %3233 = vmatpush.bf16.msrb.mxu0 %v6063_v26 }
  0x4e   : > { %v6008_v51 = vld [vmem:[#allocation2 + $0x90] sm:$0xff]  ;;  %815 = vst [vmem:[#allocation2 + $0xc] sm:$0xf] %v814_v3  ;;  %v6031_v3 = vld [vmem:[%s8285_s1 + $0x98] sm:$0xff]  ;;  %v6174_v32 = vunpack.c.l.bf16 %v6273_v15  ;;  %v403_v33 = vpack.c.bf16 %v371_v22, %v371_v22  ;;  %v380_v38 = vmax.f32 %v348_v30, 0.0  ;;  %v323_v40 = vmul.f32 %v6158_v63, %v6426_v4  ;;  %1812 = vmatpush.bf16.msrb.mxu1 %v6022_v61 }
  0x4f   : > { %816 = vst [vmem:[#allocation2 + $0x10] sm:$0xf] %v504_v27  ;;  %1191 = vmatmul.bf16.vlgmr.msra.gmra.mxu3 %v6008_v51  ;;  %v6791_v5 = vrot.slane %v719_v52, 7  ;;  %v716_v35 = vor.u32 %v714_v34, %v713_v49  ;;  %v717_v60 = vrot.slane %v713_v49, 4  ;;  %2239 = vmatpush.bf16.msrb.mxu2 %v6031_v3  ;;  %v324_v27 = vmul.f32 %v6159_v59, %v6426_v4  ;;  %v822_v49 = vld [vmem:[#allocation2 + $0x18] sm:$0xf] }
  0x50   : > { %v6001_v0 = vld [vmem:[#allocation2 + $0x3c] sm:$0xff]  ;;  %852 = vst [vmem:[#allocation2 + $0x48] sm:$0xf] %v851_v29  ;;  %v507_v50 = vshrl.u32 %v402_v36, 16  ;;  %v510_v25 = vshll.u32 %v402_v36, 16  ;;  %v381_v44 = vmax.f32 %v349_v45, 0.0  ;;  %v412_v34 = vpack.c.bf16 %v380_v38, %v380_v38 }
  0x51   : > { %853 = vst [vmem:[#allocation2 + $0x4c] sm:$0xf] %v589_v47  ;;  %1156 = vmatmul.bf16.gmra.mxu1 %v6001_v0  ;;  %v724_v16 = vor.u32 %v722_v53, %v6791_v5  ;;  %v907_v21 = vsel %vm6482_vm5, %v716_v35, %v906_v56  ;;  %v6175_v47 = vunpack.c.h.bf16 %v6273_v15  ;;  %v518_v10 = vshll.u32 %v403_v33, 16  ;;  %v857_v14 = vld [vmem:[#allocation2 + $0x54] sm:$0xf] }
  0x52   : > { %880 = vst [vmem:[#allocation2 + $0x78] sm:$0xf] %v879_v54  ;;  %v515_v54 = vshrl.u32 %v403_v33, 16  ;;  %v356_v11 = vadd.f32 %v6433_v7, %v323_v40  ;;  %v509_v51 = vrot.slane %v507_v50, 7  ;;  %v357_v52 = vadd.f32 %v6433_v7, %v324_v27  ;;  %v6005_v62 = vld [vmem:[#allocation2 + $0x6c] sm:$0xff] }
  0x53   : > { %881 = vst [vmem:[#allocation2 + $0x7c] sm:$0xf] %v657_v37  ;;  %v725_v17 = vsel %vm6471_vm4, %v717_v60, %v724_v16  ;;  %2240 = vmatpush.bf16.msrb.mxu2 %v6030_v19  ;;  %v413_v37 = vpack.c.bf16 %v381_v44, %v381_v44  ;;  %v331_v53 = vmul.f32 %v6174_v32, %v6426_v4  ;;  %v592_v56 = vshrl.u32 %v412_v34, 16  ;;  %v6261_v22 = vld [vmem:[%s6424_s29 + $0x10] sm:$0xff]   ;;  %v885_v33 = vld [vmem:[#allocation2 + $0x84] sm:$0xf] }
  0x54   : > { %908 = vst [vmem:[#allocation2 + $0xa8] sm:$0xf] %v907_v21  ;;  %v6834_v55 = vrot.slane %v515_v54, 7  ;;  %v595_v1 = vshll.u32 %v412_v34, 16  ;;  %v388_v57 = vmax.f32 %v356_v11, 0.0  ;;  %v512_v0 = vor.u32 %v510_v25, %v509_v51  ;;  %v6009_v9 = vld [vmem:[#allocation2 + $0x9c] sm:$0xff] }
  0x55   : > { %909 = vst [vmem:[#allocation2 + $0xac] sm:$0xf] %v725_v17  ;;  %v513_v3 = vrot.slane %v509_v51, 4  ;;  %v600_v6 = vshrl.u32 %v413_v37, 16  ;;  %v603_v8 = vshll.u32 %v413_v37, 16  ;;  %v594_v59 = vrot.slane %v592_v56, 7 }
  0x56   : > { %v5997_v29 = vld [vmem:[#allocation2 + $0xc] sm:$0xff]  ;;  %v520_v63 = vor.u32 %v518_v10, %v6834_v55  ;;  %v389_v35 = vmax.f32 %v357_v52, 0.0  ;;  %v332_v60 = vmul.f32 %v6175_v47, %v6426_v4  ;;  %v823_v42 = vsel %vm6482_vm5, %v512_v0, %v822_v49  ;;  %v6028_v49 = vld [vmem:[%s8285_s1 + $0x80] sm:$0xff] }
  0x57   : > { %1136 = vmatmul.bf16.gmra.mxu0 %v5997_v29  ;;  %v6840_v13 = vrot.slane %v600_v6, 7  ;;  %v420_v15 = vpack.c.bf16 %v388_v57, %v388_v57  ;;  %v364_v16 = vadd.f32 %v6433_v7, %v331_v53  ;;  %824 = vst [vmem:[#allocation2 + $0x18] sm:$0xf] %v823_v42  ;;  %v597_v19 = vor.u32 %v595_v1, %v594_v59  ;;  %v6029_v29 = vld [vmem:[%s8285_s1 + $0x88] sm:$0xff]  ;;  %v6062_v10 = vld [vmem:[%s8285_s1 + $0x110] sm:$0xff] }
  0x58   : > { %v521_v58 = vsel %vm6471_vm4, %v513_v3, %v520_v63  ;;  %v598_v20 = vrot.slane %v594_v59, 4  ;;  %v421_v21 = vpack.c.bf16 %v389_v35, %v389_v35  ;;  %v505_v24 = vrot.slane %v6689_v18, 4  ;;  %v6002_v26 = vld [vmem:[#allocation2 + $0x48] sm:$0xff]  ;;  %2241 = vmatpush.bf16.msrb.mxu2 %v6029_v29  ;;  %3234 = vmatpush.bf16.msrb.mxu0 %v6062_v10  ;;  %v819_v3 = vld [vmem:[#allocation2 + $0x14] sm:$0x1]  ;;  %v6020_v35 = vld [vmem:[%s8285_s1 + $0x40] sm:$0xff] }
  0x59   : > { %825 = vst [vmem:[#allocation2 + $0x1c] sm:$0xf] %v521_v58  ;;  %v605_v30 = vor.u32 %v603_v8, %v6840_v13  ;;  %v660_v17 = vshrl.u32 %v420_v15, 16  ;;  %v663_v36 = vshll.u32 %v420_v15, 16  ;;  %v858_v61 = vsel %vm6482_vm5, %v597_v19, %v857_v14  ;;  %v6053_v25 = vld [vmem:[%s8285_s1 + $0xc8] sm:$0xff] }
  0x5a   : > { %v668_v45 = vshrl.u32 %v421_v21, 16  ;;  %v671_v32 = vshll.u32 %v421_v21, 16  ;;  %v365_v38 = vadd.f32 %v6433_v7, %v332_v60  ;;  %859 = vst [vmem:[#allocation2 + $0x54] sm:$0xf] %v858_v61  ;;  %v396_v27 = vmax.f32 %v364_v16, 0.0  ;;  %v6021_v34 = vld [vmem:[%s8285_s1 + $0x48] sm:$0xff]  ;;  %2554 = vmatpush.bf16.msrb.mxu3 %v6053_v25 }
  0x5b   : > { %v606_v40 = vsel %vm6471_vm4, %v598_v20, %v605_v30  ;;  %v662_v18 = vrot.slane %v660_v17, 7  ;;  %v6126_v50 = vunpack.c.l.bf16 %v6261_v22  ;;  %v6127_v54 = vunpack.c.h.bf16 %v6261_v22  ;;  %v6061_v0 = vld [vmem:[%s8285_s1 + $0x108] sm:$0xff]  ;;  %1813 = vmatpush.bf16.msrb.mxu1 %v6021_v34  ;;  %v1244_v60 = vld [vmem:[#allocation2] sm:$0xf]  ;;  %v913_v22 = vld [vmem:[#allocation2 + $0xb4] sm:$0xf] }
  0x5c   : > { %860 = vst [vmem:[#allocation2 + $0x58] sm:$0xf] %v606_v40  ;;  %v6859_v44 = vrot.slane %v668_v45, 7  ;;  %v397_v47 = vmax.f32 %v365_v38, 0.0  ;;  %v428_v52 = vpack.c.bf16 %v396_v27, %v396_v27  ;;  %2242 = vmatpush.bf16.msrb.mxu2 %v6028_v49  ;;  %v820_v20 = vsel %vm6869_vm7, %v505_v24, %v819_v3  ;;  %3235 = vmatpush.bf16.msrb.mxu0 %v6061_v0  ;;  %v6060_v30 = vld [vmem:[%s8285_s1 + $0x100] sm:$0xff] }
  0x5d   : > { %1176 = vmatmul.bf16.gmra.mxu2 %v6005_v62  ;;  %v665_v51 = vor.u32 %v663_v36, %v662_v18  ;;  %v666_v37 = vrot.slane %v662_v18, 4  ;;  %v307_v53 = vmul.f32 %v6126_v50, %v6426_v4  ;;  %v308_v57 = vmul.f32 %v6127_v54, %v6426_v4  ;;  %v6052_v62 = vld [vmem:[%s8285_s1 + $0xc0] sm:$0xff]  ;;  %821 = vst [vmem:[#allocation2 + $0x14] sm:$0x1] %v820_v20  ;;  %v6006_v18 = vld [vmem:[#allocation2 + $0x78] sm:$0xff]  ;;  %v6010_v54 = vld [vmem:[#allocation2 + $0xa8] sm:$0xff] }
  0x5e   : > { %v673_v56 = vor.u32 %v671_v32, %v6859_v44  ;;  %v429_v1 = vpack.c.bf16 %v397_v47, %v397_v47  ;;  %v728_v8 = vshrl.u32 %v428_v52, 16  ;;  %v731_v63 = vshll.u32 %v428_v52, 16  ;;  %2555 = vmatpush.bf16.msrb.mxu3 %v6052_v62  ;;  %v6901_v32 = vld [vmem:[#allocation2 + $0x4] sm:$0xf]  ;;  %v6906_v25 = vld [vmem:[#allocation2 + $0x8] sm:$0x1] }
  0x5f   : > { %1196 = vmatmul.bf16.gmra.mxu3 %v6009_v9  ;;  %v886_v6 = vsel %vm6482_vm5, %v665_v51, %v885_v33  ;;  %v340_v59 = vadd.f32 %v6433_v7, %v307_v53  ;;  %v341_v16 = vadd.f32 %v6433_v7, %v308_v57  ;;  %v1296_v17 = vshrl.u32 %v1244_v60, 16  ;;  %1814 = vmatpush.bf16.msrb.mxu1 %v6020_v35 }
  0x60   : > { %v5998_v9 = vld [vmem:[#allocation2 + $0x18] sm:$0xff]  ;;  %v674_v42 = vsel %vm6471_vm4, %v666_v37, %v673_v56  ;;  %887 = vst [vmem:[#allocation2 + $0x84] sm:$0xf] %v886_v6  ;;  %v736_v14 = vshrl.u32 %v429_v1, 16  ;;  %v739_v15 = vshll.u32 %v429_v1, 16  ;;  %v730_v58 = vrot.slane %v728_v8, 7  ;;  %3236 = vmatpush.bf16.msrb.mxu0 %v6060_v30 }
  0x61   : > { %1161 = vmatmul.bf16.gmra.mxu1 %v6002_v26  ;;  %888 = vst [vmem:[#allocation2 + $0x88] sm:$0xf] %v674_v42  ;;  %v372_v19 = vmax.f32 %v340_v59, 0.0  ;;  %v373_v26 = vmax.f32 %v341_v16, 0.0  ;;  %v1299_v33 = vshll.u32 %v1244_v60, 16  ;;  %v1298_v40 = vrot.slane %v1296_v17, 4 }
  0x62   : > { %v6896_v21 = vrot.slane %v736_v14, 7  ;;  %v733_v36 = vor.u32 %v731_v63, %v730_v58  ;;  %v734_v61 = vrot.slane %v730_v58, 4  ;;  %v829_v37 = vld [vmem:[#allocation2 + $0x24] sm:$0xf]  ;;  %v1305_v52 = vshll.u32 %v6901_v32, 16  ;;  %v6099_v42 = vld [vmem:[%s8285_s1 + $0x1b8] sm:$0xff] }
  0x63   : > { %v404_v45 = vpack.c.bf16 %v372_v19, %v372_v19  ;;  %v405_v38 = vpack.c.bf16 %v373_v26, %v373_v26  ;;  %v1301_v47 = vrot.slane %v1299_v33, 5  ;;  %v1309_v56 = vshrl.u32 %v6901_v32, 16  ;;  %v6003_v0 = vld [vmem:[#allocation2 + $0x54] sm:$0xff]  ;;  %v2669_v63 = vld [vmem:[#allocation2 + $0xc] sm:$0xf]  ;;  %3968 = vmatpush.bf16.msra.mxu2 %v6099_v42 }
  0x64   : > { %v741_v24 = vor.u32 %v739_v15, %v6896_v21  ;;  %v914_v27 = vsel %vm6482_vm5, %v733_v36, %v913_v22  ;;  %v1307_v57 = vrot.slane %v1305_v52, 5  ;;  %v1315_v62 = vshll.u32 %v6906_v25, 16  ;;  %v2670_v14 = vld [vmem:[#allocation2 + $0x10] sm:$0xf]  ;;  %v6107_v15 = vld [vmem:[%s8285_s1 + $0x1f8] sm:$0xff] }
  0x65   : > { %v524_v29 = vshrl.u32 %v404_v45, 16  ;;  %v527_v50 = vshll.u32 %v404_v45, 16  ;;  %915 = vst [vmem:[#allocation2 + $0xb4] sm:$0xf] %v914_v27  ;;  %v532_v34 = vshrl.u32 %v405_v38, 16  ;;  %v535_v51 = vshll.u32 %v405_v38, 16  ;;  %4649 = vmatpush.bf16.msra.mxu3 %v6107_v15 }
  0x66   : > { %v742_v10 = vsel %vm6471_vm4, %v734_v61, %v741_v24  ;;  %v1302_v49 = vor.u32 %v1301_v47, %v1298_v40  ;;  %v1311_v8 = vrot.slane %v1309_v56, 4  ;;  %v1317_v19 = vrot.slane %v1315_v62, 5  ;;  %v6075_v22 = vld [vmem:[%s8285_s1 + $0x178] sm:$0xff]  ;;  %v2671_v17 = vld [vmem:[#allocation2 + $0x14] sm:$0x1] }
  0x67   : > { %1141 = vmatmul.bf16.gmra.mxu0 %v5998_v9  ;;  %916 = vst [vmem:[#allocation2 + $0xb8] sm:$0xf] %v742_v10  ;;  %v526_v53 = vrot.slane %v524_v29, 7  ;;  %v6912_v1 = vrot.slane %v532_v34, 7  ;;  %v2718_v20 = vshrl.u32 %v2669_v63, 16  ;;  %v6115_v26 = vld [vmem:[%s8285_s1 + $0x238] sm:$0xff]  ;;  %3654 = vmatpush.bf16.msra.mxu1 %v6075_v22 }
  0x68   : > { %v1303_v60 = vrot.slane %v1302_v49, 4  ;;  %v1312_v9 = vor.u32 %v1311_v8, %v1307_v57  ;;  %v2721_v36 = vshll.u32 %v2669_v63, 16  ;;  %v2727_v45 = vshll.u32 %v2670_v14, 16  ;;  %5074 = vmatpush.bf16.msra.mxu0 %v6115_v26  ;;  %v1247_v40 = vld [vmem:[#allocation2 + $0xc] sm:$0xf] }
  0x69   : > { %v529_v3 = vor.u32 %v527_v50, %v526_v53  ;;  %v530_v6 = vrot.slane %v526_v53, 4  ;;  %v537_v59 = vor.u32 %v535_v51, %v6912_v1  ;;  %v2720_v61 = vrot.slane %v2718_v20, 4  ;;  %v6942_v47 = vld [vmem:[#allocation2 + $0x10] sm:$0xf]  ;;  %v1928_v49 = vld [vmem:[#allocation2] sm:$0xe] }
  0x6a   : > { %v1313_v30 = vrot.slane %v1312_v9, 4  ;;  %v2731_v33 = vshrl.u32 %v2670_v14, 16  ;;  %v1308_v24 = vsel %vm6928_vm10, %v1303_v60, %v1307_v57  ;;  %v2723_v38 = vrot.slane %v2721_v36, 5  ;;  %v826_v62 = vld [vmem:[#allocation2 + $0x20] sm:$0x1] }
  0x6b   : > { %v830_v35 = vsel %vm6482_vm5, %v529_v3, %v829_v37  ;;  %v538_v16 = vsel %vm6471_vm4, %v530_v6, %v537_v59  ;;  %v2729_v27 = vrot.slane %v2727_v45, 5  ;;  %v2737_v50 = vshll.u32 %v2671_v17, 16  ;;  %v6948_v59 = vld [vmem:[#allocation2 + $0x14] sm:$0x1]  ;;  %v2672_v42 = vld [vmem:[#allocation2 + $0x18] sm:$0xf] }
  0x6c   : > { %831 = vst [vmem:[#allocation2 + $0x24] sm:$0xf] %v830_v35  ;;  %v2733_v29 = vrot.slane %v2731_v33, 4  ;;  %v2724_v10 = vor.u32 %v2723_v38, %v2720_v61  ;;  %v1997_v34 = vrot.slane %v6901_v32, 5  ;;  %v1320_v37 = vshrl.u32 %v1247_v40, 16 }
  0x6d   : > { %1181 = vmatmul.bf16.gmra.mxu2 %v6006_v18  ;;  %832 = vst [vmem:[#allocation2 + $0x28] sm:$0xf] %v538_v16  ;;  %v1318_v18 = vsel %vm6928_vm10, %v1313_v30, %v1317_v19  ;;  %v1695_v52 = vunpack.c.l.b16 %v1308_v24  ;;  %v1323_v56 = vshll.u32 %v1247_v40, 16  ;;  %v1329_v57 = vshll.u32 %v6942_v47, 16  ;;  %v2673_v61 = vld [vmem:[#allocation2 + $0x1c] sm:$0xf] }
  0x6e   : > { %v2734_v51 = vor.u32 %v2733_v29, %v2729_v27  ;;  %v1696_v53 = vunpack.c.l.b16 %v1318_v18  ;;  %v2725_v6 = vrot.slane %v2724_v10, 4  ;;  %v2739_v63 = vrot.slane %v2737_v50, 5  ;;  %v6011_v14 = vld [vmem:[#allocation2 + $0xb4] sm:$0xff]  ;;  %v6966_v50 = vld [vmem:[#allocation2 + $0x1c] sm:$0xf] }
  0x6f   : > { %1201 = vmatmul.bf16.gmra.mxu3 %v6010_v54  ;;  %v522_v54 = vrot.slane %v6834_v55, 4  ;;  %v1333_v55 = vshrl.u32 %v6942_v47, 16  ;;  %v1322_v32 = vrot.slane %v1320_v37, 4  ;;  %v1325_v35 = vrot.slane %v1323_v56, 5  ;;  %v1250_v29 = vld [vmem:[#allocation2 + $0x18] sm:$0xf] }
  0x70   : > { %v2735_v8 = vrot.slane %v2734_v51, 4  ;;  %v1331_v60 = vrot.slane %v1329_v57, 5  ;;  %v1727_v15 = vpack.c.b16 %v1696_v53, %v1695_v52  ;;  %v5592_v16 = vrot.slane %v1928_v49, 9  ;;  %v833_v56 = vld [vmem:[#allocation2 + $0x2c] sm:$0x1] }
  0x71   : > { %1166 = vmatmul.bf16.gmra.mxu1 %v6003_v0  ;;  %v6007_v0 = vld [vmem:[#allocation2 + $0x84] sm:$0xff]  ;;  %v1335_v9 = vrot.slane %v1333_v55, 4  ;;  %v1999_v19 = vrot.slane %v1997_v34, 4  ;;  %v2000_v20 = vrot.slane %v6906_v25, 5  ;;  %v2730_v26 = vsel %vm6928_vm10, %v2725_v6, %v2729_v27 }
  0x72   : > { %v2740_v30 = vsel %vm6928_vm10, %v2735_v8, %v2739_v63  ;;  %v1339_v17 = vshll.u32 %v6948_v59, 16  ;;  %v827_v36 = vsel %vm6869_vm7, %v522_v54, %v826_v62  ;;  %v1326_v45 = vor.u32 %v1325_v35, %v1322_v32 }
  0x73   : > { %v1336_v25 = vor.u32 %v1335_v9, %v1331_v60  ;;  %828 = vst [vmem:[#allocation2 + $0x20] sm:$0x1] %v827_v36  ;;  %v2742_v33 = vshrl.u32 %v2672_v42, 16  ;;  %v2745_v24 = vshll.u32 %v2672_v42, 16  ;;  %v539_v38 = vrot.slane %v6912_v1, 4 }
  0x74   : > { %v5999_v3 = vld [vmem:[#allocation2 + $0x24] sm:$0xff]  ;;  %v1998_v40 = vsel %vm6952_vm13, %v5592_v16, %v1997_v34  ;;  %v2751_v18 = vshll.u32 %v2673_v61, 16  ;;  %v2755_v27 = vshrl.u32 %v2673_v61, 16  ;;  %v2001_v54 = vsel %vm6952_vm13, %v1999_v19, %v2000_v20 }
  0x75   : > { %v3117_v10 = vunpack.c.l.b16 %v2730_v26  ;;  %v3118_v51 = vunpack.c.l.b16 %v2740_v30  ;;  %v1341_v37 = vrot.slane %v1339_v17, 5  ;;  %v1327_v52 = vrot.slane %v1326_v45, 4 }
  0x76   : > { %v1337_v53 = vrot.slane %v1336_v25, 4  ;;  %v2744_v49 = vrot.slane %v2742_v33, 4  ;;  %v2747_v1 = vrot.slane %v2745_v24, 5  ;;  %v1344_v57 = vshrl.u32 %v1250_v29, 16  ;;  %v1929_v25 = vld [vmem:[#allocation2 + $0xc] sm:$0xe] }
  0x77   : > { %1146 = vmatmul.bf16.gmra.mxu0 %v5999_v3  ;;  %v1347_v62 = vshll.u32 %v1250_v29, 16  ;;  %v1353_v34 = vshll.u32 %v6966_v50, 16  ;;  %v2757_v3 = vrot.slane %v2755_v27, 4  ;;  %v1357_v6 = vshrl.u32 %v6966_v50, 16 }
  0x78   : > { %v2123_v8 = vunpack.c.l.b16 %v1998_v40  ;;  %v2124_v63 = vunpack.c.l.b16 %v2001_v54  ;;  %v834_v32 = vsel %vm6869_vm7, %v539_v38, %v833_v56  ;;  %v3149_v35 = vpack.c.b16 %v3118_v51, %v3117_v10  ;;  %v2675_v54 = vld [vmem:[#allocation2 + $0x24] sm:$0xf] }
  0x79   : > { %v1332_v9 = vsel %vm6928_vm10, %v1327_v52, %v1331_v60  ;;  %v1342_v42 = vsel %vm6928_vm10, %v1337_v53, %v1341_v37  ;;  %835 = vst [vmem:[#allocation2 + $0x2c] sm:$0x1] %v834_v32  ;;  %v1349_v16 = vrot.slane %v1347_v62, 5  ;;  %v6978_v19 = vrot.slane %v1353_v34, 5  ;;  %v2676_v37 = vld [vmem:[#allocation2 + $0x28] sm:$0xf] }
  0x7a   : > { %v2674_v55 = vld [vmem:[#allocation2 + $0x20] sm:$0x1]  ;;  %v1359_v20 = vrot.slane %v1357_v6, 4  ;;  %v2155_v36 = vpack.c.b16 %v2124_v63, %v2123_v8  ;;  %v1697_v61 = vunpack.c.l.b16 %v1332_v9  ;;  %v1698_v45 = vunpack.c.l.b16 %v1342_v42  ;;  %v840_v34 = vld [vmem:[#allocation2 + $0x38] sm:$0x1] }
  0x7b   : > { %v2761_v30 = vshll.u32 %v2674_v55, 16  ;;  %v6980_v17 = vld [vmem:[#allocation2 + $0x20] sm:$0x1]  ;;  %v2004_v60 = vrot.slane %v6942_v47, 5  ;;  %v556_v10 = vrot.slane %v6475_v41, 4  ;;  %v5593_v51 = vrot.slane %v1929_v25, 9 }
  0x7c   : > { %v1360_v38 = vor.u32 %v1359_v20, %v6978_v19  ;;  %v1363_v40 = vshll.u32 %v6980_v17, 16  ;;  %v1728_v52 = vpack.c.b16 %v1698_v45, %v1697_v61  ;;  %v2007_v47 = vrot.slane %v6948_v59, 5  ;;  %v6098_v41 = vld [vmem:[%s8285_s1 + $0x1b0] sm:$0xff]  ;;  %v1253_v42 = vld [vmem:[#allocation2 + $0x24] sm:$0xf] }
  0x7d   : > { %1186 = vmatmul.bf16.gmra.mxu2 %v6007_v0  ;;  %v2753_v0 = vrot.slane %v2751_v18, 5  ;;  %v6036_v18 = vld [vmem:[#allocation2 + $0xc] sm:$0xff]  ;;  %v2763_v29 = vrot.slane %v2761_v30, 5  ;;  %v2006_v53 = vrot.slane %v2004_v60, 4  ;;  %v2766_v62 = vshrl.u32 %v2675_v54, 16 }
  0x7e   : > { %v1361_v56 = vrot.slane %v1360_v38, 4  ;;  %v2769_v6 = vshll.u32 %v2675_v54, 16  ;;  %v2775_v8 = vshll.u32 %v2676_v37, 16  ;;  %v2779_v63 = vshrl.u32 %v2676_v37, 16  ;;  %v6106_v59 = vld [vmem:[%s8285_s1 + $0x1f0] sm:$0xff]  ;;  %3969 = vmatpush.bf16.msra.mxu2 %v6098_v41 }
  0x7f   : > { %1206 = vmatmul.bf16.gmra.mxu3 %v6011_v14  ;;  %v2748_v14 = vor.u32 %v2747_v1, %v2744_v49  ;;  %v2758_v26 = vor.u32 %v2757_v3, %v2753_v0  ;;  %v6114_v55 = vld [vmem:[%s8285_s1 + $0x230] sm:$0xff]  ;;  %v841_v32 = vsel %vm6869_vm7, %v556_v10, %v840_v34  ;;  %v2008_v9 = vsel %vm6952_vm13, %v2006_v53, %v2007_v47  ;;  %v1930_v10 = vld [vmem:[#allocation2 + $0x18] sm:$0xe] }
  0x80   : > { %4650 = vmatpush.bf16.msra.mxu3 %v6106_v59  ;;  %v2777_v61 = vrot.slane %v2775_v8, 5  ;;  %v2781_v45 = vrot.slane %v2779_v63, 4  ;;  %5075 = vmatpush.bf16.msra.mxu0 %v6114_v55  ;;  %842 = vst [vmem:[#allocation2 + $0x38] sm:$0x1] %v841_v32  ;;  %v2677_v25 = vld [vmem:[#allocation2 + $0x2c] sm:$0x1] }
  0x81   : > { %1815 = vmatmul.bf16.vlgmr.msrb.gmra.mxu1 %v1727_v15  ;;  %v1346_v15 = vrot.slane %v1344_v57, 4  ;;  %v2749_v33 = vrot.slane %v2748_v14, 4  ;;  %v2759_v27 = vrot.slane %v2758_v26, 4  ;;  %v1365_v57 = vrot.slane %v1363_v40, 5  ;;  %v7009_v14 = vld [vmem:[#allocation2 + $0x28] sm:$0xf] }
  0x82   : > { %v2768_v26 = vrot.slane %v2766_v62, 4  ;;  %v1381_v38 = vshrl.u32 %v7009_v14, 16  ;;  %v2782_v37 = vor.u32 %v2781_v45, %v2777_v61  ;;  %v7020_v62 = vld [vmem:[#allocation2 + $0x2c] sm:$0x1]  ;;  %v5594_v34 = vrot.slane %v1930_v10, 9 }
  0x83   : > { %v1350_v24 = vor.u32 %v1349_v16, %v1346_v15  ;;  %v2754_v49 = vsel %vm6928_vm10, %v2749_v33, %v2753_v0  ;;  %v2764_v3 = vsel %vm6928_vm10, %v2759_v27, %v2763_v29  ;;  %v6074_v0 = vld [vmem:[%s8285_s1 + $0x170] sm:$0xff]  ;;  %v1366_v30 = vsel %vm6928_vm10, %v1361_v56, %v1365_v57 }
  0x84   : > { %v3119_v15 = vunpack.c.l.b16 %v2754_v49  ;;  %v3120_v16 = vunpack.c.l.b16 %v2764_v3  ;;  %3655 = vmatpush.bf16.msra.mxu1 %v6074_v0  ;;  %v1371_v33 = vshll.u32 %v1253_v42, 16  ;;  %v2011_v29 = vrot.slane %v6966_v50, 5  ;;  %v2678_v41 = vld [vmem:[#allocation2 + $0x30] sm:$0xf]  ;;  %v2679_v50 = vld [vmem:[#allocation2 + $0x34] sm:$0xf] }
  0x85   : > { %v1351_v1 = vrot.slane %v1350_v24, 4  ;;  %v1377_v24 = vshll.u32 %v7009_v14, 16  ;;  %v1700_v54 = vunpack.c.l.b16 %v1366_v30  ;;  %v573_v56 = vrot.slane %v6599_v12, 4 }
  0x86   : > { %v1373_v47 = vrot.slane %v1371_v33, 5  ;;  %v2014_v3 = vrot.slane %v6980_v17, 5  ;;  %v2013_v8 = vrot.slane %v2011_v29, 4  ;;  %v2783_v59 = vrot.slane %v2782_v37, 4 }
  0x87   : > { %3237 = vmatmul.bf16.vlgmr.msrb.gmra.mxu0 %v3149_v35  ;;  %v2005_v35 = vsel %vm6952_vm13, %v5593_v51, %v2004_v60  ;;  %v1356_v20 = vsel %vm6928_vm10, %v1351_v1, %v6978_v19  ;;  %v1368_v60 = vshrl.u32 %v1253_v42, 16  ;;  %v2126_v19 = vunpack.c.l.b16 %v2008_v9 }
  0x88   : > { %v2125_v40 = vunpack.c.l.b16 %v2005_v35  ;;  %v1699_v27 = vunpack.c.l.b16 %v1356_v20  ;;  %v1379_v49 = vrot.slane %v1377_v24, 5  ;;  %v1383_v1 = vrot.slane %v1381_v38, 4  ;;  %v847_v20 = vld [vmem:[#allocation2 + $0x44] sm:$0x1] }
  0x89   : > { %v1370_v53 = vrot.slane %v1368_v60, 4  ;;  %v1387_v9 = vshll.u32 %v7020_v62, 16  ;;  %v2790_v12 = vshrl.u32 %v2678_v41, 16  ;;  %v2793_v42 = vshll.u32 %v2678_v41, 16 }
  0x8a   : > { %v2156_v57 = vpack.c.b16 %v2126_v19, %v2125_v40  ;;  %v1729_v55 = vpack.c.b16 %v1700_v54, %v1699_v27  ;;  %v1384_v35 = vor.u32 %v1383_v1, %v1379_v49  ;;  %v2012_v17 = vsel %vm6952_vm13, %v5594_v34, %v2011_v29  ;;  %v1256_v27 = vld [vmem:[#allocation2 + $0x30] sm:$0xf]  ;;  %v7036_v29 = vld [vmem:[#allocation2 + $0x34] sm:$0xf]  ;;  %v2680_v54 = vld [vmem:[#allocation2 + $0x38] sm:$0x1] }
  0x8b   : > { %v1374_v32 = vor.u32 %v1373_v47, %v1370_v53  ;;  %v2015_v45 = vsel %vm6952_vm13, %v2013_v8, %v2014_v3  ;;  %v1389_v33 = vrot.slane %v1387_v9, 5  ;;  %v2792_v24 = vrot.slane %v2790_v12, 4 }
  0x8c   : > { %v1385_v60 = vrot.slane %v1384_v35, 4  ;;  %v2795_v38 = vrot.slane %v2793_v42, 5  ;;  %v2127_v10 = vunpack.c.l.b16 %v2012_v17  ;;  %v1392_v53 = vshrl.u32 %v1256_v27, 16  ;;  %v7048_v42 = vld [vmem:[#allocation2 + $0x38] sm:$0x1] }
  0x8d   : > { %2243 = vmatmul.bf16.vlgmr.msrb.gmra.mxu2 %v2155_v36  ;;  %v2771_v36 = vrot.slane %v2769_v6, 5  ;;  %v6037_v6 = vld [vmem:[#allocation2 + $0x18] sm:$0xff]  ;;  %v1395_v47 = vshll.u32 %v1256_v27, 16  ;;  %v1401_v1 = vshll.u32 %v7036_v29, 16  ;;  %v2809_v41 = vshll.u32 %v2680_v54, 16  ;;  %v6105_v27 = vld [vmem:[%s8285_s1 + $0x1e8] sm:$0xff] }
  0x8e   : > { %v2796_v34 = vor.u32 %v2795_v38, %v2792_v24  ;;  %v854_v38 = vld [vmem:[#allocation2 + $0x50] sm:$0x1]  ;;  %4651 = vmatpush.bf16.msra.mxu3 %v6105_v27 }
  0x8f   : > { %2556 = vmatmul.bf16.vlgmr.msrb.gmra.mxu3 %v6036_v18  ;;  %v3150_v18 = vpack.c.b16 %v3120_v16, %v3119_v15  ;;  %v2772_v51 = vor.u32 %v2771_v36, %v2768_v26  ;;  %v2799_v15 = vshll.u32 %v2679_v50, 16  ;;  %v2803_v16 = vshrl.u32 %v2679_v50, 16 }
  0x90   : > { %v848_v36 = vsel %vm6869_vm7, %v573_v56, %v847_v20  ;;  %v1405_v56 = vshrl.u32 %v7036_v29, 16  ;;  %v2797_v35 = vrot.slane %v2796_v34, 4  ;;  %v2811_v12 = vrot.slane %v2809_v41, 5  ;;  %v2681_v20 = vld [vmem:[#allocation2 + $0x3c] sm:$0xf] }
  0x91   : > { %1820 = vmatmul.bf16.gmra.mxu1 %v1728_v52  ;;  %v2785_v52 = vshll.u32 %v2677_v25, 16  ;;  %v2773_v63 = vrot.slane %v2772_v51, 4  ;;  %v1375_v25 = vrot.slane %v1374_v32, 4  ;;  %v7034_v40 = vrot.slane %v2799_v15, 5  ;;  %849 = vst [vmem:[#allocation2 + $0x44] sm:$0x1] %v848_v36 }
  0x92   : > { %v2805_v19 = vrot.slane %v2803_v16, 4  ;;  %v2128_v51 = vunpack.c.l.b16 %v2015_v45  ;;  %v1407_v32 = vrot.slane %v1405_v56, 4  ;;  %v590_v15 = vrot.slane %v6758_v31, 4  ;;  %v6038_v16 = vld [vmem:[#allocation2 + $0x24] sm:$0xff]  ;;  %v7071_v56 = vld [vmem:[#allocation2 + $0x40] sm:$0xf] }
  0x93   : > { %v2787_v0 = vrot.slane %v2785_v52, 5  ;;  %v2778_v26 = vsel %vm6928_vm10, %v2773_v63, %v2777_v61  ;;  %v1380_v37 = vsel %vm6928_vm10, %v1375_v25, %v1379_v49  ;;  %v1390_v52 = vsel %vm6928_vm10, %v1385_v60, %v1389_v33  ;;  %v1931_v49 = vld [vmem:[#allocation2 + $0x24] sm:$0xe] }
  0x94   : > { %v2806_v3 = vor.u32 %v2805_v19, %v7034_v40  ;;  %v2157_v50 = vpack.c.b16 %v2128_v51, %v2127_v10  ;;  %v1702_v8 = vunpack.c.l.b16 %v1390_v52  ;;  %v2018_v63 = vrot.slane %v7009_v14, 5 }
  0x95   : > { %v2788_v30 = vsel %vm6928_vm10, %v2783_v59, %v2787_v0  ;;  %v1394_v59 = vrot.slane %v1392_v53, 4  ;;  %v1397_v0 = vrot.slane %v1395_v47, 5  ;;  %v5595_v17 = vrot.slane %v1931_v49, 9  ;;  %v1259_v53 = vld [vmem:[#allocation2 + $0x3c] sm:$0xf] }
  0x96   : > { %v3122_v61 = vunpack.c.l.b16 %v2788_v30  ;;  %v2807_v9 = vrot.slane %v2806_v3, 4  ;;  %v2021_v14 = vrot.slane %v7020_v62, 5  ;;  %v2682_v30 = vld [vmem:[#allocation2 + $0x40] sm:$0xf]  ;;  %v1411_v60 = vshll.u32 %v7048_v42, 16  ;;  %v6097_v62 = vld [vmem:[%s8285_s1 + $0x1a8] sm:$0xff] }
  0x97   : > { %3242 = vmatmul.bf16.gmra.mxu0 %v3150_v18  ;;  %v3121_v18 = vunpack.c.l.b16 %v2778_v26  ;;  %v2020_v26 = vrot.slane %v2018_v63, 4  ;;  %v1398_v45 = vor.u32 %v1397_v0, %v1394_v59  ;;  %v2802_v33 = vsel %vm6928_vm10, %v2797_v35, %v7034_v40  ;;  %3970 = vmatpush.bf16.msra.mxu2 %v6097_v62 }
  0x98   : > { %v2812_v31 = vsel %vm6928_vm10, %v2807_v9, %v2811_v12  ;;  %v2814_v24 = vshrl.u32 %v2681_v20, 16  ;;  %v2817_v19 = vshll.u32 %v2681_v20, 16  ;;  %v855_v40 = vsel %vm6869_vm7, %v590_v15, %v854_v38  ;;  %v2683_v49 = vld [vmem:[#allocation2 + $0x44] sm:$0x1] }
  0x99   : > { %v2019_v54 = vsel %vm6952_vm13, %v5595_v17, %v2018_v63  ;;  %856 = vst [vmem:[#allocation2 + $0x50] sm:$0x1] %v855_v40  ;;  %v2022_v10 = vsel %vm6952_vm13, %v2020_v26, %v2021_v14  ;;  %v1399_v51 = vrot.slane %v1398_v45, 4  ;;  %v1413_v52 = vrot.slane %v1411_v60, 5 }
  0x9a   : > { %v3123_v47 = vunpack.c.l.b16 %v2802_v33  ;;  %v2819_v34 = vrot.slane %v2817_v19, 5  ;;  %v2130_v63 = vunpack.c.l.b16 %v2022_v10  ;;  %v1416_v59 = vshrl.u32 %v1259_v53, 16  ;;  %v7094_v19 = vld [vmem:[#allocation2 + $0x44] sm:$0x1] }
  0x9b   : > { %v1419_v0 = vshll.u32 %v1259_v53, 16  ;;  %v1425_v9 = vshll.u32 %v7071_v56, 16  ;;  %v1429_v12 = vshrl.u32 %v7071_v56, 16  ;;  %v2025_v20 = vrot.slane %v7036_v29, 5 }
  0x9c   : > { %v2833_v14 = vshll.u32 %v2683_v49, 16  ;;  %v2028_v29 = vrot.slane %v7048_v42, 5 }
  0x9d   : > { %2248 = vmatmul.bf16.gmra.mxu2 %v2156_v57  ;;  %v3151_v57 = vpack.c.b16 %v3122_v61, %v3121_v18  ;;  %v2823_v18 = vshll.u32 %v2682_v30, 16  ;;  %v2827_v61 = vshrl.u32 %v2682_v30, 16  ;;  %v1421_v45 = vrot.slane %v1419_v0, 5 }
  0x9e   : > { %v1427_v33 = vrot.slane %v1425_v9, 5  ;;  %v2027_v27 = vrot.slane %v2025_v20, 4  ;;  %v2835_v10 = vrot.slane %v2833_v14, 5  ;;  %v7112_v14 = vld [vmem:[#allocation2 + $0x4c] sm:$0xf] }
  0x9f   : > { %2561 = vmatmul.bf16.gmra.mxu3 %v6037_v6  ;;  %v1701_v6 = vunpack.c.l.b16 %v1380_v37  ;;  %v7073_v3 = vrot.slane %v2823_v18, 5  ;;  %v2829_v41 = vrot.slane %v2827_v61, 4  ;;  %v2685_v18 = vld [vmem:[#allocation2 + $0x4c] sm:$0xf]  ;;  %v6039_v61 = vld [vmem:[#allocation2 + $0x30] sm:$0xff] }
  0xa0   : > { %v2686_v9 = vld [vmem:[#allocation2 + $0x50] sm:$0x1] }
  0xa1   : > { %1825 = vmatmul.bf16.gmra.mxu1 %v1729_v55  ;;  %v7046_v55 = vrot.slane %v1401_v1, 5  ;;  %v1730_v36 = vpack.c.b16 %v1702_v8, %v1701_v6  ;;  %v3124_v1 = vunpack.c.l.b16 %v2812_v31  ;;  %v6113_v6 = vld [vmem:[%s8285_s1 + $0x228] sm:$0xff]  ;;  %v2129_v8 = vunpack.c.l.b16 %v2019_v54 }
  0xa2   : > { %5076 = vmatpush.bf16.msra.mxu0 %v6113_v6  ;;  %v2830_v26 = vor.u32 %v2829_v41, %v7073_v3  ;;  %v1431_v31 = vrot.slane %v1429_v12, 4 }
  0xa3   : > { %v1408_v25 = vor.u32 %v1407_v32, %v7046_v55  ;;  %v1404_v32 = vsel %vm6928_vm10, %v1399_v51, %v7046_v55  ;;  %v3152_v15 = vpack.c.b16 %v3124_v1, %v3123_v47  ;;  %v1418_v55 = vrot.slane %v1416_v59, 4 }
  0xa4   : > { %v1703_v30 = vunpack.c.l.b16 %v1404_v32  ;;  %v2158_v60 = vpack.c.b16 %v2130_v63, %v2129_v8  ;;  %v2831_v54 = vrot.slane %v2830_v26, 4  ;;  %v1432_v53 = vor.u32 %v1431_v31, %v1427_v33 }
  0xa5   : > { %v1409_v37 = vrot.slane %v1408_v25, 4  ;;  %v607_v25 = vrot.slane %v6840_v13, 4  ;;  %v1422_v13 = vor.u32 %v1421_v45, %v1418_v55  ;;  %v1435_v47 = vshll.u32 %v7094_v19, 16 }
  0xa6   : > { %v2847_v1 = vshll.u32 %v2685_v18, 16  ;;  %v2029_v63 = vsel %vm6952_vm13, %v2027_v27, %v2028_v29  ;;  %v1433_v32 = vrot.slane %v1432_v53, 4  ;;  %v2857_v45 = vshll.u32 %v2686_v9, 16  ;;  %v2687_v53 = vld [vmem:[#allocation2 + $0x54] sm:$0xf] }
  0xa7   : > { %3247 = vmatmul.bf16.gmra.mxu0 %v3151_v57  ;;  %v2816_v57 = vrot.slane %v2814_v24, 4  ;;  %v1414_v35 = vsel %vm6928_vm10, %v1409_v37, %v1413_v52  ;;  %v2684_v24 = vld [vmem:[#allocation2 + $0x48] sm:$0xf]  ;;  %v1423_v49 = vrot.slane %v1422_v13, 4  ;;  %v2132_v26 = vunpack.c.l.b16 %v2029_v63 }
  0xa8   : > { %v7091_v38 = vpop.f32.mrf.mxu1  ;;  %v2838_v37 = vshrl.u32 %v2684_v24, 16  ;;  %v2841_v52 = vshll.u32 %v2684_v24, 16  ;;  %v1449_v29 = vshll.u32 %v7112_v14, 16  ;;  %v2859_v13 = vrot.slane %v2857_v45, 5 }
  0xa9   : > { %v2820_v17 = vor.u32 %v2819_v34, %v2816_v57  ;;  %v2851_v57 = vshrl.u32 %v2685_v18, 16  ;;  %v861_v34 = vld [vmem:[#allocation2 + $0x5c] sm:$0x1]  ;;  %v7106_v8 = vpop.f32.mrf.mxu0  ;;  %v1453_v18 = vshrl.u32 %v7112_v14, 16 }
  0xaa   : > { %v862_v6 = vsel %vm6869_vm7, %v607_v25, %v861_v34  ;;  %v2840_v59 = vrot.slane %v2838_v37, 4  ;;  %v2843_v0 = vrot.slane %v2841_v52, 5 }
  0xab   : > { %v2821_v40 = vrot.slane %v2820_v17, 4  ;;  %863 = vst [vmem:[#allocation2 + $0x5c] sm:$0x1] %v862_v6  ;;  %v2853_v12 = vrot.slane %v2851_v57, 4  ;;  %v7127_v57 = vrot.slane %v1449_v29, 5  ;;  %v1455_v34 = vrot.slane %v1453_v18, 4 }
  0xac   : > { %v2844_v55 = vor.u32 %v2843_v0, %v2840_v59  ;;  %v2688_v6 = vld [vmem:[#allocation2 + $0x58] sm:$0xf]  ;;  %v2862_v59 = vshrl.u32 %v2687_v53, 16  ;;  %v1265_v29 = vld [vmem:[#allocation2 + $0x54] sm:$0xf] }
  0xad   : > { %2253 = vmatmul.bf16.gmra.mxu2 %v2157_v50  ;;  %v6073_v50 = vld [vmem:[%s8285_s1 + $0x168] sm:$0xff]  ;;  %v2826_v41 = vsel %vm6928_vm10, %v2821_v40, %v7073_v3  ;;  %v7110_v3 = vrot.slane %v2847_v1, 5  ;;  %v7155_v18 = vld [vmem:[#allocation2 + $0x58] sm:$0xf] }
  0xae   : > { %3656 = vmatpush.bf16.msra.mxu1 %v6073_v50  ;;  %v2836_v50 = vsel %vm6928_vm10, %v2831_v54, %v2835_v10  ;;  %v1933_v54 = vld [vmem:[#allocation2 + $0x3c] sm:$0xe]  ;;  %v2845_v10 = vrot.slane %v2844_v55, 4 }
  0xaf   : > { %2566 = vmatmul.bf16.gmra.mxu3 %v6038_v16  ;;  %v1932_v16 = vld [vmem:[#allocation2 + $0x30] sm:$0xe] }
  0xb0   : > { %v5596_v62 = vrot.slane %v1932_v16, 9  ;;  %v3126_v16 = vunpack.c.l.b16 %v2836_v50  ;;  %v7129_v50 = vld [vmem:[#allocation2 + $0x50] sm:$0x1] }
  0xb1   : > { %1830 = vmatmul.bf16.gmra.mxu1 %v1730_v36  ;;  %v1704_v36 = vunpack.c.l.b16 %v1414_v35  ;;  %v1437_v35 = vrot.slane %v1435_v47, 5  ;;  %v624_v47 = vrot.slane %v6516_v2, 4  ;;  %v7125_v1 = vpop.f32.mrf.mxu0  ;;  %v2850_v2 = vsel %vm6928_vm10, %v2845_v10, %v7110_v3 }
  0xb2   : > { %v2026_v42 = vsel %vm6952_vm13, %v5596_v62, %v2025_v20  ;;  %v1262_v20 = vld [vmem:[#allocation2 + $0x48] sm:$0xf]  ;;  %v2689_v10 = vld [vmem:[#allocation2 + $0x5c] sm:$0x1] }
  0xb3   : > { %v1731_v51 = vpack.c.b16 %v1704_v36, %v1703_v30  ;;  %v2131_v17 = vunpack.c.l.b16 %v2026_v42  ;;  %v7114_v30 = vpop.f32.mrf.mxu1  ;;  %v1428_v36 = vsel %vm6928_vm10, %v1423_v49, %v1427_v33  ;;  %v1438_v25 = vsel %vm6928_vm10, %v1433_v32, %v1437_v35  ;;  %v6040_v42 = vld [vmem:[#allocation2 + $0x3c] sm:$0xff] }
  0xb4   : > { %v1440_v31 = vshrl.u32 %v1262_v20, 16  ;;  %v1443_v24 = vshll.u32 %v1262_v20, 16  ;;  %v1705_v27 = vunpack.c.l.b16 %v1428_v36  ;;  %v1706_v40 = vunpack.c.l.b16 %v1438_v25 }
  0xb5   : > { %v2032_v33 = vrot.slane %v7071_v56, 5  ;;  %v2035_v49 = vrot.slane %v7094_v19, 5  ;;  %v2865_v35 = vshll.u32 %v2687_v53, 16  ;;  %v2875_v20 = vshrl.u32 %v2688_v6, 16  ;;  %v868_v19 = vld [vmem:[#allocation2 + $0x68] sm:$0x1] }
  0xb6   : > { %v1442_v37 = vrot.slane %v1440_v31, 4  ;;  %v1445_v52 = vrot.slane %v1443_v24, 5  ;;  %v1732_v56 = vpack.c.b16 %v1706_v40, %v1705_v27  ;;  %v2864_v25 = vrot.slane %v2862_v59, 4 }
  0xb7   : > { %3252 = vmatmul.bf16.gmra.mxu0 %v3152_v15  ;;  %v3125_v15 = vunpack.c.l.b16 %v2826_v41  ;;  %v5597_v41 = vrot.slane %v1933_v54, 9  ;;  %v2034_v63 = vrot.slane %v2032_v33, 4 }
  0xb8   : > { %v1446_v32 = vor.u32 %v1445_v52, %v1442_v37  ;;  %v1464_v37 = vshrl.u32 %v1265_v29, 16  ;;  %v1467_v52 = vshll.u32 %v1265_v29, 16 }
  0xb9   : > { %v3153_v62 = vpack.c.b16 %v3126_v16, %v3125_v15  ;;  %v1459_v15 = vshll.u32 %v7129_v50, 16  ;;  %v2871_v16 = vshll.u32 %v2688_v6, 16  ;;  %v2033_v55 = vsel %vm6952_vm13, %v5597_v41, %v2032_v33 }
  0xba   : > { %v2036_v45 = vsel %vm6952_vm13, %v2034_v63, %v2035_v49  ;;  %v1447_v24 = vrot.slane %v1446_v32, 4  ;;  %v2877_v33 = vrot.slane %v2875_v20, 4  ;;  %v1477_v41 = vshrl.u32 %v7155_v18, 16 }
  0xbb   : > { %v1461_v40 = vrot.slane %v1459_v15, 5  ;;  %v7159_v54 = vrot.slane %v2871_v16, 5  ;;  %v1469_v15 = vrot.slane %v1467_v52, 5 }
  0xbc   : > { %v1452_v59 = vsel %vm6928_vm10, %v1447_v24, %v7127_v57 }
  0xbd   : > { %2258 = vmatmul.bf16.gmra.mxu2 %v2158_v60  ;;  %v2854_v60 = vor.u32 %v2853_v12, %v7110_v3  ;;  %v1456_v12 = vor.u32 %v1455_v34, %v7127_v57  ;;  %v6104_v3 = vld [vmem:[%s8285_s1 + $0x1e0] sm:$0xff]  ;;  %v2134_v34 = vunpack.c.l.b16 %v2036_v45  ;;  %v2878_v32 = vor.u32 %v2877_v33, %v7159_v54  ;;  %v7184_v45 = vld [vmem:[#allocation2 + $0x5c] sm:$0x1] }
  0xbe   : > { %4652 = vmatpush.bf16.msra.mxu3 %v6104_v3  ;;  %v1707_v3 = vunpack.c.l.b16 %v1452_v59  ;;  %v1483_v52 = vshll.u32 %v7184_v45, 16  ;;  %v875_v59 = vld [vmem:[#allocation2 + $0x74] sm:$0x1] }
  0xbf   : > { %2571 = vmatmul.bf16.gmra.mxu3 %v6039_v61  ;;  %v2159_v61 = vpack.c.b16 %v2132_v26, %v2131_v17  ;;  %v6096_v17 = vld [vmem:[%s8285_s1 + $0x1a0] sm:$0xff]  ;;  %v869_v26 = vsel %vm6869_vm7, %v624_v47, %v868_v19  ;;  %v1457_v27 = vrot.slane %v1456_v12, 4  ;;  %v2133_v47 = vunpack.c.l.b16 %v2033_v55 }
  0xc0   : > { %870 = vst [vmem:[#allocation2 + $0x68] sm:$0x1] %v869_v26  ;;  %3971 = vmatpush.bf16.msra.mxu2 %v6096_v17  ;;  %v1466_v12 = vrot.slane %v1464_v37, 4  ;;  %v1479_v19 = vrot.slane %v1477_v41, 4  ;;  %v2690_v17 = vld [vmem:[#allocation2 + $0x60] sm:$0xf] }
  0xc1   : > { %1835 = vmatmul.bf16.gmra.mxu1 %v1731_v51  ;;  %v2855_v51 = vrot.slane %v2854_v60, 4  ;;  %v3127_v60 = vunpack.c.l.b16 %v2850_v2  ;;  %v1462_v2 = vsel %vm6928_vm10, %v1457_v27, %v1461_v40  ;;  %v641_v27 = vrot.slane %v6624_v28, 4  ;;  %v6041_v40 = vld [vmem:[#allocation2 + $0x48] sm:$0xff] }
  0xc2   : > { %v1708_v26 = vunpack.c.l.b16 %v1462_v2  ;;  %v1470_v33 = vor.u32 %v1469_v15, %v1466_v12  ;;  %v1485_v15 = vrot.slane %v1483_v52, 5 }
  0xc3   : > { %v2860_v0 = vsel %vm6928_vm10, %v2855_v51, %v2859_v13  ;;  %v6072_v51 = vld [vmem:[%s8285_s1 + $0x160] sm:$0xff] }
  0xc4   : > { %v3128_v31 = vunpack.c.l.b16 %v2860_v0  ;;  %v6112_v13 = vld [vmem:[%s8285_s1 + $0x220] sm:$0xff]  ;;  %3657 = vmatpush.bf16.msra.mxu1 %v6072_v51  ;;  %v1934_v0 = vld [vmem:[#allocation2 + $0x48] sm:$0xe]  ;;  %v2889_v51 = vshll.u32 %v2690_v17, 16  ;;  %v1471_v2 = vrot.slane %v1470_v33, 4 }
  0xc5   : > { %5077 = vmatpush.bf16.msra.mxu0 %v6112_v13  ;;  %v5598_v55 = vrot.slane %v1934_v0, 9 }
  0xc6   : > { %v3154_v6 = vpack.c.b16 %v3128_v31, %v3127_v60  ;;  %v2042_v31 = vrot.slane %v7129_v50, 5 }
  0xc7   : > { %3257 = vmatmul.bf16.gmra.mxu0 %v3153_v62  ;;  %v2867_v62 = vrot.slane %v2865_v35, 5  ;;  %v2881_v35 = vshll.u32 %v2689_v10, 16  ;;  %v2886_v10 = vshrl.u32 %v2690_v17, 16 }
  0xc9   : > { %v2868_v63 = vor.u32 %v2867_v62, %v2864_v25  ;;  %v2691_v25 = vld [vmem:[#allocation2 + $0x64] sm:$0xf]  ;;  %v2879_v62 = vrot.slane %v2878_v32, 4  ;;  %v2883_v29 = vrot.slane %v2881_v35, 5  ;;  %v2888_v0 = vrot.slane %v2886_v10, 4 }
  0xca   : > { %v2891_v32 = vrot.slane %v2889_v51, 5  ;;  %v876_v35 = vsel %vm6869_vm7, %v641_v27, %v875_v59 }
  0xcb   : > { %v2869_v24 = vrot.slane %v2868_v63, 4  ;;  %v2884_v63 = vsel %vm6928_vm10, %v2879_v62, %v2883_v29  ;;  %877 = vst [vmem:[#allocation2 + $0x74] sm:$0x1] %v876_v35 }
  0xcd   : > { %2263 = vmatmul.bf16.gmra.mxu2 %v2159_v61 }
  0xce   : > { %v7137_v9 = vpop.f32.mrf.mxu1 }
  0xcf   : > { %2576 = vmatmul.bf16.gmra.mxu3 %v6040_v42  ;;  %v1473_v42 = vshll.u32 %v7155_v18, 16 }
  0xd0   : > { %v7149_v36 = vpop.f32.mrf.mxu2 }
  0xd1   : > { %8300 = vst [vmem:[#allocation3_spill] sm:$0xff] %v7149_v36  ;;  %1840 = vmatmul.bf16.gmra.mxu1 %v1732_v56  ;;  %v2039_v56 = vrot.slane %v7112_v14, 5  ;;  %v2160_v14 = vpack.c.b16 %v2134_v34, %v2133_v47  ;;  %v7182_v20 = vrot.slane %v1473_v42, 5  ;;  %v2895_v47 = vshll.u32 %v2691_v25, 16 }
  0xd2   : > { %v7157_v61 = vpop.f32.mrf.mxu3  ;;  %v2899_v34 = vshrl.u32 %v2691_v25, 16  ;;  %v1733_v42 = vpack.c.b16 %v1708_v26, %v1707_v3  ;;  %v3130_v26 = vunpack.c.l.b16 %v2884_v63  ;;  %v1935_v63 = vld [vmem:[#allocation2 + $0x54] sm:$0xe] }
  0xd3   : > { %8301 = vst [vmem:[#allocation4_spill] sm:$0xff] %v7157_v61  ;;  %v2041_v57 = vrot.slane %v2039_v56, 4  ;;  %v1480_v37 = vor.u32 %v1479_v19, %v7182_v20  ;;  %v2040_v41 = vsel %vm6952_vm13, %v5598_v55, %v2039_v56  ;;  %v1268_v55 = vld [vmem:[#allocation2 + $0x60] sm:$0xf]  ;;  %v1476_v29 = vsel %vm6928_vm10, %v1471_v2, %v7182_v20 }
  0xd4   : > { %v7167_v53 = vpop.f32.mrf.mxu0  ;;  %v2901_v19 = vrot.slane %v2899_v34, 4  ;;  %v2135_v25 = vunpack.c.l.b16 %v2040_v41  ;;  %v1488_v10 = vshrl.u32 %v1268_v55, 16  ;;  %v1491_v51 = vshll.u32 %v1268_v55, 16 }
  0xd5   : > { %v2043_v28 = vsel %vm6952_vm13, %v2041_v57, %v2042_v31  ;;  %v1481_v56 = vrot.slane %v1480_v37, 4  ;;  %v7213_v57 = vld [vmem:[#allocation2 + $0x64] sm:$0xf]  ;;  %v1709_v41 = vunpack.c.l.b16 %v1476_v29  ;;  %v5599_v55 = vrot.slane %v1935_v63, 9  ;;  %v6103_v63 = vld [vmem:[%s8285_s1 + $0x1d8] sm:$0xff] }
  0xd6   : > { %v7172_v49 = vpop.f32.mrf.mxu1  ;;  %v2136_v31 = vunpack.c.l.b16 %v2043_v28  ;;  %v1497_v37 = vshll.u32 %v7213_v57, 16  ;;  %v1501_v52 = vshrl.u32 %v7213_v57, 16  ;;  %v2046_v28 = vrot.slane %v7155_v18, 5  ;;  %v6042_v18 = vld [vmem:[#allocation2 + $0x54] sm:$0xff]  ;;  %4653 = vmatpush.bf16.msra.mxu3 %v6103_v63 }
  0xd7   : > { %3262 = vmatmul.bf16.gmra.mxu0 %v3154_v6  ;;  %v2874_v6 = vsel %vm6928_vm10, %v2869_v24, %v7159_v54  ;;  %v2692_v54 = vld [vmem:[#allocation2 + $0x68] sm:$0x1]  ;;  %v2892_v24 = vor.u32 %v2891_v32, %v2888_v0  ;;  %v1486_v27 = vsel %vm6928_vm10, %v1481_v56, %v1485_v15  ;;  %v1490_v32 = vrot.slane %v1488_v10, 4 }
  0xd8   : > { %v7180_v16 = vpop.f32.mrf.mxu2  ;;  %v3129_v3 = vunpack.c.l.b16 %v2874_v6  ;;  %v2905_v33 = vshll.u32 %v2692_v54, 16  ;;  %v1710_v6 = vunpack.c.l.b16 %v1486_v27  ;;  %v1493_v35 = vrot.slane %v1491_v51, 5 }
  0xd9   : > { %8302 = vst [vmem:[#allocation5_spill] sm:$0xff] %v7180_v16  ;;  %v2893_v59 = vrot.slane %v2892_v24, 4  ;;  %v7230_v56 = vrot.slane %v1497_v37, 5  ;;  %v1503_v15 = vrot.slane %v1501_v52, 4  ;;  %v658_v54 = vrot.slane %v6765_v23, 4 }
  0xda   : > { %v7186_v60 = vpop.f32.mrf.mxu3  ;;  %v2907_v0 = vrot.slane %v2905_v33, 5  ;;  %v2694_v24 = vld [vmem:[#allocation2 + $0x70] sm:$0xf]  ;;  %v1734_v29 = vpack.c.b16 %v1710_v6, %v1709_v41  ;;  %v1494_v10 = vor.u32 %v1493_v35, %v1490_v32  ;;  %v882_v6 = vld [vmem:[#allocation2 + $0x80] sm:$0x1] }
  0xdb   : > { %8303 = vst [vmem:[#allocation6_spill] sm:$0xff] %v7186_v60  ;;  %v1504_v51 = vor.u32 %v1503_v15, %v7230_v56  ;;  %v2923_v41 = vshrl.u32 %v2694_v24, 16 }
  0xdc   : > { %v7190_v13 = vpop.f32.mrf.mxu0 }
  0xdd   : > { %2268 = vmatmul.bf16.gmra.mxu2 %v2160_v14  ;;  %v7209_v14 = vrot.slane %v2895_v47, 5  ;;  %v3155_v47 = vpack.c.b16 %v3130_v26, %v3129_v3  ;;  %v7235_v26 = vld [vmem:[#allocation2 + $0x68] sm:$0x1] }
  0xde   : > { %v7194_v50 = vpop.f32.mrf.mxu1  ;;  %v1507_v37 = vshll.u32 %v7235_v26, 16 }
  0xdf   : > { %2581 = vmatmul.bf16.gmra.mxu3 %v6041_v40  ;;  %v2902_v40 = vor.u32 %v2901_v19, %v7209_v14  ;;  %v2693_v19 = vld [vmem:[#allocation2 + $0x6c] sm:$0xf]  ;;  %v2898_v27 = vsel %vm6928_vm10, %v2893_v59, %v7209_v14  ;;  %v2047_v14 = vsel %vm6952_vm13, %v5599_v55, %v2046_v28  ;;  %v883_v59 = vsel %vm6869_vm7, %v658_v54, %v882_v6 }
  0xe0   : > { %v7207_v12 = vpop.f32.mrf.mxu2  ;;  %v2910_v23 = vshrl.u32 %v2693_v19, 16  ;;  %v2913_v52 = vshll.u32 %v2693_v19, 16  ;;  %v3131_v32 = vunpack.c.l.b16 %v2898_v27  ;;  %884 = vst [vmem:[#allocation2 + $0x80] sm:$0x1] %v883_v59  ;;  %v1505_v19 = vrot.slane %v1504_v51, 4 }
  0xe1   : > { %8304 = vst [vmem:[#allocation7_spill] sm:$0xff] %v7207_v12  ;;  %1845 = vmatmul.bf16.gmra.mxu1 %v1733_v42  ;;  %v2161_v42 = vpack.c.b16 %v2136_v31, %v2135_v25  ;;  %v2903_v2 = vrot.slane %v2902_v40, 4  ;;  %v2048_v25 = vrot.slane %v2046_v28, 4  ;;  %v2049_v31 = vrot.slane %v7184_v45, 5  ;;  %v896_v12 = vld [vmem:[#allocation2 + $0x98] sm:$0x1] }
  0xe2   : > { %v7211_v17 = vpop.f32.mrf.mxu3  ;;  %v2912_v15 = vrot.slane %v2910_v23, 4  ;;  %v1495_v28 = vrot.slane %v1494_v10, 4  ;;  %v2915_v55 = vrot.slane %v2913_v52, 5  ;;  %v2925_v6 = vrot.slane %v2923_v41, 4 }
  0xe3   : > { %8305 = vst [vmem:[#allocation8_spill] sm:$0xff] %v7211_v17  ;;  %v2908_v40 = vsel %vm6928_vm10, %v2903_v2, %v2907_v0  ;;  %v2050_v0 = vsel %vm6952_vm13, %v2048_v25, %v2049_v31  ;;  %v2695_v17 = vld [vmem:[#allocation2 + $0x74] sm:$0x1]  ;;  %v2137_v60 = vunpack.c.l.b16 %v2047_v14  ;;  %v6071_v25 = vld [vmem:[%s8285_s1 + $0x158] sm:$0xff] }
  0xe4   : > { %v7215_v62 = vpop.f32.mrf.mxu0  ;;  %v3132_v35 = vunpack.c.l.b16 %v2908_v40  ;;  %v6111_v31 = vld [vmem:[%s8285_s1 + $0x218] sm:$0xff]  ;;  %v2138_v27 = vunpack.c.l.b16 %v2050_v0  ;;  %v1500_v51 = vsel %vm6928_vm10, %v1495_v28, %v7230_v56  ;;  %v2916_v52 = vor.u32 %v2915_v55, %v2912_v15  ;;  %3658 = vmatpush.bf16.msra.mxu1 %v6071_v25 }
  0xe5   : > { %5078 = vmatpush.bf16.msra.mxu0 %v6111_v31  ;;  %v2929_v14 = vshll.u32 %v2695_v17, 16  ;;  %v2696_v28 = vld [vmem:[#allocation2 + $0x78] sm:$0xf]  ;;  %v1711_v15 = vunpack.c.l.b16 %v1500_v51  ;;  %v2053_v55 = vrot.slane %v7213_v57, 5  ;;  %v7293_v17 = vld [vmem:[%s8286_s2] ss:$0 sm:$0xff] }
  0xe6   : > { %v7225_v34 = vpop.f32.mrf.mxu1  ;;  %v3156_v40 = vpack.c.b16 %v3132_v35, %v3131_v32  ;;  %v2162_v56 = vpack.c.b16 %v2138_v27, %v2137_v60  ;;  %v6043_v51 = vld [vmem:[#allocation2 + $0x60] sm:$0xff]  ;;  %v2934_v57 = vshrl.u32 %v2696_v28, 16 }
  0xe7   : > { %3267 = vmatmul.bf16.gmra.mxu0 %v3155_v47  ;;  %v2919_v47 = vshll.u32 %v2694_v24, 16  ;;  %v1271_v24 = vld [vmem:[#allocation2 + $0x6c] sm:$0xf]  ;;  %v2931_v60 = vrot.slane %v2929_v14, 5  ;;  %v2056_v14 = vrot.slane %v7235_v26, 5 }
  0xe8   : > { %v7228_v20 = vpop.f32.mrf.mxu2  ;;  %v1512_v23 = vshrl.u32 %v1271_v24, 16  ;;  %v1515_v10 = vshll.u32 %v1271_v24, 16  ;;  %v2917_v24 = vrot.slane %v2916_v52, 4  ;;  %v2937_v52 = vshll.u32 %v2696_v28, 16 }
  0xe9   : > { %8306 = vst [vmem:[#allocation9_spill] sm:$0xff] %v7228_v20  ;;  %v7265_v54 = vrot.slane %v2919_v47, 5  ;;  %v2936_v26 = vrot.slane %v2934_v57, 4  ;;  %v7326_v57 = vld [vmem:[#allocation2 + $0x7c] sm:$0xf] }
  0xea   : > { %v7233_v3 = vpop.f32.mrf.mxu3  ;;  %v1514_v32 = vrot.slane %v1512_v23, 4  ;;  %v1517_v35 = vrot.slane %v1515_v10, 5  ;;  %v675_v10 = vrot.slane %v6859_v44, 4 }
  0xeb   : > { %8307 = vst [vmem:[#allocation10_spill] sm:$0xff] %v7233_v3  ;;  %v2926_v41 = vor.u32 %v2925_v6, %v7265_v54  ;;  %v2697_v6 = vld [vmem:[#allocation2 + $0x7c] sm:$0xf]  ;;  %v2922_v44 = vsel %vm6928_vm10, %v2917_v24, %v7265_v54 }
  0xec   : > { %v7243_v33 = vpop.f32.mrf.mxu0 }
  0xed   : > { %2273 = vmatmul.bf16.gmra.mxu2 %v2161_v42  ;;  %v6095_v42 = vld [vmem:[%s8285_s1 + $0x198] sm:$0xff]  ;;  %v2927_v31 = vrot.slane %v2926_v41, 4  ;;  %v2055_v41 = vrot.slane %v2053_v55, 4 }
  0xee   : > { %v7247_v45 = vpop.f32.mrf.mxu1  ;;  %3972 = vmatpush.bf16.msra.mxu2 %v6095_v42 }
  0xef   : > { %2586 = vmatmul.bf16.gmra.mxu3 %v6042_v18  ;;  %v1509_v18 = vrot.slane %v1507_v37, 5  ;;  %v2932_v28 = vsel %vm6928_vm10, %v2927_v31, %v2931_v60  ;;  %v2057_v60 = vsel %vm6952_vm13, %v2055_v41, %v2056_v14 }
  0xf0   : > { %v7259_v2 = vpop.f32.mrf.mxu2 }
  0xf1   : > { %8308 = vst [vmem:[#allocation11_spill] sm:$0xff] %v7259_v2  ;;  %1850 = vmatmul.bf16.gmra.mxu1 %v1734_v29  ;;  %v7273_v29 = vld [vmem:[#allocation2 + $0x70] sm:$0xf]  ;;  %v1510_v37 = vsel %vm6928_vm10, %v1505_v19, %v1509_v18  ;;  %v1936_v18 = vld [vmem:[#allocation2 + $0x60] sm:$0xe]  ;;  %v2943_v2 = vshll.u32 %v2697_v6, 16 }
  0xf2   : > { %v7263_v3 = vpop.f32.mrf.mxu3  ;;  %v1521_v42 = vshll.u32 %v7273_v29, 16  ;;  %v1525_v63 = vshrl.u32 %v7273_v29, 16  ;;  %v1712_v19 = vunpack.c.l.b16 %v1510_v37  ;;  %v7300_v37 = vld [vmem:[#allocation2 + $0x74] sm:$0x1]  ;;  %v5600_v61 = vrot.slane %v1936_v18, 9 }
  0xf3   : > { %8309 = vst [vmem:[#allocation12_spill] sm:$0xff] %v7263_v3  ;;  %v1212_v3 = vadd.f32 %v7293_v17, %v7106_v8  ;;  %v1531_v8 = vshll.u32 %v7300_v37, 16 }
  0xf4   : > { %v7285_v59 = vpop.f32.mrf.mxu0  ;;  %v7297_v27 = vrot.slane %v1521_v42, 5  ;;  %v1527_v23 = vrot.slane %v1525_v63, 4  ;;  %v2947_v42 = vshrl.u32 %v2697_v6, 16  ;;  %v7318_v6 = vrot.slane %v2943_v2, 5 }
  0xf5   : > { %v2054_v31 = vsel %vm6952_vm13, %v5600_v61, %v2053_v55  ;;  %v1549_v61 = vshrl.u32 %v7326_v57, 16 }
  0xf6   : > { %v7280_v47 = vpop.f32.mrf.mxu1  ;;  %v2949_v54 = vrot.slane %v2947_v42, 4  ;;  %v2698_v42 = vld [vmem:[#allocation2 + $0x80] sm:$0x1]  ;;  %v2139_v55 = vunpack.c.l.b16 %v2054_v31 }
  0xf7   : > { %8310 = vst [vmem:[#allocation13_spill] sm:$0xff] %v7280_v47  ;;  %3272 = vmatmul.bf16.gmra.mxu0 %v3156_v40  ;;  %v1735_v40 = vpack.c.b16 %v1712_v19, %v1711_v15  ;;  %v2939_v15 = vrot.slane %v2937_v52, 5  ;;  %v1533_v52 = vrot.slane %v1531_v8, 5 }
  0xf8   : > { %v7287_v0 = vpop.f32.mrf.mxu2 }
  0xf9   : > { %8311 = vst [vmem:[#allocation14_spill] sm:$0xff] %v7287_v0  ;;  %v1518_v0 = vor.u32 %v1517_v35, %v1514_v32  ;;  %v889_v32 = vld [vmem:[#allocation2 + $0x8c] sm:$0x1]  ;;  %v2940_v14 = vor.u32 %v2939_v15, %v2936_v26  ;;  %v2060_v15 = vrot.slane %v7273_v29, 5  ;;  %v692_v29 = vrot.slane %v6550_v46, 4 }
  0xfa   : > { %v7295_v25 = vpop.f32.mrf.mxu3  ;;  %v890_v24 = vsel %vm6869_vm7, %v675_v10, %v889_v32  ;;  %v2140_v32 = vunpack.c.l.b16 %v2057_v60  ;;  %v1551_v60 = vrot.slane %v1549_v61, 4 }
  0xfb   : > { %8312 = vst [vmem:[#allocation15_spill] sm:$0xff] %v7295_v25  ;;  %v1528_v25 = vor.u32 %v1527_v23, %v7297_v27  ;;  %v1519_v18 = vrot.slane %v1518_v0, 4  ;;  %v3134_v23 = vunpack.c.l.b16 %v2932_v28  ;;  %v2953_v28 = vshll.u32 %v2698_v42, 16 }
  0xfc   : > { %891 = vst [vmem:[#allocation2 + $0x8c] sm:$0x1] %v890_v24 }
  0xfd   : > { %2278 = vmatmul.bf16.gmra.mxu2 %v2162_v56  ;;  %v7312_v56 = vpop.f32.mrf.mxu0  ;;  %v1529_v2 = vrot.slane %v1528_v25, 4  ;;  %v1524_v41 = vsel %vm6928_vm10, %v1519_v18, %v7297_v27  ;;  %v2163_v27 = vpack.c.b16 %v2140_v32, %v2139_v55  ;;  %v7347_v18 = vld [vmem:[#allocation2 + $0x80] sm:$0x1]  ;;  %v2699_v55 = vld [vmem:[#allocation2 + $0x84] sm:$0xf] }
  0xfe   : > { %v1816_v63 = vpop.f32.mrf.mxu1  ;;  %v1713_v26 = vunpack.c.l.b16 %v1524_v41  ;;  %v1555_v61 = vshll.u32 %v7347_v18, 16  ;;  %v2700_v32 = vld [vmem:[#allocation2 + $0x88] sm:$0xf]  ;;  %v1214_v41 = vadd.f32 %v7293_v17, %v7167_v53  ;;  %v2961_v46 = vshll.u32 %v2699_v55, 16 }
  0xff   : > { %2591 = vmatmul.bf16.gmra.mxu3 %v6043_v51  ;;  %v7314_v35 = vadd.f32 %v1816_v63, %v1212_v3  ;;  %v3133_v3 = vunpack.c.l.b16 %v2922_v44  ;;  %v1274_v51 = vld [vmem:[#allocation2 + $0x78] sm:$0xf]  ;;  %v2950_v44 = vor.u32 %v2949_v54, %v7318_v6  ;;  %v1534_v8 = vsel %vm6928_vm10, %v1529_v2, %v1533_v52 }
 0x100   : > { %v7316_v19 = vpop.f32.mrf.mxu2  ;;  %v1536_v63 = vshrl.u32 %v1274_v51, 16  ;;  %v1539_v10 = vshll.u32 %v1274_v51, 16  ;;  %v1714_v54 = vunpack.c.l.b16 %v1534_v8  ;;  %v2955_v2 = vrot.slane %v2953_v28, 5 }
 0x101   : > { %8313 = vst [vmem:[#allocation16_spill] sm:$0xff] %v7316_v19  ;;  %1855 = vmatmul.bf16.gmra.mxu1 %v1735_v40  ;;  %v1545_v40 = vshll.u32 %v7326_v57, 16  ;;  %v3157_v24 = vpack.c.b16 %v3134_v23, %v3133_v3  ;;  %v1937_v3 = vld [vmem:[#allocation2 + $0x6c] sm:$0xe]  ;;  %v2941_v23 = vrot.slane %v2940_v14, 4  ;;  %v2951_v42 = vrot.slane %v2950_v44, 4 }
 0x102   : > { %v7328_v0 = vpop.f32.mrf.mxu3  ;;  %v1538_v51 = vrot.slane %v1536_v63, 4  ;;  %v5601_v8 = vrot.slane %v1937_v3, 9  ;;  %v2062_v14 = vrot.slane %v2060_v15, 4  ;;  %v1736_v44 = vpack.c.b16 %v1714_v54, %v1713_v26  ;;  %v6102_v3 = vld [vmem:[%s8285_s1 + $0x1d0] sm:$0xff] }
 0x103   : > { %8314 = vst [vmem:[#allocation17_spill] sm:$0xff] %v7328_v0  ;;  %v1541_v0 = vrot.slane %v1539_v10, 5  ;;  %v7342_v31 = vrot.slane %v1545_v40, 5  ;;  %v6044_v10 = vld [vmem:[#allocation2 + $0x6c] sm:$0xff]  ;;  %v2063_v28 = vrot.slane %v7300_v37, 5  ;;  %v1557_v37 = vrot.slane %v1555_v61, 5  ;;  %4654 = vmatpush.bf16.msra.mxu3 %v6102_v3 }
 0x104   : > { %v2971_v54 = vshrl.u32 %v2700_v32, 16 }
 0x105   : > { %v7340_v19 = vpop.f32.mrf.mxu0  ;;  %v1542_v63 = vor.u32 %v1541_v0, %v1538_v51  ;;  %v1552_v40 = vor.u32 %v1551_v60, %v7342_v31  ;;  %v2946_v0 = vsel %vm6928_vm10, %v2941_v23, %v7318_v6  ;;  %v6094_v6 = vld [vmem:[%s8285_s1 + $0x190] sm:$0xff]  ;;  %v1213_v23 = vadd.f32 %v7293_v17, %v7125_v1 }
 0x106   : > { %v7336_v25 = vpop.f32.mrf.mxu1  ;;  %v2064_v61 = vsel %vm6952_vm13, %v2062_v14, %v2063_v28  ;;  %3973 = vmatpush.bf16.msra.mxu2 %v6094_v6  ;;  %v2973_v28 = vrot.slane %v2971_v54, 4 }
 0x107   : > { %3277 = vmatmul.bf16.gmra.mxu0 %v3157_v24  ;;  %v2956_v24 = vsel %vm6928_vm10, %v2951_v42, %v2955_v2  ;;  %v1543_v60 = vrot.slane %v1542_v63, 4  ;;  %v1553_v26 = vrot.slane %v1552_v40, 4  ;;  %v2061_v2 = vsel %vm6952_vm13, %v5601_v8, %v2060_v15 }
 0x108   : > { %v7344_v20 = vpop.f32.mrf.mxu2  ;;  %v897_v63 = vsel %vm6869_vm7, %v692_v29, %v896_v12  ;;  %v2963_v12 = vrot.slane %v2961_v46, 5  ;;  %v7385_v29 = vld [vmem:[#allocation2 + $0x88] sm:$0xf]  ;;  %v2142_v6 = vunpack.c.l.b16 %v2064_v61 }
 0x109   : > { %8315 = vst [vmem:[#allocation18_spill] sm:$0xff] %v7344_v20  ;;  %v2967_v20 = vshll.u32 %v2700_v32, 16  ;;  %v1277_v32 = vld [vmem:[#allocation2 + $0x84] sm:$0xf]  ;;  %v1548_v15 = vsel %vm6928_vm10, %v1543_v60, %v7342_v31  ;;  %v6110_v31 = vld [vmem:[%s8285_s1 + $0x210] sm:$0xff]  ;;  %v1573_v54 = vshrl.u32 %v7385_v29, 16 }
 0x10a   : > { %v7349_v52 = vpop.f32.mrf.mxu3  ;;  %898 = vst [vmem:[#allocation2 + $0x98] sm:$0x1] %v897_v63  ;;  %v1560_v60 = vshrl.u32 %v1277_v32, 16  ;;  %v1563_v46 = vshll.u32 %v1277_v32, 16  ;;  %5079 = vmatpush.bf16.msra.mxu0 %v6110_v31  ;;  %v1715_v63 = vunpack.c.l.b16 %v1548_v15 }
 0x10b   : > { %8316 = vst [vmem:[#allocation19_spill] sm:$0xff] %v7349_v52  ;;  %v2958_v52 = vshrl.u32 %v2699_v55, 16  ;;  %v3135_v55 = vunpack.c.l.b16 %v2946_v0  ;;  %v7389_v14 = vrot.slane %v2967_v20, 5  ;;  %v6070_v0 = vld [vmem:[%s8285_s1 + $0x150] sm:$0xff]  ;;  %v2067_v20 = vrot.slane %v7326_v57, 5 }
 0x10c   : > { %3659 = vmatpush.bf16.msra.mxu1 %v6070_v0  ;;  %v1216_v0 = vadd.f32 %v7293_v17, %v7215_v62  ;;  %v1562_v16 = vrot.slane %v1560_v60, 4 }
 0x10d   : > { %2283 = vmatmul.bf16.gmra.mxu2 %v2163_v27  ;;  %v7362_v53 = vpop.f32.mrf.mxu0  ;;  %v2960_v8 = vrot.slane %v2958_v52, 4  ;;  %v1215_v52 = vadd.f32 %v7293_v17, %v7190_v13  ;;  %v1897_v13 = vadd.f32 %v7336_v25, %v1213_v23  ;;  %v2974_v61 = vor.u32 %v2973_v28, %v7389_v14 }
 0x10e   : > { %v1821_v51 = vpop.f32.mrf.mxu1  ;;  %v1575_v23 = vrot.slane %v1573_v54, 4 }
 0x10f   : > { %2596 = vmatmul.bf16.gmra.mxu3 %v6044_v10  ;;  %v7364_v27 = vadd.f32 %v1821_v51, %v1214_v41  ;;  %v3136_v41 = vunpack.c.l.b16 %v2956_v24  ;;  %v2141_v24 = vunpack.c.l.b16 %v2061_v2  ;;  %v2701_v51 = vld [vmem:[#allocation2 + $0x8c] sm:$0x1]  ;;  %v2975_v60 = vrot.slane %v2974_v61, 4 }
 0x110   : > { %v2244_v42 = vpop.f32.mrf.mxu2  ;;  %v2977_v57 = vshll.u32 %v2701_v51, 16  ;;  %v2069_v51 = vrot.slane %v2067_v20, 4 }
 0x111   : > { %v2324_v40 = vadd.f32 %v2244_v42, %v7314_v35  ;;  %1860 = vmatmul.bf16.gmra.mxu1 %v1736_v44  ;;  %v1558_v44 = vsel %vm6928_vm10, %v1553_v26, %v1557_v37  ;;  %v1938_v26 = vld [vmem:[#allocation2 + $0x78] sm:$0xe]  ;;  %v1569_v37 = vshll.u32 %v7385_v29, 16  ;;  %v3158_v3 = vpack.c.b16 %v3136_v41, %v3135_v55  ;;  %v2702_v41 = vld [vmem:[#allocation2 + $0x90] sm:$0xf] }
 0x112   : > { %v2557_v1 = vpop.f32.mrf.mxu3  ;;  %v5602_v10 = vrot.slane %v1938_v26, 9  ;;  %v1565_v55 = vrot.slane %v1563_v46, 5  ;;  %v6045_v26 = vld [vmem:[#allocation2 + $0x78] sm:$0xff]  ;;  %v2979_v46 = vrot.slane %v2977_v57, 5  ;;  %v2982_v47 = vshrl.u32 %v2702_v41, 16 }
 0x113   : > { %v2637_v35 = vadd.f32 %v2557_v1, %v2324_v40  ;;  %v1716_v40 = vunpack.c.l.b16 %v1558_v44  ;;  %v2964_v1 = vor.u32 %v2963_v12, %v2960_v8  ;;  %v2164_v44 = vpack.c.b16 %v2142_v6, %v2141_v24  ;;  %v7410_v8 = vld [vmem:[#allocation2 + $0x8c] sm:$0x1]  ;;  %v2703_v12 = vld [vmem:[#allocation2 + $0x94] sm:$0xf] }
 0x114   : > { %v7412_v25 = vrot.slane %v1569_v37, 5  ;;  %v1579_v24 = vshll.u32 %v7410_v8, 16  ;;  %v2985_v6 = vshll.u32 %v2702_v41, 16  ;;  %v2991_v37 = vshll.u32 %v2703_v12, 16 }
 0x115   : > { %v7403_v2 = vpop.f32.mrf.mxu0  ;;  %v1737_v28 = vpack.c.b16 %v1716_v40, %v1715_v63  ;;  %v2965_v62 = vrot.slane %v2964_v1, 4  ;;  %v2068_v40 = vsel %vm6952_vm13, %v5602_v10, %v2067_v20  ;;  %v903_v1 = vld [vmem:[#allocation2 + $0xa4] sm:$0x1]  ;;  %v2984_v41 = vrot.slane %v2982_v47, 4 }
 0x116   : > { %v1823_v42 = vpop.f32.mrf.mxu1  ;;  %v1576_v54 = vor.u32 %v1575_v23, %v7412_v25  ;;  %v2704_v23 = vld [vmem:[#allocation2 + $0x98] sm:$0x1]  ;;  %v1217_v47 = vadd.f32 %v7293_v17, %v7243_v33 }
 0x117   : > { %v7405_v32 = vadd.f32 %v1823_v42, %v1215_v52  ;;  %3282 = vmatmul.bf16.gmra.mxu0 %v3158_v3  ;;  %v2070_v42 = vrot.slane %v7347_v18, 5  ;;  %v7418_v3 = vadd.f32 %v7340_v19, %v2637_v35  ;;  %v2970_v19 = vsel %vm6928_vm10, %v2965_v62, %v7389_v14 }
 0x118   : > { %v2246_v31 = vpop.f32.mrf.mxu2  ;;  %v7441_v14 = vrot.slane %v2991_v37, 5 }
 0x119   : > { %v2325_v15 = vadd.f32 %v2246_v31, %v1897_v13  ;;  %v1566_v13 = vor.u32 %v1565_v55, %v1562_v16  ;;  %v2995_v31 = vshrl.u32 %v2703_v12, 16  ;;  %v2071_v16 = vsel %vm6952_vm13, %v2069_v51, %v2070_v42 }
 0x11a   : > { %v2559_v52 = vpop.f32.mrf.mxu3  ;;  %v1581_v55 = vrot.slane %v1579_v24, 5  ;;  %v2143_v51 = vunpack.c.l.b16 %v2068_v40  ;;  %v3137_v42 = vunpack.c.l.b16 %v2970_v19 }
 0x11b   : > { %v2638_v36 = vadd.f32 %v2559_v52, %v2325_v15  ;;  %v1567_v20 = vrot.slane %v1566_v13, 4  ;;  %v2987_v15 = vrot.slane %v2985_v6, 5  ;;  %v2997_v12 = vrot.slane %v2995_v31, 4  ;;  %v1939_v6 = vld [vmem:[#allocation2 + $0x84] sm:$0xe] }
 0x11c   : > { %v1218_v13 = vadd.f32 %v7293_v17, %v7285_v59 }
 0x11d   : > { %2288 = vmatmul.bf16.gmra.mxu2 %v2164_v44  ;;  %v7421_v18 = vadd.f32 %v7362_v53, %v2638_v36  ;;  %v7427_v61 = vpop.f32.mrf.mxu0  ;;  %v2980_v36 = vsel %vm6928_vm10, %v2975_v60, %v2979_v46  ;;  %v8317_v53 = vrot.slane %v6656_v48, 4  ;;  %v1577_v44 = vrot.slane %v1576_v54, 4 }
 0x11e   : > { %v1826_v63 = vpop.f32.mrf.mxu1  ;;  %v2144_v48 = vunpack.c.l.b16 %v2071_v16  ;;  %v3138_v62 = vunpack.c.l.b16 %v2980_v36  ;;  %v726_v60 = vrot.slane %v6791_v5, 4  ;;  %v1572_v24 = vsel %vm6928_vm10, %v1567_v20, %v7412_v25  ;;  %v2705_v20 = vld [vmem:[#allocation2 + $0x9c] sm:$0xf] }
 0x11f   : > { %2601 = vmatmul.bf16.gmra.mxu3 %v6045_v26  ;;  %v7429_v57 = vadd.f32 %v1826_v63, %v1216_v0  ;;  %v904_v10 = vsel %vm6869_vm7, %v8317_v53, %v903_v1  ;;  %v1280_v26 = vld [vmem:[#allocation2 + $0x90] sm:$0xf]  ;;  %v2988_v37 = vor.u32 %v2987_v15, %v2984_v41  ;;  %v3001_v54 = vshll.u32 %v2704_v23, 16  ;;  %v2706_v23 = vld [vmem:[#allocation2 + $0xa0] sm:$0xf] }
 0x120   : > { %v2249_v35 = vpop.f32.mrf.mxu2  ;;  %905 = vst [vmem:[#allocation2 + $0xa4] sm:$0x1] %v904_v10  ;;  %v1582_v31 = vsel %vm6928_vm10, %v1577_v44, %v1581_v55  ;;  %v2998_v33 = vor.u32 %v2997_v12, %v7441_v14  ;;  %v1584_v63 = vshrl.u32 %v1280_v26, 16  ;;  %v1587_v40 = vshll.u32 %v1280_v26, 16 }
 0x121   : > { %v2326_v0 = vadd.f32 %v2249_v35, %v7364_v27  ;;  %1865 = vmatmul.bf16.gmra.mxu1 %v1737_v28  ;;  %v2074_v27 = vrot.slane %v7385_v29, 5  ;;  %v7447_v28 = vld [vmem:[#allocation2 + $0x94] sm:$0xf]  ;;  %v2165_v29 = vpack.c.b16 %v2144_v48, %v2143_v51  ;;  %v3159_v16 = vpack.c.b16 %v3138_v62, %v3137_v42  ;;  %v7465_v62 = vld [vmem:[#allocation2 + $0x98] sm:$0x1] }
 0x122   : > { %v2562_v52 = vpop.f32.mrf.mxu3  ;;  %v1593_v19 = vshll.u32 %v7447_v28, 16  ;;  %v1597_v59 = vshrl.u32 %v7447_v28, 16  ;;  %v5603_v53 = vrot.slane %v1939_v6, 9  ;;  %v2077_v35 = vrot.slane %v7410_v8, 5 }
 0x123   : > { %v2639_v46 = vadd.f32 %v2562_v52, %v2326_v0  ;;  %v2076_v10 = vrot.slane %v2074_v27, 4  ;;  %v1717_v41 = vunpack.c.l.b16 %v1572_v24  ;;  %v1718_v15 = vunpack.c.l.b16 %v1582_v31 }
 0x124   : > { %v2989_v0 = vrot.slane %v2988_v37, 4  ;;  %v3003_v44 = vrot.slane %v3001_v54, 5  ;;  %v2999_v52 = vrot.slane %v2998_v33, 4  ;;  %v1586_v51 = vrot.slane %v1584_v63, 4  ;;  %v6046_v54 = vld [vmem:[#allocation2 + $0x84] sm:$0xff] }
 0x125   : > { %v7459_v36 = vpop.f32.mrf.mxu0  ;;  %v1589_v48 = vrot.slane %v1587_v40, 5  ;;  %v7467_v26 = vrot.slane %v1593_v19, 5  ;;  %v3006_v8 = vshrl.u32 %v2705_v20, 16  ;;  %v3009_v6 = vshll.u32 %v2705_v20, 16 }
 0x126   : > { %v1828_v1 = vpop.f32.mrf.mxu1  ;;  %v7471_v24 = vadd.f32 %v7293_v17, %v7312_v56  ;;  %v3015_v31 = vshll.u32 %v2706_v23, 16  ;;  %v1738_v33 = vpack.c.b16 %v1718_v15, %v1717_v41  ;;  %v2075_v63 = vsel %vm6952_vm13, %v5603_v53, %v2074_v27 }
 0x127   : > { %v7461_v25 = vadd.f32 %v1828_v1, %v1217_v47  ;;  %3287 = vmatmul.bf16.gmra.mxu0 %v3159_v16  ;;  %v1599_v47 = vrot.slane %v1597_v59, 4  ;;  %v2078_v40 = vsel %vm6952_vm13, %v2076_v10, %v2077_v35  ;;  %v2994_v16 = vsel %vm6928_vm10, %v2989_v0, %v7441_v14  ;;  %v1940_v10 = vld [vmem:[#allocation2 + $0x90] sm:$0xe]  ;;  %v910_v14 = vld [vmem:[#allocation2 + $0xb0] sm:$0x1] }
 0x128   : > { %v2251_v55 = vpop.f32.mrf.mxu2  ;;  %v1590_v1 = vor.u32 %v1589_v48, %v1586_v51  ;;  %v1603_v56 = vshll.u32 %v7465_v62, 16  ;;  %v7482_v19 = vadd.f32 %v7403_v2, %v2639_v46  ;;  %v3004_v27 = vsel %vm6928_vm10, %v2999_v52, %v3003_v44  ;;  %v2707_v46 = vld [vmem:[#allocation2 + $0xa4] sm:$0x1]  ;;  %v6101_v44 = vld [vmem:[%s8285_s1 + $0x1c8] sm:$0xff] }
 0x129   : > { %v2327_v12 = vadd.f32 %v2251_v55, %v7405_v32  ;;  %v3019_v32 = vshrl.u32 %v2706_v23, 16  ;;  %v1600_v53 = vor.u32 %v1599_v47, %v7467_v26  ;;  %v3008_v35 = vrot.slane %v3006_v8, 4  ;;  %4655 = vmatpush.bf16.msra.mxu3 %v6101_v44 }
 0x12a   : > { %v2564_v42 = vpop.f32.mrf.mxu3  ;;  %v3011_v55 = vrot.slane %v3009_v6, 5  ;;  %v2145_v2 = vunpack.c.l.b16 %v2075_v63  ;;  %v7497_v15 = vrot.slane %v3015_v31, 5  ;;  %v3139_v52 = vunpack.c.l.b16 %v2994_v16  ;;  %v1283_v6 = vld [vmem:[#allocation2 + $0x9c] sm:$0xf] }
 0x12b   : > { %v2640_v37 = vadd.f32 %v2564_v42, %v2327_v12  ;;  %v3021_v0 = vrot.slane %v3019_v32, 4  ;;  %v2146_v12 = vunpack.c.l.b16 %v2078_v40  ;;  %v2081_v51 = vrot.slane %v7447_v28, 5 }
 0x12c   : > { %v3140_v42 = vunpack.c.l.b16 %v3004_v27  ;;  %v1591_v47 = vrot.slane %v1590_v1, 4  ;;  %v1605_v8 = vrot.slane %v1603_v56, 5  ;;  %v1601_v31 = vrot.slane %v1600_v53, 4 }
 0x12d   : > { %2293 = vmatmul.bf16.gmra.mxu2 %v2165_v29  ;;  %v7485_v59 = vadd.f32 %v7427_v61, %v2640_v37  ;;  %v7490_v29 = vpop.f32.mrf.mxu0  ;;  %v6093_v61 = vld [vmem:[%s8285_s1 + $0x188] sm:$0xff]  ;;  %v7508_v37 = vld [vmem:[#allocation2 + $0xa0] sm:$0xf]  ;;  %v5604_v32 = vrot.slane %v1940_v10, 9  ;;  %v3012_v63 = vor.u32 %v3011_v55, %v3008_v35  ;;  %v3025_v28 = vshll.u32 %v2707_v46, 16 }
 0x12e   : > { %v1831_v20 = vpop.f32.mrf.mxu1  ;;  %3974 = vmatpush.bf16.msra.mxu2 %v6093_v61  ;;  %v1608_v40 = vshrl.u32 %v1283_v6, 16  ;;  %v1611_v16 = vshll.u32 %v1283_v6, 16  ;;  %v2083_v1 = vrot.slane %v2081_v51, 4  ;;  %v2084_v56 = vrot.slane %v7465_v62, 5 }
 0x12f   : > { %2606 = vmatmul.bf16.gmra.mxu3 %v6046_v54  ;;  %v7492_v41 = vadd.f32 %v1831_v20, %v1218_v13  ;;  %v911_v13 = vsel %vm6869_vm7, %v726_v60, %v910_v14  ;;  %v3022_v60 = vor.u32 %v3021_v0, %v7497_v15  ;;  %v1617_v20 = vshll.u32 %v7508_v37, 16  ;;  %v2708_v0 = vld [vmem:[#allocation2 + $0xa8] sm:$0xf] }
 0x130   : > { %v2254_v23 = vpop.f32.mrf.mxu2  ;;  %912 = vst [vmem:[#allocation2 + $0xb0] sm:$0x1] %v911_v13  ;;  %v1621_v27 = vshrl.u32 %v7508_v37, 16  ;;  %v2166_v53 = vpack.c.b16 %v2146_v12, %v2145_v2  ;;  %v3160_v10 = vpack.c.b16 %v3140_v42, %v3139_v52  ;;  %v1596_v35 = vsel %vm6928_vm10, %v1591_v47, %v7467_v26  ;;  %v2709_v52 = vld [vmem:[#allocation2 + $0xac] sm:$0xf] }
 0x131   : > { %v2328_v48 = vadd.f32 %v2254_v23, %v7429_v57  ;;  %1870 = vmatmul.bf16.gmra.mxu1 %v1738_v33  ;;  %v6069_v57 = vld [vmem:[%s8285_s1 + $0x148] sm:$0xff]  ;;  %v1606_v14 = vsel %vm6928_vm10, %v1601_v31, %v1605_v8  ;;  %v7529_v61 = vsel %vm6952_vm13, %v5604_v32, %v2081_v51  ;;  %v3013_v62 = vrot.slane %v3012_v63, 4  ;;  %v7540_v51 = vld [vmem:[#allocation2 + $0xa4] sm:$0x1] }
 0x132   : > { %v2567_v54 = vpop.f32.mrf.mxu3  ;;  %v6109_v33 = vld [vmem:[%s8285_s1 + $0x208] sm:$0xff]  ;;  %3660 = vmatpush.bf16.msra.mxu1 %v6069_v57  ;;  %v3027_v46 = vrot.slane %v3025_v28, 5  ;;  %v3023_v23 = vrot.slane %v3022_v60, 4  ;;  %v1610_v26 = vrot.slane %v1608_v40, 4  ;;  %v1613_v12 = vrot.slane %v1611_v16, 5  ;;  %v6047_v40 = vld [vmem:[#allocation2 + $0x90] sm:$0xff] }
 0x133   : > { %v7510_v5 = vadd.f32 %v2567_v54, %v2328_v48  ;;  %5080 = vmatpush.bf16.msra.mxu0 %v6109_v33  ;;  %v1719_v48 = vunpack.c.l.b16 %v1596_v35  ;;  %v7538_v42 = vsel %vm6952_vm13, %v2083_v1, %v2084_v56  ;;  %v7542_v47 = vrot.slane %v1617_v20, 5  ;;  %v1941_v35 = vld [vmem:[#allocation2 + $0x9c] sm:$0xe] }
 0x134   : > { %v1623_v8 = vrot.slane %v1621_v27, 4  ;;  %v1720_v54 = vunpack.c.l.b16 %v1606_v14  ;;  %v3033_v31 = vshll.u32 %v2708_v0, 16  ;;  %v743_v32 = vrot.slane %v6896_v21, 4 }
 0x135   : > { %v7531_v44 = vpop.f32.mrf.mxu0  ;;  %v3018_v28 = vsel %vm6928_vm10, %v3013_v62, %v7497_v15  ;;  %v3039_v60 = vshll.u32 %v2709_v52, 16  ;;  %v3043_v57 = vshrl.u32 %v2709_v52, 16  ;;  %v3028_v16 = vsel %vm6928_vm10, %v3023_v23, %v3027_v46 }
 0x136   : > { %v1833_v55 = vpop.f32.mrf.mxu1  ;;  %v1614_v1 = vor.u32 %v1613_v12, %v1610_v26  ;;  %v1220_v21 = vadd.f32 %v7293_v17, %v7091_v38  ;;  %v2147_v56 = vunpack.c.l.b16 %v7529_v61  ;;  %v2148_v20 = vunpack.c.l.b16 %v7538_v42  ;;  %v917_v38 = vld [vmem:[#allocation2 + $0xbc] sm:$0x1] }
 0x137   : > { %v7534_v2 = vadd.f32 %v1833_v55, %v7471_v24  ;;  %v3030_v24 = vshrl.u32 %v2708_v0, 16  ;;  %3292 = vmatmul.bf16.gmra.mxu0 %v3160_v10  ;;  %v1624_v15 = vor.u32 %v1623_v8, %v7542_v47  ;;  %v1739_v27 = vpack.c.b16 %v1720_v54, %v1719_v48  ;;  %v6274_v26 = vld [vmem:[%s6424_s29 + $0x78] sm:$0xff]   ;;  %v2710_v42 = vld [vmem:[#allocation2 + $0xb0] sm:$0x1] }
 0x138   : > { %v2256_v13 = vpop.f32.mrf.mxu2  ;;  %v7557_v10 = vunpack.c.l.b16 %v3018_v28  ;;  %v3035_v14 = vrot.slane %v3033_v31, 5  ;;  %v7559_v46 = vunpack.c.l.b16 %v3028_v16  ;;  %v7561_v0 = vrot.slane %v3039_v60, 5  ;;  %v7579_v28 = vld [vmem:[#allocation2 + $0xac] sm:$0xf] }
 0x139   : > { %v2329_v6 = vadd.f32 %v2256_v13, %v7461_v25  ;;  %v1627_v25 = vshll.u32 %v7540_v51, 16  ;;  %v3032_v55 = vrot.slane %v3030_v24, 4  ;;  %v3045_v23 = vrot.slane %v3043_v57, 4 }
 0x13a   : > { %v2569_v63 = vpop.f32.mrf.mxu3  ;;  %v7566_v61 = vadd.f32 %v7459_v36, %v7510_v5  ;;  %v1615_v52 = vrot.slane %v1614_v1, 4  ;;  %v2088_v48 = vrot.slane %v7508_v37, 5  ;;  %v5605_v54 = vrot.slane %v1941_v35, 9 }
 0x13b   : > { %v2642_v33 = vadd.f32 %v2569_v63, %v2329_v6  ;;  %v1629_v13 = vrot.slane %v1627_v25, 5  ;;  %v1625_v6 = vrot.slane %v1624_v15, 4  ;;  %v918_v24 = vsel %vm6869_vm7, %v743_v32, %v917_v38  ;;  %v1286_v63 = vld [vmem:[#allocation2 + $0xa8] sm:$0xf] }
 0x13c   : > { %v3036_v5 = vor.u32 %v3035_v14, %v3032_v55  ;;  %v6178_v60 = vunpack.c.l.bf16 %v6274_v26  ;;  %v6179_v57 = vunpack.c.h.bf16 %v6274_v26  ;;  %v3049_v16 = vshll.u32 %v2710_v42, 16  ;;  %919 = vst [vmem:[#allocation2 + $0xbc] sm:$0x1] %v918_v24  ;;  %v2711_v24 = vld [vmem:[#allocation2 + $0xb4] sm:$0xf] }
 0x13d   : > { %2298 = vmatmul.bf16.gmra.mxu2 %v2166_v53  ;;  %v7568_v53 = vpop.f32.mrf.mxu0  ;;  %v7576_v31 = vadd.f32 %v7490_v29, %v2642_v33  ;;  %v1632_v1 = vshrl.u32 %v1286_v63, 16  ;;  %v1635_v25 = vshll.u32 %v1286_v63, 16  ;;  %v3161_v29 = vpack.c.b16 %v7559_v46, %v7557_v10  ;;  %v7607_v63 = vld [vmem:[#allocation2 + $0xb0] sm:$0x1] }
 0x13e   : > { %v1836_v62 = vpop.f32.mrf.mxu1  ;;  %v2090_v33 = vrot.slane %v2088_v48, 4  ;;  %v2089_v15 = vsel %vm6952_vm13, %v5605_v54, %v2088_v48  ;;  %v1645_v35 = vshrl.u32 %v7579_v28, 16  ;;  %v1630_v55 = vsel %vm6928_vm10, %v1625_v6, %v1629_v13 }
 0x13f   : > { %2611 = vmatmul.bf16.gmra.mxu3 %v6047_v40  ;;  %v7570_v12 = vadd.f32 %v1836_v62, %v1220_v21  ;;  %v3046_v40 = vor.u32 %v3045_v23, %v7561_v0  ;;  %v1620_v21 = vsel %vm6928_vm10, %v1615_v52, %v7542_v47  ;;  %v3037_v14 = vrot.slane %v3036_v5, 4 }
 0x140   : > { %v2259_v8 = vpop.f32.mrf.mxu2  ;;  %v333_v10 = vmul.f32 %v6178_v60, %v6426_v4  ;;  %v334_v62 = vmul.f32 %v6179_v57, %v6426_v4  ;;  %v3051_v23 = vrot.slane %v3049_v16, 5  ;;  %v1634_v47 = vrot.slane %v1632_v1, 4  ;;  %v6048_v1 = vld [vmem:[#allocation2 + $0x9c] sm:$0xff] }
 0x141   : > { %v2330_v36 = vadd.f32 %v2259_v8, %v7492_v41  ;;  %1875 = vmatmul.bf16.gmra.mxu1 %v1739_v27  ;;  %v2091_v41 = vrot.slane %v7540_v51, 5  ;;  %v1641_v27 = vshll.u32 %v7579_v28, 16  ;;  %v3047_v46 = vrot.slane %v3046_v40, 4 }
 0x142   : > { %v2572_v37 = vpop.f32.mrf.mxu3  ;;  %v1637_v38 = vrot.slane %v1635_v25, 5  ;;  %v1221_v26 = vadd.f32 %v7293_v17, %v7114_v30  ;;  %v2167_v48 = vpack.c.b16 %v2148_v20, %v2147_v56  ;;  %v1721_v8 = vunpack.c.l.b16 %v1620_v21  ;;  %v2712_v25 = vld [vmem:[#allocation2 + $0xb8] sm:$0xf] }
 0x143   : > { %v2643_v32 = vadd.f32 %v2572_v37, %v2330_v36  ;;  %v2092_v13 = vsel %vm6952_vm13, %v2090_v33, %v2091_v41  ;;  %v1722_v6 = vunpack.c.l.b16 %v1630_v55  ;;  %v7604_v54 = vrot.slane %v1641_v27, 5 }
 0x144   : > { %v1647_v4 = vrot.slane %v1645_v35, 4  ;;  %v2149_v5 = vunpack.c.l.b16 %v2089_v15  ;;  %v366_v30 = vadd.f32 %v6433_v7, %v333_v10  ;;  %v367_v60 = vadd.f32 %v6433_v7, %v334_v62 }
 0x145   : > { %v7600_v52 = vpop.f32.mrf.mxu0  ;;  %v2150_v20 = vunpack.c.l.b16 %v2092_v13  ;;  %v3042_v57 = vsel %vm6928_vm10, %v3037_v14, %v7561_v0  ;;  %v3052_v37 = vsel %vm6928_vm10, %v3047_v46, %v3051_v23  ;;  %v1638_v40 = vor.u32 %v1637_v38, %v1634_v47  ;;  %v6092_v23 = vld [vmem:[%s8285_s1 + $0x180] sm:$0xff] }
 0x146   : > { %v7596_v51 = vpop.f32.mrf.mxu1  ;;  %v3054_v33 = vshrl.u32 %v2711_v24, 16  ;;  %v3057_v41 = vshll.u32 %v2711_v24, 16  ;;  %v7620_v7 = vadd.f32 %v7293_v17, %v7172_v49  ;;  %v1648_v21 = vor.u32 %v1647_v4, %v7604_v54  ;;  %v6100_v13 = vld [vmem:[%s8285_s1 + $0x1c0] sm:$0xff]  ;;  %3975 = vmatpush.bf16.msra.mxu2 %v6092_v23 }
 0x147   : > { %3297 = vmatmul.bf16.gmra.mxu0 %v3161_v29  ;;  %v1740_v29 = vpack.c.b16 %v1722_v6, %v1721_v8  ;;  %v1651_v0 = vshll.u32 %v7607_v63, 16  ;;  %v7624_v15 = vunpack.c.l.b16 %v3042_v57  ;;  %v7626_v27 = vunpack.c.l.b16 %v3052_v37  ;;  %4656 = vmatpush.bf16.msra.mxu3 %v6100_v13 }
 0x148   : > { %v2261_v42 = vpop.f32.mrf.mxu2  ;;  %v399_v35 = vmax.f32 %v367_v60, 0.0  ;;  %v7628_v14 = vpack.c.b16 %v2150_v20, %v2149_v5  ;;  %v1639_v10 = vrot.slane %v1638_v40, 4  ;;  %v3063_v62 = vshll.u32 %v2712_v25, 16  ;;  %v1289_v5 = vld [vmem:[#allocation2 + $0xb4] sm:$0xf] }
 0x149   : > { %v2331_v36 = vadd.f32 %v2261_v42, %v7534_v2  ;;  %v1222_v2 = vadd.f32 %v7293_v17, %v7137_v9  ;;  %v398_v9 = vmax.f32 %v366_v30, 0.0  ;;  %v7631_v49 = vadd.f32 %v7531_v44, %v2643_v32 }
 0x14a   : > { %v2574_v56 = vpop.f32.mrf.mxu3  ;;  %v3056_v47 = vrot.slane %v3054_v33, 4  ;;  %v3059_v38 = vrot.slane %v3057_v41, 5  ;;  %v1649_v8 = vrot.slane %v1648_v21, 4  ;;  %v1653_v44 = vrot.slane %v1651_v0, 5 }
 0x14b   : > { %v2644_v16 = vadd.f32 %v2574_v56, %v2331_v36  ;;  %v430_v32 = vpack.c.bf16 %v398_v9, %v398_v9  ;;  %v3162_v24 = vpack.c.b16 %v7626_v27, %v7624_v15  ;;  %v7649_v36 = vld [vmem:[#allocation2 + $0xa8] sm:$0xe]  ;;  %v431_v30 = vpack.c.bf16 %v399_v35, %v399_v35 }
 0x14c   : > { %v1905_v56 = vadd.f32 %v7596_v51, %v1221_v26  ;;  %v1644_v20 = vsel %vm6928_vm10, %v1639_v10, %v7604_v54  ;;  %v7656_v57 = vrot.slane %v3063_v62, 5  ;;  %v6108_v51 = vld [vmem:[%s8285_s1 + $0x200] sm:$0xff]  ;;  %v5606_v54 = vrot.slane %v7649_v36, 9 }
 0x14d   : > { %2303 = vmatmul.bf16.gmra.mxu2 %v2167_v48  ;;  %v7633_v17 = vpop.f32.mrf.mxu0  ;;  %v3067_v48 = vshrl.u32 %v2712_v25, 16  ;;  %v7644_v6 = vadd.f32 %v7568_v53, %v2644_v16  ;;  %v2095_v53 = vrot.slane %v7579_v28, 5  ;;  %v745_v26 = vshrl.u32 %v430_v32, 16  ;;  %5081 = vmatpush.bf16.msra.mxu0 %v6108_v51 }
 0x14e   : > { %v1841_v55 = vpop.f32.mrf.mxu1  ;;  %v748_v16 = vshll.u32 %v430_v32, 16  ;;  %v1654_v28 = vsel %vm6928_vm10, %v1649_v8, %v1653_v44  ;;  %v3060_v25 = vor.u32 %v3059_v38, %v3056_v47  ;;  %v1656_v33 = vshrl.u32 %v1289_v5, 16 }
 0x14f   : > { %2616 = vmatmul.bf16.gmra.mxu3 %v6048_v1  ;;  %v7635_v46 = vadd.f32 %v1841_v55, %v1222_v2  ;;  %v3069_v40 = vrot.slane %v3067_v48, 4  ;;  %v6068_v2 = vld [vmem:[%s8285_s1 + $0x140] sm:$0xff]  ;;  %v2713_v1 = vld [vmem:[#allocation2 + $0xbc] sm:$0x1]  ;;  %v1659_v41 = vshll.u32 %v1289_v5, 16  ;;  %v747_v21 = vrot.slane %v745_v26, 7 }
 0x150   : > { %v2264_v42 = vpop.f32.mrf.mxu2  ;;  %3661 = vmatpush.bf16.msra.mxu1 %v6068_v2  ;;  %v753_v0 = vshrl.u32 %v431_v30, 16  ;;  %v1723_v27 = vunpack.c.l.b16 %v1644_v20  ;;  %v2097_v9 = vrot.slane %v2095_v53, 4  ;;  %v2098_v35 = vrot.slane %v7607_v63, 5  ;;  %v920_v48 = vld [vmem:[#allocation2 + $0xc0] sm:$0xf]  ;;  %v6049_v20 = vld [vmem:[#allocation2 + $0xa8] sm:$0xff] }
 0x151   : > { %v2332_v4 = vadd.f32 %v2264_v42, %v7570_v12  ;;  %1880 = vmatmul.bf16.gmra.mxu1 %v1740_v29  ;;  %v7658_v12 = vld [vmem:[#allocation2 + $0xb8] sm:$0xf]  ;;  %v3070_v23 = vor.u32 %v3069_v40, %v7656_v57  ;;  %v3073_v47 = vshll.u32 %v2713_v1, 16  ;;  %v750_v38 = vor.u32 %v748_v16, %v747_v21  ;;  %v924_v1 = vld [vmem:[#allocation2 + $0xc8] sm:$0x1] }
 0x152   : > { %v2577_v60 = vpop.f32.mrf.mxu3  ;;  %v1665_v29 = vshll.u32 %v7658_v12, 16  ;;  %v1669_v55 = vshrl.u32 %v7658_v12, 16  ;;  %v1724_v42 = vunpack.c.l.b16 %v1654_v28  ;;  %v3061_v8 = vrot.slane %v3060_v25, 4 }
 0x153   : > { %v2645_v37 = vadd.f32 %v2577_v60, %v2332_v4  ;;  %v1658_v44 = vrot.slane %v1656_v33, 4  ;;  %v756_v32 = vshll.u32 %v431_v30, 16  ;;  %v1661_v36 = vrot.slane %v1659_v41, 5  ;;  %v7685_v30 = vld [vmem:[#allocation2 + $0xbc] sm:$0x1] }
 0x154   : > { %v7678_v63 = vrot.slane %v1665_v29, 5  ;;  %v755_v5 = vrot.slane %v753_v0, 7  ;;  %v751_v2 = vrot.slane %v747_v21, 4  ;;  %v921_v40 = vsel %vm6482_vm5, %v750_v38, %v920_v48 }
 0x155   : > { %v7672_v10 = vpop.f32.mrf.mxu0  ;;  %v7683_v51 = vadd.f32 %v7600_v52, %v2645_v37  ;;  %v3071_v16 = vrot.slane %v3070_v23, 4  ;;  %v3075_v28 = vrot.slane %v3073_v47, 5  ;;  %922 = vst [vmem:[#allocation2 + $0xc0] sm:$0xf] %v921_v40  ;;  %v2096_v43 = vsel %vm6952_vm13, %v5606_v54, %v2095_v53 }
 0x156   : > { %v1843_v15 = vpop.f32.mrf.mxu1  ;;  %v2099_v52 = vsel %vm6952_vm13, %v2097_v9, %v2098_v35  ;;  %v758_v37 = vor.u32 %v756_v32, %v755_v5  ;;  %v1741_v25 = vpack.c.b16 %v1724_v42, %v1723_v27  ;;  %v1662_v33 = vor.u32 %v1661_v36, %v1658_v44  ;;  %v6326_v36 = vld [vmem:[#allocation2 + $0x14] sm:$0x1] }
 0x157   : > { %v7675_v62 = vadd.f32 %v1843_v15, %v7620_v7  ;;  %3302 = vmatmul.bf16.gmra.mxu0 %v3162_v24  ;;  %v1671_v7 = vrot.slane %v1669_v55, 4  ;;  %v760_v41 = vrot.slane %v755_v5, 4  ;;  %v1675_v54 = vshll.u32 %v7685_v30, 16 }
 0x158   : > { %v2266_v13 = vpop.f32.mrf.mxu2  ;;  %v759_v0 = vsel %vm6471_vm4, %v751_v2, %v758_v37  ;;  %v2151_v39 = vunpack.c.l.b16 %v2096_v43  ;;  %v2152_v23 = vunpack.c.l.b16 %v2099_v52  ;;  %v1663_v47 = vrot.slane %v1662_v33, 4  ;;  %v3350_v33 = vld [vmem:[#allocation2 + $0xc] sm:$0xe] }
 0x159   : > { %v2333_v4 = vadd.f32 %v2266_v13, %v1905_v56  ;;  %v7690_v56 = vld [vmem:[%s8286_s2] ss:$0 sm:$0xff]  ;;  %v1672_v53 = vor.u32 %v1671_v7, %v7678_v63  ;;  %923 = vst [vmem:[#allocation2 + $0xc4] sm:$0xf] %v759_v0  ;;  %v925_v27 = vsel %vm6869_vm7, %v760_v41, %v924_v1  ;;  %v3419_v5 = vrot.slane %v6326_v36, 5 }
 0x15a   : > { %v2579_v60 = vpop.f32.mrf.mxu3  ;;  %v1224_v24 = vadd.f32 %v7690_v56, %v7194_v50  ;;  %v3066_v50 = vsel %vm6928_vm10, %v3061_v8, %v7656_v57  ;;  %v6325_v57 = vld [vmem:[#allocation2 + $0x10] sm:$0xf]  ;;  %926 = vst [vmem:[#allocation2 + $0xc8] sm:$0x1] %v925_v27  ;;  %v1677_v8 = vrot.slane %v1675_v54, 5 }
 0x15b   : > { %v2646_v26 = vadd.f32 %v2579_v60, %v2333_v4  ;;  %v3416_v9 = vrot.slane %v6325_v57, 5  ;;  %v3145_v48 = vunpack.c.l.b16 %v3066_v50  ;;  %v1673_v42 = vrot.slane %v1672_v53, 4 }
 0x15c   : > { %v2714_v44 = vld [vmem:[#allocation2 + $0xc0] sm:$0xf]  ;;  %v1225_v60 = vadd.f32 %v7690_v56, %v7225_v34  ;;  %v5768_v53 = vrot.slane %v3350_v33, 9 }
 0x15d   : > { %2308 = vmatmul.bf16.gmra.mxu2 %v7628_v14  ;;  %v7700_v29 = vadd.f32 %v7633_v17, %v2646_v26  ;;  %v7709_v14 = vpop.f32.mrf.mxu0  ;;  %v3076_v17 = vsel %vm6928_vm10, %v3071_v16, %v3075_v28  ;;  %v3078_v4 = vshrl.u32 %v2714_v44, 16  ;;  %v3081_v11 = vshll.u32 %v2714_v44, 16 }
 0x15e   : > { %v1846_v21 = vpop.f32.mrf.mxu1  ;;  %v3146_v13 = vunpack.c.l.b16 %v3076_v17  ;;  %v3418_v40 = vrot.slane %v3416_v9, 4  ;;  %v2169_v26 = vpack.c.b16 %v2152_v23, %v2151_v39  ;;  %v1943_v17 = vld [vmem:[#allocation2 + $0xb4] sm:$0xe]  ;;  %v3417_v39 = vsel %vm6952_vm13, %v5768_v53, %v3416_v9 }
 0x15f   : > { %2621 = vmatmul.bf16.gmra.mxu3 %v6049_v20  ;;  %v7711_v15 = vadd.f32 %v1846_v21, %v1224_v24  ;;  %v3080_v20 = vrot.slane %v3078_v4, 4  ;;  %v3083_v7 = vrot.slane %v3081_v11, 5  ;;  %v1678_v24 = vsel %vm6928_vm10, %v1673_v42, %v1677_v8 }
 0x160   : > { %v2269_v35 = vpop.f32.mrf.mxu2  ;;  %v3163_v16 = vpack.c.b16 %v3146_v13, %v3145_v48  ;;  %v2715_v43 = vld [vmem:[#allocation2 + $0xc4] sm:$0xf]  ;;  %v1726_v0 = vunpack.c.l.b16 %v1678_v24  ;;  %v3420_v23 = vsel %vm6952_vm13, %v3418_v40, %v3419_v5  ;;  %v3542_v13 = vunpack.c.l.b16 %v3417_v39  ;;  %v4089_v5 = vld [vmem:[#allocation2 + $0x18] sm:$0xf]  ;;  %v4090_v40 = vld [vmem:[#allocation2 + $0x1c] sm:$0xf] }
 0x161   : > { %v2334_v55 = vadd.f32 %v2269_v35, %v7635_v46  ;;  %1885 = vmatmul.bf16.gmra.mxu1 %v1741_v25  ;;  %v1668_v46 = vsel %vm6928_vm10, %v1663_v47, %v7678_v63  ;;  %v2716_v34 = vld [vmem:[#allocation2 + $0xc8] sm:$0x1]  ;;  %v3084_v1 = vor.u32 %v3083_v7, %v3080_v20  ;;  %v3087_v25 = vshll.u32 %v2715_v43, 16  ;;  %v4770_v39 = vld [vmem:[#allocation2 + $0x18] sm:$0xe] }
 0x162   : > { %v2582_v38 = vpop.f32.mrf.mxu3  ;;  %v3091_v63 = vshrl.u32 %v2715_v43, 16  ;;  %v1725_v21 = vunpack.c.l.b16 %v1668_v46  ;;  %v3097_v50 = vshll.u32 %v2716_v34, 16  ;;  %v5607_v42 = vrot.slane %v1943_v17, 9 }
 0x163   : > { %v2647_v32 = vadd.f32 %v2582_v38, %v2334_v55  ;;  %v3089_v27 = vrot.slane %v3087_v25, 5  ;;  %v3085_v55 = vrot.slane %v3084_v1, 4  ;;  %v6050_v38 = vld [vmem:[#allocation2 + $0xb4] sm:$0xff]  ;;  %v3543_v8 = vunpack.c.l.b16 %v3420_v23 }
 0x164   : > { %v3093_v57 = vrot.slane %v3091_v63, 4  ;;  %v3099_v48 = vrot.slane %v3097_v50, 5  ;;  %v1742_v44 = vpack.c.b16 %v1726_v0, %v1725_v21  ;;  %v2105_v4 = vrot.slane %v7685_v30, 5 }
 0x165   : > { %v7724_v2 = vadd.f32 %v7672_v10, %v2647_v32  ;;  %v3268_v52 = vpop.f32.mrf.mxu0  ;;  %v2102_v10 = vrot.slane %v7658_v12, 5  ;;  %v7739_v36 = vpack.c.b16 %v3543_v8, %v3542_v13  ;;  %v4141_v24 = vshll.u32 %v4089_v5, 16 }
 0x166   : > { %v1848_v28 = vpop.f32.mrf.mxu1  ;;  %v3094_v12 = vor.u32 %v3093_v57, %v3089_v27  ;;  %v4147_v25 = vshll.u32 %v4090_v40, 16  ;;  %v4151_v63 = vshrl.u32 %v4090_v40, 16  ;;  %v4836_v23 = vrot.slane %v4090_v40, 5 }
 0x167   : > { %v7728_v37 = vadd.f32 %v1848_v28, %v1225_v60  ;;  %3307 = vmatmul.bf16.gmra.mxu0 %v3163_v16  ;;  %v2104_v32 = vrot.slane %v2102_v10, 4  ;;  %v4138_v28 = vshrl.u32 %v4089_v5, 16  ;;  %v4143_v17 = vrot.slane %v4141_v24, 5 }
 0x168   : > { %v2271_v41 = vpop.f32.mrf.mxu2  ;;  %v3095_v11 = vrot.slane %v3094_v12, 4  ;;  %v4153_v57 = vrot.slane %v4151_v63, 4 }
 0x169   : > { %v2335_v54 = vadd.f32 %v2271_v41, %v7675_v62  ;;  %v1226_v62 = vadd.f32 %v7690_v56, %v7247_v45  ;;  %v3090_v45 = vsel %vm6928_vm10, %v3085_v55, %v3089_v27  ;;  %v8318_v41 = vld [vmem:[#allocation13_spill] sm:$0xff]  ;;  %v7759_v27 = vrot.slane %v4147_v25, 5  ;;  %v3351_v25 = vld [vmem:[#allocation2 + $0x18] sm:$0xe] }
 0x16a   : > { %v2584_v35 = vpop.f32.mrf.mxu3  ;;  %v3100_v7 = vsel %vm6928_vm10, %v3095_v11, %v3099_v48  ;;  %v3147_v34 = vunpack.c.l.b16 %v3090_v45  ;;  %v1227_v21 = vadd.f32 %v7690_v56, %v8318_v41  ;;  %v4092_v45 = vld [vmem:[#allocation2 + $0x24] sm:$0xf] }
 0x16b   : > { %v2648_v47 = vadd.f32 %v2584_v35, %v2335_v54  ;;  %v3148_v1 = vunpack.c.l.b16 %v3100_v7  ;;  %v7767_v7 = vld [vmem:[#allocation2 + $0x28] sm:$0xf]  ;;  %v4162_v63 = vshrl.u32 %v4092_v45, 16 }
 0x16c   : > { %v4171_v41 = vshll.u32 %v7767_v7, 16 }
 0x16d   : > { %2313 = vmatmul.bf16.gmra.mxu2 %v2169_v26  ;;  %v7742_v60 = vadd.f32 %v7709_v14, %v2648_v47  ;;  %v3270_v46 = vpop.f32.mrf.mxu0  ;;  %v2103_v26 = vsel %vm6952_vm13, %v5607_v42, %v2102_v10  ;;  %v2106_v14 = vsel %vm6952_vm13, %v2104_v32, %v2105_v4  ;;  %v4140_v10 = vrot.slane %v4138_v28, 4 }
 0x16e   : > { %v1851_v9 = vpop.f32.mrf.mxu1  ;;  %v2153_v50 = vunpack.c.l.b16 %v2103_v26  ;;  %v2154_v53 = vunpack.c.l.b16 %v2106_v14  ;;  %v5944_v42 = vrot.slane %v4770_v39, 9  ;;  %v4838_v4 = vrot.slane %v4836_v23, 4 }
 0x16f   : > { %2626 = vmatmul.bf16.gmra.mxu3 %v6050_v38  ;;  %v7744_v20 = vadd.f32 %v1851_v9, %v1226_v62  ;;  %v4091_v38 = vld [vmem:[#allocation2 + $0x20] sm:$0x1]  ;;  %v4154_v62 = vor.u32 %v4153_v57, %v7759_v27  ;;  %v8319_v9 = vld [vmem:[#allocation3_spill] sm:$0xff] }
 0x170   : > { %v2274_v30 = vpop.f32.mrf.mxu2  ;;  %v2170_v48 = vpack.c.b16 %v2154_v53, %v2153_v50  ;;  %v4157_v32 = vshll.u32 %v4091_v38, 16  ;;  %v4839_v11 = vrot.slane %v4091_v38, 5  ;;  %v1228_v5 = vadd.f32 %v7690_v56, %v8319_v9  ;;  %v6328_v57 = vld [vmem:[#allocation2 + $0x20] sm:$0x1] }
 0x171   : > { %v2336_v16 = vadd.f32 %v2274_v30, %v7711_v15  ;;  %1890 = vmatmul.bf16.gmra.mxu1 %v1742_v44  ;;  %v3164_v15 = vpack.c.b16 %v3148_v1, %v3147_v34  ;;  %v6051_v44 = vld [vmem:[#allocation2 + $0xc0] sm:$0xff]  ;;  %v4837_v26 = vsel %vm6952_vm13, %v5944_v42, %v4836_v23  ;;  %v3426_v39 = vrot.slane %v6328_v57, 5 }
 0x172   : > { %v2587_v43 = vpop.f32.mrf.mxu3  ;;  %v4159_v34 = vrot.slane %v4157_v32, 5  ;;  %v4840_v1 = vsel %vm6952_vm13, %v4838_v4, %v4839_v11  ;;  %v4962_v53 = vunpack.c.l.b16 %v4837_v26  ;;  %v4771_v4 = vld [vmem:[#allocation2 + $0x24] sm:$0xe]  ;;  %v4843_v11 = vrot.slane %v7767_v7, 5 }
 0x173   : > { %v2649_v33 = vadd.f32 %v2587_v43, %v2336_v16  ;;  %v6327_v16 = vld [vmem:[#allocation2 + $0x1c] sm:$0xf]  ;;  %v4155_v43 = vrot.slane %v4154_v62, 4  ;;  %v4094_v62 = vld [vmem:[#allocation2 + $0x2c] sm:$0x1] }
 0x174   : > { %v3423_v14 = vrot.slane %v6327_v16, 5  ;;  %v4181_v16 = vshll.u32 %v4094_v62, 16 }
 0x175   : > { %v7757_v54 = vadd.f32 %v3268_v52, %v2649_v33  ;;  %v3273_v35 = vpop.f32.mrf.mxu0  ;;  %v4144_v52 = vor.u32 %v4143_v17, %v4140_v10  ;;  %v4165_v33 = vshll.u32 %v4092_v45, 16  ;;  %v4160_v38 = vsel %vm6928_vm10, %v4155_v43, %v4159_v34  ;;  %v6076_v34 = vld [vmem:[#allocation2 + $0x18] sm:$0xff] }
 0x176   : > { %v1853_v0 = vpop.f32.mrf.mxu1  ;;  %v3425_v17 = vrot.slane %v3423_v14, 4  ;;  %v4538_v45 = vunpack.c.l.b16 %v4160_v38  ;;  %v4095_v38 = vld [vmem:[#allocation2 + $0x30] sm:$0xf] }
 0x177   : > { %v7761_v55 = vadd.f32 %v1853_v0, %v1227_v21  ;;  %3312 = vmatmul.bf16.gmra.mxu0 %v3164_v15  ;;  %v4145_v30 = vrot.slane %v4144_v52, 4  ;;  %v4175_v21 = vshrl.u32 %v7767_v7, 16  ;;  %v4963_v15 = vunpack.c.l.b16 %v4840_v1 }
 0x178   : > { %v2276_v47 = vpop.f32.mrf.mxu2  ;;  %v5769_v0 = vrot.slane %v3351_v25, 9  ;;  %v5945_v25 = vrot.slane %v4771_v4, 9  ;;  %v4846_v7 = vrot.slane %v4094_v62, 5  ;;  %v4189_v4 = vshll.u32 %v4095_v38, 16 }
 0x179   : > { %v2337_v12 = vadd.f32 %v2276_v47, %v7728_v37  ;;  %v4150_v47 = vsel %vm6928_vm10, %v4145_v30, %v7759_v27  ;;  %v3427_v27 = vsel %vm6952_vm13, %v3425_v17, %v3426_v39 }
 0x17a   : > { %v2589_v13 = vpop.f32.mrf.mxu3  ;;  %v3424_v32 = vsel %vm6952_vm13, %v5769_v0, %v3423_v14  ;;  %v3545_v1 = vunpack.c.l.b16 %v3427_v27  ;;  %v4186_v27 = vshrl.u32 %v4095_v38, 16 }
 0x17b   : > { %v2650_v8 = vadd.f32 %v2589_v13, %v2337_v12  ;;  %v4164_v12 = vrot.slane %v4162_v63, 4  ;;  %v8320_v13 = vld [vmem:[#allocation5_spill] sm:$0xff]  ;;  %v3544_v14 = vunpack.c.l.b16 %v3424_v32  ;;  %v4845_v63 = vrot.slane %v4843_v11, 4 }
 0x17c   : > { %v1229_v52 = vadd.f32 %v7690_v56, %v8320_v13  ;;  %v4096_v13 = vld [vmem:[#allocation2 + $0x34] sm:$0xf] }
 0x17d   : > { %2318 = vmatmul.bf16.gmra.mxu2 %v2170_v48  ;;  %v7769_v37 = vadd.f32 %v3270_v46, %v2650_v8  ;;  %v7773_v28 = vpop.f32.mrf.mxu0  ;;  %v4167_v48 = vrot.slane %v4165_v33, 5  ;;  %v4994_v8 = vpack.c.b16 %v4963_v15, %v4962_v53  ;;  %v4183_v53 = vrot.slane %v4181_v16, 5 }
 0x17e   : > { %v1856_v40 = vpop.f32.mrf.mxu1  ;;  %v3575_v0 = vpack.c.b16 %v3545_v1, %v3544_v14  ;;  %v4847_v39 = vsel %vm6952_vm13, %v4845_v63, %v4846_v7 }
 0x17f   : > { %2631 = vmatmul.bf16.gmra.mxu3 %v6051_v44  ;;  %v7775_v24 = vadd.f32 %v1856_v40, %v1228_v5  ;;  %v4537_v5 = vunpack.c.l.b16 %v4150_v47  ;;  %v4168_v26 = vor.u32 %v4167_v48, %v4164_v12  ;;  %v4965_v32 = vunpack.c.l.b16 %v4847_v39  ;;  %v6077_v39 = vld [vmem:[#allocation2 + $0x24] sm:$0xff] }
 0x180   : > { %v2279_v46 = vpop.f32.mrf.mxu2 }
 0x181   : > { %v2338_v50 = vadd.f32 %v2279_v46, %v7744_v20  ;;  %3662 = vmatmul.bf16.vlgmr.msra.gmra.mxu1 %v7739_v36  ;;  %v7788_v20 = vrot.slane %v4171_v41, 5  ;;  %v4177_v36 = vrot.slane %v4175_v21, 4  ;;  %v4569_v41 = vpack.c.b16 %v4538_v45, %v4537_v5 }
 0x182   : > { %v2592_v10 = vpop.f32.mrf.mxu3  ;;  %v4169_v21 = vrot.slane %v4168_v26, 4 }
 0x183   : > { %v2651_v23 = vadd.f32 %v2592_v10, %v2338_v50  ;;  %v8321_v10 = vld [vmem:[#allocation7_spill] sm:$0xff] }
 0x184   : > { %v1230_v15 = vadd.f32 %v7690_v56, %v8321_v10  ;;  %v4174_v62 = vsel %vm6928_vm10, %v4169_v21, %v7788_v20  ;;  %v4097_v10 = vld [vmem:[#allocation2 + $0x38] sm:$0x1] }
 0x185   : > { %v7792_v42 = vadd.f32 %v3273_v35, %v2651_v23  ;;  %v3278_v9 = vpop.f32.mrf.mxu0  ;;  %v4178_v35 = vor.u32 %v4177_v36, %v7788_v20  ;;  %v6329_v23 = vld [vmem:[#allocation2 + $0x28] sm:$0xf]  ;;  %v3352_v36 = vld [vmem:[#allocation2 + $0x24] sm:$0xe]  ;;  %v4539_v14 = vunpack.c.l.b16 %v4174_v62  ;;  %v4205_v62 = vshll.u32 %v4097_v10, 16 }
 0x186   : > { %v1858_v44 = vpop.f32.mrf.mxu1  ;;  %v3430_v47 = vrot.slane %v6329_v23, 5  ;;  %v5770_v5 = vrot.slane %v3352_v36, 9 }
 0x187   : > { %v7799_v40 = vadd.f32 %v1858_v44, %v1229_v52  ;;  %5082 = vmatmul.bf16.vlgmr.msra.gmra.mxu0 %v4994_v8  ;;  %v4179_v50 = vrot.slane %v4178_v35, 4  ;;  %v4195_v35 = vshll.u32 %v4096_v13, 16 }
 0x188   : > { %v2281_v30 = vpop.f32.mrf.mxu2  ;;  %v3432_v45 = vrot.slane %v3430_v47, 4  ;;  %v3431_v7 = vsel %vm6952_vm13, %v5770_v5, %v3430_v47  ;;  %v7836_v5 = vld [vmem:[#allocation2 + $0x40] sm:$0xf] }
 0x189   : > { %v2339_v43 = vadd.f32 %v2281_v30, %v7761_v55  ;;  %v4844_v55 = vsel %vm6952_vm13, %v5945_v25, %v4843_v11  ;;  %v6330_v30 = vld [vmem:[#allocation2 + $0x2c] sm:$0x1]  ;;  %v7828_v21 = vrot.slane %v4195_v35, 5  ;;  %v3546_v23 = vunpack.c.l.b16 %v3431_v7 }
 0x18a   : > { %v2594_v46 = vpop.f32.mrf.mxu3  ;;  %v4964_v8 = vunpack.c.l.b16 %v4844_v55  ;;  %v3433_v26 = vrot.slane %v6330_v30, 5  ;;  %v4850_v55 = vrot.slane %v4096_v13, 5 }
 0x18b   : > { %v2652_v33 = vadd.f32 %v2594_v46, %v2339_v43  ;;  %v4199_v43 = vshrl.u32 %v4096_v13, 16  ;;  %v4188_v46 = vrot.slane %v4186_v27, 4  ;;  %v4853_v27 = vrot.slane %v4097_v10, 5 }
 0x18c   : > { %v4995_v25 = vpack.c.b16 %v4965_v32, %v4964_v8  ;;  %v4852_v32 = vrot.slane %v4850_v55, 4 }
 0x18d   : > { %3976 = vmatmul.bf16.vlgmr.msra.gmra.mxu2 %v6076_v34  ;;  %v7808_v17 = vadd.f32 %v7773_v28, %v2652_v33  ;;  %v3280_v12 = vpop.f32.mrf.mxu0  ;;  %v4184_v28 = vsel %vm6928_vm10, %v4179_v50, %v4183_v53  ;;  %v8322_v34 = vld [vmem:[#allocation9_spill] sm:$0xff]  ;;  %v3434_v33 = vsel %vm6952_vm13, %v3432_v45, %v3433_v26 }
 0x18e   : > { %v1861_v57 = vpop.f32.mrf.mxu1  ;;  %v1231_v20 = vadd.f32 %v7690_v56, %v8322_v34  ;;  %v4540_v1 = vunpack.c.l.b16 %v4184_v28  ;;  %v3547_v38 = vunpack.c.l.b16 %v3434_v33  ;;  %v4219_v33 = vshll.u32 %v7836_v5, 16 }
 0x18f   : > { %4657 = vmatmul.bf16.vlgmr.msra.gmra.mxu3 %v4569_v41  ;;  %v7812_v48 = vadd.f32 %v1861_v57, %v1230_v15  ;;  %v4191_v41 = vrot.slane %v4189_v4, 5  ;;  %v4201_v15 = vrot.slane %v4199_v43, 4  ;;  %v8323_v4 = vld [vmem:[#allocation11_spill] sm:$0xff] }
 0x190   : > { %v2284_v52 = vpop.f32.mrf.mxu2  ;;  %v4570_v36 = vpack.c.b16 %v4540_v1, %v4539_v14  ;;  %v1232_v13 = vadd.f32 %v7690_v56, %v8323_v4  ;;  %v4207_v1 = vrot.slane %v4205_v62, 5 }
 0x191   : > { %v2340_v44 = vadd.f32 %v2284_v52, %v7775_v24  ;;  %3667 = vmatmul.bf16.gmra.mxu1 %v3575_v0  ;;  %v4772_v0 = vld [vmem:[#allocation2 + $0x30] sm:$0xe]  ;;  %v4192_v52 = vor.u32 %v4191_v41, %v4188_v46  ;;  %v4223_v41 = vshrl.u32 %v7836_v5, 16 }
 0x192   : > { %v2597_v11 = vpop.f32.mrf.mxu3  ;;  %v5946_v28 = vrot.slane %v4772_v0, 9  ;;  %v3353_v46 = vld [vmem:[#allocation2 + $0x30] sm:$0xe] }
 0x193   : > { %v2653_v16 = vadd.f32 %v2597_v11, %v2340_v44  ;;  %v4202_v44 = vor.u32 %v4201_v15, %v7828_v21  ;;  %v3576_v11 = vpack.c.b16 %v3547_v38, %v3546_v23  ;;  %v4193_v26 = vrot.slane %v4192_v52, 4 }
 0x194   : > { %v4851_v35 = vsel %vm6952_vm13, %v5946_v28, %v4850_v55  ;;  %v7856_v28 = vrot.slane %v4219_v33, 5 }
 0x195   : > { %v7822_v24 = vadd.f32 %v3278_v9, %v2653_v16  ;;  %v3283_v50 = vpop.f32.mrf.mxu0  ;;  %v6331_v16 = vld [vmem:[#allocation2 + $0x34] sm:$0xf]  ;;  %v4203_v14 = vrot.slane %v4202_v44, 4  ;;  %v4966_v15 = vunpack.c.l.b16 %v4851_v35 }
 0x196   : > { %v1863_v63 = vpop.f32.mrf.mxu1  ;;  %v3437_v43 = vrot.slane %v6331_v16, 5 }
 0x197   : > { %v7830_v53 = vadd.f32 %v1863_v63, %v1231_v20  ;;  %5087 = vmatmul.bf16.gmra.mxu0 %v4995_v25  ;;  %v4854_v25 = vsel %vm6952_vm13, %v4852_v32, %v4853_v27  ;;  %v4100_v32 = vld [vmem:[#allocation2 + $0x44] sm:$0x1] }
 0x198   : > { %v2286_v57 = vpop.f32.mrf.mxu2  ;;  %v4967_v55 = vunpack.c.l.b16 %v4854_v25 }
 0x199   : > { %v2341_v9 = vadd.f32 %v2286_v57, %v7799_v40  ;;  %v4098_v40 = vld [vmem:[#allocation2 + $0x3c] sm:$0xf]  ;;  %v5771_v57 = vrot.slane %v3353_v46, 9  ;;  %v4229_v46 = vshll.u32 %v4100_v32, 16 }
 0x19a   : > { %v2599_v47 = vpop.f32.mrf.mxu3  ;;  %v4210_v63 = vshrl.u32 %v4098_v40, 16  ;;  %v4213_v7 = vshll.u32 %v4098_v40, 16  ;;  %v4996_v4 = vpack.c.b16 %v4967_v55, %v4966_v15  ;;  %v4773_v40 = vld [vmem:[#allocation2 + $0x3c] sm:$0xe] }
 0x19b   : > { %v2654_v8 = vadd.f32 %v2599_v47, %v2341_v9  ;;  %v3439_v9 = vrot.slane %v3437_v43, 4  ;;  %v4198_v47 = vsel %vm6928_vm10, %v4193_v26, %v7828_v21  ;;  %v5947_v33 = vrot.slane %v4773_v40, 9 }
 0x19c   : > { %v4212_v52 = vrot.slane %v4210_v63, 4  ;;  %v4215_v62 = vrot.slane %v4213_v7, 5  ;;  %v4541_v35 = vunpack.c.l.b16 %v4198_v47  ;;  %v6078_v63 = vld [vmem:[#allocation2 + $0x30] sm:$0xff] }
 0x19d   : > { %3981 = vmatmul.bf16.gmra.mxu2 %v6077_v39  ;;  %v7838_v45 = vadd.f32 %v3280_v12, %v2654_v8  ;;  %v7842_v34 = vpop.f32.mrf.mxu0  ;;  %v6332_v39 = vld [vmem:[#allocation2 + $0x38] sm:$0x1]  ;;  %v8324_v8 = vld [vmem:[#allocation14_spill] sm:$0xff] }
 0x19e   : > { %v1866_v30 = vpop.f32.mrf.mxu1  ;;  %v3440_v23 = vrot.slane %v6332_v39, 5  ;;  %v1233_v44 = vadd.f32 %v7690_v56, %v8324_v8  ;;  %v4216_v25 = vor.u32 %v4215_v62, %v4212_v52  ;;  %v8325_v39 = vld [vmem:[#allocation16_spill] sm:$0xff]  ;;  %v4101_v8 = vld [vmem:[#allocation2 + $0x48] sm:$0xf] }
 0x19f   : > { %4662 = vmatmul.bf16.gmra.mxu3 %v4570_v36  ;;  %v7844_v20 = vadd.f32 %v1866_v30, %v1232_v13  ;;  %v4208_v36 = vsel %vm6928_vm10, %v4203_v14, %v4207_v1  ;;  %v4857_v30 = vrot.slane %v7836_v5, 5  ;;  %v4860_v5 = vrot.slane %v4100_v32, 5  ;;  %v6333_v62 = vld [vmem:[#allocation2 + $0x40] sm:$0xf] }
 0x1a0   : > { %v2289_v12 = vpop.f32.mrf.mxu2  ;;  %v3441_v21 = vsel %vm6952_vm13, %v3439_v9, %v3440_v23  ;;  %v4542_v16 = vunpack.c.l.b16 %v4208_v36  ;;  %v4217_v55 = vrot.slane %v4216_v25, 4  ;;  %v4231_v9 = vrot.slane %v4229_v46, 5 }
 0x1a1   : > { %v2342_v10 = vadd.f32 %v2289_v12, %v7812_v48  ;;  %3672 = vmatmul.bf16.gmra.mxu1 %v3576_v11  ;;  %v4225_v48 = vrot.slane %v4223_v41, 4  ;;  %v3438_v11 = vsel %vm6952_vm13, %v5771_v57, %v3437_v43  ;;  %v3549_v7 = vunpack.c.l.b16 %v3441_v21 }
 0x1a2   : > { %v2602_v0 = vpop.f32.mrf.mxu3  ;;  %v3548_v43 = vunpack.c.l.b16 %v3438_v11  ;;  %v1234_v23 = vadd.f32 %v7690_v56, %v8325_v39  ;;  %v4222_v21 = vsel %vm6928_vm10, %v4217_v55, %v7856_v28 }
 0x1a3   : > { %v2655_v38 = vadd.f32 %v2602_v0, %v2342_v10  ;;  %v4859_v10 = vrot.slane %v4857_v30, 4  ;;  %v4571_v0 = vpack.c.b16 %v4542_v16, %v4541_v35  ;;  %v4234_v16 = vshrl.u32 %v4101_v8, 16 }
 0x1a5   : > { %v7860_v27 = vadd.f32 %v3283_v50, %v2655_v38  ;;  %v3288_v26 = vpop.f32.mrf.mxu0  ;;  %v4226_v50 = vor.u32 %v4225_v48, %v7856_v28  ;;  %v3577_v38 = vpack.c.b16 %v3549_v7, %v3548_v43  ;;  %v4861_v52 = vsel %vm6952_vm13, %v4859_v10, %v4860_v5 }
 0x1a6   : > { %v1868_v13 = vpop.f32.mrf.mxu1  ;;  %v3444_v48 = vrot.slane %v6333_v62, 5  ;;  %v4969_v35 = vunpack.c.l.b16 %v4861_v52  ;;  %v4543_v10 = vunpack.c.l.b16 %v4222_v21  ;;  %v4774_v62 = vld [vmem:[#allocation2 + $0x48] sm:$0xe] }
 0x1a7   : > { %v7867_v14 = vadd.f32 %v1868_v13, %v1233_v44  ;;  %5092 = vmatmul.bf16.gmra.mxu0 %v4996_v4  ;;  %v4227_v57 = vrot.slane %v4226_v50, 4  ;;  %v3354_v4 = vld [vmem:[#allocation2 + $0x3c] sm:$0xe]  ;;  %v4102_v13 = vld [vmem:[#allocation2 + $0x4c] sm:$0xf] }
 0x1a8   : > { %v2291_v1 = vpop.f32.mrf.mxu2  ;;  %v5772_v50 = vrot.slane %v3354_v4, 9  ;;  %v3446_v46 = vrot.slane %v3444_v48, 4  ;;  %v4243_v43 = vshll.u32 %v4102_v13, 16 }
 0x1a9   : > { %v2343_v12 = vadd.f32 %v2291_v1, %v7830_v53  ;;  %v4858_v53 = vsel %vm6952_vm13, %v5947_v33, %v4857_v30  ;;  %v4237_v1 = vshll.u32 %v4101_v8, 16  ;;  %v4247_v33 = vshrl.u32 %v4102_v13, 16 }
 0x1aa   : > { %v2604_v41 = vpop.f32.mrf.mxu3  ;;  %v4968_v40 = vunpack.c.l.b16 %v4858_v53  ;;  %v4864_v8 = vrot.slane %v4102_v13, 5 }
 0x1ab   : > { %v2656_v15 = vadd.f32 %v2604_v41, %v2343_v12  ;;  %v6334_v12 = vld [vmem:[#allocation2 + $0x44] sm:$0x1]  ;;  %v8326_v41 = vld [vmem:[#allocation18_spill] sm:$0xff]  ;;  %v4239_v39 = vrot.slane %v4237_v1, 5  ;;  %v4249_v52 = vrot.slane %v4247_v33, 4 }
 0x1ac   : > { %v1235_v28 = vadd.f32 %v7690_v56, %v8326_v41  ;;  %v6335_v41 = vld [vmem:[#allocation2 + $0x4c] sm:$0xf] }
 0x1ad   : > { %3986 = vmatmul.bf16.gmra.mxu2 %v6078_v63  ;;  %v7876_v47 = vadd.f32 %v7842_v34, %v2656_v15  ;;  %v3290_v44 = vpop.f32.mrf.mxu0  ;;  %v4232_v34 = vsel %vm6928_vm10, %v4227_v57, %v4231_v9  ;;  %v3447_v63 = vrot.slane %v6334_v12, 5  ;;  %v4997_v15 = vpack.c.b16 %v4969_v35, %v4968_v40  ;;  %v8327_v12 = vld [vmem:[#allocation4_spill] sm:$0xff] }
 0x1ae   : > { %v1871_v36 = vpop.f32.mrf.mxu1  ;;  %v4544_v5 = vunpack.c.l.b16 %v4232_v34  ;;  %v3445_v57 = vsel %vm6952_vm13, %v5772_v50, %v3444_v48  ;;  %v4866_v50 = vrot.slane %v4864_v8, 4  ;;  %v1236_v13 = vadd.f32 %v7690_v56, %v8327_v12 }
 0x1af   : > { %4667 = vmatmul.bf16.gmra.mxu3 %v4571_v0  ;;  %v7880_v32 = vadd.f32 %v1871_v36, %v1234_v23  ;;  %v4236_v0 = vrot.slane %v4234_v16, 4  ;;  %v3448_v9 = vsel %vm6952_vm13, %v3446_v46, %v3447_v63  ;;  %v7896_v23 = vrot.slane %v4243_v43, 5  ;;  %v4103_v36 = vld [vmem:[#allocation2 + $0x50] sm:$0x1] }
 0x1b0   : > { %v2294_v11 = vpop.f32.mrf.mxu2  ;;  %v3550_v21 = vunpack.c.l.b16 %v3445_v57  ;;  %v3551_v34 = vunpack.c.l.b16 %v3448_v9  ;;  %v4572_v40 = vpack.c.b16 %v4544_v5, %v4543_v10  ;;  %v4253_v35 = vshll.u32 %v4103_v36, 16  ;;  %v3355_v57 = vld [vmem:[#allocation2 + $0x48] sm:$0xe] }
 0x1b1   : > { %v2344_v30 = vadd.f32 %v2294_v11, %v7844_v20  ;;  %3677 = vmatmul.bf16.gmra.mxu1 %v3577_v38  ;;  %v6079_v11 = vld [vmem:[#allocation2 + $0x3c] sm:$0xff]  ;;  %v5948_v16 = vrot.slane %v4774_v62, 9  ;;  %v4867_v46 = vrot.slane %v4103_v36, 5  ;;  %v4104_v36 = vld [vmem:[#allocation2 + $0x54] sm:$0xf] }
 0x1b2   : > { %v2607_v25 = vpop.f32.mrf.mxu3  ;;  %v3578_v63 = vpack.c.b16 %v3551_v34, %v3550_v21 }
 0x1b3   : > { %v2657_v7 = vadd.f32 %v2607_v25, %v2344_v30  ;;  %v4240_v30 = vor.u32 %v4239_v39, %v4236_v0  ;;  %v4250_v25 = vor.u32 %v4249_v52, %v7896_v23  ;;  %v4865_v33 = vsel %vm6952_vm13, %v5948_v16, %v4864_v8  ;;  %v4105_v52 = vld [vmem:[#allocation2 + $0x58] sm:$0xf] }
 0x1b4   : > { %v4255_v0 = vrot.slane %v4253_v35, 5  ;;  %v4970_v39 = vunpack.c.l.b16 %v4865_v33  ;;  %v4267_v35 = vshll.u32 %v4105_v52, 16  ;;  %v4271_v16 = vshrl.u32 %v4105_v52, 16 }
 0x1b5   : > { %v7890_v20 = vadd.f32 %v3288_v26, %v2657_v7  ;;  %v3293_v38 = vpop.f32.mrf.mxu0  ;;  %v4241_v7 = vrot.slane %v4240_v30, 4  ;;  %v4258_v30 = vshrl.u32 %v4104_v36, 16 }
 0x1b6   : > { %v1873_v55 = vpop.f32.mrf.mxu1 }
 0x1b7   : > { %v7898_v53 = vadd.f32 %v1873_v55, %v1235_v28  ;;  %5097 = vmatmul.bf16.gmra.mxu0 %v4997_v15  ;;  %v3451_v28 = vrot.slane %v6335_v41, 5  ;;  %v4251_v15 = vrot.slane %v4250_v25, 4  ;;  %v4868_v55 = vsel %vm6952_vm13, %v4866_v50, %v4867_v46 }
 0x1b8   : > { %v2296_v4 = vpop.f32.mrf.mxu2  ;;  %v4971_v8 = vunpack.c.l.b16 %v4868_v55  ;;  %v4260_v55 = vrot.slane %v4258_v30, 4  ;;  %v8329_v30 = vld [vmem:[#allocation8_spill] sm:$0xff] }
 0x1b9   : > { %v2345_v26 = vadd.f32 %v2296_v4, %v7867_v14  ;;  %v5773_v4 = vrot.slane %v3355_v57, 9 }
 0x1ba   : > { %v2609_v48 = vpop.f32.mrf.mxu3  ;;  %v4998_v46 = vpack.c.b16 %v4971_v8, %v4970_v39  ;;  %v6080_v39 = vld [vmem:[#allocation2 + $0x48] sm:$0xff] }
 0x1bb   : > { %v2658_v1 = vadd.f32 %v2609_v48, %v2345_v26  ;;  %v3453_v26 = vrot.slane %v3451_v28, 4  ;;  %v4246_v48 = vsel %vm6928_vm10, %v4241_v7, %v7896_v23 }
 0x1bc   : > { %v4545_v7 = vunpack.c.l.b16 %v4246_v48 }
 0x1bd   : > { %3991 = vmatmul.bf16.gmra.mxu2 %v6079_v11  ;;  %v7904_v14 = vadd.f32 %v3290_v44, %v2658_v1  ;;  %v3295_v10 = vpop.f32.mrf.mxu0  ;;  %v6336_v11 = vld [vmem:[#allocation2 + $0x50] sm:$0x1] }
 0x1be   : > { %v1876_v43 = vpop.f32.mrf.mxu1  ;;  %v3454_v21 = vrot.slane %v6336_v11, 5  ;;  %v8328_v1 = vld [vmem:[#allocation6_spill] sm:$0xff] }
 0x1bf   : > { %4672 = vmatmul.bf16.gmra.mxu3 %v4572_v40  ;;  %v7908_v5 = vadd.f32 %v1876_v43, %v1236_v13  ;;  %v4256_v40 = vsel %vm6928_vm10, %v4251_v15, %v4255_v0  ;;  %v1237_v25 = vadd.f32 %v7690_v56, %v8328_v1  ;;  %v3452_v13 = vsel %vm6952_vm13, %v5773_v4, %v3451_v28  ;;  %v4775_v15 = vld [vmem:[#allocation2 + $0x54] sm:$0xe] }
 0x1c0   : > { %v2299_v9 = vpop.f32.mrf.mxu2  ;;  %v3455_v23 = vsel %vm6952_vm13, %v3453_v26, %v3454_v21  ;;  %v4546_v33 = vunpack.c.l.b16 %v4256_v40 }
 0x1c1   : > { %v2346_v44 = vadd.f32 %v2299_v9, %v7880_v32  ;;  %3682 = vmatmul.bf16.gmra.mxu1 %v3578_v63  ;;  %v4261_v32 = vshll.u32 %v4104_v36, 16  ;;  %v4871_v63 = vrot.slane %v4105_v52, 5  ;;  %v4273_v9 = vrot.slane %v4271_v16, 4 }
 0x1c2   : > { %v2612_v62 = vpop.f32.mrf.mxu3  ;;  %v3552_v36 = vunpack.c.l.b16 %v3452_v13  ;;  %v3553_v28 = vunpack.c.l.b16 %v3455_v23  ;;  %v5949_v52 = vrot.slane %v4775_v15, 9  ;;  %v4573_v21 = vpack.c.b16 %v4546_v33, %v4545_v7  ;;  %v4107_v13 = vld [vmem:[#allocation2 + $0x60] sm:$0xf]  ;;  %v3356_v33 = vld [vmem:[#allocation2 + $0x54] sm:$0xe] }
 0x1c3   : > { %v2659_v34 = vadd.f32 %v2612_v62, %v2346_v44  ;;  %v4263_v57 = vrot.slane %v4261_v32, 5  ;;  %v4106_v62 = vld [vmem:[#allocation2 + $0x5c] sm:$0x1]  ;;  %v4873_v4 = vrot.slane %v4871_v63, 4  ;;  %v1238_v32 = vadd.f32 %v7690_v56, %v8329_v30 }
 0x1c4   : > { %v4874_v26 = vrot.slane %v4106_v62, 5  ;;  %v4277_v40 = vshll.u32 %v4106_v62, 16  ;;  %v4872_v1 = vsel %vm6952_vm13, %v5949_v52, %v4871_v63 }
 0x1c5   : > { %v7920_v50 = vadd.f32 %v3293_v38, %v2659_v34  ;;  %v3298_v43 = vpop.f32.mrf.mxu0  ;;  %v4269_v38 = vrot.slane %v4267_v35, 5  ;;  %v4264_v34 = vor.u32 %v4263_v57, %v4260_v55  ;;  %v3579_v35 = vpack.c.b16 %v3553_v28, %v3552_v36 }
 0x1c6   : > { %v1878_v12 = vpop.f32.mrf.mxu1  ;;  %v5774_v28 = vrot.slane %v3356_v33, 9 }
 0x1c7   : > { %v7926_v41 = vadd.f32 %v1878_v12, %v1237_v25  ;;  %5102 = vmatmul.bf16.gmra.mxu0 %v4998_v46  ;;  %v4274_v48 = vor.u32 %v4273_v9, %v4269_v38  ;;  %v4875_v25 = vsel %vm6952_vm13, %v4873_v4, %v4874_v26  ;;  %v6337_v46 = vld [vmem:[#allocation2 + $0x58] sm:$0xf]  ;;  %v4972_v9 = vunpack.c.l.b16 %v4872_v1 }
 0x1c8   : > { %v2301_v0 = vpop.f32.mrf.mxu2  ;;  %v3458_v12 = vrot.slane %v6337_v46, 5  ;;  %v4973_v63 = vunpack.c.l.b16 %v4875_v25  ;;  %v4285_v4 = vshll.u32 %v4107_v13, 16 }
 0x1c9   : > { %v2347_v44 = vadd.f32 %v2301_v0, %v7898_v53  ;;  %v4265_v0 = vrot.slane %v4264_v34, 4  ;;  %v4275_v55 = vrot.slane %v4274_v48, 4  ;;  %v8330_v48 = vld [vmem:[#allocation10_spill] sm:$0xff] }
 0x1ca   : > { %v2614_v8 = vpop.f32.mrf.mxu3  ;;  %v3460_v62 = vrot.slane %v3458_v12, 4  ;;  %v4999_v30 = vpack.c.b16 %v4973_v63, %v4972_v9 }
 0x1cb   : > { %v2660_v11 = vadd.f32 %v2614_v8, %v2347_v44  ;;  %v4108_v44 = vld [vmem:[#allocation2 + $0x64] sm:$0xf]  ;;  %v6338_v8 = vld [vmem:[#allocation2 + $0x5c] sm:$0x1] }
 0x1cc   : > { %v3461_v52 = vrot.slane %v6338_v8, 5  ;;  %v4291_v34 = vshll.u32 %v4108_v44, 16 }
 0x1cd   : > { %3996 = vmatmul.bf16.gmra.mxu2 %v6080_v39  ;;  %v7931_v53 = vadd.f32 %v3295_v10, %v2660_v11  ;;  %v3300_v23 = vpop.f32.mrf.mxu0  ;;  %v4279_v10 = vrot.slane %v4277_v40, 5  ;;  %v4282_v39 = vshrl.u32 %v4107_v13, 16  ;;  %v4270_v11 = vsel %vm6928_vm10, %v4265_v0, %v4269_v38  ;;  %v4776_v0 = vld [vmem:[#allocation2 + $0x60] sm:$0xe] }
 0x1ce   : > { %v1881_v16 = vpop.f32.mrf.mxu1  ;;  %v1239_v40 = vadd.f32 %v7690_v56, %v8330_v48  ;;  %v3462_v1 = vsel %vm6952_vm13, %v3460_v62, %v3461_v52  ;;  %v4287_v38 = vrot.slane %v4285_v4, 5  ;;  %v4547_v13 = vunpack.c.l.b16 %v4270_v11 }
 0x1cf   : > { %4677 = vmatmul.bf16.gmra.mxu3 %v4573_v21  ;;  %v7937_v7 = vadd.f32 %v1881_v16, %v1238_v32  ;;  %v4280_v21 = vsel %vm6928_vm10, %v4275_v55, %v4279_v10  ;;  %v3459_v16 = vsel %vm6952_vm13, %v5774_v28, %v3458_v12  ;;  %v4284_v25 = vrot.slane %v4282_v39, 4  ;;  %v6081_v12 = vld [vmem:[#allocation2 + $0x54] sm:$0xff] }
 0x1d0   : > { %v2304_v15 = vpop.f32.mrf.mxu2  ;;  %v4548_v33 = vunpack.c.l.b16 %v4280_v21  ;;  %v4878_v56 = vrot.slane %v4108_v44, 5  ;;  %v3554_v9 = vunpack.c.l.b16 %v3459_v16  ;;  %v3555_v63 = vunpack.c.l.b16 %v3462_v1  ;;  %v4110_v21 = vld [vmem:[#allocation2 + $0x6c] sm:$0xf] }
 0x1d1   : > { %v2348_v57 = vadd.f32 %v2304_v15, %v7908_v5  ;;  %3687 = vmatmul.bf16.gmra.mxu1 %v3579_v35  ;;  %v4295_v5 = vshrl.u32 %v4108_v44, 16  ;;  %v4288_v28 = vor.u32 %v4287_v38, %v4284_v25  ;;  %v5950_v62 = vrot.slane %v4776_v0, 9  ;;  %v3357_v25 = vld [vmem:[#allocation2 + $0x60] sm:$0xe]  ;;  %v6340_v38 = vld [vmem:[#allocation2 + $0x64] sm:$0xf] }
 0x1d2   : > { %v2617_v36 = vpop.f32.mrf.mxu3  ;;  %v4574_v52 = vpack.c.b16 %v4548_v33, %v4547_v13  ;;  %v4880_v4 = vrot.slane %v4878_v56, 4  ;;  %v3580_v48 = vpack.c.b16 %v3555_v63, %v3554_v9  ;;  %v3465_v13 = vrot.slane %v6340_v38, 5  ;;  %v4112_v38 = vld [vmem:[#allocation2 + $0x74] sm:$0x1] }
 0x1d3   : > { %v2661_v26 = vadd.f32 %v2617_v36, %v2348_v57  ;;  %v4297_v10 = vrot.slane %v4295_v5, 4  ;;  %v4109_v36 = vld [vmem:[#allocation2 + $0x68] sm:$0x1]  ;;  %v4289_v16 = vrot.slane %v4288_v28, 4  ;;  %v4879_v1 = vsel %vm6952_vm13, %v5950_v62, %v4878_v56 }
 0x1d4   : > { %v4301_v11 = vshll.u32 %v4109_v36, 16  ;;  %v4974_v62 = vunpack.c.l.b16 %v4879_v1 }
 0x1d5   : > { %v7946_v32 = vadd.f32 %v3298_v43, %v2661_v26  ;;  %v7952_v46 = vpop.f32.mrf.mxu0  ;;  %v7956_v43 = vrot.slane %v4291_v34, 5  ;;  %v4881_v26 = vrot.slane %v4109_v36, 5  ;;  %v8331_v34 = vld [vmem:[#allocation12_spill] sm:$0xff] }
 0x1d6   : > { %v1883_v35 = vpop.f32.mrf.mxu1  ;;  %v4303_v9 = vrot.slane %v4301_v11, 5 }
 0x1d7   : > { %v7954_v15 = vadd.f32 %v1883_v35, %v1239_v40  ;;  %5107 = vmatmul.bf16.gmra.mxu0 %v4999_v30  ;;  %v4298_v44 = vor.u32 %v4297_v10, %v7956_v43  ;;  %v7967_v40 = vld [vmem:[#allocation2 + $0x70] sm:$0xf]  ;;  %v4306_v10 = vshrl.u32 %v4110_v21, 16 }
 0x1d8   : > { %v2306_v55 = vpop.f32.mrf.mxu2  ;;  %v4315_v63 = vshll.u32 %v7967_v40, 16  ;;  %v4319_v56 = vshrl.u32 %v7967_v40, 16 }
 0x1d9   : > { %v2349_v57 = vadd.f32 %v2306_v55, %v7926_v41  ;;  %v7963_v41 = vld [vmem:[%s8286_s2] ss:$0 sm:$0xff]  ;;  %v4882_v55 = vsel %vm6952_vm13, %v4880_v4, %v4881_v26  ;;  %v4308_v26 = vrot.slane %v4306_v10, 4  ;;  %v4885_v10 = vrot.slane %v7967_v40, 5 }
 0x1da   : > { %v2619_v39 = vpop.f32.mrf.mxu3  ;;  %v1240_v5 = vadd.f32 %v7963_v41, %v8331_v34  ;;  %v6341_v34 = vld [vmem:[#allocation2 + $0x68] sm:$0x1] }
 0x1db   : > { %v2662_v8 = vadd.f32 %v2619_v39, %v2349_v57  ;;  %v4309_v57 = vshll.u32 %v4110_v21, 16  ;;  %v5775_v39 = vrot.slane %v3357_v25, 9 }
 0x1dd   : > { %4001 = vmatmul.bf16.gmra.mxu2 %v6081_v12  ;;  %v7969_v30 = vadd.f32 %v3300_v23, %v2662_v8  ;;  %v7973_v33 = vpop.f32.mrf.mxu0  ;;  %v4299_v12 = vrot.slane %v4298_v44, 4  ;;  %v4975_v8 = vunpack.c.l.b16 %v4882_v55  ;;  %v4311_v21 = vrot.slane %v4309_v57, 5  ;;  %v4777_v55 = vld [vmem:[#allocation2 + $0x6c] sm:$0xe] }
 0x1de   : > { %v1886_v35 = vpop.f32.mrf.mxu1  ;;  %v4294_v44 = vsel %vm6928_vm10, %v4289_v16, %v7956_v43  ;;  %v3466_v25 = vsel %vm6952_vm13, %v5775_v39, %v3465_v13  ;;  %v5951_v40 = vrot.slane %v4777_v55, 9 }
 0x1df   : > { %4682 = vmatmul.bf16.gmra.mxu3 %v4574_v52  ;;  %v7975_v0 = vadd.f32 %v1886_v35, %v1240_v5  ;;  %v3467_v52 = vrot.slane %v3465_v13, 4  ;;  %v3468_v5 = vrot.slane %v6341_v34, 5  ;;  %v4304_v11 = vsel %vm6928_vm10, %v4299_v12, %v4303_v9 }
 0x1e0   : > { %v2309_v23 = vpop.f32.mrf.mxu2  ;;  %v7987_v35 = vrot.slane %v4315_v63, 5  ;;  %v5000_v43 = vpack.c.b16 %v4975_v8, %v4974_v62  ;;  %v4549_v9 = vunpack.c.l.b16 %v4294_v44  ;;  %v4550_v63 = vunpack.c.l.b16 %v4304_v11  ;;  %v8334_v44 = vld [vmem:[#allocation17_spill] sm:$0xff] }
 0x1e1   : > { %v2350_v36 = vadd.f32 %v2309_v23, %v7937_v7  ;;  %3692 = vmatmul.bf16.gmra.mxu1 %v3580_v48  ;;  %v4321_v7 = vrot.slane %v4319_v56, 4  ;;  %v8332_v48 = vld [vmem:[#allocation15_spill] sm:$0xff]  ;;  %v3469_v23 = vsel %vm6952_vm13, %v3467_v52, %v3468_v5  ;;  %v3556_v13 = vunpack.c.l.b16 %v3466_v25 }
 0x1e2   : > { %v2622_v28 = vpop.f32.mrf.mxu3  ;;  %v1241_v1 = vadd.f32 %v7963_v41, %v8332_v48  ;;  %v4325_v34 = vshll.u32 %v4112_v38, 16  ;;  %v3557_v62 = vunpack.c.l.b16 %v3469_v23  ;;  %v4887_v8 = vrot.slane %v4885_v10, 4  ;;  %v4114_v23 = vld [vmem:[#allocation2 + $0x7c] sm:$0xf] }
 0x1e3   : > { %v2663_v4 = vadd.f32 %v2622_v28, %v2350_v36  ;;  %v4312_v36 = vor.u32 %v4311_v21, %v4308_v26  ;;  %v4322_v39 = vor.u32 %v4321_v7, %v7987_v35  ;;  %v4888_v48 = vrot.slane %v4112_v38, 5 }
 0x1e4   : > { %v4575_v5 = vpack.c.b16 %v4550_v63, %v4549_v9  ;;  %v1242_v11 = vadd.f32 %v7963_v41, %v8334_v44  ;;  %v3581_v7 = vpack.c.b16 %v3557_v62, %v3556_v13  ;;  %v4886_v25 = vsel %vm6952_vm13, %v5951_v40, %v4885_v10 }
 0x1e5   : > { %v7995_v57 = vadd.f32 %v7952_v46, %v2663_v4  ;;  %v3308_v12 = vpop.f32.mrf.mxu0  ;;  %v6082_v4 = vld [vmem:[#allocation2 + $0x60] sm:$0xff]  ;;  %v4313_v26 = vrot.slane %v4312_v36, 4  ;;  %v4323_v21 = vrot.slane %v4322_v39, 4  ;;  %v3358_v36 = vld [vmem:[#allocation2 + $0x6c] sm:$0xe]  ;;  %v4343_v44 = vshrl.u32 %v4114_v23, 16 }
 0x1e6   : > { %v1888_v16 = vpop.f32.mrf.mxu1 }
 0x1e7   : > { %8333 = vst [vmem:[#allocation13_spill] sm:$0xff] %v7995_v57  ;;  %v7999_v56 = vadd.f32 %v1888_v16, %v1241_v1  ;;  %5112 = vmatmul.bf16.gmra.mxu0 %v5000_v43  ;;  %v4327_v1 = vrot.slane %v4325_v34, 5  ;;  %v4113_v16 = vld [vmem:[#allocation2 + $0x78] sm:$0xf]  ;;  %v4318_v10 = vsel %vm6928_vm10, %v4313_v26, %v7987_v35 }
 0x1e8   : > { %v2311_v28 = vpop.f32.mrf.mxu2  ;;  %v4330_v40 = vshrl.u32 %v4113_v16, 16  ;;  %v4551_v26 = vunpack.c.l.b16 %v4318_v10  ;;  %v4892_v10 = vrot.slane %v4114_v23, 5 }
 0x1e9   : > { %v2351_v46 = vadd.f32 %v2311_v28, %v7954_v15  ;;  %v4889_v15 = vsel %vm6952_vm13, %v4887_v8, %v4888_v48  ;;  %v4328_v13 = vsel %vm6928_vm10, %v4323_v21, %v4327_v1  ;;  %v5776_v8 = vrot.slane %v3358_v36, 9 }
 0x1ea   : > { %v2624_v57 = vpop.f32.mrf.mxu3  ;;  %v4977_v39 = vunpack.c.l.b16 %v4889_v15  ;;  %v4552_v21 = vunpack.c.l.b16 %v4328_v13 }
 0x1eb   : > { %v2664_v52 = vadd.f32 %v2624_v57, %v2351_v46  ;;  %v6342_v57 = vld [vmem:[#allocation2 + $0x70] sm:$0xf]  ;;  %v4333_v46 = vshll.u32 %v4113_v16, 16 }
 0x1ec   : > { %v3472_v43 = vrot.slane %v6342_v57, 5 }
 0x1ed   : > { %4006 = vmatmul.bf16.gmra.mxu2 %v6082_v4  ;;  %v8010_v38 = vadd.f32 %v7973_v33, %v2664_v52  ;;  %v3310_v9 = vpop.f32.mrf.mxu0  ;;  %v4976_v33 = vunpack.c.l.b16 %v4886_v25  ;;  %v4339_v4 = vshll.u32 %v4114_v23, 16  ;;  %v6343_v52 = vld [vmem:[#allocation2 + $0x74] sm:$0x1]  ;;  %v4332_v25 = vrot.slane %v4330_v40, 4 }
 0x1ee   : > { %v1891_v55 = vpop.f32.mrf.mxu1  ;;  %v3474_v48 = vrot.slane %v3472_v43, 4  ;;  %v4335_v15 = vrot.slane %v4333_v46, 5  ;;  %v3473_v57 = vsel %vm6952_vm13, %v5776_v8, %v3472_v43  ;;  %v4576_v43 = vpack.c.b16 %v4552_v21, %v4551_v26 }
 0x1ef   : > { %4687 = vmatmul.bf16.gmra.mxu3 %v4575_v5  ;;  %v8012_v63 = vadd.f32 %v1891_v55, %v1242_v11  ;;  %v3475_v5 = vrot.slane %v6343_v52, 5  ;;  %v8335_v55 = vld [vmem:[#allocation19_spill] sm:$0xff]  ;;  %v5001_v1 = vpack.c.b16 %v4977_v39, %v4976_v33  ;;  %v4341_v36 = vrot.slane %v4339_v4, 5  ;;  %v4115_v33 = vld [vmem:[#allocation2 + $0x80] sm:$0x1] }
 0x1f0   : > { %v2314_v28 = vpop.f32.mrf.mxu2  ;;  %v1243_v35 = vadd.f32 %v7963_v41, %v8335_v55  ;;  %v4778_v41 = vld [vmem:[#allocation2 + $0x78] sm:$0xe]  ;;  %v3558_v40 = vunpack.c.l.b16 %v3473_v57  ;;  %v4336_v52 = vor.u32 %v4335_v15, %v4332_v25  ;;  %v4895_v55 = vrot.slane %v4115_v33, 5  ;;  %v6344_v25 = vld [vmem:[#allocation2 + $0x7c] sm:$0xf] }
 0x1f1   : > { %v2352_v34 = vadd.f32 %v2314_v28, %v7975_v0  ;;  %3697 = vmatmul.bf16.gmra.mxu1 %v3581_v7  ;;  %v3476_v16 = vsel %vm6952_vm13, %v3474_v48, %v3475_v5  ;;  %v4345_v28 = vrot.slane %v4343_v44, 4  ;;  %v5952_v48 = vrot.slane %v4778_v41, 9  ;;  %v4116_v41 = vld [vmem:[#allocation2 + $0x84] sm:$0xf] }
 0x1f2   : > { %v2627_v62 = vpop.f32.mrf.mxu3  ;;  %v3559_v46 = vunpack.c.l.b16 %v3476_v16  ;;  %v4349_v5 = vshll.u32 %v4115_v33, 16  ;;  %v4894_v44 = vrot.slane %v4892_v10, 4  ;;  %v4337_v23 = vrot.slane %v4336_v52, 4  ;;  %v3359_v16 = vld [vmem:[#allocation2 + $0x78] sm:$0xe] }
 0x1f3   : > { %v2665_v11 = vadd.f32 %v2627_v62, %v2352_v34  ;;  %v4346_v8 = vor.u32 %v4345_v28, %v4341_v36  ;;  %v3479_v15 = vrot.slane %v6344_v25, 5  ;;  %v6345_v52 = vld [vmem:[#allocation2 + $0x80] sm:$0x1] }
 0x1f4   : > { %v4896_v57 = vsel %vm6952_vm13, %v4894_v44, %v4895_v55 }
 0x1f5   : > { %v8022_v0 = vadd.f32 %v3308_v12, %v2665_v11  ;;  %v3313_v34 = vpop.f32.mrf.mxu0  ;;  %v6083_v12 = vld [vmem:[#allocation2 + $0x6c] sm:$0xff]  ;;  %v4347_v21 = vrot.slane %v4346_v8, 4 }
 0x1f6   : > { %v1893_v7 = vpop.f32.mrf.mxu1 }
 0x1f7   : > { %8336 = vst [vmem:[#allocation3_spill] sm:$0xff] %v8022_v0  ;;  %v8028_v62 = vadd.f32 %v1893_v7, %v1243_v35  ;;  %5117 = vmatmul.bf16.gmra.mxu0 %v5001_v1  ;;  %v3582_v35 = vpack.c.b16 %v3559_v46, %v3558_v40  ;;  %v4351_v1 = vrot.slane %v4349_v5, 5  ;;  %v5777_v40 = vrot.slane %v3359_v16, 9  ;;  %v4779_v16 = vld [vmem:[#allocation2 + $0x84] sm:$0xe] }
 0x1f8   : > { %v2316_v13 = vpop.f32.mrf.mxu2  ;;  %v3481_v46 = vrot.slane %v3479_v15, 4 }
 0x1f9   : > { %v2353_v39 = vadd.f32 %v2316_v13, %v7999_v56  ;;  %v4893_v56 = vsel %vm6952_vm13, %v5952_v48, %v4892_v10  ;;  %v4342_v13 = vsel %vm6928_vm10, %v4337_v23, %v4341_v36  ;;  %v4117_v10 = vld [vmem:[#allocation2 + $0x88] sm:$0xf]  ;;  %v4352_v8 = vsel %vm6928_vm10, %v4347_v21, %v4351_v1 }
 0x1fa   : > { %v2629_v11 = vpop.f32.mrf.mxu3  ;;  %v4978_v33 = vunpack.c.l.b16 %v4893_v56  ;;  %v4354_v48 = vshrl.u32 %v4116_v41, 16  ;;  %v4363_v5 = vshll.u32 %v4117_v10, 16  ;;  %v4553_v44 = vunpack.c.l.b16 %v4342_v13 }
 0x1fb   : > { %v2666_v4 = vadd.f32 %v2629_v11, %v2353_v39  ;;  %v3482_v11 = vrot.slane %v6345_v52, 5  ;;  %v4554_v36 = vunpack.c.l.b16 %v4352_v8  ;;  %v3480_v56 = vsel %vm6952_vm13, %v5777_v40, %v3479_v15  ;;  %v4118_v52 = vld [vmem:[#allocation2 + $0x8c] sm:$0x1] }
 0x1fc   : > { %v4356_v21 = vrot.slane %v4354_v48, 4  ;;  %v5953_v40 = vrot.slane %v4779_v16, 9  ;;  %v4902_v48 = vrot.slane %v4118_v52, 5 }
 0x1fd   : > { %4011 = vmatmul.bf16.gmra.mxu2 %v6083_v12  ;;  %v8031_v7 = vadd.f32 %v3310_v9, %v2666_v4  ;;  %v3315_v26 = vpop.f32.mrf.mxu0  ;;  %v4979_v12 = vunpack.c.l.b16 %v4896_v57  ;;  %v4357_v4 = vshll.u32 %v4116_v41, 16  ;;  %v3483_v25 = vsel %vm6952_vm13, %v3481_v46, %v3482_v11 }
 0x1fe   : > { %v8033_v0 = vpop.f32.mrf.mxu1  ;;  %v4577_v15 = vpack.c.b16 %v4554_v36, %v4553_v44  ;;  %v8059_v44 = vld [vmem:[#allocation2 + $0x94] sm:$0xf] }
 0x1ff   : > { %4692 = vmatmul.bf16.gmra.mxu3 %v4576_v43  ;;  %v4359_v1 = vrot.slane %v4357_v4, 5 }
 0x200   : > { %v2319_v28 = vpop.f32.mrf.mxu2 }
 0x201   : > { %v2354_v9 = vadd.f32 %v2319_v28, %v8012_v63  ;;  %3702 = vmatmul.bf16.gmra.mxu1 %v3582_v35  ;;  %v4367_v63 = vshrl.u32 %v4117_v10, 16  ;;  %v5002_v35 = vpack.c.b16 %v4979_v12, %v4978_v33  ;;  %v4899_v28 = vrot.slane %v4117_v10, 5  ;;  %v6084_v33 = vld [vmem:[#allocation2 + $0x78] sm:$0xff] }
 0x202   : > { %v2632_v39 = vpop.f32.mrf.mxu3  ;;  %v3561_v12 = vunpack.c.l.b16 %v3483_v25  ;;  %v4360_v11 = vor.u32 %v4359_v1, %v4356_v21  ;;  %v6346_v25 = vld [vmem:[#allocation2 + $0x88] sm:$0xf]  ;;  %v3360_v1 = vld [vmem:[#allocation2 + $0x84] sm:$0xe] }
 0x203   : > { %v2667_v43 = vadd.f32 %v2632_v39, %v2354_v9  ;;  %v4365_v9 = vrot.slane %v4363_v5, 5  ;;  %v3560_v39 = vunpack.c.l.b16 %v3480_v56  ;;  %v4901_v8 = vrot.slane %v4899_v28, 4  ;;  %v4119_v5 = vld [vmem:[#allocation2 + $0x90] sm:$0xf] }
 0x204   : > { %v4900_v56 = vsel %vm6952_vm13, %v5953_v40, %v4899_v28  ;;  %v5778_v40 = vrot.slane %v3360_v1, 9 }
 0x205   : > { %v8044_v55 = vadd.f32 %v3313_v34, %v2667_v43  ;;  %v8052_v57 = vpop.f32.mrf.mxu0  ;;  %v4369_v34 = vrot.slane %v4367_v63, 4  ;;  %v3583_v10 = vpack.c.b16 %v3561_v12, %v3560_v39  ;;  %v4903_v21 = vsel %vm6952_vm13, %v4901_v8, %v4902_v48 }
 0x206   : > { %v8046_v23 = vpop.f32.mrf.mxu1  ;;  %v3743_v39 = vadd.f32 %v8033_v0, %v7418_v3  ;;  %v4980_v28 = vunpack.c.l.b16 %v4900_v56  ;;  %v4387_v12 = vshll.u32 %v8059_v44, 16 }
 0x207   : > { %8337 = vst [vmem:[#allocation5_spill] sm:$0xff] %v8044_v55  ;;  %5122 = vmatmul.bf16.gmra.mxu0 %v5002_v35  ;;  %v4370_v4 = vor.u32 %v4369_v34, %v4365_v9  ;;  %v4373_v55 = vshll.u32 %v4118_v52, 16  ;;  %v4361_v35 = vrot.slane %v4360_v11, 4  ;;  %v4391_v52 = vshrl.u32 %v8059_v44, 16  ;;  %v6347_v11 = vld [vmem:[#allocation2 + $0x8c] sm:$0x1] }
 0x208   : > { %v2321_v41 = vpop.f32.mrf.mxu2  ;;  %v3489_v8 = vrot.slane %v6347_v11, 5 }
 0x209   : > { %v2355_v13 = vadd.f32 %v2321_v41, %v8028_v62  ;;  %v3486_v41 = vrot.slane %v6346_v25, 5  ;;  %v4371_v34 = vrot.slane %v4370_v4, 4 }
 0x20a   : > { %v2634_v43 = vpop.f32.mrf.mxu3 }
 0x20b   : > { %v2668_v46 = vadd.f32 %v2634_v43, %v2355_v13  ;;  %v4375_v13 = vrot.slane %v4373_v55, 5  ;;  %v4366_v55 = vsel %vm6928_vm10, %v4361_v35, %v4365_v9  ;;  %v3744_v35 = vadd.f32 %v8046_v23, %v7421_v18 }
 0x20d   : > { %4016 = vmatmul.bf16.gmra.mxu2 %v6084_v33  ;;  %v8055_v63 = vadd.f32 %v3315_v26, %v2668_v46  ;;  %v5085_v36 = vpop.f32.mrf.mxu0  ;;  %v4378_v26 = vshrl.u32 %v4119_v5, 16  ;;  %v4381_v33 = vshll.u32 %v4119_v5, 16  ;;  %v3488_v46 = vrot.slane %v3486_v41, 4 }
 0x20e   : > { %v3668_v62 = vpop.f32.mrf.mxu1  ;;  %v4376_v4 = vsel %vm6928_vm10, %v4371_v34, %v4375_v13  ;;  %v4393_v5 = vrot.slane %v4391_v52, 4  ;;  %v4555_v13 = vunpack.c.l.b16 %v4366_v55 }
 0x20f   : > { %8338 = vst [vmem:[#allocation7_spill] sm:$0xff] %v8055_v63  ;;  %4697 = vmatmul.bf16.gmra.mxu3 %v4577_v15  ;;  %v4981_v15 = vunpack.c.l.b16 %v4903_v21  ;;  %v4380_v3 = vrot.slane %v4378_v26, 4  ;;  %v4383_v0 = vrot.slane %v4381_v33, 5  ;;  %v3487_v21 = vsel %vm6952_vm13, %v5778_v40, %v3486_v41  ;;  %v4121_v33 = vld [vmem:[#allocation2 + $0x98] sm:$0x1] }
 0x210   : > { %v3977_v16 = vpop.f32.mrf.mxu2  ;;  %v3490_v1 = vsel %vm6952_vm13, %v3488_v46, %v3489_v8  ;;  %v4556_v26 = vunpack.c.l.b16 %v4376_v4  ;;  %v3562_v41 = vunpack.c.l.b16 %v3487_v21  ;;  %v4909_v23 = vrot.slane %v4121_v33, 5 }
 0x211   : > { %3707 = vmatmul.bf16.gmra.mxu1 %v3583_v10  ;;  %v4057_v48 = vadd.f32 %v3977_v16, %v3743_v39  ;;  %v8071_v10 = vrot.slane %v4387_v12, 5  ;;  %v5003_v56 = vpack.c.b16 %v4981_v15, %v4980_v28  ;;  %v4906_v16 = vrot.slane %v8059_v44, 5  ;;  %v4780_v39 = vld [vmem:[#allocation2 + $0x90] sm:$0xe]  ;;  %v6085_v15 = vld [vmem:[#allocation2 + $0x84] sm:$0xff] }
 0x212   : > { %v4658_v43 = vpop.f32.mrf.mxu3  ;;  %v4384_v12 = vor.u32 %v4383_v0, %v4380_v3  ;;  %v3563_v40 = vunpack.c.l.b16 %v3490_v1  ;;  %v4397_v44 = vshll.u32 %v4121_v33, 16  ;;  %v4578_v55 = vpack.c.b16 %v4556_v26, %v4555_v13 }
 0x213   : > { %v4738_v9 = vadd.f32 %v4658_v43, %v4057_v48  ;;  %v4394_v46 = vor.u32 %v4393_v5, %v8071_v10  ;;  %v5954_v43 = vrot.slane %v4780_v39, 9  ;;  %v4908_v18 = vrot.slane %v4906_v16, 4  ;;  %v8087_v5 = vld [vmem:[#allocation2 + $0xa0] sm:$0xf] }
 0x214   : > { %v3745_v4 = vadd.f32 %v3668_v62, %v7482_v19  ;;  %v3584_v0 = vpack.c.b16 %v3563_v40, %v3562_v41  ;;  %v4385_v21 = vrot.slane %v4384_v12, 4  ;;  %v3361_v12 = vld [vmem:[#allocation2 + $0x90] sm:$0xe]  ;;  %v4411_v40 = vshll.u32 %v8087_v5, 16 }
 0x215   : > { %v8082_v34 = vpop.f32.mrf.mxu0  ;;  %v5163_v8 = vadd.f32 %v8052_v57, %v4738_v9  ;;  %v4395_v1 = vrot.slane %v4394_v46, 4  ;;  %v4399_v57 = vrot.slane %v4397_v44, 5  ;;  %v4907_v19 = vsel %vm6952_vm13, %v5954_v43, %v4906_v16 }
 0x216   : > { %v8073_v25 = vpop.f32.mrf.mxu1  ;;  %v4910_v62 = vsel %vm6952_vm13, %v4908_v18, %v4909_v23  ;;  %v4415_v16 = vshrl.u32 %v8087_v5, 16  ;;  %v4390_v44 = vsel %vm6928_vm10, %v4385_v21, %v8071_v10  ;;  %v4982_v43 = vunpack.c.l.b16 %v4907_v19  ;;  %v4124_v10 = vld [vmem:[#allocation2 + $0xa4] sm:$0x1] }
 0x217   : > { %5127 = vmatmul.bf16.gmra.mxu0 %v5003_v56  ;;  %v5296_v13 = vmul.f32 %v5163_v8, %v5163_v8  ;;  %v4983_v23 = vunpack.c.l.b16 %v4910_v62 }
 0x218   : > { %v3979_v28 = vpop.f32.mrf.mxu2 }
 0x219   : > { %v4058_v52 = vadd.f32 %v3979_v28, %v3744_v35  ;;  %v4122_v35 = vld [vmem:[#allocation2 + $0x9c] sm:$0xf]  ;;  %v5004_v21 = vpack.c.b16 %v4983_v23, %v4982_v43  ;;  %v4421_v43 = vshll.u32 %v4124_v10, 16  ;;  %v6086_v23 = vld [vmem:[#allocation2 + $0x90] sm:$0xff] }
 0x21a   : > { %v4660_v11 = vpop.f32.mrf.mxu3  ;;  %v4405_v41 = vshll.u32 %v4122_v35, 16 }
 0x21b   : > { %v4739_v48 = vadd.f32 %v4660_v11, %v4058_v52 }
 0x21d   : > { %v5164_v3 = vadd.f32 %v5085_v36, %v4739_v48  ;;  %4021 = vmatmul.bf16.gmra.mxu2 %v6085_v15  ;;  %v6348_v36 = vld [vmem:[#allocation2 + $0x94] sm:$0xf]  ;;  %v5090_v28 = vpop.f32.mrf.mxu0  ;;  %v4402_v15 = vshrl.u32 %v4122_v35, 16 }
 0x21e   : > { %v8096_v56 = vpop.f32.mrf.mxu1  ;;  %v3493_v9 = vrot.slane %v6348_v36, 5  ;;  %v4400_v36 = vsel %vm6928_vm10, %v4395_v1, %v4399_v57  ;;  %v4913_v1 = vrot.slane %v8087_v5, 5 }
 0x21f   : > { %v6183_v26 = vpack.c.bf16 %v5164_v3, %v5163_v8  ;;  %v5259_v33 = vadd.f32 %v5164_v3, %v5163_v8  ;;  %v5297_v39 = vmul.f32 %v5164_v3, %v5164_v3  ;;  %4702 = vmatmul.bf16.gmra.mxu3 %v4578_v55  ;;  %v5779_v8 = vrot.slane %v3361_v12, 9  ;;  %v6349_v55 = vld [vmem:[#allocation2 + $0x98] sm:$0x1] }
 0x220   : > { %v3982_v52 = vpop.f32.mrf.mxu2  ;;  %v3495_v48 = vrot.slane %v3493_v9, 4  ;;  %v3496_v3 = vrot.slane %v6349_v55, 5  ;;  %v4404_v63 = vrot.slane %v4402_v15, 4  ;;  %v3746_v15 = vadd.f32 %v8073_v25, %v7485_v59  ;;  %v4125_v25 = vld [vmem:[#allocation2 + $0xa8] sm:$0xf] }
 0x221   : > { %6184 = vst [vmem:[%s8094_s30] sm:$0xff] %v6183_v26   ;;  %v5328_v46 = vadd.f32 %v5297_v39, %v5296_v13  ;;  %v4059_v11 = vadd.f32 %v3982_v52, %v3745_v4  ;;  %3712 = vmatmul.bf16.gmra.mxu1 %v3584_v0  ;;  %v4407_v26 = vrot.slane %v4405_v41, 5  ;;  %v8110_v13 = vrot.slane %v4411_v40, 5  ;;  %v4781_v40 = vld [vmem:[#allocation2 + $0x9c] sm:$0xe] }
 0x222   : > { %v4663_v18 = vpop.f32.mrf.mxu3  ;;  %v4417_v4 = vrot.slane %v4415_v16, 4  ;;  %v4557_v39 = vunpack.c.l.b16 %v4390_v44  ;;  %v3494_v62 = vsel %vm6952_vm13, %v5779_v8, %v3493_v9  ;;  %v3497_v12 = vsel %vm6952_vm13, %v3495_v48, %v3496_v3 }
 0x223   : > { %v4740_v35 = vadd.f32 %v4663_v18, %v4059_v11  ;;  %v4408_v11 = vor.u32 %v4407_v26, %v4404_v63  ;;  %v3564_v8 = vunpack.c.l.b16 %v3494_v62  ;;  %v3565_v48 = vunpack.c.l.b16 %v3497_v12 }
 0x224   : > { %v4418_v44 = vor.u32 %v4417_v4, %v8110_v13  ;;  %v5955_v5 = vrot.slane %v4781_v40, 9  ;;  %v4916_v3 = vrot.slane %v4124_v10, 5  ;;  %v6350_v10 = vld [vmem:[#allocation2 + $0xa0] sm:$0xf] }
 0x225   : > { %v5165_v0 = vadd.f32 %v8082_v34, %v4740_v35  ;;  %v5093_v41 = vpop.f32.mrf.mxu0  ;;  %v4558_v34 = vunpack.c.l.b16 %v4400_v36  ;;  %v3747_v36 = vadd.f32 %v8096_v56, %v7566_v61  ;;  %v4409_v63 = vrot.slane %v4408_v11, 4 }
 0x226   : > { %v8113_v19 = vpop.f32.mrf.mxu1  ;;  %v3585_v4 = vpack.c.b16 %v3565_v48, %v3564_v8  ;;  %v3500_v12 = vrot.slane %v6350_v10, 5  ;;  %v4426_v61 = vshrl.u32 %v4125_v25, 16  ;;  %v4429_v11 = vshll.u32 %v4125_v25, 16 }
 0x227   : > { %v5260_v57 = vadd.f32 %v5259_v33, %v5165_v0  ;;  %v5298_v52 = vmul.f32 %v5165_v0, %v5165_v0  ;;  %5132 = vmatmul.bf16.gmra.mxu0 %v5004_v21  ;;  %v4915_v33 = vrot.slane %v4913_v1, 4  ;;  %v4579_v59 = vpack.c.b16 %v4558_v34, %v4557_v39 }
 0x228   : > { %v3984_v16 = vpop.f32.mrf.mxu2  ;;  %v4914_v21 = vsel %vm6952_vm13, %v5955_v5, %v4913_v1  ;;  %v4431_v25 = vrot.slane %v4429_v11, 5 }
 0x229   : > { %v5329_v18 = vadd.f32 %v5328_v46, %v5298_v52  ;;  %v4060_v9 = vadd.f32 %v3984_v16, %v3746_v15  ;;  %v4419_v46 = vrot.slane %v4418_v44, 4  ;;  %v4423_v52 = vrot.slane %v4421_v43, 5  ;;  %v8125_v15 = vld [vmem:[#allocation2 + $0xac] sm:$0xf]  ;;  %v3362_v16 = vld [vmem:[#allocation2 + $0x9c] sm:$0xe] }
 0x22a   : > { %v4665_v55 = vpop.f32.mrf.mxu3  ;;  %v4917_v39 = vsel %vm6952_vm13, %v4915_v33, %v4916_v3  ;;  %v4414_v43 = vsel %vm6928_vm10, %v4409_v63, %v8110_v13  ;;  %v4435_v1 = vshll.u32 %v8125_v15, 16  ;;  %v5780_v5 = vrot.slane %v3362_v16, 9  ;;  %v6351_v3 = vld [vmem:[#allocation2 + $0xa4] sm:$0x1] }
 0x22b   : > { %v4741_v35 = vadd.f32 %v4665_v55, %v4060_v9  ;;  %v4439_v9 = vshrl.u32 %v8125_v15, 16  ;;  %v4985_v55 = vunpack.c.l.b16 %v4917_v39  ;;  %v3502_v33 = vrot.slane %v3500_v12, 4 }
 0x22c   : > { %v4428_v13 = vrot.slane %v4426_v61, 4  ;;  %v8141_v63 = vrot.slane %v4435_v1, 5  ;;  %v4920_v39 = vrot.slane %v8125_v15, 5 }
 0x22d   : > { %v5166_v26 = vadd.f32 %v5090_v28, %v4741_v35  ;;  %4026 = vmatmul.bf16.gmra.mxu2 %v6086_v23  ;;  %v5095_v40 = vpop.f32.mrf.mxu0  ;;  %v3503_v35 = vrot.slane %v6351_v3, 5 }
 0x22e   : > { %v8127_v62 = vpop.f32.mrf.mxu1  ;;  %v4922_v15 = vrot.slane %v4920_v39, 4 }
 0x22f   : > { %v6188_v56 = vpack.c.bf16 %v5166_v26, %v5165_v0  ;;  %v5261_v28 = vadd.f32 %v5260_v57, %v5166_v26  ;;  %v5299_v34 = vmul.f32 %v5166_v26, %v5166_v26  ;;  %4707 = vmatmul.bf16.gmra.mxu3 %v4579_v59  ;;  %v4424_v0 = vsel %vm6928_vm10, %v4419_v46, %v4423_v52 }
 0x230   : > { %v3987_v44 = vpop.f32.mrf.mxu2  ;;  %v4984_v57 = vunpack.c.l.b16 %v4914_v21  ;;  %v4441_v26 = vrot.slane %v4439_v9, 4  ;;  %v3501_v52 = vsel %vm6952_vm13, %v5780_v5, %v3500_v12  ;;  %v3504_v21 = vsel %vm6952_vm13, %v3502_v33, %v3503_v35  ;;  %v6087_v12 = vld [vmem:[#allocation2 + $0x9c] sm:$0xff] }
 0x231   : > { %6275 = vst [vmem:[%s8094_s30 + $0x8] sm:$0xff] %v6188_v56   ;;  %v5330_v23 = vadd.f32 %v5329_v18, %v5299_v34  ;;  %v4061_v8 = vadd.f32 %v3987_v44, %v3747_v36  ;;  %3717 = vmatmul.bf16.gmra.mxu1 %v3585_v4  ;;  %v4559_v18 = vunpack.c.l.b16 %v4414_v43  ;;  %v4560_v36 = vunpack.c.l.b16 %v4424_v0  ;;  %v4127_v4 = vld [vmem:[#allocation2 + $0xb0] sm:$0x1]  ;;  %v4782_v56 = vld [vmem:[#allocation2 + $0xa8] sm:$0xe] }
 0x232   : > { %v4668_v48 = vpop.f32.mrf.mxu3  ;;  %v5005_v34 = vpack.c.b16 %v4985_v55, %v4984_v57  ;;  %v4432_v44 = vor.u32 %v4431_v25, %v4428_v13  ;;  %v4442_v1 = vor.u32 %v4441_v26, %v8141_v63  ;;  %v4445_v9 = vshll.u32 %v4127_v4, 16 }
 0x233   : > { %v4742_v59 = vadd.f32 %v4668_v48, %v4061_v8  ;;  %v5956_v8 = vrot.slane %v4782_v56, 9  ;;  %v3566_v48 = vunpack.c.l.b16 %v3501_v52  ;;  %v3567_v55 = vunpack.c.l.b16 %v3504_v21 }
 0x234   : > { %v4580_v3 = vpack.c.b16 %v4560_v36, %v4559_v18  ;;  %v4433_v35 = vrot.slane %v4432_v44, 4  ;;  %v3749_v26 = vadd.f32 %v8127_v62, %v7631_v49  ;;  %v6352_v18 = vld [vmem:[#allocation2 + $0xac] sm:$0xf]  ;;  %v3363_v49 = vld [vmem:[#allocation2 + $0xa8] sm:$0xe] }
 0x235   : > { %v5167_v10 = vadd.f32 %v5093_v41, %v4742_v59  ;;  %v3748_v41 = vadd.f32 %v8113_v19, %v7576_v31  ;;  %v5098_v11 = vpop.f32.mrf.mxu0  ;;  %v4443_v31 = vrot.slane %v4442_v1, 4  ;;  %v4447_v19 = vrot.slane %v4445_v9, 5 }
 0x236   : > { %v8143_v46 = vpop.f32.mrf.mxu1  ;;  %v3586_v13 = vpack.c.b16 %v3567_v55, %v3566_v48  ;;  %v4921_v25 = vsel %vm6952_vm13, %v5956_v8, %v4920_v39  ;;  %v3507_v36 = vrot.slane %v6352_v18, 5  ;;  %v4438_v39 = vsel %vm6928_vm10, %v4433_v35, %v8141_v63  ;;  %v6353_v55 = vld [vmem:[#allocation2 + $0xb0] sm:$0x1] }
 0x237   : > { %v5262_v61 = vadd.f32 %v5261_v28, %v5167_v10  ;;  %v5300_v16 = vmul.f32 %v5167_v10, %v5167_v10  ;;  %5137 = vmatmul.bf16.gmra.mxu0 %v5005_v34  ;;  %v4923_v28 = vrot.slane %v4127_v4, 5  ;;  %v8161_v34 = vld [vmem:[#allocation2 + $0xb8] sm:$0xf]  ;;  %v4986_v44 = vunpack.c.l.b16 %v4921_v25 }
 0x238   : > { %v3989_v43 = vpop.f32.mrf.mxu2  ;;  %v3509_v48 = vrot.slane %v3507_v36, 4  ;;  %v3510_v63 = vrot.slane %v6353_v55, 5  ;;  %v4561_v35 = vunpack.c.l.b16 %v4438_v39  ;;  %v3750_v18 = vadd.f32 %v8143_v46, %v7644_v6 }
 0x239   : > { %v5331_v0 = vadd.f32 %v5330_v23, %v5300_v16  ;;  %v4062_v57 = vadd.f32 %v3989_v43, %v3748_v41  ;;  %v4128_v23 = vld [vmem:[#allocation2 + $0xb4] sm:$0xf]  ;;  %v4924_v4 = vsel %vm6952_vm13, %v4922_v15, %v4923_v28  ;;  %v4448_v41 = vsel %vm6928_vm10, %v4443_v31, %v4447_v19 }
 0x23a   : > { %v4670_v5 = vpop.f32.mrf.mxu3  ;;  %v4450_v43 = vshrl.u32 %v4128_v23, 16  ;;  %v4453_v1 = vshll.u32 %v4128_v23, 16  ;;  %v4562_v31 = vunpack.c.l.b16 %v4448_v41  ;;  %v4927_v39 = vrot.slane %v8161_v34, 5 }
 0x23b   : > { %v4743_v33 = vadd.f32 %v4670_v5, %v4062_v57  ;;  %v4463_v5 = vshrl.u32 %v8161_v34, 16 }
 0x23c   : > { %v4452_v28 = vrot.slane %v4450_v43, 4  ;;  %v4581_v46 = vpack.c.b16 %v4562_v31, %v4561_v35  ;;  %v6354_v31 = vld [vmem:[#allocation2 + $0xb8] sm:$0xf] }
 0x23d   : > { %v5168_v59 = vadd.f32 %v5095_v40, %v4743_v33  ;;  %4031 = vmatmul.bf16.gmra.mxu2 %v6087_v12  ;;  %v5100_v16 = vpop.f32.mrf.mxu0  ;;  %v5781_v12 = vrot.slane %v3363_v49, 9  ;;  %v4455_v33 = vrot.slane %v4453_v1, 5  ;;  %v4465_v23 = vrot.slane %v4463_v5, 4  ;;  %v8187_v5 = vld [vmem:[#allocation2 + $0xc4] sm:$0xf] }
 0x23e   : > { %v8157_v56 = vpop.f32.mrf.mxu1 }
 0x23f   : > { %v6193_v40 = vpack.c.bf16 %v5168_v59, %v5167_v10  ;;  %v5263_v52 = vadd.f32 %v5262_v61, %v5168_v59  ;;  %v5301_v21 = vmul.f32 %v5168_v59, %v5168_v59  ;;  %4712 = vmatmul.bf16.gmra.mxu3 %v4580_v3  ;;  %v4987_v10 = vunpack.c.l.b16 %v4924_v4 }
 0x240   : > { %v3992_v62 = vpop.f32.mrf.mxu2  ;;  %v4459_v61 = vshll.u32 %v8161_v34, 16  ;;  %v3508_v59 = vsel %vm6952_vm13, %v5781_v12, %v3507_v36  ;;  %v3751_v34 = vadd.f32 %v8157_v56, %v7683_v51 }
 0x241   : > { %6276 = vst [vmem:[%s8094_s30 + $0x10] sm:$0xff] %v6193_v40   ;;  %v5332_v9 = vadd.f32 %v5331_v0, %v5301_v21  ;;  %v4063_v8 = vadd.f32 %v3992_v62, %v3749_v26  ;;  %3722 = vmatmul.bf16.gmra.mxu1 %v3586_v13  ;;  %v5006_v19 = vpack.c.b16 %v4987_v10, %v4986_v44  ;;  %v4130_v40 = vld [vmem:[#allocation2 + $0xbc] sm:$0x1]  ;;  %v4783_v21 = vld [vmem:[#allocation2 + $0xb4] sm:$0xe]  ;;  %v6088_v44 = vld [vmem:[#allocation2 + $0xa8] sm:$0xff]  ;;  %v3568_v43 = vunpack.c.l.b16 %v3508_v59 }
 0x242   : > { %v4673_v57 = vpop.f32.mrf.mxu3  ;;  %v3511_v13 = vsel %vm6952_vm13, %v3509_v48, %v3510_v63  ;;  %v8177_v25 = vrot.slane %v4459_v61, 5  ;;  %v4456_v62 = vor.u32 %v4455_v33, %v4452_v28  ;;  %v4469_v10 = vshll.u32 %v4130_v40, 16  ;;  %v4131_v63 = vld [vmem:[#allocation2 + $0xc0] sm:$0xf] }
 0x243   : > { %v4744_v15 = vadd.f32 %v4673_v57, %v4063_v8  ;;  %v3569_v1 = vunpack.c.l.b16 %v3511_v13  ;;  %v5957_v61 = vrot.slane %v4783_v21, 9  ;;  %v4929_v57 = vrot.slane %v4927_v39, 4 }
 0x244   : > { %v4930_v12 = vrot.slane %v4130_v40, 5  ;;  %v4457_v55 = vrot.slane %v4456_v62, 4  ;;  %v4471_v33 = vrot.slane %v4469_v10, 5  ;;  %v4477_v40 = vshll.u32 %v4131_v63, 16 }
 0x245   : > { %v5169_v3 = vadd.f32 %v5098_v11, %v4744_v15  ;;  %v8181_v11 = vpop.f32.mrf.mxu0  ;;  %v4928_v35 = vsel %vm6952_vm13, %v5957_v61, %v4927_v39  ;;  %v4483_v21 = vshll.u32 %v8187_v5, 16 }
 0x246   : > { %v8171_v0 = vpop.f32.mrf.mxu1  ;;  %v4931_v56 = vsel %vm6952_vm13, %v4929_v57, %v4930_v12 }
 0x247   : > { %v5264_v26 = vadd.f32 %v5263_v52, %v5169_v3  ;;  %v5302_v4 = vmul.f32 %v5169_v3, %v5169_v3  ;;  %5142 = vmatmul.bf16.gmra.mxu0 %v5006_v19  ;;  %v4466_v52 = vor.u32 %v4465_v23, %v8177_v25  ;;  %v3514_v19 = vrot.slane %v6354_v31, 5  ;;  %v3364_v23 = vld [vmem:[#allocation2 + $0xb4] sm:$0xe] }
 0x248   : > { %v3994_v49 = vpop.f32.mrf.mxu2 }
 0x249   : > { %v5333_v36 = vadd.f32 %v5332_v9, %v5302_v4  ;;  %v4064_v41 = vadd.f32 %v3994_v49, %v3750_v18  ;;  %v3587_v9 = vpack.c.b16 %v3569_v1, %v3568_v43  ;;  %v4467_v28 = vrot.slane %v4466_v52, 4 }
 0x24a   : > { %v4675_v8 = vpop.f32.mrf.mxu3  ;;  %v4474_v18 = vshrl.u32 %v4131_v63, 16  ;;  %v4487_v49 = vshrl.u32 %v8187_v5, 16  ;;  %v5782_v43 = vrot.slane %v3364_v23, 9  ;;  %v3516_v1 = vrot.slane %v3514_v19, 4 }
 0x24b   : > { %v4745_v6 = vadd.f32 %v4675_v8, %v4064_v41  ;;  %v6355_v8 = vld [vmem:[#allocation2 + $0xbc] sm:$0x1]  ;;  %v4472_v61 = vsel %vm6928_vm10, %v4467_v28, %v4471_v33  ;;  %v4934_v28 = vrot.slane %v8187_v5, 5 }
 0x24c   : > { %v3517_v52 = vrot.slane %v6355_v8, 5  ;;  %v4489_v57 = vrot.slane %v4487_v49, 4  ;;  %v3515_v63 = vsel %vm6952_vm13, %v5782_v43, %v3514_v19  ;;  %v6089_v49 = vld [vmem:[#allocation2 + $0xb4] sm:$0xff] }
 0x24d   : > { %v5170_v48 = vadd.f32 %v5100_v16, %v4745_v6  ;;  %4036 = vmatmul.bf16.gmra.mxu2 %v6088_v44  ;;  %v5105_v51 = vpop.f32.mrf.mxu0  ;;  %v4989_v44 = vunpack.c.l.b16 %v4931_v56  ;;  %v4476_v6 = vrot.slane %v4474_v18, 4  ;;  %v4936_v5 = vrot.slane %v4934_v28, 4 }
 0x24e   : > { %v8189_v15 = vpop.f32.mrf.mxu1 }
 0x24f   : > { %v6198_v16 = vpack.c.bf16 %v5170_v48, %v5169_v3  ;;  %v5265_v59 = vadd.f32 %v5264_v26, %v5170_v48  ;;  %v5303_v13 = vmul.f32 %v5170_v48, %v5170_v48  ;;  %4717 = vmatmul.bf16.gmra.mxu3 %v4581_v46  ;;  %v4462_v3 = vsel %vm6928_vm10, %v4457_v55, %v8177_v25  ;;  %v4133_v25 = vld [vmem:[#allocation2 + $0xc8] sm:$0x1] }
 0x250   : > { %v3997_v4 = vpop.f32.mrf.mxu2  ;;  %v4988_v26 = vunpack.c.l.b16 %v4928_v35  ;;  %v4479_v46 = vrot.slane %v4477_v40, 5  ;;  %v4563_v48 = vunpack.c.l.b16 %v4462_v3  ;;  %v3518_v35 = vsel %vm6952_vm13, %v3516_v1, %v3517_v52 }
 0x251   : > { %6277 = vst [vmem:[%s8094_s30 + $0x18] sm:$0xff] %v6198_v16   ;;  %v5334_v39 = vadd.f32 %v5333_v36, %v5303_v13  ;;  %v4065_v62 = vadd.f32 %v3997_v4, %v3751_v34  ;;  %3727 = vmatmul.bf16.gmra.mxu1 %v3587_v9  ;;  %v8203_v36 = vrot.slane %v4483_v21, 5  ;;  %v4784_v34 = vld [vmem:[#allocation2 + $0xc0] sm:$0xe]  ;;  %v3752_v16 = vadd.f32 %v8171_v0, %v7700_v29 }
 0x252   : > { %v4678_v41 = vpop.f32.mrf.mxu3  ;;  %v5007_v9 = vpack.c.b16 %v4989_v44, %v4988_v26  ;;  %v4564_v13 = vunpack.c.l.b16 %v4472_v61  ;;  %v4480_v23 = vor.u32 %v4479_v46, %v4476_v6  ;;  %v4493_v18 = vshll.u32 %v4133_v25, 16  ;;  %v6356_v61 = vld [vmem:[#allocation2 + $0xc4] sm:$0xf]  ;;  %v4134_v46 = vld [vmem:[#allocation2 + $0xcc] sm:$0xf] }
 0x253   : > { %v4746_v10 = vadd.f32 %v4678_v41, %v4065_v62  ;;  %v4490_v4 = vor.u32 %v4489_v57, %v8203_v36  ;;  %v5958_v40 = vrot.slane %v4784_v34, 9  ;;  %v3570_v62 = vunpack.c.l.b16 %v3515_v63 }
 0x254   : > { %v3571_v3 = vunpack.c.l.b16 %v3518_v35  ;;  %v4582_v44 = vpack.c.b16 %v4564_v13, %v4563_v48  ;;  %v4481_v29 = vrot.slane %v4480_v23, 4  ;;  %v4495_v43 = vrot.slane %v4493_v18, 5  ;;  %v4135_v13 = vld [vmem:[#allocation2 + $0xd0] sm:$0xf] }
 0x255   : > { %v5171_v12 = vadd.f32 %v8181_v11, %v4746_v10  ;;  %v5108_v11 = vpop.f32.mrf.mxu0  ;;  %v4491_v0 = vrot.slane %v4490_v4, 4  ;;  %v4935_v52 = vsel %vm6952_vm13, %v5958_v40, %v4934_v28  ;;  %v3521_v6 = vrot.slane %v6356_v61, 5  ;;  %v6357_v4 = vld [vmem:[#allocation2 + $0xc8] sm:$0x1] }
 0x256   : > { %v8206_v55 = vpop.f32.mrf.mxu1  ;;  %v3588_v8 = vpack.c.b16 %v3571_v3, %v3570_v62  ;;  %v4486_v35 = vsel %vm6928_vm10, %v4481_v29, %v8203_v36  ;;  %v3524_v18 = vrot.slane %v6357_v4, 5  ;;  %v4501_v40 = vshll.u32 %v4134_v46, 16 }
 0x257   : > { %v5266_v33 = vadd.f32 %v5265_v59, %v5171_v12  ;;  %v5304_v31 = vmul.f32 %v5171_v12, %v5171_v12  ;;  %5147 = vmatmul.bf16.gmra.mxu0 %v5007_v9  ;;  %v4937_v59 = vrot.slane %v4133_v25, 5  ;;  %v3365_v9 = vld [vmem:[#allocation2 + $0xc0] sm:$0xe]  ;;  %v4496_v28 = vsel %vm6928_vm10, %v4491_v0, %v4495_v43 }
 0x258   : > { %v3999_v56 = vpop.f32.mrf.mxu2  ;;  %v3523_v23 = vrot.slane %v3521_v6, 4  ;;  %v4511_v36 = vshrl.u32 %v4135_v13, 16  ;;  %v4565_v3 = vunpack.c.l.b16 %v4486_v35  ;;  %v4503_v29 = vrot.slane %v4501_v40, 5 }
 0x259   : > { %v5335_v21 = vadd.f32 %v5334_v39, %v5304_v31  ;;  %v4066_v19 = vadd.f32 %v3999_v56, %v3752_v16  ;;  %v4938_v10 = vsel %vm6952_vm13, %v4936_v5, %v4937_v59  ;;  %v4990_v31 = vunpack.c.l.b16 %v4935_v52  ;;  %v4785_v52 = vld [vmem:[#allocation2 + $0xcc] sm:$0xe] }
 0x25a   : > { %v4680_v26 = vpop.f32.mrf.mxu3  ;;  %v4498_v56 = vshrl.u32 %v4134_v46, 16  ;;  %v4513_v46 = vrot.slane %v4511_v36, 4 }
 0x25b   : > { %v4747_v41 = vadd.f32 %v4680_v26, %v4066_v19  ;;  %v4566_v26 = vunpack.c.l.b16 %v4496_v28 }
 0x25d   : > { %v5172_v1 = vadd.f32 %v5105_v51, %v4747_v41  ;;  %4041 = vmatmul.bf16.gmra.mxu2 %v6089_v49  ;;  %v3753_v51 = vadd.f32 %v8189_v15, %v7724_v2  ;;  %v5110_v34 = vpop.f32.mrf.mxu0  ;;  %v5783_v15 = vrot.slane %v3365_v9, 9  ;;  %v4507_v49 = vshll.u32 %v4135_v13, 16 }
 0x25e   : > { %v8218_v39 = vpop.f32.mrf.mxu1  ;;  %v3525_v41 = vsel %vm6952_vm13, %v3523_v23, %v3524_v18 }
 0x25f   : > { %v6203_v57 = vpack.c.bf16 %v5172_v1, %v5171_v12  ;;  %v5267_v48 = vadd.f32 %v5266_v33, %v5172_v1  ;;  %v5305_v25 = vmul.f32 %v5172_v1, %v5172_v1  ;;  %4722 = vmatmul.bf16.gmra.mxu3 %v4582_v44  ;;  %v4991_v33 = vunpack.c.l.b16 %v4938_v10 }
 0x260   : > { %v4002_v63 = vpop.f32.mrf.mxu2  ;;  %v4500_v44 = vrot.slane %v4498_v56, 4  ;;  %v3754_v1 = vadd.f32 %v8206_v55, %v7742_v60  ;;  %v4509_v61 = vrot.slane %v4507_v49, 5  ;;  %v3573_v9 = vunpack.c.l.b16 %v3525_v41 }
 0x261   : > { %6278 = vst [vmem:[%s8094_s30 + $0x20] sm:$0xff] %v6203_v57   ;;  %v5336_v16 = vadd.f32 %v5335_v21, %v5305_v25  ;;  %v4067_v12 = vadd.f32 %v4002_v63, %v3753_v51  ;;  %3732 = vmatmul.bf16.gmra.mxu1 %v3588_v8  ;;  %v5008_v5 = vpack.c.b16 %v4991_v33, %v4990_v31  ;;  %v6090_v51 = vld [vmem:[#allocation2 + $0xc0] sm:$0xff]  ;;  %v4136_v63 = vld [vmem:[#allocation2 + $0xd4] sm:$0x1] }
 0x262   : > { %v4683_v2 = vpop.f32.mrf.mxu3  ;;  %v3522_v21 = vsel %vm6952_vm13, %v5783_v15, %v3521_v6  ;;  %v4504_v28 = vor.u32 %v4503_v29, %v4500_v44  ;;  %v4944_v60 = vrot.slane %v4136_v63, 5  ;;  %v4514_v55 = vor.u32 %v4513_v46, %v4509_v61 }
 0x263   : > { %v4748_v19 = vadd.f32 %v4683_v2, %v4067_v12  ;;  %v3572_v6 = vunpack.c.l.b16 %v3522_v21  ;;  %v4583_v12 = vpack.c.b16 %v4566_v26, %v4565_v3  ;;  %v4517_v56 = vshll.u32 %v4136_v63, 16 }
 0x264   : > { %v4505_v23 = vrot.slane %v4504_v28, 4  ;;  %v4515_v3 = vrot.slane %v4514_v55, 4 }
 0x265   : > { %v5173_v62 = vadd.f32 %v5108_v11, %v4748_v19  ;;  %v5113_v8 = vpop.f32.mrf.mxu0  ;;  %v4941_v11 = vrot.slane %v4135_v13, 5  ;;  %v3589_v2 = vpack.c.b16 %v3573_v9, %v3572_v6  ;;  %v4519_v26 = vrot.slane %v4517_v56, 5  ;;  %v6091_v9 = vld [vmem:[#allocation2 + $0xcc] sm:$0xff] }
 0x266   : > { %v3695_v59 = vpop.f32.mrf.mxu1 }
 0x267   : > { %v5268_v0 = vadd.f32 %v5267_v48, %v5173_v62  ;;  %v5306_v43 = vmul.f32 %v5173_v62, %v5173_v62  ;;  %5152 = vmatmul.bf16.gmra.mxu0 %v5008_v5  ;;  %v5959_v48 = vrot.slane %v4785_v52, 9  ;;  %v4943_v33 = vrot.slane %v4941_v11, 4 }
 0x268   : > { %v4004_v10 = vpop.f32.mrf.mxu2  ;;  %v4520_v29 = vsel %vm6928_vm10, %v4515_v3, %v4519_v26 }
 0x269   : > { %v5337_v57 = vadd.f32 %v5336_v16, %v5306_v43  ;;  %v4068_v25 = vadd.f32 %v4004_v10, %v3754_v1  ;;  %v3755_v16 = vadd.f32 %v8218_v39, %v7757_v54  ;;  %v4942_v4 = vsel %vm6952_vm13, %v5959_v48, %v4941_v11 }
 0x26a   : > { %v4685_v35 = vpop.f32.mrf.mxu3  ;;  %v4945_v36 = vsel %vm6952_vm13, %v4943_v33, %v4944_v60  ;;  %v4992_v39 = vunpack.c.l.b16 %v4942_v4  ;;  %v3756_v10 = vadd.f32 %v3695_v59, %v7769_v37 }
 0x26b   : > { %v4749_v31 = vadd.f32 %v4685_v35, %v4068_v25  ;;  %v4993_v41 = vunpack.c.l.b16 %v4945_v36 }
 0x26d   : > { %v5174_v13 = vadd.f32 %v5110_v34, %v4749_v31  ;;  %4046 = vmatmul.bf16.gmra.mxu2 %v6090_v51  ;;  %v5115_v49 = vpop.f32.mrf.mxu0  ;;  %v5009_v43 = vpack.c.b16 %v4993_v41, %v4992_v39 }
 0x26e   : > { %v3698_v15 = vpop.f32.mrf.mxu1 }
 0x26f   : > { %v6208_v18 = vpack.c.bf16 %v5174_v13, %v5173_v62  ;;  %v5269_v40 = vadd.f32 %v5268_v0, %v5174_v13  ;;  %v5307_v19 = vmul.f32 %v5174_v13, %v5174_v13  ;;  %4727 = vmatmul.bf16.gmra.mxu3 %v4583_v12  ;;  %v4510_v62 = vsel %vm6928_vm10, %v4505_v23, %v4509_v61 }
 0x270   : > { %v4007_v34 = vpop.f32.mrf.mxu2  ;;  %v4567_v22 = vunpack.c.l.b16 %v4510_v62  ;;  %v3757_v12 = vadd.f32 %v3698_v15, %v7792_v42 }
 0x271   : > { %6279 = vst [vmem:[%s8094_s30 + $0x28] sm:$0xff] %v6208_v18   ;;  %v5338_v5 = vadd.f32 %v5337_v57, %v5307_v19  ;;  %v4069_v21 = vadd.f32 %v4007_v34, %v3755_v16  ;;  %3737 = vmatmul.bf16.gmra.mxu1 %v3589_v2  ;;  %v4568_v57 = vunpack.c.l.b16 %v4520_v29 }
 0x272   : > { %v4688_v54 = vpop.f32.mrf.mxu3 }
 0x273   : > { %v4750_v44 = vadd.f32 %v4688_v54, %v4069_v21  ;;  %v4584_v58 = vpack.c.b16 %v4568_v57, %v4567_v22 }
 0x275   : > { %v5175_v0 = vadd.f32 %v5113_v8, %v4750_v44  ;;  %v5118_v46 = vpop.f32.mrf.mxu0 }
 0x276   : > { %v3700_v1 = vpop.f32.mrf.mxu1 }
 0x277   : > { %v5270_v52 = vadd.f32 %v5269_v40, %v5175_v0  ;;  %v5308_v11 = vmul.f32 %v5175_v0, %v5175_v0  ;;  %5157 = vmatmul.bf16.gmra.mxu0 %v5009_v43  ;;  %v3758_v4 = vadd.f32 %v3700_v1, %v7808_v17 }
 0x278   : > { %v4009_v25 = vpop.f32.mrf.mxu2 }
 0x279   : > { %v5339_v51 = vadd.f32 %v5338_v5, %v5308_v11  ;;  %v4070_v6 = vadd.f32 %v4009_v25, %v3756_v10 }
 0x27a   : > { %v4690_v63 = vpop.f32.mrf.mxu3 }
 0x27b   : > { %v4751_v61 = vadd.f32 %v4690_v63, %v4070_v6 }
 0x27d   : > { %v5176_v35 = vadd.f32 %v5115_v49, %v4751_v61  ;;  %4051 = vmatmul.bf16.gmra.mxu2 %v6091_v9  ;;  %v5120_v37 = vpop.f32.mrf.mxu0 }
 0x27e   : > { %v3703_v8 = vpop.f32.mrf.mxu1 }
 0x27f   : > { %v6213_v28 = vpack.c.bf16 %v5176_v35, %v5175_v0  ;;  %v5271_v48 = vadd.f32 %v5270_v52, %v5176_v35  ;;  %v5309_v31 = vmul.f32 %v5176_v35, %v5176_v35  ;;  %4732 = vmatmul.bf16.gmra.mxu3 %v4584_v58  ;;  %v3759_v21 = vadd.f32 %v3703_v8, %v7822_v24 }
 0x280   : > { %v4012_v59 = vpop.f32.mrf.mxu2 }
 0x281   : > { %6280 = vst [vmem:[%s8094_s30 + $0x30] sm:$0xff] %v6213_v28   ;;  %v5340_v33 = vadd.f32 %v5339_v51, %v5309_v31  ;;  %v4071_v60 = vadd.f32 %v4012_v59, %v3757_v12 }
 0x282   : > { %v4693_v55 = vpop.f32.mrf.mxu3 }
 0x283   : > { %v4752_v56 = vadd.f32 %v4693_v55, %v4071_v60 }
 0x285   : > { %v5177_v13 = vadd.f32 %v5118_v46, %v4752_v56  ;;  %v5123_v18 = vpop.f32.mrf.mxu0 }
 0x286   : > { %v3705_v2 = vpop.f32.mrf.mxu1 }
 0x287   : > { %v5272_v16 = vadd.f32 %v5271_v48, %v5177_v13  ;;  %v5310_v23 = vmul.f32 %v5177_v13, %v5177_v13  ;;  %v3760_v1 = vadd.f32 %v3705_v2, %v7838_v45 }
 0x288   : > { %v4014_v40 = vpop.f32.mrf.mxu2 }
 0x289   : > { %v5341_v19 = vadd.f32 %v5340_v33, %v5310_v23  ;;  %v4072_v49 = vadd.f32 %v4014_v40, %v3758_v4 }
 0x28a   : > { %v4695_v42 = vpop.f32.mrf.mxu3 }
 0x28b   : > { %v4753_v15 = vadd.f32 %v4695_v42, %v4072_v49 }
 0x28d   : > { %v5178_v36 = vadd.f32 %v5120_v37, %v4753_v15  ;;  %v5125_v54 = vpop.f32.mrf.mxu0 }
 0x28e   : > { %v3708_v34 = vpop.f32.mrf.mxu1 }
 0x28f   : > { %v6218_v3 = vpack.c.bf16 %v5178_v36, %v5177_v13  ;;  %v5273_v26 = vadd.f32 %v5272_v16, %v5178_v36  ;;  %v5311_v5 = vmul.f32 %v5178_v36, %v5178_v36  ;;  %v3761_v61 = vadd.f32 %v3708_v34, %v7860_v27 }
 0x290   : > { %v4017_v39 = vpop.f32.mrf.mxu2 }
 0x291   : > { %6281 = vst [vmem:[%s8094_s30 + $0x38] sm:$0xff] %v6218_v3   ;;  %v5342_v41 = vadd.f32 %v5341_v19, %v5311_v5  ;;  %v4073_v44 = vadd.f32 %v4017_v39, %v3759_v21 }
 0x292   : > { %v4698_v62 = vpop.f32.mrf.mxu3 }
 0x293   : > { %v4754_v17 = vadd.f32 %v4698_v62, %v4073_v44 }
 0x295   : > { %v5179_v29 = vadd.f32 %v5123_v18, %v4754_v17  ;;  %v5128_v52 = vpop.f32.mrf.mxu0 }
 0x296   : > { %v3710_v0 = vpop.f32.mrf.mxu1 }
 0x297   : > { %v5274_v22 = vadd.f32 %v5273_v26, %v5179_v29  ;;  %v5312_v43 = vmul.f32 %v5179_v29, %v5179_v29  ;;  %v3762_v33 = vadd.f32 %v3710_v0, %v7876_v47 }
 0x298   : > { %v4019_v11 = vpop.f32.mrf.mxu2 }
 0x299   : > { %v5343_v10 = vadd.f32 %v5342_v41, %v5312_v43  ;;  %v4074_v46 = vadd.f32 %v4019_v11, %v3760_v1 }
 0x29a   : > { %v4700_v57 = vpop.f32.mrf.mxu3 }
 0x29b   : > { %v4755_v24 = vadd.f32 %v4700_v57, %v4074_v46 }
 0x29d   : > { %v5180_v25 = vadd.f32 %v5125_v54, %v4755_v24  ;;  %v5130_v58 = vpop.f32.mrf.mxu0 }
 0x29e   : > { %v3713_v51 = vpop.f32.mrf.mxu1 }
 0x29f   : > { %v6223_v6 = vpack.c.bf16 %v5180_v25, %v5179_v29  ;;  %v5275_v9 = vadd.f32 %v5274_v22, %v5180_v25  ;;  %v5313_v63 = vmul.f32 %v5180_v25, %v5180_v25  ;;  %v3763_v19 = vadd.f32 %v3713_v51, %v7890_v20 }
 0x2a0   : > { %v4022_v35 = vpop.f32.mrf.mxu2 }
 0x2a1   : > { %6282 = vst [vmem:[%s8094_s30 + $0x40] sm:$0xff] %v6223_v6   ;;  %v5344_v8 = vadd.f32 %v5343_v10, %v5313_v63  ;;  %v4075_v28 = vadd.f32 %v4022_v35, %v3761_v61 }
 0x2a2   : > { %v4703_v48 = vpop.f32.mrf.mxu3 }
 0x2a3   : > { %v4756_v45 = vadd.f32 %v4703_v48, %v4075_v28 }
 0x2a5   : > { %v5181_v31 = vadd.f32 %v5128_v52, %v4756_v45  ;;  %v5133_v60 = vpop.f32.mrf.mxu0 }
 0x2a6   : > { %v3715_v12 = vpop.f32.mrf.mxu1 }
 0x2a7   : > { %v5276_v37 = vadd.f32 %v5275_v9, %v5181_v31  ;;  %v5314_v59 = vmul.f32 %v5181_v31, %v5181_v31  ;;  %v3764_v54 = vadd.f32 %v3715_v12, %v7904_v14 }
 0x2a8   : > { %v4024_v55 = vpop.f32.mrf.mxu2 }
 0x2a9   : > { %v5345_v56 = vadd.f32 %v5344_v8, %v5314_v59  ;;  %v4076_v13 = vadd.f32 %v4024_v55, %v3762_v33 }
 0x2aa   : > { %v4705_v2 = vpop.f32.mrf.mxu3 }
 0x2ab   : > { %v4757_v27 = vadd.f32 %v4705_v2, %v4076_v13 }
 0x2ad   : > { %v5182_v16 = vadd.f32 %v5130_v58, %v4757_v27  ;;  %v5135_v49 = vpop.f32.mrf.mxu0 }
 0x2ae   : > { %v3718_v23 = vpop.f32.mrf.mxu1 }
 0x2af   : > { %v6228_v4 = vpack.c.bf16 %v5182_v16, %v5181_v31  ;;  %v5277_v18 = vadd.f32 %v5276_v37, %v5182_v16  ;;  %v5315_v40 = vmul.f32 %v5182_v16, %v5182_v16  ;;  %v3765_v52 = vadd.f32 %v3718_v23, %v7920_v50 }
 0x2b0   : > { %v4027_v42 = vpop.f32.mrf.mxu2 }
 0x2b1   : > { %6283 = vst [vmem:[%s8094_s30 + $0x48] sm:$0xff] %v6228_v4   ;;  %v5346_v15 = vadd.f32 %v5345_v56, %v5315_v40  ;;  %v4077_v36 = vadd.f32 %v4027_v42, %v3763_v19 }
 0x2b2   : > { %v4708_v34 = vpop.f32.mrf.mxu3 }
 0x2b3   : > { %v4758_v47 = vadd.f32 %v4708_v34, %v4077_v36 }
 0x2b5   : > { %v5183_v3 = vadd.f32 %v5133_v60, %v4758_v47  ;;  %v5138_v39 = vpop.f32.mrf.mxu0 }
 0x2b6   : > { %v3720_v26 = vpop.f32.mrf.mxu1 }
 0x2b7   : > { %v5278_v5 = vadd.f32 %v5277_v18, %v5183_v3  ;;  %v5316_v21 = vmul.f32 %v5183_v3, %v5183_v3  ;;  %v3766_v9 = vadd.f32 %v3720_v26, %v7931_v53 }
 0x2b8   : > { %v4029_v41 = vpop.f32.mrf.mxu2 }
 0x2b9   : > { %v5347_v44 = vadd.f32 %v5346_v15, %v5316_v21  ;;  %v4078_v62 = vadd.f32 %v4029_v41, %v3764_v54 }
 0x2ba   : > { %v4710_v17 = vpop.f32.mrf.mxu3 }
 0x2bb   : > { %v4759_v20 = vadd.f32 %v4710_v17, %v4078_v62 }
 0x2bd   : > { %v5184_v29 = vadd.f32 %v5135_v49, %v4759_v20  ;;  %v5140_v11 = vpop.f32.mrf.mxu0 }
 0x2be   : > { %v3723_v0 = vpop.f32.mrf.mxu1 }
 0x2bf   : > { %v6233_v22 = vpack.c.bf16 %v5184_v29, %v5183_v3  ;;  %v5279_v43 = vadd.f32 %v5278_v5, %v5184_v29  ;;  %v5317_v1 = vmul.f32 %v5184_v29, %v5184_v29  ;;  %v3767_v37 = vadd.f32 %v3723_v0, %v7946_v32  ;;  %v8339_v3 = vld [vmem:[#allocation13_spill] sm:$0xff] }
 0x2c0   : > { %v4032_v10 = vpop.f32.mrf.mxu2 }
 0x2c1   : > { %6284 = vst [vmem:[%s8094_s30 + $0x50] sm:$0xff] %v6233_v22   ;;  %v5348_v46 = vadd.f32 %v5347_v44, %v5317_v1  ;;  %v4079_v57 = vadd.f32 %v4032_v10, %v3765_v52 }
 0x2c2   : > { %v4713_v24 = vpop.f32.mrf.mxu3 }
 0x2c3   : > { %v4760_v14 = vadd.f32 %v4713_v24, %v4079_v57 }
 0x2c5   : > { %v5185_v25 = vadd.f32 %v5138_v39, %v4760_v14  ;;  %v5143_v63 = vpop.f32.mrf.mxu0  ;;  %v8340_v14 = vld [vmem:[#allocation3_spill] sm:$0xff] }
 0x2c6   : > { %v3725_v58 = vpop.f32.mrf.mxu1 }
 0x2c7   : > { %v5280_v51 = vadd.f32 %v5279_v43, %v5185_v25  ;;  %v5318_v6 = vmul.f32 %v5185_v25, %v5185_v25  ;;  %v3768_v23 = vadd.f32 %v3725_v58, %v7969_v30 }
 0x2c8   : > { %v4034_v61 = vpop.f32.mrf.mxu2 }
 0x2c9   : > { %v5349_v35 = vadd.f32 %v5348_v46, %v5318_v6  ;;  %v4080_v8 = vadd.f32 %v4034_v61, %v3766_v9 }
 0x2ca   : > { %v4715_v28 = vpop.f32.mrf.mxu3 }
 0x2cb   : > { %v4761_v50 = vadd.f32 %v4715_v28, %v4080_v8 }
 0x2cd   : > { %v5186_v48 = vadd.f32 %v5140_v11, %v4761_v50  ;;  %v5145_v33 = vpop.f32.mrf.mxu0 }
 0x2ce   : > { %v3728_v53 = vpop.f32.mrf.mxu1 }
 0x2cf   : > { %v6238_v45 = vpack.c.bf16 %v5186_v48, %v5185_v25  ;;  %v5281_v31 = vadd.f32 %v5280_v51, %v5186_v48  ;;  %v5319_v12 = vmul.f32 %v5186_v48, %v5186_v48  ;;  %v3769_v26 = vadd.f32 %v3728_v53, %v8339_v3  ;;  %v8341_v53 = vld [vmem:[#allocation5_spill] sm:$0xff] }
 0x2d0   : > { %v4037_v59 = vpop.f32.mrf.mxu2 }
 0x2d1   : > { %6285 = vst [vmem:[%s8094_s30 + $0x58] sm:$0xff] %v6238_v45   ;;  %v5350_v60 = vadd.f32 %v5349_v35, %v5319_v12  ;;  %v4081_v55 = vadd.f32 %v4037_v59, %v3767_v37 }
 0x2d2   : > { %v4718_v56 = vpop.f32.mrf.mxu3 }
 0x2d3   : > { %v4762_v13 = vadd.f32 %v4718_v56, %v4081_v55 }
 0x2d5   : > { %v5187_v2 = vadd.f32 %v5143_v63, %v4762_v13  ;;  %v5148_v49 = vpop.f32.mrf.mxu0 }
 0x2d6   : > { %v3730_v42 = vpop.f32.mrf.mxu1 }
 0x2d7   : > { %v5282_v27 = vadd.f32 %v5281_v31, %v5187_v2  ;;  %v5320_v16 = vmul.f32 %v5187_v2, %v5187_v2  ;;  %v3770_v29 = vadd.f32 %v3730_v42, %v8010_v38 }
 0x2d8   : > { %v4039_v4 = vpop.f32.mrf.mxu2 }
 0x2d9   : > { %v5351_v18 = vadd.f32 %v5350_v60, %v5320_v16  ;;  %v4082_v40 = vadd.f32 %v4039_v4, %v3768_v23 }
 0x2da   : > { %v4720_v19 = vpop.f32.mrf.mxu3 }
 0x2db   : > { %v4763_v32 = vadd.f32 %v4720_v19, %v4082_v40 }
 0x2dd   : > { %v5188_v15 = vadd.f32 %v5145_v33, %v4763_v32  ;;  %v5150_v30 = vpop.f32.mrf.mxu0  ;;  %v8342_v32 = vld [vmem:[#allocation7_spill] sm:$0xff] }
 0x2de   : > { %v3733_v62 = vpop.f32.mrf.mxu1 }
 0x2df   : > { %v6243_v36 = vpack.c.bf16 %v5188_v15, %v5187_v2  ;;  %v5283_v34 = vadd.f32 %v5282_v27, %v5188_v15  ;;  %v5321_v47 = vmul.f32 %v5188_v15, %v5188_v15  ;;  %v3771_v25 = vadd.f32 %v3733_v62, %v8340_v14 }
 0x2e0   : > { %v4042_v5 = vpop.f32.mrf.mxu2 }
 0x2e1   : > { %6286 = vst [vmem:[%s8094_s30 + $0x60] sm:$0xff] %v6243_v36   ;;  %v5352_v21 = vadd.f32 %v5351_v18, %v5321_v47  ;;  %v4083_v54 = vadd.f32 %v4042_v5, %v3769_v26 }
 0x2e2   : > { %v4723_v39 = vpop.f32.mrf.mxu3 }
 0x2e3   : > { %v4764_v41 = vadd.f32 %v4723_v39, %v4083_v54 }
 0x2e5   : > { %v5189_v44 = vadd.f32 %v5148_v49, %v4764_v41  ;;  %v5153_v10 = vpop.f32.mrf.mxu0 }
 0x2e6   : > { %v3735_v6 = vpop.f32.mrf.mxu1 }
 0x2e7   : > { %v5284_v17 = vadd.f32 %v5283_v34, %v5189_v44  ;;  %v5322_v20 = vmul.f32 %v5189_v44, %v5189_v44  ;;  %v3772_v28 = vadd.f32 %v3735_v6, %v8031_v7 }
 0x2e8   : > { %v4044_v0 = vpop.f32.mrf.mxu2 }
 0x2e9   : > { %v5353_v22 = vadd.f32 %v5352_v21, %v5322_v20  ;;  %v4084_v43 = vadd.f32 %v4044_v0, %v3770_v29 }
 0x2ea   : > { %v4725_v1 = vpop.f32.mrf.mxu3 }
 0x2eb   : > { %v4765_v52 = vadd.f32 %v4725_v1, %v4084_v43 }
 0x2ed   : > { %v5190_v11 = vadd.f32 %v5150_v30, %v4765_v52  ;;  %v5155_v50 = vpop.f32.mrf.mxu0 }
 0x2ee   : > { %v3738_v37 = vpop.f32.mrf.mxu1 }
 0x2ef   : > { %v6248_v46 = vpack.c.bf16 %v5190_v11, %v5189_v44  ;;  %v5285_v57 = vadd.f32 %v5284_v17, %v5190_v11  ;;  %v5323_v24 = vmul.f32 %v5190_v11, %v5190_v11  ;;  %v3773_v13 = vadd.f32 %v3738_v37, %v8341_v53 }
 0x2f0   : > { %v4047_v51 = vpop.f32.mrf.mxu2 }
 0x2f1   : > { %6287 = vst [vmem:[%s8094_s30 + $0x68] sm:$0xff] %v6248_v46   ;;  %v5354_v9 = vadd.f32 %v5353_v22, %v5323_v24  ;;  %v4085_v63 = vadd.f32 %v4047_v51, %v3771_v25 }
 0x2f2   : > { %v4728_v61 = vpop.f32.mrf.mxu3 }
 0x2f3   : > { %v4766_v58 = vadd.f32 %v4728_v61, %v4085_v63 }
 0x2f5   : > { %v5191_v38 = vadd.f32 %v5153_v10, %v4766_v58  ;;  %v5158_v23 = vpop.f32.mrf.mxu0 }
 0x2f6   : > { %v3740_v18 = vpop.f32.mrf.mxu1 }
 0x2f7   : > { %v5286_v35 = vadd.f32 %v5285_v57, %v5191_v38  ;;  %v5324_v8 = vmul.f32 %v5191_v38, %v5191_v38  ;;  %v3774_v42 = vadd.f32 %v3740_v18, %v8342_v32 }
 0x2f8   : > { %v4049_v48 = vpop.f32.mrf.mxu2 }
 0x2f9   : > { %v5355_v45 = vadd.f32 %v5354_v9, %v5324_v8  ;;  %v4086_v31 = vadd.f32 %v4049_v48, %v3772_v28 }
 0x2fa   : > { %v4730_v12 = vpop.f32.mrf.mxu3 }
 0x2fb   : > { %v4767_v59 = vadd.f32 %v4730_v12, %v4086_v31 }
 0x2fd   : > { %v5192_v33 = vadd.f32 %v5155_v50, %v4767_v59  ;;  %v5160_v26 = vpop.f32.mrf.mxu0 }
 0x2ff   : > { %v6253_v60 = vpack.c.bf16 %v5192_v33, %v5191_v38  ;;  %v5287_v55 = vadd.f32 %v5286_v35, %v5192_v33  ;;  %v5325_v56 = vmul.f32 %v5192_v33, %v5192_v33 }
 0x300   : > { %v4052_v2 = vpop.f32.mrf.mxu2 }
 0x301   : > { %6288 = vst [vmem:[%s8094_s30 + $0x70] sm:$0xff] %v6253_v60   ;;  %v5356_v27 = vadd.f32 %v5355_v45, %v5325_v56  ;;  %v4087_v16 = vadd.f32 %v4052_v2, %v3773_v13 }
 0x302   : > { %v4733_v4 = vpop.f32.mrf.mxu3 }
 0x303   : > { %v4768_v7 = vadd.f32 %v4733_v4, %v4087_v16 }
 0x305   : > { %v5193_v40 = vadd.f32 %v5158_v23, %v4768_v7 }
 0x307   : > { %v5288_v19 = vadd.f32 %v5287_v55, %v5193_v40  ;;  %v5326_v49 = vmul.f32 %v5193_v40, %v5193_v40 }
 0x308   : > { %v4054_v15 = vpop.f32.mrf.mxu2 }
 0x309   : > { %v5357_v36 = vadd.f32 %v5356_v27, %v5326_v49  ;;  %v4088_v34 = vadd.f32 %v4054_v15, %v3774_v42 }
 0x30a   : > { %v4735_v47 = vpop.f32.mrf.mxu3 }
 0x30b   : > { %v4769_v3 = vadd.f32 %v4735_v47, %v4088_v34 }
 0x30d   : > { %v5194_v5 = vadd.f32 %v5160_v26, %v4769_v3 }
 0x30f   : > { %v6258_v21 = vpack.c.bf16 %v5194_v5, %v5193_v40  ;;  %v5289_v54 = vadd.f32 %v5288_v19, %v5194_v5  ;;  %v5327_v39 = vmul.f32 %v5194_v5, %v5194_v5 }
 0x311   : > { %6289 = vst [vmem:[%s8094_s30 + $0x78] sm:$0xff] %v6258_v21   ;;  %v5290_v41 = vrot.slane %v5289_v54, 4  ;;  %v5358_v30 = vadd.f32 %v5357_v36, %v5327_v39 }
 0x313   : > { %v5291_v44 = vadd.f32 %v5290_v41, %v5289_v54  ;;  %v5359_v62 = vrot.slane %v5358_v30, 4 }
 0x315   : > { %v5292_v17 = vrot.slane %v5291_v44, 2  ;;  %v5360_v20 = vadd.f32 %v5359_v62, %v5358_v30 }
 0x317   : > { %v5293_v29 = vadd.f32 %v5292_v17, %v5291_v44  ;;  %v5361_v0 = vrot.slane %v5360_v20, 2 }
 0x319   : > { %v5294_v22 = vrot.slane %v5293_v29, 1  ;;  %v5362_v43 = vadd.f32 %v5361_v0, %v5360_v20 }
 0x31b   : > { %v5363_v1 = vrot.slane %v5362_v43, 1  ;;  %v5295_v52 = vadd.f32 %v5294_v22, %v5293_v29 }
 0x31d   : > { %v5364_v11 = vadd.f32 %v5363_v1, %v5362_v43 }
 0x31f   : > { %v5366_v10 = vsel %vm817_vm6, %v5295_v52, %v5364_v11 }
 0x320   : > { %5367 = vst [vmem:[%s235_s8] sm:$0x3] %v5366_v10 }
 0x321 PF: > { %s16_s18 = sadd.s32 1, %s6364_s18  }
 0x322   : > { %p13_p4 = scmp.ge.s32.totalorder %s16_s18, 4  }
 0x324   :  { %15 = sbr.rel (!%p13_p4) target bundleno = 1 (0x1), region = 80 }

// kernel: double_conv.3
= control target key start
LH: loop header
LB: loop body
LE: loop exit
PB: predicated region body
PF: predicated region fallthrough
CT: control target
= control target key end

     0   :  { %s6155_s18 = smov 0   ;;  %s7981_s0 = inlined_call_operand.vmem [shape: bf16[2,16,16,128], index: 0, kind: input, shape index: {}]   ;;  %s7982_s1 = inlined_call_operand.vmem [shape: bf16[1152,128], index: 1, kind: input, shape index: {}]   ;;  %s7983_s2 = inlined_call_operand.vmem [shape: f32[1,128], index: 2, kind: input, shape index: {}]   ;;  %s7984_s3 = inlined_call_operand.vmem [shape: f32[2,128], index: 3, kind: input, shape index: {}]   ;;  %s7985_s4 = inlined_call_operand.vmem [shape: bf16[2,16,16,128], index: 4, kind: output, shape index: {0}]   ;;  %s7986_s5 = inlined_call_operand.vmem [shape: f32[2,2,128], index: 5, kind: output, shape index: {1}]  }
   0x1 LB: > { %s5291_s19 = sadd.s32 4294967295, %s6122_s18   ;;  %p5295_p0 = scmp.ge.s32.totalorder %s6122_s18, 1  ;;  %s6122_s18 = sphi %s6155_s18, %s16_s18  }
   0x2   : > { %p190_p1 = scmp.lt.s32.totalorder %s6122_s18, 3 }
   0x4   : > { %p191_p2 = pnand %p5295_p0, %p190_p1 }
   0x6   : > { %194 = sbr.rel (%p191_p2) target bundleno = 801 (0x321), region = 36 }
   0xb   : > { %v5856_v0 = vld [vmem:[%s7982_s1 + $0x38] sm:$0xff]  ;;  %p222_p3 = scmp.lt.s32.totalorder %s5291_s19, 1  ;;  %v6124_v1 = vmov 0   ;;  %v5855_v2 = vld [vmem:[%s7982_s1 + $0x30] sm:$0xff]  ;;  %vm323_vm0 = vsmask.f32 256 }
   0xc   : > { %281 = vst [vmem:[#allocation2 + $0x30] sm:$0xf] %v6124_v1  ;;  %6048 = vmatpush.bf16.msra.mxu1 %v5856_v0  ;;  %6049 = vmatpush.bf16.msra.mxu2 %v5856_v0  ;;  %v5854_v3 = vld [vmem:[%s7982_s1 + $0x28] sm:$0xff]  ;;  %vm647_vm1 = vcmask 1043456   ;;  %vm324_vm2 = vsmask.f32 4368 }
   0xd   : > { %s8041_s19 = smov (!%p222_p3, %s5291_s19), 1  ;;  %282 = vst [vmem:[#allocation2 + $0x34] sm:$0xf] %v6124_v1  ;;  %6050 = vmatpush.bf16.msra.mxu3 %v5856_v0  ;;  %960 = vmatpush.bf16.msra.mxu0 %v5856_v0  ;;  %vm648_vm3 = vsmask.f32 7938  ;;  %vm6193_vm4 = vmor %vm323_vm0, %vm324_vm2  ;;  %v5853_v13 = vld [vmem:[%s7982_s1 + $0x20] sm:$0xff] }
   0xe   : > { %s5831_s25 = sshll.u32 %s8041_s19, 7  ;;  %269 = vst [vmem:[#allocation2] sm:$0xf] %v6124_v1  ;;  %vm6205_vm5 = vmand %vm647_vm1, %vm648_vm3  ;;  %v5852_v21 = vld [vmem:[%s7982_s1 + $0x18] sm:$0xff]  ;;  %v5851_v22 = vld [vmem:[%s7982_s1 + $0x10] sm:$0xff]  ;;  %vm654_vm6 = vcmask 1040384  }
   0xf   : > { %s6183_s28 = scalar_lea.vmem %s7981_s0, %s5831_s25  ;;  %270 = vst [vmem:[#allocation2 + $0x4] sm:$0xf] %v6124_v1  ;;  %v5850_v23 = vld [vmem:[%s7982_s1 + $0x8] sm:$0xff]  ;;  %v5849_v24 = vld [vmem:[%s7982_s1] sm:$0xff]  ;;  %v5872_v31 = vld [vmem:[%s7982_s1 + $0xb8] sm:$0xff]  ;;  %vm1829_vm11 = vcmask 1042432   ;;  %s7775_s17 = scalar_lea.vmem %s7985_s4, %s5831_s25 }
  0x10   : > { %6051 = vmatpush.bf16.msra.mxu1 %v5855_v2  ;;  %6052 = vmatpush.bf16.msra.mxu2 %v5855_v2  ;;  %v243_v4 = vld [vmem:[%s6183_s28 + $0x18] sm:$0xf]  ;;  %v244_v5 = vld [vmem:[%s6183_s28 + $0x1c] sm:$0xf]  ;;  %271 = vst [vmem:[#allocation2 + $0x8] sm:$0x1] %v6124_v1  ;;  %vm6572_vm7 = vmand %vm654_vm6, %vm323_vm0 }
  0x11   : > { %6053 = vmatpush.bf16.msra.mxu3 %v5855_v2  ;;  %961 = vmatpush.bf16.msra.mxu0 %v5855_v2  ;;  %v378_v6 = vshrl.u32 %v243_v4, 16  ;;  %v381_v7 = vshll.u32 %v243_v4, 16  ;;  %v386_v8 = vshrl.u32 %v244_v5, 16  ;;  %v389_v9 = vshll.u32 %v244_v5, 16  ;;  %272 = vst [vmem:[#allocation2 + $0xc] sm:$0xf] %v6124_v1 }
  0x12   : > { %273 = vst [vmem:[#allocation2 + $0x10] sm:$0xf] %v6124_v1  ;;  %v251_v26 = vld [vmem:[%s6183_s28 + $0x38] sm:$0xf]  ;;  %v252_v27 = vld [vmem:[%s6183_s28 + $0x3c] sm:$0xf] }
  0x13   : > { %v380_v11 = vrot.slane %v378_v6, 7  ;;  %v6197_v12 = vrot.slane %v386_v8, 7  ;;  %274 = vst [vmem:[#allocation2 + $0x14] sm:$0x1] %v6124_v1  ;;  %v673_v15 = vld [vmem:[#allocation2 + $0x30] sm:$0xf] }
  0x14   : > { %6054 = vmatpush.bf16.msra.mxu1 %v5854_v3  ;;  %6055 = vmatpush.bf16.msra.mxu2 %v5854_v3  ;;  %275 = vst [vmem:[#allocation2 + $0x18] sm:$0xf] %v6124_v1  ;;  %v446_v28 = vshrl.u32 %v251_v26, 16  ;;  %v6255_v29 = vld [vmem:[%s6183_s28 + $0x58] sm:$0xf]  ;;  %v454_v34 = vshrl.u32 %v252_v27, 16 }
  0x15   : > { %6056 = vmatpush.bf16.msra.mxu3 %v5854_v3  ;;  %962 = vmatpush.bf16.msra.mxu0 %v5854_v3  ;;  %v383_v16 = vor.u32 %v381_v7, %v380_v11  ;;  %v384_v17 = vrot.slane %v380_v11, 4  ;;  %v391_v18 = vor.u32 %v389_v9, %v6197_v12  ;;  %276 = vst [vmem:[#allocation2 + $0x1c] sm:$0xf] %v6124_v1  ;;  %v260_v30 = vld [vmem:[%s6183_s28 + $0x5c] sm:$0xf]  ;;  %v514_v37 = vshrl.u32 %v6255_v29, 16 }
  0x16   : > { %277 = vst [vmem:[#allocation2 + $0x20] sm:$0x1] %v6124_v1  ;;  %v5833_v32 = vld [vmem:[#allocation2] sm:$0xff]  ;;  %v5896_v33 = vld [vmem:[%s7982_s1 + $0xf8] sm:$0xff]  ;;  %v5871_v38 = vld [vmem:[%s7982_s1 + $0xb0] sm:$0xff]  ;;  %v6281_v40 = vrot.slane %v446_v28, 7 }
  0x17   : > { %v392_v19 = vsel %vm6193_vm4, %v384_v17, %v391_v18  ;;  %v674_v20 = vsel %vm6205_vm5, %v383_v16, %v673_v15  ;;  %278 = vst [vmem:[#allocation2 + $0x24] sm:$0xf] %v6124_v1  ;;  %v5864_v35 = vld [vmem:[%s7982_s1 + $0x78] sm:$0xff]  ;;  %v6270_v36 = vld [vmem:[%s6183_s28 + $0x20] sm:$0xf]  ;;  %v522_v41 = vshrl.u32 %v260_v30, 16 }
  0x18   : > { %6057 = vmatpush.bf16.msra.mxu1 %v5853_v13  ;;  %6058 = vmatpush.bf16.msra.mxu2 %v5853_v13  ;;  %675 = vst [vmem:[#allocation2 + $0x30] sm:$0xf] %v674_v20  ;;  %v5904_v39 = vld [vmem:[%s7982_s1 + $0x138] sm:$0xff]  ;;  %v5895_v42 = vld [vmem:[%s7982_s1 + $0xf0] sm:$0xff]  ;;  %v449_v44 = vshll.u32 %v251_v26, 16  ;;  %v395_v45 = vshrl.u32 %v6270_v36, 16 }
  0x19   : > { %6059 = vmatpush.bf16.msra.mxu3 %v5853_v13  ;;  %963 = vmatpush.bf16.msra.mxu0 %v5853_v13  ;;  %676 = vst [vmem:[#allocation2 + $0x34] sm:$0xf] %v392_v19  ;;  %v5863_v43 = vld [vmem:[%s7982_s1 + $0x70] sm:$0xff]  ;;  %v6292_v46 = vld [vmem:[%s6183_s28 + $0x40] sm:$0xf]  ;;  %v6295_v47 = vrot.slane %v454_v34, 7 }
  0x1a   : > { %279 = vst [vmem:[#allocation2 + $0x28] sm:$0xf] %v6124_v1  ;;  %v457_v48 = vshll.u32 %v252_v27, 16  ;;  %v246_v49 = vld [vmem:[%s6183_s28 + $0x24] sm:$0xf]  ;;  %v6299_v50 = vrot.slane %v514_v37, 7  ;;  %v6323_v62 = vor.u32 %v449_v44, %v6281_v40 }
  0x1b   : > { %280 = vst [vmem:[#allocation2 + $0x2c] sm:$0x1] %v6124_v1  ;;  %v6302_v51 = vld [vmem:[%s6183_s28 + $0x44] sm:$0xf]  ;;  %v463_v52 = vshrl.u32 %v6292_v46, 16  ;;  %v6306_v53 = vrot.slane %v522_v41, 7 }
  0x1c   : > { %6060 = vmatpush.bf16.msra.mxu1 %v5852_v21  ;;  %6061 = vmatpush.bf16.msra.mxu2 %v5852_v21  ;;  %283 = vst [vmem:[#allocation2 + $0x38] sm:$0x1] %v6124_v1  ;;  %v525_v54 = vshll.u32 %v260_v30, 16  ;;  %v6309_v55 = vld [vmem:[%s6183_s28 + $0x60] sm:$0xf]  ;;  %v6312_v56 = vrot.slane %v395_v45, 7  ;;  %v459_v3 = vor.u32 %v457_v48, %v6295_v47 }
  0x1d   : > { %6062 = vmatpush.bf16.msra.mxu3 %v5852_v21  ;;  %964 = vmatpush.bf16.msra.mxu0 %v5852_v21  ;;  %284 = vst [vmem:[#allocation2 + $0x3c] sm:$0xf] %v6124_v1  ;;  %v403_v57 = vshrl.u32 %v246_v49, 16  ;;  %v6315_v58 = vld [vmem:[%s6183_s28 + $0x64] sm:$0xf]  ;;  %v452_v59 = vrot.slane %v6281_v40, 4 }
  0x1e   : > { %285 = vst [vmem:[#allocation2 + $0x40] sm:$0xf] %v6124_v1  ;;  %v517_v60 = vshll.u32 %v6255_v29, 16  ;;  %v471_v61 = vshrl.u32 %v6302_v51, 16  ;;  %v6325_v63 = vrot.slane %v463_v52, 7  ;;  %v531_v0 = vshrl.u32 %v6309_v55, 16 }
  0x1f   : > { %286 = vst [vmem:[#allocation2 + $0x44] sm:$0x1] %v6124_v1  ;;  %v6329_v2 = vld [vmem:[%s6183_s28] sm:$0xf]  ;;  %v520_v4 = vrot.slane %v6299_v50, 4  ;;  %v527_v5 = vor.u32 %v525_v54, %v6306_v53  ;;  %v539_v6 = vshrl.u32 %v6315_v58, 16 }
  0x20   : > { %6063 = vmatpush.bf16.msra.mxu1 %v5851_v22  ;;  %6064 = vmatpush.bf16.msra.mxu2 %v5851_v22  ;;  %287 = vst [vmem:[#allocation2 + $0x48] sm:$0xf] %v6124_v1  ;;  %v5837_v25 = vld [vmem:[#allocation2 + $0x30] sm:$0xff]  ;;  %v6337_v7 = vld [vmem:[%s6183_s28 + $0x4] sm:$0xf]  ;;  %v398_v9 = vshll.u32 %v6270_v36, 16 }
  0x21   : > { %6065 = vmatpush.bf16.msra.mxu3 %v5851_v22  ;;  %965 = vmatpush.bf16.msra.mxu0 %v5851_v22  ;;  %288 = vst [vmem:[#allocation2 + $0x4c] sm:$0xf] %v6124_v1  ;;  %v401_v11 = vrot.slane %v6312_v56, 4  ;;  %v6342_v13 = vrot.slane %v403_v57, 7  ;;  %v406_v15 = vshll.u32 %v246_v49, 16  ;;  %v466_v16 = vshll.u32 %v6292_v46, 16 }
  0x22   : > { %289 = vst [vmem:[#allocation2 + $0x50] sm:$0x1] %v6124_v1  ;;  %v474_v17 = vshll.u32 %v6302_v51, 16  ;;  %v327_v18 = vshrl.u32 %v6329_v2, 16  ;;  %v335_v19 = vshrl.u32 %v6337_v7, 16  ;;  %v469_v21 = vrot.slane %v6325_v63, 4 }
  0x23   : > { %290 = vst [vmem:[#allocation2 + $0x54] sm:$0xf] %v6124_v1  ;;  %v6351_v22 = vrot.slane %v471_v61, 7  ;;  %v6360_v27 = vrot.slane %v539_v6, 7  ;;  %v542_v28 = vshll.u32 %v6315_v58, 16  ;;  %v400_v30 = vor.u32 %v398_v9, %v6312_v56  ;;  %v5894_v34 = vld [vmem:[%s7982_s1 + $0xe8] sm:$0xff] }
  0x24   : > { %6066 = vmatpush.bf16.msra.mxu1 %v5850_v23  ;;  %6067 = vmatpush.bf16.msra.mxu2 %v5850_v23  ;;  %291 = vst [vmem:[#allocation2 + $0x58] sm:$0xf] %v6124_v1  ;;  %v6358_v26 = vld [vmem:[#allocation2 + $0x3c] sm:$0xf]  ;;  %v6364_v29 = vld [vmem:[%s6183_s28 + $0x28] sm:$0xf]  ;;  %v468_v44 = vor.u32 %v466_v16, %v6325_v63 }
  0x25   : > { %6068 = vmatpush.bf16.msra.mxu3 %v5850_v23  ;;  %966 = vmatpush.bf16.msra.mxu0 %v5850_v23  ;;  %292 = vst [vmem:[#allocation2 + $0x5c] sm:$0x1] %v6124_v1  ;;  %v6353_v23 = vrot.slane %v531_v0, 7  ;;  %v338_v40 = vshll.u32 %v6337_v7, 16  ;;  %v5862_v41 = vld [vmem:[%s7982_s1 + $0x68] sm:$0xff]  ;;  %v5869_v45 = vld [vmem:[%s7982_s1 + $0xa0] sm:$0xff]  ;;  %v681_v56 = vsel %vm6205_vm5, %v400_v30, %v6358_v26  ;;  %v544_v61 = vor.u32 %v542_v28, %v6360_v27 }
  0x26   : > { %293 = vst [vmem:[#allocation2 + $0x60] sm:$0xf] %v6124_v1  ;;  %v5893_v46 = vld [vmem:[%s7982_s1 + $0xe0] sm:$0xff]  ;;  %v248_v48 = vld [vmem:[%s6183_s28 + $0x2c] sm:$0xf]  ;;  %v412_v54 = vshrl.u32 %v6364_v29, 16 }
  0x27   : > { %294 = vst [vmem:[#allocation2 + $0x64] sm:$0xf] %v6124_v1  ;;  %v5902_v51 = vld [vmem:[%s7982_s1 + $0x128] sm:$0xff]  ;;  %v5861_v52 = vld [vmem:[%s7982_s1 + $0x60] sm:$0xff]  ;;  %v537_v57 = vrot.slane %v6353_v23, 4  ;;  %v423_v0 = vshll.u32 %v248_v48, 16 }
  0x28   : > { %6069 = vmatpush.bf16.msra.mxu1 %v5849_v24  ;;  %6070 = vmatpush.bf16.msra.mxu2 %v5849_v24  ;;  %295 = vst [vmem:[#allocation2 + $0x68] sm:$0x1] %v6124_v1  ;;  %v256_v6 = vld [vmem:[%s6183_s28 + $0x4c] sm:$0xf]  ;;  %vm1129_vm8 = vsmask.f32 3328 }
  0x29   : > { %6071 = vmatpush.bf16.msra.mxu3 %v5849_v24  ;;  %967 = vmatpush.bf16.msra.mxu0 %v5849_v24  ;;  %296 = vst [vmem:[#allocation2 + $0x6c] sm:$0xf] %v6124_v1  ;;  %v534_v24 = vshll.u32 %v6309_v55, 16  ;;  %v420_v55 = vshrl.u32 %v248_v48, 16  ;;  %v545_v63 = vsel %vm6193_vm4, %v537_v57, %v544_v61  ;;  %v264_v26 = vld [vmem:[%s6183_s28 + $0x6c] sm:$0xf] }
  0x2a   : > { %297 = vst [vmem:[#allocation2 + $0x70] sm:$0xf] %v6124_v1  ;;  %vm1130_vm9 = vsmask.f32 7440  ;;  %vm1830_vm12 = vcmask 1046532   ;;  %s5300_s25 = sshll.u32 %s8041_s19, 1 }
  0x2b   : > { %988 = vmatmul.bf16.vlgmr.msra.gmra.mxu1 %v5837_v25  ;;  %298 = vst [vmem:[#allocation2 + $0x74] sm:$0x1] %v6124_v1  ;;  %v519_v25 = vor.u32 %v517_v60, %v6299_v50  ;;  %v476_v50 = vor.u32 %v474_v17, %v6351_v22  ;;  %v536_v60 = vor.u32 %v534_v24, %v6353_v23  ;;  %v491_v23 = vshll.u32 %v256_v6, 16  ;;  %vm6591_vm10 = vmor %vm1129_vm8, %vm1130_vm9  ;;  %s235_s21 = scalar_lea.vmem %s7986_s5, %s5300_s25 }
  0x2c   : > { %299 = vst [vmem:[#allocation2 + $0x78] sm:$0xf] %v6124_v1  ;;  %2072 = vmatpush.bf16.msrb.mxu2 %v5872_v31  ;;  %968 = vmatmul.bf16.vlgmr.msra.gmra.mxu0 %v5833_v32  ;;  %v408_v31 = vor.u32 %v406_v15, %v6342_v13  ;;  %v5870_v32 = vld [vmem:[%s7982_s1 + $0xa8] sm:$0xff]  ;;  %vm6620_vm13 = vmor %vm1829_vm11, %vm1830_vm12 }
  0x2d   : > { %300 = vst [vmem:[#allocation2 + $0x7c] sm:$0xf] %v6124_v1  ;;  %2385 = vmatpush.bf16.msrb.mxu3 %v5896_v33  ;;  %1644 = vmatpush.bf16.msrb.mxu1 %v5864_v35  ;;  %v701_v8 = vld [vmem:[#allocation2 + $0x60] sm:$0xf]  ;;  %v330_v33 = vshll.u32 %v6329_v2, 16  ;;  %v5903_v35 = vld [vmem:[%s7982_s1 + $0x130] sm:$0xff] }
  0x2e   : > { %301 = vst [vmem:[#allocation2 + $0x80] sm:$0x1] %v6124_v1  ;;  %3066 = vmatpush.bf16.msrb.mxu0 %v5904_v39  ;;  %v702_v36 = vsel %vm6205_vm5, %v6323_v62, %v701_v8  ;;  %v6387_v39 = vrot.slane %v335_v19, 7  ;;  %v414_v62 = vrot.slane %v412_v54, 7  ;;  %v255_v2 = vld [vmem:[%s6183_s28 + $0x48] sm:$0xf]  ;;  %v477_v8 = vsel %vm6193_vm4, %v469_v21, %v476_v50 }
  0x2f   : > { %302 = vst [vmem:[#allocation2 + $0x84] sm:$0xf] %v6124_v1  ;;  %v480_v7 = vshrl.u32 %v255_v2, 16  ;;  %v650_v15 = vld [vmem:[#allocation2 + $0xc] sm:$0xf]  ;;  %v483_v16 = vshll.u32 %v255_v2, 16 }
  0x30   : > { %303 = vst [vmem:[#allocation2 + $0x88] sm:$0xf] %v6124_v1  ;;  %2073 = vmatpush.bf16.msrb.mxu2 %v5871_v38  ;;  %v6383_v37 = vld [vmem:[#allocation2 + $0x6c] sm:$0xf]  ;;  %v6385_v38 = vrot.slane %v327_v18, 7  ;;  %v418_v17 = vrot.slane %v414_v62, 4 }
  0x31   : > { %304 = vst [vmem:[#allocation2 + $0x8c] sm:$0x1] %v6124_v1  ;;  %2386 = vmatpush.bf16.msrb.mxu3 %v5895_v42  ;;  %1645 = vmatpush.bf16.msrb.mxu1 %v5863_v43  ;;  %v460_v42 = vsel %vm6193_vm4, %v452_v59, %v459_v3  ;;  %v528_v43 = vsel %vm6193_vm4, %v520_v4, %v527_v5  ;;  %v415_v59 = vshll.u32 %v6364_v29, 16  ;;  %v6431_v5 = vrot.slane %v420_v55, 7  ;;  %v687_v18 = vld [vmem:[#allocation2 + $0x48] sm:$0xf] }
  0x32   : > { %305 = vst [vmem:[#allocation2 + $0x90] sm:$0xf] %v6124_v1  ;;  %3067 = vmatpush.bf16.msrb.mxu0 %v5903_v35  ;;  %v709_v3 = vsel %vm6205_vm5, %v468_v44, %v6383_v37  ;;  %v332_v4 = vor.u32 %v330_v33, %v6385_v38  ;;  %v333_v9 = vrot.slane %v6385_v38, 4  ;;  %v482_v19 = vrot.slane %v480_v7, 7  ;;  %v240_v55 = vld [vmem:[%s6183_s28 + $0xc] sm:$0xf] }
  0x33   : > { %306 = vst [vmem:[#allocation2 + $0x94] sm:$0xf] %v6124_v1  ;;  %v417_v24 = vor.u32 %v415_v59, %v414_v62  ;;  %v425_v29 = vor.u32 %v423_v0, %v6431_v5  ;;  %v556_v35 = vshrl.u32 %v264_v26, 16  ;;  %v355_v0 = vshll.u32 %v240_v55, 16  ;;  %v659_v2 = vld [vmem:[#allocation2 + $0x18] sm:$0xf] }
  0x34   : > { %307 = vst [vmem:[#allocation2 + $0x98] sm:$0x1] %v6124_v1  ;;  %2074 = vmatpush.bf16.msrb.mxu2 %v5870_v32  ;;  %v651_v28 = vsel %vm6205_vm5, %v332_v4, %v650_v15  ;;  %v485_v33 = vor.u32 %v483_v16, %v482_v19  ;;  %v5901_v7 = vld [vmem:[%s7982_s1 + $0x120] sm:$0xff]  ;;  %v5867_v15 = vld [vmem:[%s7982_s1 + $0x90] sm:$0xff] }
  0x35   : > { %308 = vst [vmem:[#allocation2 + $0x9c] sm:$0xf] %v6124_v1  ;;  %2387 = vmatpush.bf16.msrb.mxu3 %v5894_v34  ;;  %1646 = vmatpush.bf16.msrb.mxu1 %v5862_v41  ;;  %v6456_v44 = vrot.slane %v556_v35, 7  ;;  %v426_v48 = vsel %vm6193_vm4, %v418_v17, %v425_v29  ;;  %v5891_v17 = vld [vmem:[%s7982_s1 + $0xd0] sm:$0xff] }
  0x36   : > { %309 = vst [vmem:[#allocation2 + $0xa0] sm:$0xf] %v6124_v1  ;;  %3068 = vmatpush.bf16.msrb.mxu0 %v5902_v51  ;;  %v239_v51 = vld [vmem:[%s6183_s28 + $0x8] sm:$0xf]  ;;  %v258_v35 = vld [vmem:[%s6183_s28 + $0x54] sm:$0xf] }
  0x37   : > { %310 = vst [vmem:[#allocation2 + $0xa4] sm:$0x1] %v6124_v1  ;;  %v347_v59 = vshll.u32 %v239_v51, 16 }
  0x38   : > { %311 = vst [vmem:[#allocation2 + $0xa8] sm:$0xf] %v6124_v1  ;;  %2075 = vmatpush.bf16.msrb.mxu2 %v5869_v45 }
  0x39   : > { %312 = vst [vmem:[#allocation2 + $0xac] sm:$0xf] %v6124_v1  ;;  %v729_v20 = vld [vmem:[#allocation2 + $0x90] sm:$0xf]  ;;  %2388 = vmatpush.bf16.msrb.mxu3 %v5893_v46  ;;  %1647 = vmatpush.bf16.msrb.mxu1 %v5861_v52 }
  0x3a   : > { %313 = vst [vmem:[#allocation2 + $0xb0] sm:$0x1] %v6124_v1  ;;  %v730_v49 = vsel %vm6205_vm5, %v519_v25, %v729_v20  ;;  %v488_v20 = vshrl.u32 %v256_v6, 16  ;;  %v263_v25 = vld [vmem:[%s6183_s28 + $0x68] sm:$0xf]  ;;  %v5892_v6 = vld [vmem:[%s7982_s1 + $0xd8] sm:$0xff]  ;;  %3069 = vmatpush.bf16.msrb.mxu0 %v5901_v7 }
  0x3b   : > { %314 = vst [vmem:[#allocation2 + $0xb4] sm:$0xf] %v6124_v1  ;;  %v548_v32 = vshrl.u32 %v263_v25, 16  ;;  %v551_v34 = vshll.u32 %v263_v25, 16 }
  0x3c   : > { %315 = vst [vmem:[#allocation2 + $0xb8] sm:$0xf] %v6124_v1  ;;  %v736_v58 = vld [vmem:[#allocation2 + $0x9c] sm:$0xf]  ;;  %v6449_v30 = vrot.slane %v488_v20, 7 }
  0x3d   : > { %316 = vst [vmem:[#allocation2 + $0xbc] sm:$0x1] %v6124_v1  ;;  %v737_v21 = vsel %vm6205_vm5, %v536_v60, %v736_v58  ;;  %v5868_v58 = vld [vmem:[%s7982_s1 + $0x98] sm:$0xff]  ;;  %v352_v60 = vshrl.u32 %v240_v55, 16  ;;  %2389 = vmatpush.bf16.msrb.mxu3 %v5892_v6  ;;  %v722_v55 = vld [vmem:[#allocation2 + $0x84] sm:$0xf] }
  0x3e   : > { %317 = vst [vmem:[#allocation2 + $0xc0] sm:$0xf] %v6124_v1  ;;  %v493_v41 = vor.u32 %v491_v23, %v6449_v30  ;;  %2076 = vmatpush.bf16.msrb.mxu2 %v5868_v58  ;;  %v249_v23 = vld [vmem:[%s6183_s28 + $0x30] sm:$0xf] }
  0x3f   : > { %318 = vst [vmem:[#allocation2 + $0xc4] sm:$0xf] %v6124_v1  ;;  %v743_v45 = vld [vmem:[#allocation2 + $0xa8] sm:$0xf]  ;;  %v6474_v4 = vrot.slane %v352_v60, 7  ;;  %v429_v25 = vshrl.u32 %v249_v23, 16 }
  0x40   : > { %319 = vst [vmem:[#allocation2 + $0xc8] sm:$0x1] %v6124_v1 }
  0x41   : > { %320 = vst [vmem:[#allocation2 + $0xcc] sm:$0xf] %v6124_v1  ;;  %v357_v16 = vor.u32 %v355_v0, %v6474_v4  ;;  %2390 = vmatpush.bf16.msrb.mxu3 %v5891_v17 }
  0x42   : > { %321 = vst [vmem:[#allocation2 + $0xd0] sm:$0xf] %v6124_v1  ;;  %2077 = vmatpush.bf16.msrb.mxu2 %v5867_v15 }
  0x43   : > { %322 = vst [vmem:[#allocation2 + $0xd4] sm:$0x1] %v6124_v1  ;;  %v409_v1 = vsel %vm6193_vm4, %v401_v11, %v408_v31  ;;  %v340_v11 = vor.u32 %v338_v40, %v6387_v39  ;;  %v715_v31 = vld [vmem:[#allocation2 + $0x78] sm:$0xf]  ;;  %v486_v40 = vrot.slane %v482_v19, 4  ;;  %v5859_v19 = vld [vmem:[%s7982_s1 + $0x50] sm:$0xff] }
  0x44   : > { %703 = vst [vmem:[#allocation2 + $0x60] sm:$0xf] %v702_v36  ;;  %v559_v36 = vshll.u32 %v264_v26, 16  ;;  %v716_v52 = vsel %vm6205_vm5, %v485_v33, %v715_v31  ;;  %v432_v26 = vshll.u32 %v249_v23, 16  ;;  %v431_v31 = vrot.slane %v429_v25, 7 }
  0x45   : > { %704 = vst [vmem:[#allocation2 + $0x64] sm:$0xf] %v460_v42  ;;  %v341_v38 = vsel %vm6193_vm4, %v333_v9, %v340_v11  ;;  %v550_v42 = vrot.slane %v548_v32, 7  ;;  %v494_v57 = vsel %vm6193_vm4, %v486_v40, %v493_v41  ;;  %v5860_v11 = vld [vmem:[%s7982_s1 + $0x58] sm:$0xff]  ;;  %v257_v33 = vld [vmem:[%s6183_s28 + $0x50] sm:$0xf] }
  0x46   : > { %731 = vst [vmem:[#allocation2 + $0x90] sm:$0xf] %v730_v49  ;;  %v561_v54 = vor.u32 %v559_v36, %v6456_v44  ;;  %1648 = vmatpush.bf16.msrb.mxu1 %v5860_v11  ;;  %v497_v36 = vshrl.u32 %v257_v33, 16  ;;  %v434_v40 = vor.u32 %v432_v26, %v431_v31  ;;  %v435_v41 = vrot.slane %v431_v31, 4  ;;  %v5865_v31 = vld [vmem:[%s7982_s1 + $0x80] sm:$0xff] }
  0x47   : > { %732 = vst [vmem:[#allocation2 + $0x94] sm:$0xf] %v528_v43  ;;  %v688_v43 = vsel %vm6205_vm5, %v417_v24, %v687_v18  ;;  %v553_v49 = vor.u32 %v551_v34, %v550_v42  ;;  %v554_v50 = vrot.slane %v550_v42, 4  ;;  %v5900_v18 = vld [vmem:[%s7982_s1 + $0x118] sm:$0xff]  ;;  %v694_v34 = vld [vmem:[#allocation2 + $0x54] sm:$0xf] }
  0x48   : > { %682 = vst [vmem:[#allocation2 + $0x3c] sm:$0xf] %v681_v56  ;;  %3070 = vmatpush.bf16.msrb.mxu0 %v5900_v18 }
  0x49   : > { %683 = vst [vmem:[#allocation2 + $0x40] sm:$0xf] %v409_v1  ;;  %v344_v1 = vshrl.u32 %v239_v51, 16  ;;  %v744_v61 = vsel %vm6205_vm5, %v553_v49, %v743_v45  ;;  %v499_v45 = vrot.slane %v497_v36, 7  ;;  %v266_v49 = vld [vmem:[%s6183_s28 + $0x74] sm:$0xf] }
  0x4a   : > { %710 = vst [vmem:[#allocation2 + $0x6c] sm:$0xf] %v709_v3  ;;  %v562_v3 = vsel %vm6193_vm4, %v554_v50, %v561_v54  ;;  %1649 = vmatpush.bf16.msrb.mxu1 %v5859_v19  ;;  %v695_v54 = vsel %vm6205_vm5, %v434_v40, %v694_v34  ;;  %v576_v0 = vshll.u32 %v266_v49, 16  ;;  %v5898_v36 = vld [vmem:[%s7982_s1 + $0x108] sm:$0xff]  ;;  %v5857_v40 = vld [vmem:[%s7982_s1 + $0x40] sm:$0xff] }
  0x4b   : > { %711 = vst [vmem:[#allocation2 + $0x70] sm:$0xf] %v477_v8  ;;  %v346_v62 = vrot.slane %v344_v1, 7 }
  0x4c   : > { %v5841_v37 = vld [vmem:[#allocation2 + $0x60] sm:$0xff]  ;;  %738 = vst [vmem:[#allocation2 + $0x9c] sm:$0xf] %v737_v21 }
  0x4d   : > { %739 = vst [vmem:[#allocation2 + $0xa0] sm:$0xf] %v545_v63  ;;  %1008 = vmatmul.bf16.vlgmr.msra.gmra.mxu2 %v5841_v37  ;;  %v349_v8 = vor.u32 %v347_v59, %v346_v62  ;;  %v350_v9 = vrot.slane %v346_v62, 4  ;;  %v250_v63 = vld [vmem:[%s6183_s28 + $0x34] sm:$0xf]  ;;  %v500_v37 = vshll.u32 %v257_v33, 16 }
  0x4e   : > { %v5845_v46 = vld [vmem:[#allocation2 + $0x90] sm:$0xff]  ;;  %652 = vst [vmem:[#allocation2 + $0xc] sm:$0xf] %v651_v28  ;;  %v437_v28 = vshrl.u32 %v250_v63, 16  ;;  %v440_v29 = vshll.u32 %v250_v63, 16  ;;  %v503_v59 = vrot.slane %v499_v45, 4 }
  0x4f   : > { %653 = vst [vmem:[#allocation2 + $0x10] sm:$0xf] %v341_v38  ;;  %1028 = vmatmul.bf16.vlgmr.msra.gmra.mxu3 %v5845_v46  ;;  %v660_v20 = vsel %vm6205_vm5, %v349_v8, %v659_v2  ;;  %v358_v24 = vsel %vm6193_vm4, %v350_v9, %v357_v16  ;;  %v505_v46 = vshrl.u32 %v258_v35, 16  ;;  %v502_v58 = vor.u32 %v500_v37, %v499_v45  ;;  %v750_v2 = vld [vmem:[#allocation2 + $0xb4] sm:$0xf]  ;;  %v5866_v16 = vld [vmem:[%s7982_s1 + $0x88] sm:$0xff] }
  0x50   : > { %v5838_v56 = vld [vmem:[#allocation2 + $0x3c] sm:$0xff]  ;;  %689 = vst [vmem:[#allocation2 + $0x48] sm:$0xf] %v688_v43  ;;  %v6504_v32 = vrot.slane %v437_v28, 7  ;;  %v265_v43 = vld [vmem:[%s6183_s28 + $0x70] sm:$0xf]  ;;  %2078 = vmatpush.bf16.msrb.mxu2 %v5866_v16 }
  0x51   : > { %690 = vst [vmem:[#allocation2 + $0x4c] sm:$0xf] %v426_v48  ;;  %993 = vmatmul.bf16.gmra.mxu1 %v5838_v56  ;;  %v508_v48 = vshll.u32 %v258_v35, 16  ;;  %v565_v50 = vshrl.u32 %v265_v43, 16  ;;  %v568_v1 = vshll.u32 %v265_v43, 16  ;;  %v573_v56 = vshrl.u32 %v266_v49, 16 }
  0x52   : > { %717 = vst [vmem:[#allocation2 + $0x78] sm:$0xf] %v716_v52  ;;  %v5842_v38 = vld [vmem:[#allocation2 + $0x6c] sm:$0xff]  ;;  %v442_v42 = vor.u32 %v440_v29, %v6504_v32  ;;  %v6515_v60 = vrot.slane %v505_v46, 7  ;;  %v723_v6 = vsel %vm6205_vm5, %v502_v58, %v722_v55  ;;  %v242_v9 = vld [vmem:[%s6183_s28 + $0x14] sm:$0xf] }
  0x53   : > { %718 = vst [vmem:[#allocation2 + $0x7c] sm:$0xf] %v494_v57  ;;  %v6517_v62 = vrot.slane %v573_v56, 7  ;;  %v241_v8 = vld [vmem:[%s6183_s28 + $0x10] sm:$0xf]  ;;  %v369_v23 = vshrl.u32 %v242_v9, 16 }
  0x54   : > { %745 = vst [vmem:[#allocation2 + $0xa8] sm:$0xf] %v744_v61  ;;  %v5846_v51 = vld [vmem:[#allocation2 + $0x9c] sm:$0xff]  ;;  %v443_v52 = vsel %vm6193_vm4, %v435_v41, %v442_v42  ;;  %v567_v61 = vrot.slane %v565_v50, 7  ;;  %v361_v17 = vshrl.u32 %v241_v8, 16  ;;  %v372_v28 = vshll.u32 %v242_v9, 16  ;;  %2079 = vmatpush.bf16.msrb.mxu2 %v5865_v31 }
  0x55   : > { %746 = vst [vmem:[#allocation2 + $0xac] sm:$0xf] %v562_v3  ;;  %v510_v3 = vor.u32 %v508_v48, %v6515_v60  ;;  %v578_v15 = vor.u32 %v576_v0, %v6517_v62  ;;  %v666_v63 = vld [vmem:[#allocation2 + $0x24] sm:$0xf]  ;;  %v5858_v29 = vld [vmem:[%s7982_s1 + $0x48] sm:$0xff]  ;;  %v6546_v34 = vrot.slane %v369_v23, 7 }
  0x56   : > { %v5834_v21 = vld [vmem:[#allocation2 + $0xc] sm:$0xff]  ;;  %661 = vst [vmem:[#allocation2 + $0x18] sm:$0xf] %v660_v20  ;;  %v570_v7 = vor.u32 %v568_v1, %v567_v61  ;;  %v571_v11 = vrot.slane %v567_v61, 4  ;;  %v364_v20 = vshll.u32 %v241_v8, 16  ;;  %v363_v26 = vrot.slane %v361_v17, 7  ;;  %1650 = vmatpush.bf16.msrb.mxu1 %v5858_v29 }
  0x57   : > { %662 = vst [vmem:[#allocation2 + $0x1c] sm:$0xf] %v358_v24  ;;  %973 = vmatmul.bf16.gmra.mxu0 %v5834_v21  ;;  %v511_v18 = vsel %vm6193_vm4, %v503_v59, %v510_v3  ;;  %v5890_v21 = vld [vmem:[%s7982_s1 + $0xc8] sm:$0xff]  ;;  %v5899_v24 = vld [vmem:[%s7982_s1 + $0x110] sm:$0xff]  ;;  %v5889_v35 = vld [vmem:[%s7982_s1 + $0xc0] sm:$0xff]  ;;  %v374_v42 = vor.u32 %v372_v28, %v6546_v34  ;;  %v342_v45 = vrot.slane %v6387_v39, 4 }
  0x58   : > { %v5839_v57 = vld [vmem:[#allocation2 + $0x48] sm:$0xff]  ;;  %696 = vst [vmem:[#allocation2 + $0x54] sm:$0xf] %v695_v54  ;;  %v751_v19 = vsel %vm6205_vm5, %v570_v7, %v750_v2  ;;  %v579_v25 = vsel %vm6193_vm4, %v571_v11, %v578_v15  ;;  %2391 = vmatpush.bf16.msrb.mxu3 %v5890_v21  ;;  %3071 = vmatpush.bf16.msrb.mxu0 %v5899_v24  ;;  %v1081_v41 = vld [vmem:[#allocation2] sm:$0xf]  ;;  %v359_v15 = vrot.slane %v6474_v4, 4 }
  0x59   : > { %697 = vst [vmem:[#allocation2 + $0x58] sm:$0xf] %v443_v52  ;;  %v366_v37 = vor.u32 %v364_v20, %v363_v26  ;;  %v6558_v43 = vld [vmem:[#allocation2 + $0x4] sm:$0xf]  ;;  %v1133_v48 = vshrl.u32 %v1081_v41, 16  ;;  %v5936_v24 = vld [vmem:[%s7982_s1 + $0x1b8] sm:$0xff] }
  0x5a   : > { %724 = vst [vmem:[#allocation2 + $0x84] sm:$0xf] %v723_v6  ;;  %v5897_v50 = vld [vmem:[%s7982_s1 + $0x100] sm:$0xff]  ;;  %v1142_v52 = vshll.u32 %v6558_v43, 16  ;;  %v1146_v39 = vshrl.u32 %v6558_v43, 16  ;;  %1651 = vmatpush.bf16.msrb.mxu1 %v5857_v40  ;;  %v5843_v59 = vld [vmem:[#allocation2 + $0x78] sm:$0xff]  ;;  %3805 = vmatpush.bf16.msra.mxu2 %v5936_v24 }
  0x5b   : > { %725 = vst [vmem:[#allocation2 + $0x88] sm:$0xf] %v511_v18  ;;  %v667_v46 = vsel %vm6205_vm5, %v366_v37, %v666_v63  ;;  %v6576_v55 = vld [vmem:[#allocation2 + $0x8] sm:$0x1]  ;;  %v1135_v1 = vrot.slane %v1133_v48, 4  ;;  %v5944_v4 = vld [vmem:[%s7982_s1 + $0x1f8] sm:$0xff] }
  0x5c   : > { %752 = vst [vmem:[#allocation2 + $0xb4] sm:$0xf] %v751_v19  ;;  %2392 = vmatpush.bf16.msrb.mxu3 %v5889_v35  ;;  %3072 = vmatpush.bf16.msrb.mxu0 %v5898_v36  ;;  %v1148_v58 = vrot.slane %v1146_v39, 4  ;;  %v656_v61 = vld [vmem:[#allocation2 + $0x14] sm:$0x1]  ;;  %v1152_v2 = vshll.u32 %v6576_v55, 16 }
  0x5d   : > { %1013 = vmatmul.bf16.gmra.mxu2 %v5842_v38  ;;  %753 = vst [vmem:[#allocation2 + $0xb8] sm:$0xf] %v579_v25  ;;  %v367_v38 = vrot.slane %v363_v26, 4  ;;  %v657_v3 = vsel %vm6572_vm7, %v342_v45, %v656_v61  ;;  %v2506_v6 = vld [vmem:[#allocation2 + $0xc] sm:$0xf]  ;;  %v5912_v28 = vld [vmem:[%s7982_s1 + $0x178] sm:$0xff] }
  0x5e   : > { %v5835_v33 = vld [vmem:[#allocation2 + $0x18] sm:$0xff]  ;;  %668 = vst [vmem:[#allocation2 + $0x24] sm:$0xf] %v667_v46  ;;  %v5847_v7 = vld [vmem:[#allocation2 + $0xa8] sm:$0xff]  ;;  %v2507_v9 = vld [vmem:[#allocation2 + $0x10] sm:$0xf]  ;;  %3491 = vmatpush.bf16.msra.mxu1 %v5912_v28 }
  0x5f   : > { %1033 = vmatmul.bf16.gmra.mxu3 %v5846_v51  ;;  %v375_v49 = vsel %vm6193_vm4, %v367_v38, %v374_v42  ;;  %v1136_v51 = vshll.u32 %v1081_v41, 16  ;;  %658 = vst [vmem:[#allocation2 + $0x14] sm:$0x1] %v657_v3  ;;  %v2555_v11 = vshrl.u32 %v2506_v6, 16  ;;  %v2558_v17 = vshll.u32 %v2506_v6, 16  ;;  %v5952_v35 = vld [vmem:[%s7982_s1 + $0x238] sm:$0xff] }
  0x60   : > { %669 = vst [vmem:[#allocation2 + $0x28] sm:$0xf] %v375_v49  ;;  %3073 = vmatpush.bf16.msrb.mxu0 %v5897_v50  ;;  %v5840_v16 = vld [vmem:[#allocation2 + $0x54] sm:$0xff]  ;;  %v2564_v18 = vshll.u32 %v2507_v9, 16  ;;  %v2568_v19 = vshrl.u32 %v2507_v9, 16  ;;  %v1154_v23 = vrot.slane %v1152_v2, 5  ;;  %4486 = vmatpush.bf16.msra.mxu3 %v5944_v4 }
  0x61   : > { %998 = vmatmul.bf16.gmra.mxu1 %v5839_v57  ;;  %v1138_v56 = vrot.slane %v1136_v51, 5  ;;  %v1144_v57 = vrot.slane %v1142_v52, 5  ;;  %v663_v63 = vld [vmem:[#allocation2 + $0x20] sm:$0x1]  ;;  %v2557_v25 = vrot.slane %v2555_v11, 4  ;;  %v2560_v26 = vrot.slane %v2558_v17, 5 }
  0x62   : > { %v2566_v31 = vrot.slane %v2564_v18, 5  ;;  %v664_v36 = vsel %vm6572_vm7, %v359_v15, %v663_v63  ;;  %v1084_v37 = vld [vmem:[#allocation2 + $0xc] sm:$0xf]  ;;  %v6600_v40 = vld [vmem:[#allocation2 + $0x10] sm:$0xf]  ;;  %v376_v18 = vrot.slane %v6546_v34, 4 }
  0x63   : > { %v1139_v0 = vor.u32 %v1138_v56, %v1135_v1  ;;  %v1149_v8 = vor.u32 %v1148_v58, %v1144_v57  ;;  %665 = vst [vmem:[#allocation2 + $0x20] sm:$0x1] %v664_v36  ;;  %v2561_v46 = vor.u32 %v2560_v26, %v2557_v25  ;;  %v1157_v50 = vshrl.u32 %v1084_v37, 16  ;;  %v2509_v1 = vld [vmem:[#allocation2 + $0x18] sm:$0xf]  ;;  %v5844_v56 = vld [vmem:[#allocation2 + $0x84] sm:$0xff] }
  0x64   : > { %4911 = vmatpush.bf16.msra.mxu0 %v5952_v35  ;;  %v1160_v51 = vshll.u32 %v1084_v37, 16  ;;  %v1166_v52 = vshll.u32 %v6600_v40, 16  ;;  %v1170_v39 = vshrl.u32 %v6600_v40, 16  ;;  %v1765_v61 = vld [vmem:[#allocation2] sm:$0xe]  ;;  %v2582_v17 = vshll.u32 %v2509_v1, 16 }
  0x65   : > { %v1140_v20 = vrot.slane %v1139_v0, 4  ;;  %v1150_v21 = vrot.slane %v1149_v8, 4  ;;  %v2562_v0 = vrot.slane %v2561_v46, 4  ;;  %v1159_v6 = vrot.slane %v1157_v50, 4  ;;  %v2510_v8 = vld [vmem:[#allocation2 + $0x1c] sm:$0xf] }
  0x66   : > { %v2508_v38 = vld [vmem:[#allocation2 + $0x14] sm:$0x1]  ;;  %v6611_v11 = vrot.slane %v1166_v52, 5  ;;  %v1172_v15 = vrot.slane %v1170_v39, 4  ;;  %v2588_v63 = vshll.u32 %v2510_v8, 16  ;;  %v2584_v35 = vrot.slane %v2582_v17, 5 }
  0x67   : > { %978 = vmatmul.bf16.gmra.mxu0 %v5835_v33  ;;  %v2570_v33 = vrot.slane %v2568_v19, 4  ;;  %v5836_v41 = vld [vmem:[#allocation2 + $0x24] sm:$0xff]  ;;  %v1145_v42 = vsel %vm6591_vm10, %v1140_v20, %v1144_v57  ;;  %v1155_v45 = vsel %vm6591_vm10, %v1150_v21, %v1154_v23  ;;  %v2574_v49 = vshll.u32 %v2508_v38, 16  ;;  %v6609_v9 = vld [vmem:[#allocation2 + $0x14] sm:$0x1] }
  0x68   : > { %v1532_v58 = vunpack.c.l.b16 %v1145_v42  ;;  %v1834_v57 = vrot.slane %v6558_v43, 5  ;;  %v5429_v19 = vrot.slane %v1765_v61, 9  ;;  %v5848_v20 = vld [vmem:[#allocation2 + $0xb4] sm:$0xff]  ;;  %v1837_v43 = vrot.slane %v6576_v55, 5  ;;  %v670_v36 = vld [vmem:[#allocation2 + $0x2c] sm:$0x1] }
  0x69   : > { %v2571_v48 = vor.u32 %v2570_v33, %v2566_v31  ;;  %v2576_v3 = vrot.slane %v2574_v49, 5  ;;  %v2567_v23 = vsel %vm6591_vm10, %v2562_v0, %v2566_v31  ;;  %v2592_v21 = vshrl.u32 %v2510_v8, 16  ;;  %v1087_v42 = vld [vmem:[#allocation2 + $0x18] sm:$0xf]  ;;  %v7336_v54 = vld [vmem:[%s7983_s2] ss:$0 sm:$0xff] }
  0x6a   : > { %v1836_v25 = vrot.slane %v1834_v57, 4  ;;  %v1176_v4 = vshll.u32 %v6609_v9, 16  ;;  %v1173_v55 = vor.u32 %v1172_v15, %v6611_v11  ;;  %v2954_v31 = vunpack.c.l.b16 %v2567_v23  ;;  %v2511_v50 = vld [vmem:[#allocation2 + $0x20] sm:$0x1]  ;;  %v1766_v15 = vld [vmem:[#allocation2 + $0xc] sm:$0xe] }
  0x6b   : > { %v2572_v2 = vrot.slane %v2571_v48, 4  ;;  %v2590_v38 = vrot.slane %v2588_v63, 5  ;;  %v671_v46 = vsel %vm6572_vm7, %v376_v18, %v670_v36  ;;  %v1835_v48 = vsel %vm6620_vm13, %v5429_v19, %v1834_v57  ;;  %v6641_v18 = vld [vmem:[#allocation2 + $0x20] sm:$0x1] }
  0x6c   : > { %v1838_v49 = vsel %vm6620_vm13, %v1836_v25, %v1837_v43  ;;  %v1174_v52 = vrot.slane %v1173_v55, 4  ;;  %v1178_v39 = vrot.slane %v1176_v4, 5  ;;  %672 = vst [vmem:[#allocation2 + $0x2c] sm:$0x1] %v671_v46  ;;  %v1960_v57 = vunpack.c.l.b16 %v1835_v48  ;;  %v2513_v4 = vld [vmem:[#allocation2 + $0x28] sm:$0xf] }
  0x6d   : > { %1018 = vmatmul.bf16.gmra.mxu2 %v5843_v59  ;;  %v1533_v59 = vunpack.c.l.b16 %v1155_v45  ;;  %v2577_v26 = vsel %vm6591_vm10, %v2572_v2, %v2576_v3  ;;  %v6625_v45 = vld [vmem:[#allocation2 + $0x1c] sm:$0xf]  ;;  %v2598_v3 = vshll.u32 %v2511_v50, 16  ;;  %v2612_v48 = vshll.u32 %v2513_v4, 16 }
  0x6e   : > { %v2955_v37 = vunpack.c.l.b16 %v2577_v26  ;;  %v1194_v61 = vshrl.u32 %v6625_v45, 16  ;;  %v1179_v8 = vsel %vm6591_vm10, %v1174_v52, %v1178_v39  ;;  %v1844_v26 = vrot.slane %v6609_v9, 5 }
  0x6f   : > { %1038 = vmatmul.bf16.gmra.mxu3 %v5847_v7  ;;  %v1162_v7 = vrot.slane %v1160_v51, 5  ;;  %v1564_v24 = vpack.c.b16 %v1533_v59, %v1532_v58  ;;  %v1184_v58 = vshll.u32 %v1087_v42, 16  ;;  %v1190_v59 = vshll.u32 %v6625_v45, 16 }
  0x70   : > { %v2986_v0 = vpack.c.b16 %v2955_v37, %v2954_v31  ;;  %v1196_v23 = vrot.slane %v1194_v61, 4  ;;  %v1535_v55 = vunpack.c.l.b16 %v1179_v8  ;;  %v2616_v9 = vshrl.u32 %v2513_v4, 16  ;;  %v5951_v8 = vld [vmem:[%s7982_s1 + $0x230] sm:$0xff] }
  0x71   : > { %1003 = vmatmul.bf16.gmra.mxu1 %v5840_v16  ;;  %v2579_v16 = vshrl.u32 %v2509_v1, 16  ;;  %v1163_v28 = vor.u32 %v1162_v7, %v1159_v6  ;;  %v1961_v6 = vunpack.c.l.b16 %v1838_v49  ;;  %v6643_v43 = vrot.slane %v1190_v59, 5  ;;  %v677_v59 = vld [vmem:[#allocation2 + $0x38] sm:$0x1]  ;;  %4912 = vmatpush.bf16.msra.mxu0 %v5951_v8 }
  0x72   : > { %v393_v49 = vrot.slane %v6197_v12, 4  ;;  %v5935_v12 = vld [vmem:[%s7982_s1 + $0x1b0] sm:$0xff] }
  0x73   : > { %v2581_v33 = vrot.slane %v2579_v16, 4  ;;  %v1164_v51 = vrot.slane %v1163_v28, 4  ;;  %v1841_v16 = vrot.slane %v6600_v40, 5  ;;  %v1992_v25 = vpack.c.b16 %v1961_v6, %v1960_v57  ;;  %v5943_v57 = vld [vmem:[%s7982_s1 + $0x1f0] sm:$0xff]  ;;  %3806 = vmatpush.bf16.msra.mxu2 %v5935_v12 }
  0x74   : > { %v1197_v36 = vor.u32 %v1196_v23, %v6643_v43  ;;  %v5911_v6 = vld [vmem:[%s7982_s1 + $0x170] sm:$0xff]  ;;  %4487 = vmatpush.bf16.msra.mxu3 %v5943_v57  ;;  %v1851_v12 = vrot.slane %v6641_v18, 5 }
  0x75   : > { %v2585_v1 = vor.u32 %v2584_v35, %v2581_v33  ;;  %v1169_v7 = vsel %vm6591_vm10, %v1164_v51, %v6611_v11  ;;  %v5430_v11 = vrot.slane %v1766_v15, 9  ;;  %v1843_v40 = vrot.slane %v1841_v16, 4  ;;  %3492 = vmatpush.bf16.msra.mxu1 %v5911_v6 }
  0x76   : > { %v1534_v28 = vunpack.c.l.b16 %v1169_v7  ;;  %v1200_v33 = vshll.u32 %v6641_v18, 16  ;;  %v2514_v7 = vld [vmem:[#allocation2 + $0x2c] sm:$0x1]  ;;  %v678_v15 = vsel %vm6572_vm7, %v393_v49, %v677_v59  ;;  %v684_v18 = vld [vmem:[#allocation2 + $0x44] sm:$0x1] }
  0x77   : > { %983 = vmatmul.bf16.gmra.mxu0 %v5836_v41  ;;  %v2594_v41 = vrot.slane %v2592_v21, 4  ;;  %v2586_v17 = vrot.slane %v2585_v1, 4  ;;  %v2600_v21 = vrot.slane %v2598_v3, 5  ;;  %v1842_v51 = vsel %vm6620_vm13, %v5430_v11, %v1841_v16  ;;  %v1090_v16 = vld [vmem:[#allocation2 + $0x24] sm:$0xf] }
  0x78   : > { %v1565_v50 = vpack.c.b16 %v1535_v55, %v1534_v28  ;;  %v1845_v61 = vsel %vm6620_vm13, %v1843_v40, %v1844_v26  ;;  %v2618_v3 = vrot.slane %v2616_v9, 4  ;;  %v2622_v11 = vshll.u32 %v2514_v7, 16  ;;  %679 = vst [vmem:[#allocation2 + $0x38] sm:$0x1] %v678_v15 }
  0x79   : > { %v2595_v2 = vor.u32 %v2594_v41, %v2590_v38  ;;  %v2591_v35 = vsel %vm6591_vm10, %v2586_v17, %v2590_v38  ;;  %v5873_v41 = vld [vmem:[#allocation2 + $0xc] sm:$0xff]  ;;  %v1202_v38 = vrot.slane %v1200_v33, 5  ;;  %v6673_v17 = vld [vmem:[#allocation2 + $0x28] sm:$0xf]  ;;  %v1205_v26 = vshrl.u32 %v1090_v16, 16 }
  0x7a   : > { %v2956_v52 = vunpack.c.l.b16 %v2591_v35  ;;  %v1208_v4 = vshll.u32 %v1090_v16, 16  ;;  %v1214_v28 = vshll.u32 %v6673_v17, 16  ;;  %v1218_v55 = vshrl.u32 %v6673_v17, 16  ;;  %v2515_v35 = vld [vmem:[#allocation2 + $0x30] sm:$0xf] }
  0x7b   : > { %v2596_v63 = vrot.slane %v2595_v2, 4  ;;  %v6660_v2 = vrot.slane %v2612_v48, 5  ;;  %v1207_v48 = vrot.slane %v1205_v26, 4 }
  0x7c   : > { %v1210_v9 = vrot.slane %v1208_v4, 5  ;;  %v6684_v49 = vrot.slane %v1214_v28, 5 }
  0x7d   : > { %1023 = vmatmul.bf16.gmra.mxu2 %v5844_v56  ;;  %v1181_v56 = vshrl.u32 %v1087_v42, 16  ;;  %v2601_v42 = vsel %vm6591_vm10, %v2596_v63, %v2600_v21 }
  0x7e   : > { %v2957_v39 = vunpack.c.l.b16 %v2601_v42  ;;  %v1211_v57 = vor.u32 %v1210_v9, %v1207_v48  ;;  %v1768_v9 = vld [vmem:[#allocation2 + $0x24] sm:$0xe] }
  0x7f   : > { %1043 = vmatmul.bf16.gmra.mxu3 %v5848_v20  ;;  %v1183_v19 = vrot.slane %v1181_v56, 4  ;;  %v1186_v20 = vrot.slane %v1184_v58, 5  ;;  %v1198_v56 = vrot.slane %v1197_v36, 4 }
  0x80   : > { %v2987_v23 = vpack.c.b16 %v2957_v39, %v2956_v52  ;;  %v2627_v52 = vshrl.u32 %v2515_v35, 16 }
  0x81   : > { %1652 = vmatmul.bf16.vlgmr.msrb.gmra.mxu1 %v1564_v24  ;;  %v2512_v24 = vld [vmem:[#allocation2 + $0x24] sm:$0xf]  ;;  %v1187_v31 = vor.u32 %v1186_v20, %v1183_v19  ;;  %v1962_v19 = vunpack.c.l.b16 %v1842_v51  ;;  %v1963_v20 = vunpack.c.l.b16 %v1845_v61  ;;  %v1203_v21 = vsel %vm6591_vm10, %v1198_v56, %v1202_v38  ;;  %v6686_v51 = vld [vmem:[#allocation2 + $0x2c] sm:$0x1] }
  0x82   : > { %v2603_v37 = vshrl.u32 %v2512_v24, 16  ;;  %v2606_v46 = vshll.u32 %v2512_v24, 16  ;;  %v1537_v36 = vunpack.c.l.b16 %v1203_v21  ;;  %v2630_v38 = vshll.u32 %v2515_v35, 16 }
  0x83   : > { %v1188_v1 = vrot.slane %v1187_v31, 4  ;;  %v1993_v40 = vpack.c.b16 %v1963_v20, %v1962_v19  ;;  %v2516_v31 = vld [vmem:[#allocation2 + $0x34] sm:$0xf]  ;;  %v1224_v7 = vshll.u32 %v6686_v51, 16  ;;  %v2517_v19 = vld [vmem:[#allocation2 + $0x38] sm:$0x1] }
  0x84   : > { %v2605_v58 = vrot.slane %v2603_v37, 4  ;;  %v1767_v37 = vld [vmem:[#allocation2 + $0x18] sm:$0xe]  ;;  %v2636_v39 = vshll.u32 %v2516_v31, 16  ;;  %v2632_v8 = vrot.slane %v2630_v38, 5 }
  0x85   : > { %v1193_v63 = vsel %vm6591_vm10, %v1188_v1, %v6643_v43  ;;  %v1848_v43 = vrot.slane %v6625_v45, 5  ;;  %v2640_v1 = vshrl.u32 %v2516_v31, 16  ;;  %v410_v45 = vrot.slane %v6342_v13, 4 }
  0x86   : > { %v1536_v33 = vunpack.c.l.b16 %v1193_v63  ;;  %v5431_v56 = vrot.slane %v1767_v37, 9  ;;  %v2629_v13 = vrot.slane %v2627_v52, 4  ;;  %v6697_v15 = vrot.slane %v2636_v39, 5  ;;  %v6699_v63 = vld [vmem:[#allocation2 + $0x34] sm:$0xf] }
  0x87   : > { %3074 = vmatmul.bf16.vlgmr.msrb.gmra.mxu0 %v2986_v0  ;;  %v2608_v0 = vrot.slane %v2606_v46, 5  ;;  %v2624_v46 = vrot.slane %v2622_v11, 5  ;;  %v1850_v61 = vrot.slane %v1848_v43, 4  ;;  %v2642_v16 = vrot.slane %v2640_v1, 4 }
  0x88   : > { %v1566_v59 = vpack.c.b16 %v1537_v36, %v1536_v33  ;;  %v685_v21 = vsel %vm6572_vm7, %v410_v45, %v684_v18  ;;  %v1212_v11 = vrot.slane %v1211_v57, 4  ;;  %v1226_v26 = vrot.slane %v1224_v7, 5 }
  0x89   : > { %v2609_v24 = vor.u32 %v2608_v0, %v2605_v58  ;;  %v5874_v58 = vld [vmem:[#allocation2 + $0x18] sm:$0xff]  ;;  %v2633_v28 = vor.u32 %v2632_v8, %v2629_v13  ;;  %v1238_v31 = vshll.u32 %v6699_v63, 16  ;;  %v1242_v36 = vshrl.u32 %v6699_v63, 16  ;;  %686 = vst [vmem:[#allocation2 + $0x44] sm:$0x1] %v685_v21 }
  0x8a   : > { %v427_v18 = vrot.slane %v6431_v5, 4  ;;  %v5934_v5 = vld [vmem:[%s7982_s1 + $0x1a8] sm:$0xff] }
  0x8b   : > { %v6716_v45 = vrot.slane %v1238_v31, 5  ;;  %3807 = vmatpush.bf16.msra.mxu2 %v5934_v5 }
  0x8d   : > { %2080 = vmatmul.bf16.vlgmr.msrb.gmra.mxu2 %v1992_v25  ;;  %v2619_v25 = vor.u32 %v2618_v3, %v6660_v2 }
  0x8f   : > { %2393 = vmatmul.bf16.vlgmr.msrb.gmra.mxu3 %v5873_v41  ;;  %v2610_v41 = vrot.slane %v2609_v24, 4  ;;  %v2620_v42 = vrot.slane %v2619_v25, 4  ;;  %v1849_v24 = vsel %vm6620_vm13, %v5431_v56, %v1848_v43  ;;  %v1852_v25 = vsel %vm6620_vm13, %v1850_v61, %v1851_v12 }
  0x90   : > { %v1964_v43 = vunpack.c.l.b16 %v1849_v24  ;;  %v1244_v56 = vrot.slane %v1242_v36, 4  ;;  %v5942_v36 = vld [vmem:[%s7982_s1 + $0x1e8] sm:$0xff] }
  0x91   : > { %1657 = vmatmul.bf16.gmra.mxu1 %v1565_v50  ;;  %v1220_v50 = vrot.slane %v1218_v55, 4  ;;  %v2615_v0 = vsel %vm6591_vm10, %v2610_v41, %v6660_v2  ;;  %v2625_v3 = vsel %vm6591_vm10, %v2620_v42, %v2624_v46  ;;  %v1093_v2 = vld [vmem:[#allocation2 + $0x30] sm:$0xf]  ;;  %v2643_v55 = vor.u32 %v2642_v16, %v6697_v15  ;;  %4488 = vmatpush.bf16.msra.mxu3 %v5942_v36 }
  0x92   : > { %v2958_v20 = vunpack.c.l.b16 %v2615_v0  ;;  %v1229_v33 = vshrl.u32 %v1093_v2, 16  ;;  %v1232_v35 = vshll.u32 %v1093_v2, 16  ;;  %v1965_v41 = vunpack.c.l.b16 %v1852_v25  ;;  %v2519_v0 = vld [vmem:[#allocation2 + $0x40] sm:$0xf] }
  0x93   : > { %v1221_v6 = vor.u32 %v1220_v50, %v6684_v49  ;;  %v1217_v42 = vsel %vm6591_vm10, %v1212_v11, %v6684_v49  ;;  %v1855_v46 = vrot.slane %v6673_v17, 5  ;;  %v2634_v50 = vrot.slane %v2633_v28, 4 }
  0x94   : > { %v2644_v52 = vrot.slane %v2643_v55, 4  ;;  %v1231_v39 = vrot.slane %v1229_v33, 4  ;;  %v1234_v1 = vrot.slane %v1232_v35, 5  ;;  %v1994_v61 = vpack.c.b16 %v1965_v41, %v1964_v43  ;;  %v2520_v43 = vld [vmem:[#allocation2 + $0x44] sm:$0x1] }
  0x95   : > { %v1222_v4 = vrot.slane %v1221_v6, 4  ;;  %v5432_v49 = vrot.slane %v1768_v9, 9  ;;  %v1857_v12 = vrot.slane %v1855_v46, 4  ;;  %v1858_v17 = vrot.slane %v6686_v51, 5  ;;  %v1096_v41 = vld [vmem:[#allocation2 + $0x3c] sm:$0xf] }
  0x96   : > { %v2639_v6 = vsel %vm6591_vm10, %v2634_v50, %v6697_v15  ;;  %v1235_v13 = vor.u32 %v1234_v1, %v1231_v39  ;;  %v1245_v8 = vor.u32 %v1244_v56, %v6716_v45  ;;  %v2664_v2 = vshrl.u32 %v2519_v0, 16  ;;  %v5910_v56 = vld [vmem:[%s7982_s1 + $0x168] sm:$0xff] }
  0x97   : > { %3079 = vmatmul.bf16.gmra.mxu0 %v2987_v23  ;;  %v2959_v23 = vunpack.c.l.b16 %v2625_v3  ;;  %v1227_v48 = vsel %vm6591_vm10, %v1222_v4, %v1226_v26  ;;  %v1538_v3 = vunpack.c.l.b16 %v1217_v42  ;;  %v1856_v21 = vsel %vm6620_vm13, %v5432_v49, %v1855_v46  ;;  %v6743_v42 = vld [vmem:[#allocation2 + $0x40] sm:$0xf]  ;;  %3493 = vmatpush.bf16.msra.mxu1 %v5910_v56 }
  0x98   : > { %v1539_v57 = vunpack.c.l.b16 %v1227_v48  ;;  %v1859_v24 = vsel %vm6620_vm13, %v1857_v12, %v1858_v17  ;;  %v2960_v25 = vunpack.c.l.b16 %v2639_v6  ;;  %v1236_v26 = vrot.slane %v1235_v13, 4  ;;  %v2522_v6 = vld [vmem:[#allocation2 + $0x4c] sm:$0xf]  ;;  %v1769_v13 = vld [vmem:[#allocation2 + $0x30] sm:$0xe] }
  0x99   : > { %v2988_v37 = vpack.c.b16 %v2959_v23, %v2958_v20  ;;  %v5875_v20 = vld [vmem:[#allocation2 + $0x24] sm:$0xff]  ;;  %v2660_v23 = vshll.u32 %v2519_v0, 16  ;;  %v1246_v4 = vrot.slane %v1245_v8, 4  ;;  %v2666_v31 = vrot.slane %v2664_v2, 4 }
  0x9a   : > { %v1567_v15 = vpack.c.b16 %v1539_v57, %v1538_v3  ;;  %v1966_v46 = vunpack.c.l.b16 %v1856_v21  ;;  %v1967_v48 = vunpack.c.l.b16 %v1859_v24  ;;  %v1241_v50 = vsel %vm6591_vm10, %v1236_v26, %v6716_v45  ;;  %v2521_v57 = vld [vmem:[#allocation2 + $0x48] sm:$0xf]  ;;  %v6762_v2 = vld [vmem:[#allocation2 + $0x44] sm:$0x1] }
  0x9b   : > { %v6736_v35 = vrot.slane %v2660_v23, 5  ;;  %v2670_v1 = vshll.u32 %v2520_v43, 16  ;;  %v1256_v49 = vshll.u32 %v1096_v41, 16  ;;  %v1262_v45 = vshll.u32 %v6743_v42, 16 }
  0x9c   : > { %v1266_v12 = vshrl.u32 %v6743_v42, 16  ;;  %v1995_v17 = vpack.c.b16 %v1967_v48, %v1966_v46  ;;  %v1540_v0 = vunpack.c.l.b16 %v1241_v50  ;;  %v1862_v3 = vrot.slane %v6699_v63, 5 }
  0x9d   : > { %2085 = vmatmul.bf16.gmra.mxu2 %v1993_v40  ;;  %v2646_v40 = vshll.u32 %v2517_v19, 16  ;;  %v2667_v39 = vor.u32 %v2666_v31, %v6736_v35  ;;  %v2675_v21 = vshrl.u32 %v2521_v57, 16  ;;  %v2684_v24 = vshll.u32 %v2522_v6, 16 }
  0x9e   : > { %v1268_v23 = vrot.slane %v1266_v12, 4  ;;  %v444_v63 = vrot.slane %v6504_v32, 4  ;;  %v5433_v26 = vrot.slane %v1769_v13, 9  ;;  %v1272_v32 = vshll.u32 %v6762_v2, 16  ;;  %v1099_v12 = vld [vmem:[#allocation2 + $0x48] sm:$0xf] }
  0x9f   : > { %2398 = vmatmul.bf16.gmra.mxu3 %v5874_v58  ;;  %v2648_v38 = vrot.slane %v2646_v40, 5  ;;  %v6718_v58 = vld [vmem:[#allocation2 + $0x38] sm:$0x1]  ;;  %v691_v40 = vld [vmem:[#allocation2 + $0x50] sm:$0x1] }
  0xa0   : > { %v1248_v16 = vshll.u32 %v6718_v58, 16  ;;  %v1274_v56 = vrot.slane %v1272_v32, 5 }
  0xa1   : > { %1662 = vmatmul.bf16.gmra.mxu1 %v1566_v59  ;;  %v2518_v59 = vld [vmem:[#allocation2 + $0x3c] sm:$0xf]  ;;  %v2649_v7 = vsel %vm6591_vm10, %v2644_v52, %v2648_v38 }
  0xa2   : > { %v2651_v19 = vshrl.u32 %v2518_v59, 16  ;;  %v2654_v51 = vshll.u32 %v2518_v59, 16  ;;  %v2961_v11 = vunpack.c.l.b16 %v2649_v7  ;;  %v1250_v28 = vrot.slane %v1248_v16, 5  ;;  %v5950_v59 = vld [vmem:[%s7982_s1 + $0x228] sm:$0xff] }
  0xa3   : > { %4913 = vmatpush.bf16.msra.mxu0 %v5950_v59  ;;  %v2668_v16 = vrot.slane %v2667_v39, 4 }
  0xa4   : > { %v2653_v55 = vrot.slane %v2651_v19, 4  ;;  %v2656_v33 = vrot.slane %v2654_v51, 5  ;;  %v2989_v9 = vpack.c.b16 %v2961_v11, %v2960_v25  ;;  %v1251_v52 = vsel %vm6591_vm10, %v1246_v4, %v1250_v28  ;;  %v5876_v4 = vld [vmem:[#allocation2 + $0x30] sm:$0xff] }
  0xa5   : > { %v1541_v7 = vunpack.c.l.b16 %v1251_v52  ;;  %v2672_v19 = vrot.slane %v2670_v1, 5  ;;  %v6760_v51 = vrot.slane %v1262_v45, 5  ;;  %v2688_v25 = vshrl.u32 %v2522_v6, 16 }
  0xa6   : > { %v2657_v38 = vor.u32 %v2656_v33, %v2653_v55  ;;  %v1864_v55 = vrot.slane %v1862_v3, 4 }
  0xa7   : > { %3084 = vmatmul.bf16.gmra.mxu0 %v2988_v37  ;;  %v692_v37 = vsel %vm6572_vm7, %v427_v18, %v691_v40  ;;  %v1568_v28 = vpack.c.b16 %v1541_v7, %v1540_v0  ;;  %v1865_v40 = vrot.slane %v6718_v58, 5  ;;  %v2673_v33 = vsel %vm6591_vm10, %v2668_v16, %v2672_v19  ;;  %v698_v58 = vld [vmem:[#allocation2 + $0x5c] sm:$0x1] }
  0xa8   : > { %693 = vst [vmem:[#allocation2 + $0x50] sm:$0x1] %v692_v37  ;;  %v2658_v8 = vrot.slane %v2657_v38, 4  ;;  %v6765_v11 = vpop.f32.mrf.mxu1  ;;  %v1269_v36 = vor.u32 %v1268_v23, %v6760_v51  ;;  %v2677_v37 = vrot.slane %v2675_v21, 4  ;;  %v2690_v46 = vrot.slane %v2688_v25, 4 }
  0xa9   : > { %v2963_v50 = vunpack.c.l.b16 %v2673_v33  ;;  %v6779_v52 = vpop.f32.mrf.mxu0  ;;  %v1863_v38 = vsel %vm6620_vm13, %v5433_v26, %v1862_v3  ;;  %v1866_v39 = vsel %vm6620_vm13, %v1864_v55, %v1865_v40  ;;  %v1277_v0 = vshrl.u32 %v1099_v12, 16  ;;  %v2524_v26 = vld [vmem:[#allocation2 + $0x54] sm:$0xf]  ;;  %v2525_v40 = vld [vmem:[#allocation2 + $0x58] sm:$0xf] }
  0xaa   : > { %v2663_v5 = vsel %vm6591_vm10, %v2658_v8, %v6736_v35  ;;  %v699_v35 = vsel %vm6572_vm7, %v444_v63, %v698_v58  ;;  %v1270_v59 = vrot.slane %v1269_v36, 4  ;;  %v1968_v13 = vunpack.c.l.b16 %v1863_v38  ;;  %v1770_v33 = vld [vmem:[#allocation2 + $0x3c] sm:$0xe] }
  0xab   : > { %700 = vst [vmem:[#allocation2 + $0x5c] sm:$0x1] %v699_v35  ;;  %v1969_v8 = vunpack.c.l.b16 %v1866_v39  ;;  %v5877_v58 = vld [vmem:[#allocation2 + $0x3c] sm:$0xff]  ;;  %v2712_v35 = vshrl.u32 %v2525_v40, 16  ;;  %v5434_v38 = vrot.slane %v1770_v33, 9 }
  0xad   : > { %2090 = vmatmul.bf16.gmra.mxu2 %v1994_v61  ;;  %v1253_v61 = vshrl.u32 %v1096_v41, 16  ;;  %v6775_v41 = vrot.slane %v2684_v24, 5 }
  0xaf   : > { %2403 = vmatmul.bf16.gmra.mxu3 %v5875_v20  ;;  %v1255_v18 = vrot.slane %v1253_v61, 4  ;;  %v1258_v20 = vrot.slane %v1256_v49, 5  ;;  %v2523_v48 = vld [vmem:[#allocation2 + $0x50] sm:$0x1]  ;;  %v2691_v49 = vor.u32 %v2690_v46, %v6775_v41  ;;  %v2699_v46 = vshrl.u32 %v2524_v26, 16 }
  0xb0   : > { %v2694_v45 = vshll.u32 %v2523_v48, 16  ;;  %v6790_v16 = vpop.f32.mrf.mxu1  ;;  %v6800_v55 = vld [vmem:[#allocation2 + $0x50] sm:$0x1]  ;;  %v461_v48 = vrot.slane %v6295_v47, 4  ;;  %v705_v47 = vld [vmem:[#allocation2 + $0x68] sm:$0x1] }
  0xb1   : > { %1667 = vmatmul.bf16.gmra.mxu1 %v1567_v15  ;;  %v2678_v15 = vshll.u32 %v2521_v57, 16  ;;  %v1259_v31 = vor.u32 %v1258_v20, %v1255_v18  ;;  %v1280_v57 = vshll.u32 %v1099_v12, 16  ;;  %v1275_v18 = vsel %vm6591_vm10, %v1270_v59, %v1274_v56  ;;  %v6807_v32 = vpop.f32.mrf.mxu0 }
  0xb2   : > { %v2692_v23 = vrot.slane %v2691_v49, 4  ;;  %v2696_v21 = vrot.slane %v2694_v45, 5  ;;  %v2701_v12 = vrot.slane %v2699_v46, 4 }
  0xb3   : > { %v2680_v43 = vrot.slane %v2678_v15, 5  ;;  %v1260_v1 = vrot.slane %v1259_v31, 4  ;;  %v1279_v15 = vrot.slane %v1277_v0, 4  ;;  %v1282_v24 = vrot.slane %v1280_v57, 5 }
  0xb4   : > { %v2697_v36 = vsel %vm6591_vm10, %v2692_v23, %v2696_v21 }
  0xb5   : > { %v2681_v61 = vor.u32 %v2680_v43, %v2677_v37  ;;  %v1265_v19 = vsel %vm6591_vm10, %v1260_v1, %v6760_v51  ;;  %v1283_v37 = vor.u32 %v1282_v24, %v1279_v15  ;;  %v1872_v1 = vrot.slane %v6762_v2, 5  ;;  %v5941_v2 = vld [vmem:[%s7982_s1 + $0x1e0] sm:$0xff] }
  0xb6   : > { %v1542_v51 = vunpack.c.l.b16 %v1265_v19  ;;  %v2965_v59 = vunpack.c.l.b16 %v2697_v36  ;;  %v2526_v19 = vld [vmem:[#allocation2 + $0x5c] sm:$0x1]  ;;  %4489 = vmatpush.bf16.msra.mxu3 %v5941_v2 }
  0xb7   : > { %3089 = vmatmul.bf16.gmra.mxu0 %v2989_v9  ;;  %v2962_v9 = vunpack.c.l.b16 %v2663_v5  ;;  %v2682_v20 = vrot.slane %v2681_v61, 4  ;;  %v1543_v5 = vunpack.c.l.b16 %v1275_v18  ;;  %v1284_v49 = vrot.slane %v1283_v37, 4  ;;  %v1102_v18 = vld [vmem:[#allocation2 + $0x54] sm:$0xf] }
  0xb8   : > { %v1304_v36 = vshll.u32 %v1102_v18, 16 }
  0xb9   : > { %v2990_v7 = vpack.c.b16 %v2963_v50, %v2962_v9  ;;  %v2687_v31 = vsel %vm6591_vm10, %v2682_v20, %v6775_v41  ;;  %v1296_v9 = vshll.u32 %v6800_v55, 16  ;;  %v2708_v50 = vshll.u32 %v2525_v40, 16  ;;  %v6827_v20 = vld [vmem:[#allocation2 + $0x58] sm:$0xf] }
  0xba   : > { %v1569_v41 = vpack.c.b16 %v1543_v5, %v1542_v51  ;;  %v2964_v56 = vunpack.c.l.b16 %v2687_v31  ;;  %v2718_v51 = vshll.u32 %v2526_v19, 16  ;;  %v5949_v5 = vld [vmem:[%s7982_s1 + $0x220] sm:$0xff]  ;;  %v1301_v31 = vshrl.u32 %v1102_v18, 16  ;;  %v5878_v19 = vld [vmem:[#allocation2 + $0x48] sm:$0xff] }
  0xbb   : > { %v1298_v57 = vrot.slane %v1296_v9, 5  ;;  %v1314_v37 = vshrl.u32 %v6827_v20, 16  ;;  %4914 = vmatpush.bf16.msra.mxu0 %v5949_v5  ;;  %v2527_v9 = vld [vmem:[#allocation2 + $0x60] sm:$0xf] }
  0xbc   : > { %v2991_v24 = vpack.c.b16 %v2965_v59, %v2964_v56  ;;  %v1303_v59 = vrot.slane %v1301_v31, 4 }
  0xbd   : > { %2095 = vmatmul.bf16.gmra.mxu2 %v1995_v17  ;;  %v6786_v17 = vld [vmem:[#allocation2 + $0x4c] sm:$0xf] }
  0xbe   : > { %v1286_v6 = vshll.u32 %v6786_v17, 16  ;;  %v1290_v3 = vshrl.u32 %v6786_v17, 16 }
  0xbf   : > { %2408 = vmatmul.bf16.gmra.mxu3 %v5876_v4  ;;  %v1996_v4 = vpack.c.b16 %v1969_v8, %v1968_v13  ;;  %v706_v13 = vsel %vm6572_vm7, %v461_v48, %v705_v47  ;;  %v2723_v47 = vshrl.u32 %v2527_v9, 16 }
  0xc0   : > { %v6797_v25 = vrot.slane %v1286_v6, 5  ;;  %v1292_v63 = vrot.slane %v1290_v3, 4  ;;  %v5933_v6 = vld [vmem:[%s7982_s1 + $0x1a0] sm:$0xff]  ;;  %v6818_v3 = vrot.slane %v2708_v50, 5  ;;  %707 = vst [vmem:[#allocation2 + $0x68] sm:$0x1] %v706_v13 }
  0xc1   : > { %1672 = vmatmul.bf16.gmra.mxu1 %v1568_v28  ;;  %v1869_v28 = vrot.slane %v6743_v42, 5  ;;  %v2702_v42 = vshll.u32 %v2524_v26, 16  ;;  %3808 = vmatpush.bf16.msra.mxu2 %v5933_v6  ;;  %v2528_v50 = vld [vmem:[#allocation2 + $0x64] sm:$0xf]  ;;  %v6861_v13 = vld [vmem:[#allocation2 + $0x5c] sm:$0x1] }
  0xc2   : > { %v1293_v43 = vor.u32 %v1292_v63, %v6797_v25  ;;  %v1289_v26 = vsel %vm6591_vm10, %v1284_v49, %v6797_v25  ;;  %v1310_v25 = vshll.u32 %v6827_v20, 16  ;;  %v1306_v49 = vrot.slane %v1304_v36, 5 }
  0xc3   : > { %v1871_v39 = vrot.slane %v1869_v28, 4  ;;  %v2704_v0 = vrot.slane %v2702_v42, 5  ;;  %v1870_v21 = vsel %vm6620_vm13, %v5434_v38, %v1869_v28  ;;  %v5909_v28 = vld [vmem:[%s7982_s1 + $0x160] sm:$0xff]  ;;  %v1544_v48 = vunpack.c.l.b16 %v1289_v26  ;;  %v1771_v38 = vld [vmem:[#allocation2 + $0x48] sm:$0xe] }
  0xc4   : > { %v1294_v45 = vrot.slane %v1293_v43, 4  ;;  %v1970_v43 = vunpack.c.l.b16 %v1870_v21  ;;  %3494 = vmatpush.bf16.msra.mxu1 %v5909_v28  ;;  %v2732_v6 = vshll.u32 %v2528_v50, 16  ;;  %v5435_v2 = vrot.slane %v1771_v38, 9 }
  0xc5   : > { %v1873_v15 = vsel %vm6620_vm13, %v1871_v39, %v1872_v1  ;;  %v2705_v63 = vor.u32 %v2704_v0, %v2701_v12  ;;  %v2720_v1 = vrot.slane %v2718_v51, 5  ;;  %v1316_v12 = vrot.slane %v1314_v37, 4 }
  0xc6   : > { %v1971_v46 = vunpack.c.l.b16 %v1873_v15  ;;  %v1879_v15 = vrot.slane %v6800_v55, 5  ;;  %v1320_v51 = vshll.u32 %v6861_v13, 16  ;;  %v2725_v28 = vrot.slane %v2723_v47, 4 }
  0xc7   : > { %3094 = vmatmul.bf16.gmra.mxu0 %v2990_v7  ;;  %v2714_v7 = vrot.slane %v2712_v35, 4  ;;  %v2706_v39 = vrot.slane %v2705_v63, 4  ;;  %v6873_v31 = vrot.slane %v2732_v6, 5  ;;  %v2529_v36 = vld [vmem:[#allocation2 + $0x68] sm:$0x1] }
  0xc8   : > { %v1997_v0 = vpack.c.b16 %v1971_v46, %v1970_v43 }
  0xc9   : > { %v2715_v40 = vor.u32 %v2714_v7, %v6818_v3 }
  0xcd   : > { %2100 = vmatmul.bf16.gmra.mxu2 %v1996_v4  ;;  %v1299_v4 = vsel %vm6591_vm10, %v1294_v45, %v1298_v57  ;;  %v6856_v45 = vrot.slane %v1310_v25, 5  ;;  %v2726_v57 = vshll.u32 %v2527_v9, 16  ;;  %v712_v25 = vld [vmem:[#allocation2 + $0x74] sm:$0x1] }
  0xce   : > { %v6813_v61 = vpop.f32.mrf.mxu1  ;;  %v1545_v35 = vunpack.c.l.b16 %v1299_v4 }
  0xcf   : > { %2413 = vmatmul.bf16.gmra.mxu3 %v5877_v58  ;;  %v1876_v58 = vrot.slane %v6786_v17, 5  ;;  %v478_v17 = vrot.slane %v6351_v22, 4  ;;  %v1307_v22 = vor.u32 %v1306_v49, %v1303_v59  ;;  %v1317_v4 = vor.u32 %v1316_v12, %v6856_v45  ;;  %v1105_v49 = vld [vmem:[#allocation2 + $0x60] sm:$0xf]  ;;  %v6886_v12 = vld [vmem:[#allocation2 + $0x64] sm:$0xf] }
  0xd0   : > { %v6825_v8 = vpop.f32.mrf.mxu2  ;;  %v1570_v18 = vpack.c.b16 %v1545_v35, %v1544_v48  ;;  %v2728_v5 = vrot.slane %v2726_v57, 5  ;;  %v2742_v59 = vshll.u32 %v2529_v36, 16  ;;  %v1325_v47 = vshrl.u32 %v1105_v49, 16  ;;  %v6903_v36 = vld [vmem:[#allocation2 + $0x68] sm:$0x1] }
  0xd1   : > { %7997 = vst [vmem:[#allocation3_spill] sm:$0xff] %v6825_v8  ;;  %1677 = vmatmul.bf16.gmra.mxu1 %v1569_v41  ;;  %v2716_v41 = vrot.slane %v2715_v40, 4  ;;  %v1878_v21 = vrot.slane %v1876_v58, 4  ;;  %v2736_v40 = vshrl.u32 %v2528_v50, 16  ;;  %v713_v46 = vsel %vm6572_vm7, %v478_v17, %v712_v25 }
  0xd2   : > { %v6829_v23 = vpop.f32.mrf.mxu3  ;;  %v1877_v9 = vsel %vm6620_vm13, %v5435_v2, %v1876_v58  ;;  %v1308_v35 = vrot.slane %v1307_v22, 4  ;;  %v1318_v38 = vrot.slane %v1317_v4, 4  ;;  %714 = vst [vmem:[#allocation2 + $0x74] sm:$0x1] %v713_v46  ;;  %v1328_v57 = vshll.u32 %v1105_v49, 16 }
  0xd3   : > { %7998 = vst [vmem:[#allocation4_spill] sm:$0xff] %v6829_v23  ;;  %v2721_v26 = vsel %vm6591_vm10, %v2716_v41, %v2720_v1  ;;  %v1880_v50 = vsel %vm6620_vm13, %v1878_v21, %v1879_v15  ;;  %v2729_v41 = vor.u32 %v2728_v5, %v2725_v28  ;;  %v1334_v58 = vshll.u32 %v6886_v12, 16 }
  0xd4   : > { %v6847_v33 = vpop.f32.mrf.mxu0  ;;  %v2967_v43 = vunpack.c.l.b16 %v2721_v26  ;;  %v1338_v17 = vshrl.u32 %v6886_v12, 16  ;;  %v1313_v21 = vsel %vm6591_vm10, %v1308_v35, %v6856_v45  ;;  %v2744_v22 = vrot.slane %v2742_v59, 5 }
  0xd5   : > { %v6901_v28 = vrot.slane %v1334_v58, 5  ;;  %v1546_v46 = vunpack.c.l.b16 %v1313_v21  ;;  %v1344_v59 = vshll.u32 %v6903_v36, 16  ;;  %v1886_v21 = vrot.slane %v6861_v13, 5  ;;  %v5940_v13 = vld [vmem:[%s7982_s1 + $0x1d8] sm:$0xff] }
  0xd6   : > { %v6851_v42 = vpop.f32.mrf.mxu1  ;;  %v1340_v5 = vrot.slane %v1338_v17, 4  ;;  %4490 = vmatpush.bf16.msra.mxu3 %v5940_v13 }
  0xd7   : > { %3099 = vmatmul.bf16.gmra.mxu0 %v2991_v24  ;;  %v2711_v24 = vsel %vm6591_vm10, %v2706_v39, %v6818_v3  ;;  %v2738_v3 = vrot.slane %v2736_v40, 4  ;;  %v1322_v39 = vrot.slane %v1320_v51, 5  ;;  %v1327_v40 = vrot.slane %v1325_v47, 4  ;;  %v5879_v47 = vld [vmem:[#allocation2 + $0x54] sm:$0xff] }
  0xd8   : > { %v6854_v56 = vpop.f32.mrf.mxu2  ;;  %v2966_v37 = vunpack.c.l.b16 %v2711_v24  ;;  %v2730_v24 = vrot.slane %v2729_v41, 4  ;;  %v1330_v51 = vrot.slane %v1328_v57, 5 }
  0xd9   : > { %7999 = vst [vmem:[#allocation5_spill] sm:$0xff] %v6854_v56  ;;  %v2739_v1 = vor.u32 %v2738_v3, %v6873_v31  ;;  %v1323_v15 = vsel %vm6591_vm10, %v1318_v38, %v1322_v39  ;;  %v2530_v3 = vld [vmem:[#allocation2 + $0x6c] sm:$0xf] }
  0xda   : > { %v6859_v7 = vpop.f32.mrf.mxu3  ;;  %v2992_v6 = vpack.c.b16 %v2967_v43, %v2966_v37  ;;  %v1883_v37 = vrot.slane %v6827_v20, 5  ;;  %v2531_v43 = vld [vmem:[#allocation2 + $0x70] sm:$0xf]  ;;  %v2735_v35 = vsel %vm6591_vm10, %v2730_v24, %v6873_v31  ;;  %v1331_v41 = vor.u32 %v1330_v51, %v1327_v40 }
  0xdb   : > { %8000 = vst [vmem:[#allocation6_spill] sm:$0xff] %v6859_v7  ;;  %v2740_v26 = vrot.slane %v2739_v1, 4  ;;  %v1341_v1 = vor.u32 %v1340_v5, %v6901_v28  ;;  %v2747_v49 = vshrl.u32 %v2530_v3, 16  ;;  %v495_v20 = vrot.slane %v6449_v30, 4  ;;  %v719_v5 = vld [vmem:[#allocation2 + $0x80] sm:$0x1] }
  0xdc   : > { %v6867_v63 = vpop.f32.mrf.mxu0  ;;  %v2750_v57 = vshll.u32 %v2530_v3, 16  ;;  %v2756_v58 = vshll.u32 %v2531_v43, 16  ;;  %v1346_v51 = vrot.slane %v1344_v59, 5  ;;  %v5932_v3 = vld [vmem:[%s7982_s1 + $0x198] sm:$0xff] }
  0xdd   : > { %2105 = vmatmul.bf16.gmra.mxu2 %v1997_v0  ;;  %v2745_v38 = vsel %vm6591_vm10, %v2740_v26, %v2744_v22  ;;  %v1332_v22 = vrot.slane %v1331_v41, 4  ;;  %v1342_v40 = vrot.slane %v1341_v1, 4  ;;  %v2749_v30 = vrot.slane %v2747_v49, 4  ;;  %v6935_v41 = vld [vmem:[#allocation2 + $0x70] sm:$0xf] }
  0xde   : > { %v6875_v55 = vpop.f32.mrf.mxu1  ;;  %v2969_v24 = vunpack.c.l.b16 %v2745_v38  ;;  %3809 = vmatpush.bf16.msra.mxu2 %v5932_v3  ;;  %v1108_v38 = vld [vmem:[#allocation2 + $0x6c] sm:$0xf]  ;;  %v1890_v3 = vrot.slane %v6886_v12, 5  ;;  %v512_v12 = vrot.slane %v6515_v60, 4 }
  0xdf   : > { %2418 = vmatmul.bf16.gmra.mxu3 %v5878_v19  ;;  %v1972_v19 = vunpack.c.l.b16 %v1877_v9  ;;  %v1547_v9 = vunpack.c.l.b16 %v1323_v15  ;;  %v2968_v15 = vunpack.c.l.b16 %v2735_v35  ;;  %v2532_v35 = vld [vmem:[#allocation2 + $0x74] sm:$0x1] }
  0xe0   : > { %v6879_v48 = vpop.f32.mrf.mxu2 }
  0xe1   : > { %8001 = vst [vmem:[#allocation7_spill] sm:$0xff] %v6879_v48  ;;  %1682 = vmatmul.bf16.gmra.mxu1 %v1570_v18  ;;  %v1973_v18 = vunpack.c.l.b16 %v1880_v50  ;;  %v1772_v50 = vld [vmem:[#allocation2 + $0x54] sm:$0xe] }
  0xe2   : > { %v6888_v0 = vpop.f32.mrf.mxu3  ;;  %v5436_v31 = vrot.slane %v1772_v50, 9  ;;  %v6926_v50 = vrot.slane %v2756_v58, 5 }
  0xe3   : > { %8002 = vst [vmem:[#allocation8_spill] sm:$0xff] %v6888_v0  ;;  %v1998_v45 = vpack.c.b16 %v1973_v18, %v1972_v19  ;;  %v1885_v19 = vrot.slane %v1883_v37, 4  ;;  %v1571_v18 = vpack.c.b16 %v1547_v9, %v1546_v46  ;;  %v720_v46 = vsel %vm6572_vm7, %v495_v20, %v719_v5  ;;  %v1773_v5 = vld [vmem:[#allocation2 + $0x60] sm:$0xe] }
  0xe4   : > { %v6892_v2 = vpop.f32.mrf.mxu0  ;;  %721 = vst [vmem:[#allocation2 + $0x80] sm:$0x1] %v720_v46  ;;  %v1884_v59 = vsel %vm6620_vm13, %v5436_v31, %v1883_v37  ;;  %v1337_v20 = vsel %vm6591_vm10, %v1332_v22, %v6901_v28  ;;  %v5908_v37 = vld [vmem:[%s7982_s1 + $0x158] sm:$0xff]  ;;  %v1352_v28 = vshll.u32 %v1108_v38, 16  ;;  %v5437_v0 = vrot.slane %v1773_v5, 9 }
  0xe5   : > { %v1887_v49 = vsel %vm6620_vm13, %v1885_v19, %v1886_v21  ;;  %v5948_v31 = vld [vmem:[%s7982_s1 + $0x218] sm:$0xff]  ;;  %v1349_v21 = vshrl.u32 %v1108_v38, 16  ;;  %v1974_v22 = vunpack.c.l.b16 %v1884_v59  ;;  %3495 = vmatpush.bf16.msra.mxu1 %v5908_v37  ;;  %v6965_v59 = vld [vmem:[%s7983_s2] ss:$0 sm:$0xff] }
  0xe6   : > { %v6899_v4 = vpop.f32.mrf.mxu1  ;;  %4915 = vmatpush.bf16.msra.mxu0 %v5948_v31  ;;  %v2534_v38 = vld [vmem:[#allocation2 + $0x7c] sm:$0xf]  ;;  %v1354_v31 = vrot.slane %v1352_v28, 5 }
  0xe7   : > { %3104 = vmatmul.bf16.gmra.mxu0 %v2992_v6  ;;  %v2760_v6 = vshrl.u32 %v2531_v43, 16  ;;  %v2752_v43 = vrot.slane %v2750_v57, 5  ;;  %v1347_v57 = vsel %vm6591_vm10, %v1342_v40, %v1346_v51  ;;  %v1975_v40 = vunpack.c.l.b16 %v1887_v49 }
  0xe8   : > { %v6905_v25 = vpop.f32.mrf.mxu2  ;;  %v1351_v37 = vrot.slane %v1349_v21, 4  ;;  %v2780_v7 = vshll.u32 %v2534_v38, 16  ;;  %v2784_v23 = vshrl.u32 %v2534_v38, 16  ;;  %v5880_v21 = vld [vmem:[#allocation2 + $0x60] sm:$0xff] }
  0xe9   : > { %8003 = vst [vmem:[#allocation9_spill] sm:$0xff] %v6905_v25  ;;  %v2753_v58 = vor.u32 %v2752_v43, %v2749_v30  ;;  %v1548_v30 = vunpack.c.l.b16 %v1337_v20  ;;  %v2533_v43 = vld [vmem:[#allocation2 + $0x78] sm:$0xf] }
  0xea   : > { %v6913_v39 = vpop.f32.mrf.mxu3 }
  0xeb   : > { %8004 = vst [vmem:[#allocation10_spill] sm:$0xff] %v6913_v39  ;;  %v2754_v13 = vrot.slane %v2753_v58, 4  ;;  %v2771_v58 = vshrl.u32 %v2533_v43, 16 }
  0xec   : > { %v6918_v17 = vpop.f32.mrf.mxu0 }
  0xed   : > { %2110 = vmatmul.bf16.gmra.mxu2 %v1998_v45  ;;  %v2762_v45 = vrot.slane %v2760_v6, 4  ;;  %v2759_v60 = vsel %vm6591_vm10, %v2754_v13, %v6926_v50  ;;  %v2773_v38 = vrot.slane %v2771_v58, 4  ;;  %v1891_v13 = vsel %vm6620_vm13, %v5437_v0, %v1890_v3  ;;  %v7001_v0 = vld [vmem:[#allocation2 + $0x7c] sm:$0xf] }
  0xee   : > { %v6921_v26 = vpop.f32.mrf.mxu1 }
  0xef   : > { %2423 = vmatmul.bf16.gmra.mxu3 %v5879_v47  ;;  %v2993_v47 = vpack.c.b16 %v2969_v24, %v2968_v15  ;;  %v2763_v6 = vor.u32 %v2762_v45, %v6926_v50  ;;  %v1358_v15 = vshll.u32 %v6935_v41, 16  ;;  %v1362_v24 = vshrl.u32 %v6935_v41, 16 }
  0xf0   : > { %v6933_v9 = vpop.f32.mrf.mxu2  ;;  %v1549_v45 = vunpack.c.l.b16 %v1347_v57  ;;  %v6972_v57 = vld [vmem:[#allocation2 + $0x74] sm:$0x1] }
  0xf1   : > { %8005 = vst [vmem:[#allocation11_spill] sm:$0xff] %v6933_v9  ;;  %1687 = vmatmul.bf16.gmra.mxu1 %v1571_v18  ;;  %v2766_v18 = vshll.u32 %v2532_v35, 16  ;;  %v2764_v46 = vrot.slane %v2763_v6, 4  ;;  %v6969_v20 = vrot.slane %v1358_v15, 5  ;;  %v2774_v6 = vshll.u32 %v2533_v43, 16 }
  0xf2   : > { %v6937_v1 = vpop.f32.mrf.mxu3  ;;  %v1572_v28 = vpack.c.b16 %v1549_v45, %v1548_v30  ;;  %v1892_v15 = vrot.slane %v1890_v3, 4  ;;  %v1368_v5 = vshll.u32 %v6972_v57, 16  ;;  %v6988_v45 = vrot.slane %v2780_v7, 5  ;;  %v726_v9 = vld [vmem:[#allocation2 + $0x8c] sm:$0x1] }
  0xf3   : > { %8006 = vst [vmem:[#allocation12_spill] sm:$0xff] %v6937_v1  ;;  %v2768_v35 = vrot.slane %v2766_v18, 5  ;;  %v1364_v1 = vrot.slane %v1362_v24, 4  ;;  %v1049_v18 = vadd.f32 %v6965_v59, %v6779_v52  ;;  %v1893_v24 = vrot.slane %v6903_v36, 5 }
  0xf4   : > { %v6955_v19 = vpop.f32.mrf.mxu0  ;;  %v1355_v52 = vor.u32 %v1354_v31, %v1351_v37  ;;  %v2776_v30 = vrot.slane %v2774_v6, 5  ;;  %v2786_v36 = vrot.slane %v2784_v23, 4  ;;  %v1370_v7 = vrot.slane %v1368_v5, 5 }
  0xf5   : > { %v1365_v43 = vor.u32 %v1364_v1, %v6969_v20  ;;  %v1894_v37 = vsel %vm6620_vm13, %v1892_v15, %v1893_v24  ;;  %v727_v23 = vsel %vm6572_vm7, %v512_v12, %v726_v9  ;;  %v1382_v15 = vshll.u32 %v7001_v0, 16 }
  0xf6   : > { %v6959_v51 = vpop.f32.mrf.mxu1  ;;  %v1356_v31 = vrot.slane %v1355_v52, 4  ;;  %v2777_v58 = vor.u32 %v2776_v30, %v2773_v38  ;;  %v1386_v24 = vshrl.u32 %v7001_v0, 16  ;;  %728 = vst [vmem:[#allocation2 + $0x8c] sm:$0x1] %v727_v23  ;;  %v1976_v12 = vunpack.c.l.b16 %v1891_v13  ;;  %v7018_v13 = vld [vmem:[#allocation2 + $0x80] sm:$0x1] }
  0xf7   : > { %3109 = vmatmul.bf16.gmra.mxu0 %v2993_v47  ;;  %v1999_v47 = vpack.c.b16 %v1975_v40, %v1974_v22  ;;  %v2769_v40 = vsel %vm6591_vm10, %v2764_v46, %v2768_v35  ;;  %v2970_v46 = vunpack.c.l.b16 %v2759_v60  ;;  %v7016_v23 = vrot.slane %v1382_v15, 5 }
  0xf8   : > { %v6967_v49 = vpop.f32.mrf.mxu2  ;;  %v2971_v35 = vunpack.c.l.b16 %v2769_v40 }
  0xf9   : > { %8007 = vst [vmem:[#allocation13_spill] sm:$0xff] %v6967_v49  ;;  %v2535_v49 = vld [vmem:[#allocation2 + $0x80] sm:$0x1] }
  0xfa   : > { %v6976_v39 = vpop.f32.mrf.mxu3  ;;  %v2790_v6 = vshll.u32 %v2535_v49, 16  ;;  %v2994_v40 = vpack.c.b16 %v2971_v35, %v2970_v46  ;;  %v1361_v49 = vsel %vm6591_vm10, %v1356_v31, %v6969_v20  ;;  %v1388_v46 = vrot.slane %v1386_v24, 4  ;;  %v2536_v35 = vld [vmem:[#allocation2 + $0x84] sm:$0xf] }
  0xfb   : > { %8008 = vst [vmem:[#allocation14_spill] sm:$0xff] %v6976_v39  ;;  %v1550_v31 = vunpack.c.l.b16 %v1361_v49  ;;  %v5881_v49 = vld [vmem:[#allocation2 + $0x6c] sm:$0xff] }
  0xfc   : > { %v6982_v22 = vpop.f32.mrf.mxu0  ;;  %v2792_v38 = vrot.slane %v2790_v6, 5 }
  0xfd   : > { %2115 = vmatmul.bf16.gmra.mxu2 %v1999_v47  ;;  %v1366_v47 = vrot.slane %v1365_v43, 4  ;;  %v2778_v43 = vrot.slane %v2777_v58, 4 }
  0xfe   : > { %v1653_v39 = vpop.f32.mrf.mxu1 }
  0xff   : > { %2428 = vmatmul.bf16.gmra.mxu3 %v5880_v21  ;;  %v6990_v50 = vadd.f32 %v1653_v39, %v1049_v18  ;;  %v2787_v39 = vor.u32 %v2786_v36, %v6988_v45  ;;  %v1111_v18 = vld [vmem:[#allocation2 + $0x78] sm:$0xf]  ;;  %v1371_v52 = vsel %vm6591_vm10, %v1366_v47, %v1370_v7  ;;  %v1897_v7 = vrot.slane %v6935_v41, 5  ;;  %v2537_v47 = vld [vmem:[#allocation2 + $0x88] sm:$0xf] }
 0x100   : > { %v6994_v1 = vpop.f32.mrf.mxu2  ;;  %v1373_v21 = vshrl.u32 %v1111_v18, 16  ;;  %v1376_v60 = vshll.u32 %v1111_v18, 16  ;;  %v1551_v58 = vunpack.c.l.b16 %v1371_v52  ;;  %v2783_v6 = vsel %vm6591_vm10, %v2778_v43, %v6988_v45 }
 0x101   : > { %8009 = vst [vmem:[#allocation15_spill] sm:$0xff] %v6994_v1  ;;  %1692 = vmatmul.bf16.gmra.mxu1 %v1572_v28  ;;  %v1977_v28 = vunpack.c.l.b16 %v1894_v37  ;;  %v2788_v5 = vrot.slane %v2787_v39, 4  ;;  %v1774_v39 = vld [vmem:[#allocation2 + $0x6c] sm:$0xe]  ;;  %v529_v41 = vrot.slane %v6306_v53, 4  ;;  %v2804_v52 = vshll.u32 %v2537_v47, 16 }
 0x102   : > { %v7003_v3 = vpop.f32.mrf.mxu3  ;;  %v1375_v36 = vrot.slane %v1373_v21, 4  ;;  %v1378_v18 = vrot.slane %v1376_v60, 5  ;;  %v2795_v60 = vshrl.u32 %v2536_v35, 16  ;;  %v1051_v45 = vadd.f32 %v6965_v59, %v6847_v33  ;;  %v5931_v33 = vld [vmem:[%s7982_s1 + $0x190] sm:$0xff] }
 0x103   : > { %8010 = vst [vmem:[#allocation16_spill] sm:$0xff] %v7003_v3  ;;  %v2000_v20 = vpack.c.b16 %v1977_v28, %v1976_v12  ;;  %v2793_v21 = vsel %vm6591_vm10, %v2788_v5, %v2792_v38  ;;  %v1392_v12 = vshll.u32 %v7018_v13, 16  ;;  %v2798_v28 = vshll.u32 %v2536_v35, 16  ;;  %3810 = vmatpush.bf16.msra.mxu2 %v5931_v33  ;;  %v2539_v33 = vld [vmem:[#allocation2 + $0x90] sm:$0xf] }
 0x104   : > { %v7007_v9 = vpop.f32.mrf.mxu0  ;;  %v1379_v24 = vor.u32 %v1378_v18, %v1375_v36  ;;  %v2808_v3 = vshrl.u32 %v2537_v47, 16  ;;  %v5438_v5 = vrot.slane %v1774_v39, 9  ;;  %v1899_v38 = vrot.slane %v1897_v7, 4  ;;  %v733_v47 = vld [vmem:[#allocation2 + $0x98] sm:$0x1] }
 0x105   : > { %v1573_v36 = vpack.c.b16 %v1551_v58, %v1550_v31  ;;  %v2972_v18 = vunpack.c.l.b16 %v2783_v6  ;;  %v1394_v25 = vrot.slane %v1392_v12, 5  ;;  %v2800_v48 = vrot.slane %v2798_v28, 5  ;;  %v2538_v39 = vld [vmem:[#allocation2 + $0x8c] sm:$0x1]  ;;  %v5939_v31 = vld [vmem:[%s7982_s1 + $0x1d0] sm:$0xff] }
 0x106   : > { %v7014_v30 = vpop.f32.mrf.mxu1  ;;  %v1380_v1 = vrot.slane %v1379_v24, 4  ;;  %v1050_v58 = vadd.f32 %v6965_v59, %v6807_v32  ;;  %v1114_v28 = vld [vmem:[#allocation2 + $0x84] sm:$0xf]  ;;  %4491 = vmatpush.bf16.msra.mxu3 %v5939_v31  ;;  %v1775_v31 = vld [vmem:[#allocation2 + $0x78] sm:$0xe] }
 0x107   : > { %3114 = vmatmul.bf16.gmra.mxu0 %v2994_v40  ;;  %v1389_v40 = vor.u32 %v1388_v46, %v7016_v23  ;;  %v2973_v46 = vunpack.c.l.b16 %v2793_v21  ;;  %v1898_v21 = vsel %vm6620_vm13, %v5438_v5, %v1897_v7  ;;  %v5907_v5 = vld [vmem:[%s7982_s1 + $0x150] sm:$0xff] }
 0x108   : > { %v7020_v37 = vpop.f32.mrf.mxu2  ;;  %v1385_v7 = vsel %vm6591_vm10, %v1380_v1, %v7016_v23  ;;  %v1400_v1 = vshll.u32 %v1114_v28, 16  ;;  %3496 = vmatpush.bf16.msra.mxu1 %v5907_v5  ;;  %v2822_v5 = vshll.u32 %v2539_v33, 16 }
 0x109   : > { %8011 = vst [vmem:[#allocation17_spill] sm:$0xff] %v7020_v37  ;;  %v2797_v37 = vrot.slane %v2795_v60, 4  ;;  %v1390_v53 = vrot.slane %v1389_v40, 4  ;;  %v734_v60 = vsel %vm6572_vm7, %v529_v41, %v733_v47  ;;  %v2995_v12 = vpack.c.b16 %v2973_v46, %v2972_v18 }
 0x10a   : > { %v7028_v15 = vpop.f32.mrf.mxu3  ;;  %735 = vst [vmem:[#allocation2 + $0x98] sm:$0x1] %v734_v60  ;;  %v1734_v46 = vadd.f32 %v7014_v30, %v1050_v58  ;;  %v1904_v47 = vrot.slane %v7001_v0, 5  ;;  %v2540_v60 = vld [vmem:[#allocation2 + $0x94] sm:$0xf]  ;;  %v1402_v30 = vrot.slane %v1400_v1, 5 }
 0x10b   : > { %8012 = vst [vmem:[#allocation18_spill] sm:$0xff] %v7028_v15  ;;  %v1900_v15 = vrot.slane %v6972_v57, 5  ;;  %v7043_v57 = vrot.slane %v2804_v52, 5  ;;  %v1395_v41 = vsel %vm6591_vm10, %v1390_v53, %v1394_v25  ;;  %v2801_v52 = vor.u32 %v2800_v48, %v2797_v37  ;;  %v5882_v1 = vld [vmem:[#allocation2 + $0x78] sm:$0xff] }
 0x10c   : > { %v7035_v43 = vpop.f32.mrf.mxu0  ;;  %v1052_v25 = vadd.f32 %v6965_v59, %v6867_v63  ;;  %v1053_v48 = vadd.f32 %v6965_v59, %v6892_v2  ;;  %v1552_v63 = vunpack.c.l.b16 %v1385_v7  ;;  %v5439_v7 = vrot.slane %v1775_v31, 9 }
 0x10d   : > { %2120 = vmatmul.bf16.gmra.mxu2 %v2000_v20  ;;  %v2810_v20 = vrot.slane %v2808_v3, 4  ;;  %v1901_v3 = vsel %vm6620_vm13, %v1899_v38, %v1900_v15  ;;  %v5947_v38 = vld [vmem:[%s7982_s1 + $0x210] sm:$0xff]  ;;  %v2802_v2 = vrot.slane %v2801_v52, 4  ;;  %v2828_v52 = vshll.u32 %v2540_v60, 16 }
 0x10e   : > { %v1658_v35 = vpop.f32.mrf.mxu1  ;;  %v1979_v53 = vunpack.c.l.b16 %v1901_v3  ;;  %4916 = vmatpush.bf16.msra.mxu0 %v5947_v38  ;;  %v2819_v3 = vshrl.u32 %v2539_v33, 16 }
 0x10f   : > { %2433 = vmatmul.bf16.gmra.mxu3 %v5881_v49  ;;  %v7038_v56 = vadd.f32 %v1658_v35, %v1051_v45  ;;  %v7058_v49 = vld [vmem:[#allocation2 + $0x88] sm:$0xf]  ;;  %v2814_v45 = vshll.u32 %v2538_v39, 16  ;;  %v2811_v15 = vor.u32 %v2810_v20, %v7043_v57  ;;  %v1978_v35 = vunpack.c.l.b16 %v1898_v21 }
 0x110   : > { %v2081_v6 = vpop.f32.mrf.mxu2  ;;  %v1406_v37 = vshll.u32 %v7058_v49, 16  ;;  %v1410_v18 = vshrl.u32 %v7058_v49, 16  ;;  %v1553_v20 = vunpack.c.l.b16 %v1395_v41  ;;  %v7086_v41 = vld [vmem:[#allocation2 + $0x8c] sm:$0x1] }
 0x111   : > { %v2161_v40 = vadd.f32 %v2081_v6, %v6990_v50  ;;  %1697 = vmatmul.bf16.gmra.mxu1 %v1573_v36  ;;  %v1397_v36 = vshrl.u32 %v1114_v28, 16  ;;  %v2816_v6 = vrot.slane %v2814_v45, 5  ;;  %v2812_v28 = vrot.slane %v2811_v15, 4 }
 0x112   : > { %v2394_v32 = vpop.f32.mrf.mxu3  ;;  %v7084_v21 = vrot.slane %v1406_v37, 5  ;;  %v1412_v0 = vrot.slane %v1410_v18, 4  ;;  %v2001_v24 = vpack.c.b16 %v1979_v53, %v1978_v35  ;;  %v1574_v8 = vpack.c.b16 %v1553_v20, %v1552_v63 }
 0x113   : > { %v2474_v50 = vadd.f32 %v2394_v32, %v2161_v40  ;;  %v1399_v32 = vrot.slane %v1397_v36, 4  ;;  %v2832_v15 = vshrl.u32 %v2540_v60, 16  ;;  %v2807_v37 = vsel %vm6591_vm10, %v2802_v2, %v7043_v57  ;;  %v2541_v60 = vld [vmem:[#allocation2 + $0x98] sm:$0x1] }
 0x114   : > { %v7076_v23 = vpop.f32.mrf.mxu0  ;;  %v2817_v18 = vsel %vm6591_vm10, %v2812_v28, %v2816_v6  ;;  %v1413_v53 = vor.u32 %v1412_v0, %v7084_v21  ;;  %v1416_v33 = vshll.u32 %v7086_v41, 16  ;;  %v2824_v63 = vrot.slane %v2822_v5, 5  ;;  %v740_v28 = vld [vmem:[#allocation2 + $0xa4] sm:$0x1] }
 0x115   : > { %v2834_v20 = vrot.slane %v2832_v15, 4  ;;  %v7101_v31 = vadd.f32 %v7007_v9, %v2474_v50  ;;  %v1905_v6 = vsel %vm6620_vm13, %v5439_v7, %v1904_v47  ;;  %v2838_v7 = vshll.u32 %v2541_v60, 16 }
 0x116   : > { %v1660_v39 = vpop.f32.mrf.mxu1  ;;  %v1414_v50 = vrot.slane %v1413_v53, 4 }
 0x117   : > { %3119 = vmatmul.bf16.gmra.mxu0 %v2995_v12  ;;  %v7082_v40 = vadd.f32 %v1660_v39, %v1052_v25  ;;  %v1906_v12 = vrot.slane %v1904_v47, 4  ;;  %v1907_v25 = vrot.slane %v7018_v13, 5  ;;  %v2821_v39 = vrot.slane %v2819_v3, 4 }
 0x118   : > { %v2083_v58 = vpop.f32.mrf.mxu2  ;;  %v7098_v13 = vrot.slane %v2828_v52, 5  ;;  %v1418_v3 = vrot.slane %v1416_v33, 5  ;;  %v1117_v52 = vld [vmem:[#allocation2 + $0x90] sm:$0xf] }
 0x119   : > { %v2162_v38 = vadd.f32 %v2083_v58, %v1734_v46  ;;  %v1403_v46 = vor.u32 %v1402_v30, %v1399_v32  ;;  %v2974_v30 = vunpack.c.l.b16 %v2807_v37  ;;  %v2975_v58 = vunpack.c.l.b16 %v2817_v18 }
 0x11a   : > { %v2396_v45 = vpop.f32.mrf.mxu3  ;;  %v1424_v15 = vshll.u32 %v1117_v52, 16  ;;  %v1980_v18 = vunpack.c.l.b16 %v1905_v6  ;;  %v1419_v33 = vsel %vm6591_vm10, %v1414_v50, %v1418_v3  ;;  %v7134_v6 = vld [vmem:[#allocation2 + $0x98] sm:$0x1] }
 0x11b   : > { %v2475_v36 = vadd.f32 %v2396_v45, %v2162_v38  ;;  %v1404_v9 = vrot.slane %v1403_v46, 4  ;;  %v2825_v38 = vor.u32 %v2824_v63, %v2821_v39  ;;  %v7118_v45 = vld [vmem:[#allocation2 + $0x94] sm:$0xf]  ;;  %v1555_v3 = vunpack.c.l.b16 %v1419_v33 }
 0x11c   : > { %v7094_v35 = vpop.f32.mrf.mxu0  ;;  %v1434_v37 = vshrl.u32 %v7118_v45, 16 }
 0x11d   : > { %2125 = vmatmul.bf16.gmra.mxu2 %v2001_v24  ;;  %v7104_v57 = vadd.f32 %v7035_v43, %v2475_v36  ;;  %v1908_v24 = vsel %vm6620_vm13, %v1906_v12, %v1907_v25  ;;  %v8013_v43 = vrot.slane %v6360_v27, 4  ;;  %v1421_v25 = vshrl.u32 %v1117_v52, 16 }
 0x11e   : > { %v1663_v2 = vpop.f32.mrf.mxu1  ;;  %v1430_v27 = vshll.u32 %v7118_v45, 16  ;;  %v1981_v46 = vunpack.c.l.b16 %v1908_v24  ;;  %v1409_v53 = vsel %vm6591_vm10, %v1404_v9, %v7084_v21  ;;  %v2826_v39 = vrot.slane %v2825_v38, 4  ;;  %v2542_v21 = vld [vmem:[#allocation2 + $0x9c] sm:$0xf]  ;;  %v1776_v38 = vld [vmem:[#allocation2 + $0x84] sm:$0xe] }
 0x11f   : > { %2438 = vmatmul.bf16.gmra.mxu3 %v5882_v1  ;;  %v7108_v32 = vadd.f32 %v1663_v2, %v1053_v48  ;;  %v741_v5 = vsel %vm6572_vm7, %v8013_v43, %v740_v28  ;;  %v2835_v48 = vor.u32 %v2834_v20, %v7098_v13  ;;  %v2996_v1 = vpack.c.b16 %v2975_v58, %v2974_v30  ;;  %v2543_v43 = vld [vmem:[#allocation2 + $0xa0] sm:$0xf] }
 0x120   : > { %v2086_v0 = vpop.f32.mrf.mxu2  ;;  %742 = vst [vmem:[#allocation2 + $0xa4] sm:$0x1] %v741_v5  ;;  %v2840_v20 = vrot.slane %v2838_v7, 5  ;;  %v563_v2 = vrot.slane %v6456_v44, 4  ;;  %v1423_v28 = vrot.slane %v1421_v25, 4  ;;  %v1426_v30 = vrot.slane %v1424_v15, 5 }
 0x121   : > { %v2163_v47 = vadd.f32 %v2086_v0, %v7038_v56  ;;  %1702 = vmatmul.bf16.gmra.mxu1 %v1574_v8  ;;  %v1054_v8 = vadd.f32 %v6965_v59, %v6918_v17  ;;  %v2836_v63 = vrot.slane %v2835_v48, 4  ;;  %v7136_v24 = vrot.slane %v1430_v27, 5 }
 0x122   : > { %v2399_v12 = vpop.f32.mrf.mxu3  ;;  %v1436_v58 = vrot.slane %v1434_v37, 4  ;;  %v1055_v0 = vadd.f32 %v6965_v59, %v6955_v19  ;;  %v1554_v50 = vunpack.c.l.b16 %v1409_v53  ;;  %v1911_v44 = vrot.slane %v7058_v49, 5  ;;  %v5883_v49 = vld [vmem:[#allocation2 + $0x84] sm:$0xff] }
 0x123   : > { %v2476_v36 = vadd.f32 %v2399_v12, %v2163_v47  ;;  %v2002_v47 = vpack.c.b16 %v1981_v46, %v1980_v18  ;;  %v2831_v48 = vsel %vm6591_vm10, %v2826_v39, %v7098_v13  ;;  %v2841_v7 = vsel %vm6591_vm10, %v2836_v63, %v2840_v20 }
 0x124   : > { %v7124_v56 = vpop.f32.mrf.mxu0  ;;  %v1427_v12 = vor.u32 %v1426_v30, %v1423_v28  ;;  %v1440_v19 = vshll.u32 %v7134_v6, 16  ;;  %v2843_v25 = vshrl.u32 %v2542_v21, 16  ;;  %v2846_v15 = vshll.u32 %v2542_v21, 16 }
 0x125   : > { %v1437_v27 = vor.u32 %v1436_v58, %v7136_v24  ;;  %v2856_v37 = vshrl.u32 %v2543_v43, 16  ;;  %v1575_v18 = vpack.c.b16 %v1555_v3, %v1554_v50  ;;  %v5440_v46 = vrot.slane %v1776_v38, 9 }
 0x126   : > { %v1665_v60 = vpop.f32.mrf.mxu1  ;;  %v1913_v13 = vrot.slane %v1911_v44, 4  ;;  %v1914_v53 = vrot.slane %v7086_v41, 5  ;;  %v2976_v33 = vunpack.c.l.b16 %v2831_v48  ;;  %v2977_v39 = vunpack.c.l.b16 %v2841_v7  ;;  %v5930_v41 = vld [vmem:[%s7982_s1 + $0x188] sm:$0xff]  ;;  %v1120_v7 = vld [vmem:[#allocation2 + $0x9c] sm:$0xf] }
 0x127   : > { %3124 = vmatmul.bf16.gmra.mxu0 %v2996_v1  ;;  %v7132_v17 = vadd.f32 %v1665_v60, %v1054_v8  ;;  %v7153_v63 = vadd.f32 %v7076_v23, %v2476_v36  ;;  %v1428_v28 = vrot.slane %v1427_v12, 4  ;;  %v1442_v30 = vrot.slane %v1440_v19, 5  ;;  %3811 = vmatpush.bf16.msra.mxu2 %v5930_v41 }
 0x128   : > { %v2088_v9 = vpop.f32.mrf.mxu2  ;;  %v2845_v58 = vrot.slane %v2843_v25, 4  ;;  %v2848_v21 = vrot.slane %v2846_v15, 5  ;;  %v1438_v3 = vrot.slane %v1437_v27, 4  ;;  %v2858_v23 = vrot.slane %v2856_v37, 4  ;;  %v5946_v27 = vld [vmem:[%s7982_s1 + $0x208] sm:$0xff] }
 0x129   : > { %v2164_v5 = vadd.f32 %v2088_v9, %v7082_v40  ;;  %v2852_v40 = vshll.u32 %v2543_v43, 16  ;;  %v747_v9 = vld [vmem:[#allocation2 + $0xb0] sm:$0x1]  ;;  %v1912_v38 = vsel %vm6620_vm13, %v5440_v46, %v1911_v44  ;;  %v1915_v48 = vsel %vm6620_vm13, %v1913_v13, %v1914_v53  ;;  %4917 = vmatpush.bf16.msra.mxu0 %v5946_v27 }
 0x12a   : > { %v2401_v52 = vpop.f32.mrf.mxu3  ;;  %v2997_v19 = vpack.c.b16 %v2977_v39, %v2976_v33  ;;  %v1433_v25 = vsel %vm6591_vm10, %v1428_v28, %v7136_v24  ;;  %v1443_v44 = vsel %vm6591_vm10, %v1438_v3, %v1442_v30  ;;  %v1445_v24 = vshrl.u32 %v1120_v7, 16  ;;  %v2545_v3 = vld [vmem:[#allocation2 + $0xa8] sm:$0xf]  ;;  %v5884_v27 = vld [vmem:[#allocation2 + $0x90] sm:$0xff] }
 0x12b   : > { %v2477_v1 = vadd.f32 %v2401_v52, %v2164_v5  ;;  %v7163_v43 = vrot.slane %v2852_v40, 5  ;;  %v2544_v5 = vld [vmem:[#allocation2 + $0xa4] sm:$0x1]  ;;  %v7175_v52 = vld [vmem:[#allocation2 + $0xa0] sm:$0xf]  ;;  %v1448_v37 = vshll.u32 %v1120_v7, 16  ;;  %v1056_v53 = vadd.f32 %v6965_v59, %v6982_v22 }
 0x12c   : > { %v7149_v8 = vpop.f32.mrf.mxu0  ;;  %v1458_v46 = vshrl.u32 %v7175_v52, 16  ;;  %v580_v13 = vrot.slane %v6517_v62, 4  ;;  %v1982_v33 = vunpack.c.l.b16 %v1912_v38  ;;  %v1983_v39 = vunpack.c.l.b16 %v1915_v48 }
 0x12d   : > { %2130 = vmatmul.bf16.gmra.mxu2 %v2002_v47  ;;  %v7156_v20 = vadd.f32 %v7094_v35, %v2477_v1  ;;  %v5938_v35 = vld [vmem:[%s7982_s1 + $0x1c8] sm:$0xff]  ;;  %v748_v47 = vsel %vm6572_vm7, %v563_v2, %v747_v9  ;;  %v2849_v2 = vor.u32 %v2848_v21, %v2845_v58  ;;  %v2859_v15 = vor.u32 %v2858_v23, %v7163_v43  ;;  %v1777_v21 = vld [vmem:[#allocation2 + $0x90] sm:$0xe] }
 0x12e   : > { %v1668_v60 = vpop.f32.mrf.mxu1  ;;  %4492 = vmatpush.bf16.msra.mxu3 %v5938_v35  ;;  %749 = vst [vmem:[#allocation2 + $0xb0] sm:$0x1] %v748_v47  ;;  %v2862_v1 = vshll.u32 %v2544_v5, 16  ;;  %v1556_v30 = vunpack.c.l.b16 %v1433_v25  ;;  %v1557_v58 = vunpack.c.l.b16 %v1443_v44  ;;  %v1918_v9 = vrot.slane %v7118_v45, 5 }
 0x12f   : > { %2443 = vmatmul.bf16.gmra.mxu3 %v5883_v49  ;;  %v7158_v50 = vadd.f32 %v1668_v60, %v1055_v0  ;;  %v5906_v49 = vld [vmem:[%s7982_s1 + $0x148] sm:$0xff]  ;;  %v1057_v60 = vadd.f32 %v6965_v59, %v6765_v11  ;;  %v2850_v23 = vrot.slane %v2849_v2, 4  ;;  %v2860_v35 = vrot.slane %v2859_v15, 4 }
 0x130   : > { %v2091_v36 = vpop.f32.mrf.mxu2  ;;  %3497 = vmatpush.bf16.msra.mxu1 %v5906_v49  ;;  %v2864_v22 = vrot.slane %v2862_v1, 5  ;;  %v1447_v47 = vrot.slane %v1445_v24, 4  ;;  %v1460_v11 = vrot.slane %v1458_v46, 4  ;;  %v2003_v7 = vpack.c.b16 %v1983_v39, %v1982_v33 }
 0x131   : > { %v2165_v0 = vadd.f32 %v2091_v36, %v7108_v32  ;;  %1707 = vmatmul.bf16.gmra.mxu1 %v1575_v18  ;;  %v1454_v18 = vshll.u32 %v7175_v52, 16  ;;  %v2546_v36 = vld [vmem:[#allocation2 + $0xac] sm:$0xf]  ;;  %v2867_v45 = vshrl.u32 %v2545_v3, 16  ;;  %v2870_v25 = vshll.u32 %v2545_v3, 16 }
 0x132   : > { %v2404_v12 = vpop.f32.mrf.mxu3  ;;  %v5441_v44 = vrot.slane %v1777_v21, 9  ;;  %v1920_v49 = vrot.slane %v1918_v9, 4  ;;  %v2876_v2 = vshll.u32 %v2546_v36, 16  ;;  %v2880_v15 = vshrl.u32 %v2546_v36, 16 }
 0x133   : > { %v2478_v32 = vadd.f32 %v2404_v12, %v2165_v0  ;;  %v1450_v0 = vrot.slane %v1448_v37, 5  ;;  %v7201_v38 = vrot.slane %v1454_v18, 5  ;;  %v7204_v12 = vld [vmem:[#allocation2 + $0xa4] sm:$0x1]  ;;  %v1921_v24 = vrot.slane %v7134_v6, 5 }
 0x134   : > { %v7189_v40 = vpop.f32.mrf.mxu0  ;;  %v2855_v37 = vsel %vm6591_vm10, %v2850_v23, %v7163_v43  ;;  %v2865_v18 = vsel %vm6591_vm10, %v2860_v35, %v2864_v22  ;;  %v1464_v39 = vshll.u32 %v7204_v12, 16  ;;  %v2872_v21 = vrot.slane %v2870_v25, 5  ;;  %v754_v23 = vld [vmem:[#allocation2 + $0xbc] sm:$0x1]  ;;  %v1123_v25 = vld [vmem:[#allocation2 + $0xa8] sm:$0xf] }
 0x135   : > { %v1451_v46 = vor.u32 %v1450_v0, %v1447_v47  ;;  %v1461_v33 = vor.u32 %v1460_v11, %v7201_v38  ;;  %v2882_v3 = vrot.slane %v2880_v15, 4  ;;  %v1919_v22 = vsel %vm6620_vm13, %v5441_v44, %v1918_v9  ;;  %v2547_v47 = vld [vmem:[#allocation2 + $0xb0] sm:$0x1] }
 0x136   : > { %v1670_v28 = vpop.f32.mrf.mxu1  ;;  %v2978_v36 = vunpack.c.l.b16 %v2855_v37  ;;  %v1925_v11 = vrot.slane %v7175_v52, 5  ;;  %v1469_v15 = vshrl.u32 %v1123_v25, 16  ;;  %v1472_v52 = vshll.u32 %v1123_v25, 16 }
 0x137   : > { %3129 = vmatmul.bf16.gmra.mxu0 %v2997_v19  ;;  %v7199_v41 = vadd.f32 %v1670_v28, %v1056_v53  ;;  %v1576_v53 = vpack.c.b16 %v1557_v58, %v1556_v30  ;;  %v2869_v28 = vrot.slane %v2867_v45, 4  ;;  %v7217_v30 = vadd.f32 %v7124_v56, %v2478_v32  ;;  %v1778_v32 = vld [vmem:[#allocation2 + $0x9c] sm:$0xe] }
 0x138   : > { %v2093_v5 = vpop.f32.mrf.mxu2  ;;  %v7222_v58 = vrot.slane %v2876_v2, 5  ;;  %v1922_v56 = vsel %vm6620_vm13, %v1920_v49, %v1921_v24  ;;  %v1462_v9 = vrot.slane %v1461_v33, 4  ;;  %v2886_v2 = vshll.u32 %v2547_v47, 16  ;;  %v2548_v47 = vld [vmem:[#allocation2 + $0xb4] sm:$0xf] }
 0x139   : > { %v2166_v48 = vadd.f32 %v2093_v5, %v7132_v17  ;;  %v2979_v5 = vunpack.c.l.b16 %v2865_v18  ;;  %v2873_v45 = vor.u32 %v2872_v21, %v2869_v28  ;;  %v1985_v24 = vunpack.c.l.b16 %v1922_v56 }
 0x13a   : > { %v2406_v19 = vpop.f32.mrf.mxu3  ;;  %v2883_v49 = vor.u32 %v2882_v3, %v7222_v58  ;;  %v5442_v37 = vrot.slane %v1778_v32, 9  ;;  %v1927_v18 = vrot.slane %v1925_v11, 4  ;;  %v2888_v3 = vrot.slane %v2886_v2, 5  ;;  %v7261_v32 = vld [vmem:[#allocation2 + $0xb0] sm:$0x1] }
 0x13b   : > { %v2479_v1 = vadd.f32 %v2406_v19, %v2166_v48  ;;  %v7236_v19 = vld [vmem:[#allocation2 + $0xac] sm:$0xf]  ;;  %v2874_v28 = vrot.slane %v2873_v45, 4  ;;  %v267_v2 = vld [vmem:[%s6183_s28 + $0x78] sm:$0xf] }
 0x13c   : > { %v7210_v17 = vpop.f32.mrf.mxu0 }
 0x13d   : > { %2135 = vmatmul.bf16.gmra.mxu2 %v2003_v7  ;;  %v7220_v6 = vadd.f32 %v7149_v8, %v2479_v1  ;;  %v1452_v8 = vrot.slane %v1451_v46, 4  ;;  %v1466_v7 = vrot.slane %v1464_v39, 5  ;;  %v2998_v1 = vpack.c.b16 %v2979_v5, %v2978_v36 }
 0x13e   : > { %v1673_v43 = vpop.f32.mrf.mxu1  ;;  %v1928_v39 = vrot.slane %v7204_v12, 5  ;;  %v1474_v36 = vrot.slane %v1472_v52, 5  ;;  %v5885_v52 = vld [vmem:[#allocation2 + $0x9c] sm:$0xff] }
 0x13f   : > { %2448 = vmatmul.bf16.gmra.mxu3 %v5884_v27  ;;  %v7224_v35 = vadd.f32 %v1673_v43, %v1057_v60  ;;  %v755_v60 = vsel %vm6572_vm7, %v580_v13, %v754_v23  ;;  %v1478_v13 = vshll.u32 %v7236_v19, 16  ;;  %v1457_v46 = vsel %vm6591_vm10, %v1452_v8, %v7201_v38 }
 0x140   : > { %v2096_v0 = vpop.f32.mrf.mxu2  ;;  %756 = vst [vmem:[#allocation2 + $0xbc] sm:$0x1] %v755_v60  ;;  %v1467_v33 = vsel %vm6591_vm10, %v1462_v9, %v1466_v7  ;;  %v2884_v43 = vrot.slane %v2883_v49, 4  ;;  %v1471_v23 = vrot.slane %v1469_v15, 4  ;;  %v7257_v38 = vadd.f32 %v6965_v59, %v6790_v16  ;;  %v2549_v7 = vld [vmem:[#allocation2 + $0xb8] sm:$0xf] }
 0x141   : > { %v2167_v48 = vadd.f32 %v2096_v0, %v7158_v50  ;;  %1712 = vmatmul.bf16.gmra.mxu1 %v1576_v53  ;;  %v1482_v50 = vshrl.u32 %v7236_v19, 16  ;;  %v1984_v53 = vunpack.c.l.b16 %v1919_v22  ;;  %v7253_v22 = vrot.slane %v1478_v13, 5 }
 0x142   : > { %v2409_v44 = vpop.f32.mrf.mxu3  ;;  %v1558_v12 = vunpack.c.l.b16 %v1457_v46  ;;  %v1926_v8 = vsel %vm6620_vm13, %v5442_v37, %v1925_v11  ;;  %v1929_v9 = vsel %vm6620_vm13, %v1927_v18, %v1928_v39  ;;  %v2879_v16 = vsel %vm6591_vm10, %v2874_v28, %v7222_v58 }
 0x143   : > { %v7239_v62 = vadd.f32 %v2409_v44, %v2167_v48  ;;  %v1484_v5 = vrot.slane %v1482_v50, 4  ;;  %v2004_v56 = vpack.c.b16 %v1985_v24, %v1984_v53  ;;  %v1559_v48 = vunpack.c.l.b16 %v1467_v33  ;;  %v268_v50 = vld [vmem:[%s6183_s28 + $0x7c] sm:$0xf] }
 0x144   : > { %v7243_v27 = vpop.f32.mrf.mxu0  ;;  %v2889_v25 = vsel %vm6591_vm10, %v2884_v43, %v2888_v3  ;;  %v1475_v44 = vor.u32 %v1474_v36, %v1471_v23  ;;  %v2891_v11 = vshrl.u32 %v2548_v47, 16  ;;  %v2894_v49 = vshll.u32 %v2548_v47, 16 }
 0x145   : > { %v1488_v13 = vshll.u32 %v7261_v32, 16  ;;  %v1986_v53 = vunpack.c.l.b16 %v1926_v8  ;;  %v1987_v24 = vunpack.c.l.b16 %v1929_v9  ;;  %v2900_v37 = vshll.u32 %v2549_v7, 16  ;;  %v5929_v8 = vld [vmem:[%s7982_s1 + $0x180] sm:$0xff] }
 0x146   : > { %v7251_v21 = vpop.f32.mrf.mxu1  ;;  %v2904_v18 = vshrl.u32 %v2549_v7, 16  ;;  %v1577_v46 = vpack.c.b16 %v1559_v48, %v1558_v12  ;;  %v2980_v33 = vunpack.c.l.b16 %v2879_v16  ;;  %v2981_v39 = vunpack.c.l.b16 %v2889_v25  ;;  %3812 = vmatpush.bf16.msra.mxu2 %v5929_v8 }
 0x147   : > { %3134 = vmatmul.bf16.gmra.mxu0 %v2998_v1  ;;  %v1485_v1 = vor.u32 %v1484_v5, %v7253_v22  ;;  %v582_v28 = vshrl.u32 %v267_v2, 16  ;;  %v2893_v3 = vrot.slane %v2891_v11, 4  ;;  %v2896_v23 = vrot.slane %v2894_v49, 5  ;;  %v2550_v25 = vld [vmem:[#allocation2 + $0xbc] sm:$0x1] }
 0x148   : > { %v2098_v0 = vpop.f32.mrf.mxu2  ;;  %v590_v36 = vshrl.u32 %v268_v50, 16  ;;  %v585_v12 = vshll.u32 %v267_v2, 16  ;;  %v7287_v48 = vrot.slane %v2900_v37, 5  ;;  %v2906_v9 = vrot.slane %v2904_v18, 4 }
 0x149   : > { %v2168_v60 = vadd.f32 %v2098_v0, %v7199_v41  ;;  %v1059_v41 = vadd.f32 %v6965_v59, %v6813_v61  ;;  %v1476_v61 = vrot.slane %v1475_v44, 4  ;;  %v1486_v47 = vrot.slane %v1485_v1, 4  ;;  %v1126_v44 = vld [vmem:[#allocation2 + $0xb4] sm:$0xf] }
 0x14a   : > { %v2411_v45 = vpop.f32.mrf.mxu3  ;;  %v1490_v0 = vrot.slane %v1488_v13, 5  ;;  %v584_v16 = vrot.slane %v582_v28, 7  ;;  %v7291_v7 = vadd.f32 %v7189_v40, %v7239_v62  ;;  %v592_v11 = vrot.slane %v590_v36, 7  ;;  %v757_v40 = vld [vmem:[#allocation2 + $0xc0] sm:$0xf] }
 0x14b   : > { %v2481_v15 = vadd.f32 %v2411_v45, %v2168_v60  ;;  %v593_v49 = vshll.u32 %v268_v50, 16  ;;  %v1060_v2 = vadd.f32 %v6965_v59, %v6851_v42  ;;  %v2005_v1 = vpack.c.b16 %v1987_v24, %v1986_v53  ;;  %v5905_v50 = vld [vmem:[%s7982_s1 + $0x140] sm:$0xff]  ;;  %v7308_v42 = vld [vmem:[#allocation2 + $0xb8] sm:$0xf] }
 0x14c   : > { %v7277_v58 = vpop.f32.mrf.mxu0  ;;  %v2999_v13 = vpack.c.b16 %v2981_v39, %v2980_v33  ;;  %v2897_v37 = vor.u32 %v2896_v23, %v2893_v3  ;;  %v587_v59 = vor.u32 %v585_v12, %v584_v16  ;;  %v1491_v24 = vsel %vm6591_vm10, %v1486_v47, %v1490_v0  ;;  %v761_v33 = vld [vmem:[#allocation2 + $0xc8] sm:$0x1]  ;;  %3498 = vmatpush.bf16.msra.mxu1 %v5905_v50 }
 0x14d   : > { %2140 = vmatmul.bf16.gmra.mxu2 %v2004_v56  ;;  %v5937_v56 = vld [vmem:[%s7982_s1 + $0x1c0] sm:$0xff]  ;;  %v2907_v18 = vor.u32 %v2906_v9, %v7287_v48  ;;  %v1496_v39 = vshll.u32 %v1126_v44, 16  ;;  %v595_v28 = vor.u32 %v593_v49, %v592_v11  ;;  %v1742_v3 = vadd.f32 %v7251_v21, %v7257_v38 }
 0x14e   : > { %v1678_v43 = vpop.f32.mrf.mxu1  ;;  %4493 = vmatpush.bf16.msra.mxu3 %v5937_v56  ;;  %v1932_v36 = vrot.slane %v7236_v19, 5  ;;  %v1502_v47 = vshll.u32 %v7308_v42, 16  ;;  %v1506_v0 = vshrl.u32 %v7308_v42, 16  ;;  %v1561_v21 = vunpack.c.l.b16 %v1491_v24 }
 0x14f   : > { %2453 = vmatmul.bf16.gmra.mxu3 %v5885_v52  ;;  %v7279_v5 = vadd.f32 %v1678_v43, %v1059_v41  ;;  %v7295_v41 = vadd.f32 %v7210_v17, %v2481_v15  ;;  %v5945_v17 = vld [vmem:[%s7982_s1 + $0x200] sm:$0xff]  ;;  %v588_v15 = vrot.slane %v584_v16, 4  ;;  %v597_v43 = vrot.slane %v592_v11, 4 }
 0x150   : > { %v2101_v60 = vpop.f32.mrf.mxu2  ;;  %4918 = vmatpush.bf16.msra.mxu0 %v5945_v17  ;;  %v2898_v38 = vrot.slane %v2897_v37, 4  ;;  %v2908_v9 = vrot.slane %v2907_v18, 4  ;;  %v7331_v10 = vrot.slane %v1502_v47, 5  ;;  %v5886_v37 = vld [vmem:[#allocation2 + $0xa8] sm:$0xff] }
 0x151   : > { %v2169_v45 = vadd.f32 %v2101_v60, %v7224_v35  ;;  %1717 = vmatmul.bf16.gmra.mxu1 %v1577_v46  ;;  %v1481_v35 = vsel %vm6591_vm10, %v1476_v61, %v7253_v22  ;;  %v2910_v22 = vshll.u32 %v2550_v25, 16  ;;  %v1493_v46 = vshrl.u32 %v1126_v44, 16 }
 0x152   : > { %v2414_v52 = vpop.f32.mrf.mxu3  ;;  %v758_v61 = vsel %vm6205_vm5, %v587_v59, %v757_v40  ;;  %v1560_v56 = vunpack.c.l.b16 %v1481_v35  ;;  %v596_v12 = vsel %vm6193_vm4, %v588_v15, %v595_v28  ;;  %v762_v14 = vsel %vm6572_vm7, %v597_v43, %v761_v33  ;;  %v7340_v40 = vld [vmem:[#allocation2 + $0xbc] sm:$0x1] }
 0x153   : > { %v2482_v62 = vadd.f32 %v2414_v52, %v2169_v45  ;;  %759 = vst [vmem:[#allocation2 + $0xc0] sm:$0xf] %v758_v61  ;;  %v2912_v19 = vrot.slane %v2910_v22, 5  ;;  %v1779_v45 = vld [vmem:[#allocation2 + $0xa8] sm:$0xe]  ;;  %v1495_v25 = vrot.slane %v1493_v46, 4  ;;  %v1061_v52 = vadd.f32 %v7336_v54, %v6875_v55 }
 0x154   : > { %v7310_v53 = vpop.f32.mrf.mxu0  ;;  %760 = vst [vmem:[#allocation2 + $0xc4] sm:$0xf] %v596_v12  ;;  %v1498_v44 = vrot.slane %v1496_v39, 5  ;;  %v2903_v50 = vsel %vm6591_vm10, %v2898_v38, %v7287_v48  ;;  %v1578_v59 = vpack.c.b16 %v1561_v21, %v1560_v56  ;;  %v1935_v15 = vrot.slane %v7261_v32, 5  ;;  %v6083_v48 = vld [vmem:[#allocation2 + $0x10] sm:$0xf] }
 0x155   : > { %763 = vst [vmem:[#allocation2 + $0xc8] sm:$0x1] %v762_v14  ;;  %v7329_v11 = vadd.f32 %v7243_v27, %v2482_v62  ;;  %v5443_v27 = vrot.slane %v1779_v45, 9  ;;  %v1934_v62 = vrot.slane %v1932_v36, 4  ;;  %v2913_v17 = vsel %vm6591_vm10, %v2908_v9, %v2912_v19 }
 0x156   : > { %v1680_v23 = vpop.f32.mrf.mxu1  ;;  %v1499_v55 = vor.u32 %v1498_v44, %v1495_v25  ;;  %v1512_v33 = vshll.u32 %v7340_v40, 16  ;;  %v3253_v43 = vrot.slane %v6083_v48, 5 }
 0x157   : > { %3139 = vmatmul.bf16.gmra.mxu0 %v2999_v13  ;;  %v7322_v8 = vadd.f32 %v1680_v23, %v1060_v2  ;;  %v1508_v2 = vrot.slane %v1506_v0, 4  ;;  %v1933_v14 = vsel %vm6620_vm13, %v5443_v27, %v1932_v36  ;;  %v1062_v36 = vadd.f32 %v7336_v54, %v6899_v4  ;;  %v3187_v4 = vld [vmem:[#allocation2 + $0xc] sm:$0xe] }
 0x158   : > { %v2103_v60 = vpop.f32.mrf.mxu2  ;;  %v1500_v21 = vrot.slane %v1499_v55, 4 }
 0x159   : > { %v2170_v16 = vadd.f32 %v2103_v60, %v1742_v3  ;;  %v1509_v46 = vor.u32 %v1508_v2, %v7331_v10  ;;  %v2983_v3 = vunpack.c.l.b16 %v2913_v17  ;;  %v1936_v60 = vsel %vm6620_vm13, %v1934_v62, %v1935_v15  ;;  %v6084_v17 = vld [vmem:[#allocation2 + $0x14] sm:$0x1] }
 0x15a   : > { %v2416_v49 = vpop.f32.mrf.mxu3  ;;  %v2551_v24 = vld [vmem:[#allocation2 + $0xc0] sm:$0xf]  ;;  %v1989_v27 = vunpack.c.l.b16 %v1936_v60  ;;  %v1505_v55 = vsel %vm6591_vm10, %v1500_v21, %v7331_v10  ;;  %v1939_v10 = vrot.slane %v7308_v42, 5  ;;  %v1063_v42 = vadd.f32 %v7336_v54, %v6921_v26  ;;  %v3927_v26 = vld [vmem:[#allocation2 + $0x1c] sm:$0xf] }
 0x15b   : > { %v2483_v13 = vadd.f32 %v2416_v49, %v2170_v16  ;;  %v2915_v39 = vshrl.u32 %v2551_v24, 16  ;;  %v2918_v28 = vshll.u32 %v2551_v24, 16  ;;  %v2552_v32 = vld [vmem:[#allocation2 + $0xc4] sm:$0xf]  ;;  %v1510_v19 = vrot.slane %v1509_v46, 4 }
 0x15c   : > { %v7342_v35 = vpop.f32.mrf.mxu0  ;;  %v2928_v56 = vshrl.u32 %v2552_v32, 16  ;;  %v2553_v38 = vld [vmem:[#allocation2 + $0xc8] sm:$0x1]  ;;  %v1514_v16 = vrot.slane %v1512_v33, 5 }
 0x15d   : > { %2145 = vmatmul.bf16.gmra.mxu2 %v2005_v1  ;;  %v7351_v18 = vadd.f32 %v7277_v58, %v2483_v13  ;;  %v2982_v1 = vunpack.c.l.b16 %v2903_v50  ;;  %v2917_v47 = vrot.slane %v2915_v39, 4  ;;  %v2920_v0 = vrot.slane %v2918_v28, 5 }
 0x15e   : > { %v1683_v22 = vpop.f32.mrf.mxu1  ;;  %v2924_v58 = vshll.u32 %v2552_v32, 16  ;;  %v2930_v25 = vrot.slane %v2928_v56, 4  ;;  %v2934_v13 = vshll.u32 %v2553_v38, 16  ;;  %v3255_v50 = vrot.slane %v3253_v43, 4  ;;  %v5887_v56 = vld [vmem:[#allocation2 + $0xb4] sm:$0xff] }
 0x15f   : > { %2458 = vmatmul.bf16.gmra.mxu3 %v5886_v37  ;;  %v7355_v61 = vadd.f32 %v1683_v22, %v1061_v52  ;;  %v3000_v49 = vpack.c.b16 %v2983_v3, %v2982_v1  ;;  %v2921_v52 = vor.u32 %v2920_v0, %v2917_v47  ;;  %v1988_v37 = vunpack.c.l.b16 %v1933_v14 }
 0x160   : > { %v2106_v23 = vpop.f32.mrf.mxu2  ;;  %v2926_v45 = vrot.slane %v2924_v58, 5  ;;  %v1515_v24 = vsel %vm6591_vm10, %v1510_v19, %v1514_v16  ;;  %v5605_v28 = vrot.slane %v3187_v4, 9  ;;  %v1562_v3 = vunpack.c.l.b16 %v1505_v55 }
 0x161   : > { %v2171_v12 = vadd.f32 %v2106_v23, %v7279_v5  ;;  %1722 = vmatmul.bf16.gmra.mxu1 %v1578_v59  ;;  %v3256_v59 = vrot.slane %v6084_v17, 5  ;;  %v2922_v33 = vrot.slane %v2921_v52, 4  ;;  %v2006_v1 = vpack.c.b16 %v1989_v27, %v1988_v37 }
 0x162   : > { %v2419_v9 = vpop.f32.mrf.mxu3  ;;  %v2931_v5 = vor.u32 %v2930_v25, %v2926_v45  ;;  %v1563_v32 = vunpack.c.l.b16 %v1515_v24  ;;  %v3254_v47 = vsel %vm6620_vm13, %v5605_v28, %v3253_v43  ;;  %v1941_v25 = vrot.slane %v1939_v10, 4 }
 0x163   : > { %v2484_v44 = vadd.f32 %v2419_v9, %v2171_v12  ;;  %v3257_v0 = vsel %vm6620_vm13, %v3255_v50, %v3256_v59  ;;  %v1780_v12 = vld [vmem:[#allocation2 + $0xb4] sm:$0xe]  ;;  %v3379_v14 = vunpack.c.l.b16 %v3254_v47  ;;  %v3984_v55 = vshll.u32 %v3927_v26, 16 }
 0x164   : > { %v7362_v2 = vpop.f32.mrf.mxu0  ;;  %v2932_v39 = vrot.slane %v2931_v5, 4  ;;  %v3380_v60 = vunpack.c.l.b16 %v3257_v0  ;;  %v1579_v43 = vpack.c.b16 %v1563_v32, %v1562_v3  ;;  %v5444_v16 = vrot.slane %v1780_v12, 9 }
 0x165   : > { %v7367_v62 = vadd.f32 %v7310_v53, %v2484_v44  ;;  %v2936_v53 = vrot.slane %v2934_v13, 5  ;;  %v1942_v44 = vrot.slane %v7340_v40, 5  ;;  %v3926_v13 = vld [vmem:[#allocation2 + $0x18] sm:$0xf]  ;;  %v3988_v24 = vshrl.u32 %v3927_v26, 16 }
 0x166   : > { %v1685_v15 = vpop.f32.mrf.mxu1  ;;  %v7390_v9 = vpack.c.b16 %v3380_v60, %v3379_v14  ;;  %v1940_v50 = vsel %vm6620_vm13, %v5444_v16, %v1939_v10  ;;  %v3978_v17 = vshll.u32 %v3926_v13, 16  ;;  %v3986_v10 = vrot.slane %v3984_v55, 5 }
 0x167   : > { %3144 = vmatmul.bf16.gmra.mxu0 %v3000_v49  ;;  %v7374_v22 = vadd.f32 %v1685_v15, %v1062_v36  ;;  %v2937_v38 = vsel %vm6591_vm10, %v2932_v39, %v2936_v53  ;;  %v1943_v40 = vsel %vm6620_vm13, %v1941_v25, %v1942_v44  ;;  %v4607_v53 = vld [vmem:[#allocation2 + $0x18] sm:$0xe]  ;;  %v3990_v47 = vrot.slane %v3988_v24, 4 }
 0x168   : > { %v2108_v46 = vpop.f32.mrf.mxu2  ;;  %v2985_v5 = vunpack.c.l.b16 %v2937_v38  ;;  %v1991_v39 = vunpack.c.l.b16 %v1943_v40  ;;  %v3980_v3 = vrot.slane %v3978_v17, 5  ;;  %v8014_v44 = vld [vmem:[#allocation3_spill] sm:$0xff] }
 0x169   : > { %v2172_v48 = vadd.f32 %v2108_v46, %v7322_v8  ;;  %v2927_v8 = vsel %vm6591_vm10, %v2922_v33, %v2926_v45  ;;  %v4673_v46 = vrot.slane %v3927_v26, 5  ;;  %v1990_v33 = vunpack.c.l.b16 %v1940_v50  ;;  %v3930_v50 = vld [vmem:[#allocation2 + $0x28] sm:$0xf] }
 0x16a   : > { %v2421_v23 = vpop.f32.mrf.mxu3  ;;  %v2984_v52 = vunpack.c.l.b16 %v2927_v8 }
 0x16b   : > { %v2485_v58 = vadd.f32 %v2421_v23, %v2172_v48  ;;  %v3928_v23 = vld [vmem:[#allocation2 + $0x20] sm:$0x1]  ;;  %v2007_v14 = vpack.c.b16 %v1991_v39, %v1990_v33  ;;  %v4012_v33 = vshrl.u32 %v3930_v50, 16 }
 0x16c   : > { %v7382_v21 = vpop.f32.mrf.mxu0  ;;  %v3001_v15 = vpack.c.b16 %v2985_v5, %v2984_v52  ;;  %v4676_v12 = vrot.slane %v3928_v23, 5  ;;  %v1065_v52 = vadd.f32 %v7336_v54, %v8014_v44 }
 0x16d   : > { %2150 = vmatmul.bf16.gmra.mxu2 %v2006_v1  ;;  %v7394_v49 = vadd.f32 %v7342_v35, %v2485_v58  ;;  %v3975_v35 = vshrl.u32 %v3926_v13, 16  ;;  %v5781_v58 = vrot.slane %v4607_v53, 9 }
 0x16e   : > { %v1688_v19 = vpop.f32.mrf.mxu1 }
 0x16f   : > { %2463 = vmatmul.bf16.gmra.mxu3 %v5887_v56  ;;  %v7396_v45 = vadd.f32 %v1688_v19, %v1063_v42  ;;  %v3977_v1 = vrot.slane %v3975_v35, 4  ;;  %v4675_v56 = vrot.slane %v4673_v46, 4  ;;  %v5888_v42 = vld [vmem:[#allocation2 + $0xc0] sm:$0xff]  ;;  %v4674_v16 = vsel %vm6620_vm13, %v5781_v58, %v4673_v46 }
 0x170   : > { %v2111_v36 = vpop.f32.mrf.mxu2  ;;  %v4799_v17 = vunpack.c.l.b16 %v4674_v16 }
 0x171   : > { %v2173_v37 = vadd.f32 %v2111_v36, %v7355_v61  ;;  %1727 = vmatmul.bf16.gmra.mxu1 %v1579_v43  ;;  %v1064_v61 = vadd.f32 %v7336_v54, %v6959_v51  ;;  %v3981_v8 = vor.u32 %v3980_v3, %v3977_v1  ;;  %v3991_v43 = vor.u32 %v3990_v47, %v3986_v10  ;;  %v6086_v3 = vld [vmem:[#allocation2 + $0x20] sm:$0x1] }
 0x172   : > { %v2424_v27 = vpop.f32.mrf.mxu3  ;;  %v4677_v25 = vsel %vm6620_vm13, %v4675_v56, %v4676_v12  ;;  %v4680_v56 = vrot.slane %v3930_v50, 5 }
 0x173   : > { %v2486_v59 = vadd.f32 %v2424_v27, %v2173_v37  ;;  %v3982_v36 = vrot.slane %v3981_v8, 4  ;;  %v6085_v37 = vld [vmem:[#allocation2 + $0x1c] sm:$0xf]  ;;  %v3992_v35 = vrot.slane %v3991_v43, 4  ;;  %v3931_v8 = vld [vmem:[#allocation2 + $0x2c] sm:$0x1] }
 0x174   : > { %v7403_v4 = vpop.f32.mrf.mxu0  ;;  %v3260_v27 = vrot.slane %v6085_v37, 5 }
 0x175   : > { %v7408_v28 = vadd.f32 %v7362_v2, %v2486_v59  ;;  %v3994_v2 = vshll.u32 %v3928_v23, 16  ;;  %v4800_v59 = vunpack.c.l.b16 %v4677_v25  ;;  %v3987_v53 = vsel %vm6591_vm10, %v3982_v36, %v3986_v10 }
 0x176   : > { %v1690_v48 = vpop.f32.mrf.mxu1  ;;  %v3262_v1 = vrot.slane %v3260_v27, 4  ;;  %v3263_v23 = vrot.slane %v6086_v3, 5  ;;  %v4683_v36 = vrot.slane %v3931_v8, 5 }
 0x177   : > { %3149 = vmatmul.bf16.gmra.mxu0 %v3001_v15  ;;  %v7410_v32 = vadd.f32 %v1690_v48, %v1064_v61  ;;  %v3996_v26 = vrot.slane %v3994_v2, 5  ;;  %v3188_v15 = vld [vmem:[#allocation2 + $0x18] sm:$0xe]  ;;  %v4831_v58 = vpack.c.b16 %v4800_v59, %v4799_v17  ;;  %v4014_v2 = vrot.slane %v4012_v33, 4 }
 0x178   : > { %v2113_v0 = vpop.f32.mrf.mxu2  ;;  %v5606_v48 = vrot.slane %v3188_v15, 9  ;;  %v3264_v44 = vsel %vm6620_vm13, %v3262_v1, %v3263_v23 }
 0x179   : > { %v2174_v51 = vadd.f32 %v2113_v0, %v7374_v22  ;;  %v3929_v22 = vld [vmem:[#allocation2 + $0x24] sm:$0xf]  ;;  %v3997_v0 = vsel %vm6591_vm10, %v3992_v35, %v3996_v26  ;;  %v5913_v35 = vld [vmem:[#allocation2 + $0x18] sm:$0xff]  ;;  %v3382_v59 = vunpack.c.l.b16 %v3264_v44  ;;  %v6088_v44 = vld [vmem:[#allocation2 + $0x2c] sm:$0x1] }
 0x17a   : > { %v2426_v60 = vpop.f32.mrf.mxu3  ;;  %v3999_v24 = vshrl.u32 %v3929_v22, 16  ;;  %v4002_v46 = vshll.u32 %v3929_v22, 16  ;;  %v4375_v43 = vunpack.c.l.b16 %v3997_v0  ;;  %v3261_v25 = vsel %vm6620_vm13, %v5606_v48, %v3260_v27 }
 0x17b   : > { %v2487_v38 = vadd.f32 %v2426_v60, %v2174_v51  ;;  %v4608_v51 = vld [vmem:[#allocation2 + $0x24] sm:$0xe]  ;;  %v3381_v17 = vunpack.c.l.b16 %v3261_v25 }
 0x17c   : > { %v7413_v19 = vpop.f32.mrf.mxu0  ;;  %v5782_v22 = vrot.slane %v4608_v51, 9 }
 0x17d   : > { %2155 = vmatmul.bf16.gmra.mxu2 %v2007_v14  ;;  %v7422_v5 = vadd.f32 %v7382_v21, %v2487_v38  ;;  %v4008_v21 = vshll.u32 %v3930_v50, 16  ;;  %v8015_v14 = vld [vmem:[#allocation5_spill] sm:$0xff]  ;;  %v4018_v50 = vshll.u32 %v3931_v8, 16 }
 0x17e   : > { %v1693_v13 = vpop.f32.mrf.mxu1  ;;  %v1066_v60 = vadd.f32 %v7336_v54, %v8015_v14  ;;  %v3932_v14 = vld [vmem:[#allocation2 + $0x30] sm:$0xf] }
 0x17f   : > { %2468 = vmatmul.bf16.gmra.mxu3 %v5888_v42  ;;  %v7424_v40 = vadd.f32 %v1693_v13, %v1065_v52  ;;  %v7436_v10 = vrot.slane %v4008_v21, 5  ;;  %v4374_v42 = vunpack.c.l.b16 %v3987_v53  ;;  %v4682_v13 = vrot.slane %v4680_v56, 4  ;;  %v8016_v21 = vld [vmem:[#allocation7_spill] sm:$0xff] }
 0x180   : > { %v2116_v55 = vpop.f32.mrf.mxu2  ;;  %v1067_v33 = vadd.f32 %v7336_v54, %v8016_v21  ;;  %v3412_v53 = vpack.c.b16 %v3382_v59, %v3381_v17  ;;  %v4020_v1 = vrot.slane %v4018_v50, 5  ;;  %v4609_v17 = vld [vmem:[#allocation2 + $0x30] sm:$0xe]  ;;  %v3934_v21 = vld [vmem:[#allocation2 + $0x38] sm:$0x1] }
 0x181   : > { %v2175_v61 = vadd.f32 %v2116_v55, %v7396_v45  ;;  %3499 = vmatmul.bf16.vlgmr.msra.gmra.mxu1 %v7390_v9  ;;  %v4001_v45 = vrot.slane %v3999_v24, 4  ;;  %v4004_v9 = vrot.slane %v4002_v46, 5  ;;  %v4015_v15 = vor.u32 %v4014_v2, %v7436_v10 }
 0x182   : > { %v2429_v39 = vpop.f32.mrf.mxu3  ;;  %v4406_v24 = vpack.c.b16 %v4375_v43, %v4374_v42  ;;  %v4681_v46 = vsel %vm6620_vm13, %v5782_v22, %v4680_v56  ;;  %v3270_v22 = vrot.slane %v6088_v44, 5 }
 0x183   : > { %v2488_v47 = vadd.f32 %v2429_v39, %v2175_v61  ;;  %v4005_v37 = vor.u32 %v4004_v9, %v4001_v45  ;;  %v4684_v61 = vsel %vm6620_vm13, %v4682_v13, %v4683_v36  ;;  %v4016_v48 = vrot.slane %v4015_v15, 4  ;;  %v3189_v9 = vld [vmem:[#allocation2 + $0x24] sm:$0xe] }
 0x184   : > { %v7432_v12 = vpop.f32.mrf.mxu0  ;;  %v4802_v0 = vunpack.c.l.b16 %v4684_v61  ;;  %v4023_v36 = vshrl.u32 %v3932_v14, 16 }
 0x185   : > { %v7439_v38 = vadd.f32 %v7403_v4, %v2488_v47  ;;  %v4801_v47 = vunpack.c.l.b16 %v4681_v46  ;;  %v4021_v2 = vsel %vm6591_vm10, %v4016_v48, %v4020_v1  ;;  %v5783_v1 = vrot.slane %v4609_v17, 9  ;;  %v3190_v17 = vld [vmem:[#allocation2 + $0x30] sm:$0xe] }
 0x186   : > { %v1695_v16 = vpop.f32.mrf.mxu1 }
 0x187   : > { %4919 = vmatmul.bf16.vlgmr.msra.gmra.mxu0 %v4831_v58  ;;  %v7445_v52 = vadd.f32 %v1695_v16, %v1066_v60  ;;  %v6087_v58 = vld [vmem:[#allocation2 + $0x28] sm:$0xf]  ;;  %v3933_v60 = vld [vmem:[#allocation2 + $0x34] sm:$0xf]  ;;  %v4832_v43 = vpack.c.b16 %v4802_v0, %v4801_v47  ;;  %v5607_v16 = vrot.slane %v3189_v9, 9  ;;  %v4690_v47 = vrot.slane %v3934_v21, 5 }
 0x188   : > { %v2118_v26 = vpop.f32.mrf.mxu2  ;;  %v3267_v56 = vrot.slane %v6087_v58, 5  ;;  %v5914_v58 = vld [vmem:[#allocation2 + $0x24] sm:$0xff] }
 0x189   : > { %v2176_v4 = vadd.f32 %v2118_v26, %v7410_v32  ;;  %v4006_v32 = vrot.slane %v4005_v37, 4  ;;  %v4026_v26 = vshll.u32 %v3932_v14, 16  ;;  %v4032_v37 = vshll.u32 %v3933_v60, 16 }
 0x18a   : > { %v2431_v27 = vpop.f32.mrf.mxu3  ;;  %v3269_v25 = vrot.slane %v3267_v56, 4 }
 0x18b   : > { %v2489_v55 = vadd.f32 %v2431_v27, %v2176_v4  ;;  %v4687_v4 = vrot.slane %v3933_v60, 5  ;;  %v4377_v27 = vunpack.c.l.b16 %v4021_v2 }
 0x18c   : > { %v7455_v39 = vpop.f32.mrf.mxu0  ;;  %v3271_v46 = vsel %vm6620_vm13, %v3269_v25, %v3270_v22  ;;  %v8018_v25 = vld [vmem:[#allocation11_spill] sm:$0xff] }
 0x18d   : > { %3813 = vmatmul.bf16.vlgmr.msra.gmra.mxu2 %v5913_v35  ;;  %v7458_v3 = vadd.f32 %v7413_v19, %v2489_v55  ;;  %v4011_v19 = vsel %vm6591_vm10, %v4006_v32, %v7436_v10  ;;  %v8017_v35 = vld [vmem:[#allocation9_spill] sm:$0xff]  ;;  %v4028_v32 = vrot.slane %v4026_v26, 5  ;;  %v3384_v9 = vunpack.c.l.b16 %v3271_v46 }
 0x18e   : > { %v1698_v23 = vpop.f32.mrf.mxu1  ;;  %v1068_v10 = vadd.f32 %v7336_v54, %v8017_v35  ;;  %v4376_v15 = vunpack.c.l.b16 %v4011_v19 }
 0x18f   : > { %4494 = vmatmul.bf16.vlgmr.msra.gmra.mxu3 %v4406_v24  ;;  %v7460_v45 = vadd.f32 %v1698_v23, %v1067_v33  ;;  %v3268_v24 = vsel %vm6620_vm13, %v5607_v16, %v3267_v56  ;;  %v4025_v33 = vrot.slane %v4023_v36, 4  ;;  %v4689_v23 = vrot.slane %v4687_v4, 4  ;;  %v6089_v36 = vld [vmem:[#allocation2 + $0x34] sm:$0xf] }
 0x190   : > { %v2121_v51 = vpop.f32.mrf.mxu2  ;;  %v3383_v56 = vunpack.c.l.b16 %v3268_v24  ;;  %v3274_v26 = vrot.slane %v6089_v36, 5 }
 0x191   : > { %v2177_v8 = vadd.f32 %v2121_v51, %v7424_v40  ;;  %3504 = vmatmul.bf16.gmra.mxu1 %v3412_v53  ;;  %v4036_v40 = vshrl.u32 %v3933_v60, 16  ;;  %v7481_v53 = vrot.slane %v4032_v37, 5  ;;  %v4407_v60 = vpack.c.b16 %v4377_v27, %v4376_v15  ;;  %v3935_v37 = vld [vmem:[#allocation2 + $0x3c] sm:$0xf] }
 0x192   : > { %v2434_v42 = vpop.f32.mrf.mxu3  ;;  %v4691_v16 = vsel %vm6620_vm13, %v4689_v23, %v4690_v47  ;;  %v3413_v44 = vpack.c.b16 %v3384_v9, %v3383_v56 }
 0x193   : > { %v2490_v13 = vadd.f32 %v2434_v42, %v2177_v8  ;;  %v4029_v8 = vor.u32 %v4028_v32, %v4025_v33  ;;  %v4042_v42 = vshll.u32 %v3934_v21, 16  ;;  %v4050_v21 = vshll.u32 %v3935_v37, 16 }
 0x194   : > { %v7468_v50 = vpop.f32.mrf.mxu0 }
 0x195   : > { %v7473_v59 = vadd.f32 %v7432_v12, %v2490_v13  ;;  %v4038_v12 = vrot.slane %v4036_v40, 4  ;;  %v3936_v40 = vld [vmem:[#allocation2 + $0x40] sm:$0xf]  ;;  %v4030_v27 = vrot.slane %v4029_v8, 4  ;;  %v4044_v24 = vrot.slane %v4042_v42, 5 }
 0x196   : > { %v1700_v55 = vpop.f32.mrf.mxu1  ;;  %v4056_v33 = vshll.u32 %v3936_v40, 16  ;;  %v4060_v47 = vshrl.u32 %v3936_v40, 16  ;;  %v4610_v42 = vld [vmem:[#allocation2 + $0x3c] sm:$0xe] }
 0x197   : > { %4924 = vmatmul.bf16.gmra.mxu0 %v4832_v43  ;;  %v7479_v61 = vadd.f32 %v1700_v55, %v1068_v10  ;;  %v4039_v2 = vor.u32 %v4038_v12, %v7481_v53  ;;  %v4688_v43 = vsel %vm6620_vm13, %v5783_v1, %v4687_v4  ;;  %v4804_v10 = vunpack.c.l.b16 %v4691_v16  ;;  %v6090_v1 = vld [vmem:[#allocation2 + $0x38] sm:$0x1] }
 0x198   : > { %v2123_v48 = vpop.f32.mrf.mxu2  ;;  %v4803_v4 = vunpack.c.l.b16 %v4688_v43  ;;  %v3276_v12 = vrot.slane %v3274_v26, 4  ;;  %v3277_v23 = vrot.slane %v6090_v1, 5  ;;  %v4035_v9 = vsel %vm6591_vm10, %v4030_v27, %v7481_v53  ;;  %v5915_v27 = vld [vmem:[#allocation2 + $0x30] sm:$0xff] }
 0x199   : > { %v2178_v0 = vadd.f32 %v2123_v48, %v7445_v52  ;;  %v1069_v52 = vadd.f32 %v7336_v54, %v8018_v25  ;;  %v4040_v55 = vrot.slane %v4039_v2, 4  ;;  %v5608_v48 = vrot.slane %v3190_v17, 9 }
 0x19a   : > { %v2436_v51 = vpop.f32.mrf.mxu3  ;;  %v4052_v2 = vrot.slane %v4050_v21, 5  ;;  %v3278_v53 = vsel %vm6620_vm13, %v3276_v12, %v3277_v23  ;;  %v8020_v23 = vld [vmem:[#allocation15_spill] sm:$0xff] }
 0x19b   : > { %v2491_v14 = vadd.f32 %v2436_v51, %v2178_v0  ;;  %v4694_v51 = vrot.slane %v3936_v40, 5  ;;  %v3275_v25 = vsel %vm6620_vm13, %v5608_v48, %v3274_v26  ;;  %v3937_v40 = vld [vmem:[#allocation2 + $0x44] sm:$0x1] }
 0x19c   : > { %v7484_v19 = vpop.f32.mrf.mxu0  ;;  %v4697_v17 = vrot.slane %v3937_v40, 5  ;;  %v3385_v26 = vunpack.c.l.b16 %v3275_v25 }
 0x19d   : > { %3818 = vmatmul.bf16.gmra.mxu2 %v5914_v58  ;;  %v7494_v22 = vadd.f32 %v7455_v39, %v2491_v14  ;;  %v4047_v39 = vshrl.u32 %v3935_v37, 16  ;;  %v4833_v58 = vpack.c.b16 %v4804_v10, %v4803_v4  ;;  %v8019_v14 = vld [vmem:[#allocation13_spill] sm:$0xff]  ;;  %v5784_v10 = vrot.slane %v4610_v42, 9 }
 0x19e   : > { %v1703_v13 = vpop.f32.mrf.mxu1 }
 0x19f   : > { %4499 = vmatmul.bf16.gmra.mxu3 %v4407_v60  ;;  %v7496_v35 = vadd.f32 %v1703_v13, %v1069_v52  ;;  %v1070_v60 = vadd.f32 %v7336_v54, %v8019_v14  ;;  %v4049_v8 = vrot.slane %v4047_v39, 4  ;;  %v7515_v52 = vrot.slane %v4056_v33, 5 }
 0x1a0   : > { %v2126_v15 = vpop.f32.mrf.mxu2  ;;  %v4378_v13 = vunpack.c.l.b16 %v4035_v9  ;;  %v4695_v12 = vsel %vm6620_vm13, %v5784_v10, %v4694_v51 }
 0x1a1   : > { %v2179_v46 = vadd.f32 %v2126_v15, %v7460_v45  ;;  %3509 = vmatmul.bf16.gmra.mxu1 %v3413_v44  ;;  %v4045_v45 = vsel %vm6591_vm10, %v4040_v55, %v4044_v24  ;;  %v4062_v44 = vrot.slane %v4060_v47, 4  ;;  %v3386_v55 = vunpack.c.l.b16 %v3278_v53  ;;  %v3191_v53 = vld [vmem:[#allocation2 + $0x3c] sm:$0xe] }
 0x1a2   : > { %v2439_v32 = vpop.f32.mrf.mxu3  ;;  %v4379_v36 = vunpack.c.l.b16 %v4045_v45 }
 0x1a3   : > { %v2492_v0 = vadd.f32 %v2439_v32, %v2179_v46  ;;  %v4053_v46 = vor.u32 %v4052_v2, %v4049_v8  ;;  %v4063_v39 = vor.u32 %v4062_v44, %v7515_v52  ;;  %v4066_v32 = vshll.u32 %v3937_v40, 16  ;;  %v3939_v2 = vld [vmem:[#allocation2 + $0x4c] sm:$0xf] }
 0x1a4   : > { %v7499_v56 = vpop.f32.mrf.mxu0  ;;  %v4408_v33 = vpack.c.b16 %v4379_v36, %v4378_v13  ;;  %v3414_v47 = vpack.c.b16 %v3386_v55, %v3385_v26 }
 0x1a5   : > { %v7509_v43 = vadd.f32 %v7468_v50, %v2492_v0  ;;  %v4696_v50 = vrot.slane %v4694_v51, 4  ;;  %v3938_v0 = vld [vmem:[#allocation2 + $0x48] sm:$0xf]  ;;  %v4054_v45 = vrot.slane %v4053_v46, 4  ;;  %v4064_v14 = vrot.slane %v4063_v39, 4 }
 0x1a6   : > { %v1705_v16 = vpop.f32.mrf.mxu1  ;;  %v4068_v42 = vrot.slane %v4066_v32, 5  ;;  %v4071_v13 = vshrl.u32 %v3938_v0, 16  ;;  %v4074_v36 = vshll.u32 %v3938_v0, 16  ;;  %v4701_v39 = vrot.slane %v3939_v2, 5  ;;  %v4611_v32 = vld [vmem:[#allocation2 + $0x48] sm:$0xe] }
 0x1a7   : > { %4929 = vmatmul.bf16.gmra.mxu0 %v4833_v58  ;;  %v7517_v37 = vadd.f32 %v1705_v16, %v1070_v60  ;;  %v4698_v1 = vsel %vm6620_vm13, %v4696_v50, %v4697_v17  ;;  %v6091_v60 = vld [vmem:[#allocation2 + $0x40] sm:$0xf]  ;;  %v4805_v16 = vunpack.c.l.b16 %v4695_v12  ;;  %v4059_v50 = vsel %vm6591_vm10, %v4054_v45, %v7515_v52  ;;  %v8021_v12 = vld [vmem:[#allocation17_spill] sm:$0xff] }
 0x1a8   : > { %v2128_v4 = vpop.f32.mrf.mxu2  ;;  %v3281_v8 = vrot.slane %v6091_v60, 5  ;;  %v4806_v25 = vunpack.c.l.b16 %v4698_v1  ;;  %v5609_v17 = vrot.slane %v3191_v53, 9  ;;  %v1072_v1 = vadd.f32 %v7336_v54, %v8021_v12 }
 0x1a9   : > { %v2180_v15 = vadd.f32 %v2128_v4, %v7479_v61  ;;  %v1071_v61 = vadd.f32 %v7336_v54, %v8020_v23  ;;  %v4084_v4 = vshrl.u32 %v3939_v2, 16  ;;  %v3940_v23 = vld [vmem:[#allocation2 + $0x50] sm:$0x1]  ;;  %v4380_v0 = vunpack.c.l.b16 %v4059_v50 }
 0x1aa   : > { %v2441_v24 = vpop.f32.mrf.mxu3  ;;  %v4834_v46 = vpack.c.b16 %v4806_v25, %v4805_v16  ;;  %v4703_v16 = vrot.slane %v4701_v39, 4  ;;  %v4704_v25 = vrot.slane %v3940_v23, 5 }
 0x1ab   : > { %v2493_v21 = vadd.f32 %v2441_v24, %v2180_v15  ;;  %v3283_v15 = vrot.slane %v3281_v8, 4  ;;  %v4069_v24 = vsel %vm6591_vm10, %v4064_v14, %v4068_v42  ;;  %v3282_v14 = vsel %vm6620_vm13, %v5609_v17, %v3281_v8 }
 0x1ac   : > { %v7521_v48 = vpop.f32.mrf.mxu0  ;;  %v5785_v42 = vrot.slane %v4611_v32, 9 }
 0x1ad   : > { %3823 = vmatmul.bf16.gmra.mxu2 %v5915_v27  ;;  %v7530_v58 = vadd.f32 %v7484_v19, %v2493_v21  ;;  %v4080_v19 = vshll.u32 %v3939_v2, 16  ;;  %v6092_v27 = vld [vmem:[#allocation2 + $0x44] sm:$0x1] }
 0x1ae   : > { %v1708_v9 = vpop.f32.mrf.mxu1  ;;  %v3284_v26 = vrot.slane %v6092_v27, 5  ;;  %v4702_v17 = vsel %vm6620_vm13, %v5785_v42, %v4701_v39  ;;  %v8022_v27 = vld [vmem:[#allocation4_spill] sm:$0xff]  ;;  %v6093_v39 = vld [vmem:[#allocation2 + $0x4c] sm:$0xf] }
 0x1af   : > { %4504 = vmatmul.bf16.gmra.mxu3 %v4408_v33  ;;  %v7532_v51 = vadd.f32 %v1708_v9, %v1071_v61  ;;  %v4076_v33 = vrot.slane %v4074_v36, 5  ;;  %v7544_v52 = vrot.slane %v4080_v19, 5  ;;  %v4086_v61 = vrot.slane %v4084_v4, 4  ;;  %v5916_v36 = vld [vmem:[#allocation2 + $0x3c] sm:$0xff] }
 0x1b0   : > { %v2131_v44 = vpop.f32.mrf.mxu2  ;;  %v4381_v9 = vunpack.c.l.b16 %v4069_v24  ;;  %v3285_v60 = vsel %vm6620_vm13, %v3283_v15, %v3284_v26  ;;  %v4705_v15 = vsel %vm6620_vm13, %v4703_v16, %v4704_v25  ;;  %v1073_v26 = vadd.f32 %v7336_v54, %v8022_v27 }
 0x1b1   : > { %v2181_v40 = vadd.f32 %v2131_v44, %v7496_v35  ;;  %3514 = vmatmul.bf16.gmra.mxu1 %v3414_v47  ;;  %v4073_v35 = vrot.slane %v4071_v13, 4  ;;  %v4090_v13 = vshll.u32 %v3940_v23, 16  ;;  %v3388_v19 = vunpack.c.l.b16 %v3285_v60 }
 0x1b2   : > { %v2444_v10 = vpop.f32.mrf.mxu3  ;;  %v4087_v4 = vor.u32 %v4086_v61, %v7544_v52  ;;  %v4409_v50 = vpack.c.b16 %v4381_v9, %v4380_v0  ;;  %v4807_v12 = vunpack.c.l.b16 %v4702_v17  ;;  %v3288_v23 = vrot.slane %v6093_v39, 5  ;;  %v3192_v0 = vld [vmem:[#allocation2 + $0x48] sm:$0xe]  ;;  %v4612_v17 = vld [vmem:[#allocation2 + $0x54] sm:$0xe] }
 0x1b3   : > { %v2494_v55 = vadd.f32 %v2444_v10, %v2181_v40  ;;  %v4077_v44 = vor.u32 %v4076_v33, %v4073_v35  ;;  %v3387_v40 = vunpack.c.l.b16 %v3282_v14  ;;  %v4092_v35 = vrot.slane %v4090_v13, 5  ;;  %v3942_v14 = vld [vmem:[#allocation2 + $0x58] sm:$0xf]  ;;  %v6094_v13 = vld [vmem:[#allocation2 + $0x50] sm:$0x1] }
 0x1b4   : > { %v7540_v21 = vpop.f32.mrf.mxu0 }
 0x1b5   : > { %v7547_v47 = vadd.f32 %v7499_v56, %v2494_v55  ;;  %v3415_v24 = vpack.c.b16 %v3388_v19, %v3387_v40 }
 0x1b6   : > { %v1710_v45 = vpop.f32.mrf.mxu1 }
 0x1b7   : > { %4934 = vmatmul.bf16.gmra.mxu0 %v4834_v46  ;;  %v7553_v2 = vadd.f32 %v1710_v45, %v1072_v1  ;;  %v4088_v46 = vrot.slane %v4087_v4, 4  ;;  %v4808_v1 = vunpack.c.l.b16 %v4705_v15  ;;  %v3941_v45 = vld [vmem:[#allocation2 + $0x54] sm:$0xf]  ;;  %v4104_v4 = vshll.u32 %v3942_v14, 16 }
 0x1b8   : > { %v2133_v53 = vpop.f32.mrf.mxu2  ;;  %v4095_v40 = vshrl.u32 %v3941_v45, 16  ;;  %v4098_v19 = vshll.u32 %v3941_v45, 16 }
 0x1b9   : > { %v2182_v56 = vadd.f32 %v2133_v53, %v7517_v37  ;;  %v4078_v37 = vrot.slane %v4077_v44, 4  ;;  %v4093_v42 = vsel %vm6591_vm10, %v4088_v46, %v4092_v35  ;;  %v4835_v25 = vpack.c.b16 %v4808_v1, %v4807_v12 }
 0x1ba   : > { %v2446_v8 = vpop.f32.mrf.mxu3  ;;  %v5610_v53 = vrot.slane %v3192_v0, 9  ;;  %v3290_v44 = vrot.slane %v3288_v23, 4  ;;  %v4097_v12 = vrot.slane %v4095_v40, 4  ;;  %v4100_v1 = vrot.slane %v4098_v19, 5 }
 0x1bb   : > { %v2495_v10 = vadd.f32 %v2446_v8, %v2182_v56  ;;  %v3291_v56 = vrot.slane %v6094_v13, 5  ;;  %v7589_v39 = vrot.slane %v4104_v4, 5  ;;  %v8024_v4 = vld [vmem:[#allocation8_spill] sm:$0xff] }
 0x1bc   : > { %v7563_v55 = vpop.f32.mrf.mxu0 }
 0x1bd   : > { %3828 = vmatmul.bf16.gmra.mxu2 %v5916_v36  ;;  %v7566_v33 = vadd.f32 %v7521_v48, %v2495_v10  ;;  %v4083_v48 = vsel %vm6591_vm10, %v4078_v37, %v7544_v52  ;;  %v4708_v10 = vrot.slane %v3942_v14, 5  ;;  %v3292_v46 = vsel %vm6620_vm13, %v3290_v44, %v3291_v56 }
 0x1be   : > { %v1713_v32 = vpop.f32.mrf.mxu1  ;;  %v4382_v27 = vunpack.c.l.b16 %v4083_v48  ;;  %v5917_v48 = vld [vmem:[#allocation2 + $0x48] sm:$0xff]  ;;  %v4101_v44 = vor.u32 %v4100_v1, %v4097_v12 }
 0x1bf   : > { %4509 = vmatmul.bf16.gmra.mxu3 %v4409_v50  ;;  %v7568_v61 = vadd.f32 %v1713_v32, %v1073_v26  ;;  %v8023_v50 = vld [vmem:[#allocation6_spill] sm:$0xff]  ;;  %v4383_v26 = vunpack.c.l.b16 %v4093_v42  ;;  %v3943_v32 = vld [vmem:[#allocation2 + $0x5c] sm:$0x1]  ;;  %v4710_v45 = vrot.slane %v4708_v10, 4  ;;  %v3390_v42 = vunpack.c.l.b16 %v3292_v46 }
 0x1c0   : > { %v2136_v9 = vpop.f32.mrf.mxu2  ;;  %v1074_v52 = vadd.f32 %v7336_v54, %v8023_v50  ;;  %v4102_v1 = vrot.slane %v4101_v44, 4 }
 0x1c1   : > { %v2183_v60 = vadd.f32 %v2136_v9, %v7532_v51  ;;  %3519 = vmatmul.bf16.gmra.mxu1 %v3415_v24  ;;  %v4108_v51 = vshrl.u32 %v3942_v14, 16  ;;  %v3289_v24 = vsel %vm6620_vm13, %v5610_v53, %v3288_v23  ;;  %v5786_v9 = vrot.slane %v4612_v17, 9  ;;  %v6095_v17 = vld [vmem:[#allocation2 + $0x58] sm:$0xf] }
 0x1c2   : > { %v2449_v16 = vpop.f32.mrf.mxu3  ;;  %v4711_v14 = vrot.slane %v3943_v32, 5  ;;  %v3389_v23 = vunpack.c.l.b16 %v3289_v24  ;;  %v4107_v44 = vsel %vm6591_vm10, %v4102_v1, %v7589_v39  ;;  %v3946_v1 = vld [vmem:[#allocation2 + $0x68] sm:$0x1] }
 0x1c3   : > { %v2496_v36 = vadd.f32 %v2449_v16, %v2183_v60  ;;  %v4709_v40 = vsel %vm6620_vm13, %v5786_v9, %v4708_v10 }
 0x1c4   : > { %v7576_v8 = vpop.f32.mrf.mxu0  ;;  %v4712_v19 = vsel %vm6620_vm13, %v4710_v45, %v4711_v14  ;;  %v4809_v10 = vunpack.c.l.b16 %v4709_v40 }
 0x1c5   : > { %v7581_v15 = vadd.f32 %v7540_v21, %v2496_v36  ;;  %v4110_v21 = vrot.slane %v4108_v51, 4  ;;  %v4114_v36 = vshll.u32 %v3943_v32, 16  ;;  %v3416_v51 = vpack.c.b16 %v3390_v42, %v3389_v23  ;;  %v3193_v32 = vld [vmem:[#allocation2 + $0x54] sm:$0xe]  ;;  %v6096_v42 = vld [vmem:[#allocation2 + $0x5c] sm:$0x1] }
 0x1c6   : > { %v1715_v37 = vpop.f32.mrf.mxu1  ;;  %v4810_v46 = vunpack.c.l.b16 %v4712_v19 }
 0x1c7   : > { %4939 = vmatmul.bf16.gmra.mxu0 %v4835_v25  ;;  %v7587_v35 = vadd.f32 %v1715_v37, %v1074_v52  ;;  %v4410_v25 = vpack.c.b16 %v4383_v26, %v4382_v27  ;;  %v4111_v56 = vor.u32 %v4110_v21, %v7589_v39  ;;  %v3295_v27 = vrot.slane %v6095_v17, 5  ;;  %v3944_v26 = vld [vmem:[#allocation2 + $0x60] sm:$0xf]  ;;  %v3945_v37 = vld [vmem:[#allocation2 + $0x64] sm:$0xf] }
 0x1c8   : > { %v2138_v0 = vpop.f32.mrf.mxu2  ;;  %v4116_v21 = vrot.slane %v4114_v36, 5  ;;  %v4122_v45 = vshll.u32 %v3944_v26, 16  ;;  %v4128_v14 = vshll.u32 %v3945_v37, 16  ;;  %v4836_v40 = vpack.c.b16 %v4810_v46, %v4809_v10  ;;  %v8025_v36 = vld [vmem:[#allocation10_spill] sm:$0xff] }
 0x1c9   : > { %v2184_v60 = vadd.f32 %v2138_v0, %v7553_v2  ;;  %v1075_v2 = vadd.f32 %v7336_v54, %v8024_v4  ;;  %v4112_v0 = vrot.slane %v4111_v56, 4  ;;  %v3297_v23 = vrot.slane %v3295_v27, 4 }
 0x1ca   : > { %v2451_v16 = vpop.f32.mrf.mxu3  ;;  %v4715_v56 = vrot.slane %v3945_v37, 5  ;;  %v1076_v4 = vadd.f32 %v7336_v54, %v8025_v36  ;;  %v7623_v46 = vrot.slane %v4128_v14, 5 }
 0x1cb   : > { %v2497_v53 = vadd.f32 %v2451_v16, %v2184_v60  ;;  %v3298_v16 = vrot.slane %v6096_v42, 5 }
 0x1cc   : > { %v7592_v13 = vpop.f32.mrf.mxu0 }
 0x1cd   : > { %3833 = vmatmul.bf16.gmra.mxu2 %v5917_v48  ;;  %v7602_v50 = vadd.f32 %v7563_v55, %v2497_v53  ;;  %v4119_v55 = vshrl.u32 %v3944_v26, 16  ;;  %v5611_v48 = vrot.slane %v3193_v32, 9  ;;  %v4132_v53 = vshrl.u32 %v3945_v37, 16 }
 0x1ce   : > { %v1718_v52 = vpop.f32.mrf.mxu1  ;;  %v3299_v39 = vsel %vm6620_vm13, %v3297_v23, %v3298_v16  ;;  %v4384_v37 = vunpack.c.l.b16 %v4107_v44 }
 0x1cf   : > { %4514 = vmatmul.bf16.gmra.mxu3 %v4410_v25  ;;  %v7604_v24 = vadd.f32 %v1718_v52, %v1075_v2  ;;  %v4121_v2 = vrot.slane %v4119_v55, 4  ;;  %v4613_v52 = vld [vmem:[#allocation2 + $0x60] sm:$0xe]  ;;  %v3296_v10 = vsel %vm6620_vm13, %v5611_v48, %v3295_v27  ;;  %v4134_v32 = vrot.slane %v4132_v53, 4 }
 0x1d0   : > { %v2141_v12 = vpop.f32.mrf.mxu2  ;;  %v3391_v27 = vunpack.c.l.b16 %v3296_v10  ;;  %v4138_v53 = vshll.u32 %v3946_v1, 16  ;;  %v6098_v10 = vld [vmem:[#allocation2 + $0x64] sm:$0xf] }
 0x1d1   : > { %v2185_v9 = vadd.f32 %v2141_v12, %v7568_v61  ;;  %3524 = vmatmul.bf16.gmra.mxu1 %v3416_v51  ;;  %v4117_v61 = vsel %vm6591_vm10, %v4112_v0, %v4116_v21  ;;  %v4124_v51 = vrot.slane %v4122_v45, 5  ;;  %v5787_v21 = vrot.slane %v4613_v52, 9  ;;  %v5918_v45 = vld [vmem:[#allocation2 + $0x54] sm:$0xff] }
 0x1d2   : > { %v2454_v60 = vpop.f32.mrf.mxu3  ;;  %v4385_v12 = vunpack.c.l.b16 %v4117_v61  ;;  %v4135_v14 = vor.u32 %v4134_v32, %v7623_v46  ;;  %v8026_v61 = vld [vmem:[#allocation12_spill] sm:$0xff]  ;;  %v3948_v32 = vld [vmem:[#allocation2 + $0x70] sm:$0xf] }
 0x1d3   : > { %v2498_v25 = vadd.f32 %v2454_v60, %v2185_v9  ;;  %v4718_v9 = vrot.slane %v3946_v1, 5  ;;  %v3392_v60 = vunpack.c.l.b16 %v3299_v39  ;;  %v4125_v23 = vor.u32 %v4124_v51, %v4121_v2  ;;  %v3947_v2 = vld [vmem:[#allocation2 + $0x6c] sm:$0xf] }
 0x1d4   : > { %v7607_v19 = vpop.f32.mrf.mxu0  ;;  %v4411_v16 = vpack.c.b16 %v4385_v12, %v4384_v37  ;;  %v3302_v39 = vrot.slane %v6098_v10, 5  ;;  %v4140_v12 = vrot.slane %v4138_v53, 5 }
 0x1d5   : > { %v7617_v17 = vadd.f32 %v7576_v8, %v2498_v25  ;;  %v4717_v8 = vrot.slane %v4715_v56, 4 }
 0x1d6   : > { %v1720_v26 = vpop.f32.mrf.mxu1 }
 0x1d7   : > { %4944 = vmatmul.bf16.gmra.mxu0 %v4836_v40  ;;  %v7625_v54 = vadd.f32 %v1720_v26, %v1076_v4  ;;  %v4716_v40 = vsel %vm6620_vm13, %v5787_v21, %v4715_v56  ;;  %v4719_v44 = vsel %vm6620_vm13, %v4717_v8, %v4718_v9  ;;  %v3417_v4 = vpack.c.b16 %v3392_v60, %v3391_v27  ;;  %v3194_v21 = vld [vmem:[#allocation2 + $0x60] sm:$0xe] }
 0x1d8   : > { %v2143_v0 = vpop.f32.mrf.mxu2  ;;  %v4126_v26 = vrot.slane %v4125_v23, 4  ;;  %v4136_v56 = vrot.slane %v4135_v14, 4  ;;  %v4811_v1 = vunpack.c.l.b16 %v4716_v40  ;;  %v4143_v9 = vshrl.u32 %v3947_v2, 16 }
 0x1d9   : > { %v2186_v55 = vadd.f32 %v2143_v0, %v7587_v35  ;;  %v7638_v35 = vld [vmem:[%s7983_s2] ss:$0 sm:$0xff]  ;;  %v4812_v0 = vunpack.c.l.b16 %v4719_v44  ;;  %v4156_v27 = vshrl.u32 %v3948_v32, 16  ;;  %v5612_v23 = vrot.slane %v3194_v21, 9 }
 0x1da   : > { %v2456_v48 = vpop.f32.mrf.mxu3  ;;  %v1077_v36 = vadd.f32 %v7638_v35, %v8026_v61  ;;  %v3304_v14 = vrot.slane %v3302_v39, 4  ;;  %v4141_v40 = vsel %vm6591_vm10, %v4136_v56, %v4140_v12  ;;  %v4722_v61 = vrot.slane %v3948_v32, 5 }
 0x1db   : > { %v2499_v42 = vadd.f32 %v2456_v48, %v2186_v55  ;;  %v4146_v55 = vshll.u32 %v3947_v2, 16  ;;  %v4131_v48 = vsel %vm6591_vm10, %v4126_v26, %v7623_v46  ;;  %v4837_v44 = vpack.c.b16 %v4812_v0, %v4811_v1  ;;  %v4614_v2 = vld [vmem:[#allocation2 + $0x6c] sm:$0xe] }
 0x1dc   : > { %v7629_v25 = vpop.f32.mrf.mxu0  ;;  %v4158_v26 = vrot.slane %v4156_v27, 4  ;;  %v5788_v0 = vrot.slane %v4614_v2, 9 }
 0x1dd   : > { %3838 = vmatmul.bf16.gmra.mxu2 %v5918_v45  ;;  %v7643_v51 = vadd.f32 %v7592_v13, %v2499_v42  ;;  %v4152_v13 = vshll.u32 %v3948_v32, 16  ;;  %v6099_v42 = vld [vmem:[#allocation2 + $0x68] sm:$0x1]  ;;  %v3303_v32 = vsel %vm6620_vm13, %v5612_v23, %v3302_v39 }
 0x1de   : > { %v1723_v52 = vpop.f32.mrf.mxu1 }
 0x1df   : > { %4519 = vmatmul.bf16.gmra.mxu3 %v4411_v16  ;;  %v7645_v37 = vadd.f32 %v1723_v52, %v1077_v36  ;;  %v3305_v16 = vrot.slane %v6099_v42, 5  ;;  %v8027_v52 = vld [vmem:[#allocation14_spill] sm:$0xff]  ;;  %v7657_v46 = vrot.slane %v4152_v13, 5 }
 0x1e0   : > { %v2146_v8 = vpop.f32.mrf.mxu2  ;;  %v1078_v10 = vadd.f32 %v7638_v35, %v8027_v52 }
 0x1e1   : > { %v2187_v45 = vadd.f32 %v2146_v8, %v7604_v24  ;;  %3529 = vmatmul.bf16.gmra.mxu1 %v3417_v4  ;;  %v4145_v24 = vrot.slane %v4143_v9, 4  ;;  %v4148_v4 = vrot.slane %v4146_v55, 5  ;;  %v3949_v8 = vld [vmem:[#allocation2 + $0x74] sm:$0x1]  ;;  %v3306_v12 = vsel %vm6620_vm13, %v3304_v14, %v3305_v16 }
 0x1e2   : > { %v2459_v60 = vpop.f32.mrf.mxu3  ;;  %v4724_v9 = vrot.slane %v4722_v61, 4  ;;  %v4725_v55 = vrot.slane %v3949_v8, 5  ;;  %v4162_v42 = vshll.u32 %v3949_v8, 16  ;;  %v4159_v52 = vor.u32 %v4158_v26, %v7657_v46 }
 0x1e3   : > { %v2500_v53 = vadd.f32 %v2459_v60, %v2187_v45  ;;  %v4386_v45 = vunpack.c.l.b16 %v4131_v48  ;;  %v4387_v60 = vunpack.c.l.b16 %v4141_v40  ;;  %v4149_v27 = vor.u32 %v4148_v4, %v4145_v24  ;;  %v5919_v48 = vld [vmem:[#allocation2 + $0x60] sm:$0xff] }
 0x1e4   : > { %v7653_v36 = vpop.f32.mrf.mxu0  ;;  %v3394_v40 = vunpack.c.l.b16 %v3306_v12  ;;  %v4723_v14 = vsel %vm6620_vm13, %v5788_v0, %v4722_v61  ;;  %v4726_v16 = vsel %vm6620_vm13, %v4724_v9, %v4725_v55  ;;  %v4164_v8 = vrot.slane %v4162_v42, 5  ;;  %v6100_v61 = vld [vmem:[#allocation2 + $0x70] sm:$0xf]  ;;  %v3195_v0 = vld [vmem:[#allocation2 + $0x6c] sm:$0xe] }
 0x1e5   : > { %v7660_v21 = vadd.f32 %v7607_v19, %v2500_v53  ;;  %v3393_v53 = vunpack.c.l.b16 %v3303_v32  ;;  %v3309_v32 = vrot.slane %v6100_v61, 5  ;;  %v3950_v55 = vld [vmem:[#allocation2 + $0x78] sm:$0xf] }
 0x1e6   : > { %v1725_v56 = vpop.f32.mrf.mxu1 }
 0x1e7   : > { %8028 = vst [vmem:[#allocation3_spill] sm:$0xff] %v7660_v21  ;;  %4949 = vmatmul.bf16.gmra.mxu0 %v4837_v44  ;;  %v7666_v1 = vadd.f32 %v1725_v56, %v1078_v10  ;;  %v4412_v21 = vpack.c.b16 %v4387_v60, %v4386_v45  ;;  %v8029_v44 = vld [vmem:[#allocation16_spill] sm:$0xff]  ;;  %v3418_v2 = vpack.c.b16 %v3394_v40, %v3393_v53  ;;  %v4160_v10 = vrot.slane %v4159_v52, 4  ;;  %v6101_v40 = vld [vmem:[#allocation2 + $0x74] sm:$0x1] }
 0x1e8   : > { %v2148_v13 = vpop.f32.mrf.mxu2  ;;  %v1079_v24 = vadd.f32 %v7638_v35, %v8029_v44  ;;  %v4813_v60 = vunpack.c.l.b16 %v4723_v14  ;;  %v4814_v56 = vunpack.c.l.b16 %v4726_v16  ;;  %v5613_v53 = vrot.slane %v3195_v0, 9 }
 0x1e9   : > { %v2188_v19 = vadd.f32 %v2148_v13, %v7625_v54  ;;  %v4150_v54 = vrot.slane %v4149_v27, 4  ;;  %v3951_v13 = vld [vmem:[#allocation2 + $0x7c] sm:$0xf]  ;;  %v4165_v42 = vsel %vm6591_vm10, %v4160_v10, %v4164_v8  ;;  %v3312_v52 = vrot.slane %v6101_v40, 5 }
 0x1ea   : > { %v2461_v39 = vpop.f32.mrf.mxu3  ;;  %v4170_v14 = vshll.u32 %v3950_v55, 16  ;;  %v4176_v16 = vshll.u32 %v3951_v13, 16 }
 0x1eb   : > { %v2501_v23 = vadd.f32 %v2461_v39, %v2188_v19 }
 0x1ec   : > { %v7676_v4 = vpop.f32.mrf.mxu0 }
 0x1ed   : > { %3843 = vmatmul.bf16.gmra.mxu2 %v5919_v48  ;;  %v7679_v26 = vadd.f32 %v7629_v25, %v2501_v23  ;;  %v4155_v25 = vsel %vm6591_vm10, %v4150_v54, %v7657_v46  ;;  %v4838_v48 = vpack.c.b16 %v4814_v56, %v4813_v60  ;;  %v4167_v23 = vshrl.u32 %v3950_v55, 16  ;;  %v4615_v54 = vld [vmem:[#allocation2 + $0x78] sm:$0xe] }
 0x1ee   : > { %v1728_v45 = vpop.f32.mrf.mxu1  ;;  %v4388_v8 = vunpack.c.l.b16 %v4155_v25  ;;  %v3310_v56 = vsel %vm6620_vm13, %v5613_v53, %v3309_v32 }
 0x1ef   : > { %4524 = vmatmul.bf16.gmra.mxu3 %v4412_v21  ;;  %v7681_v12 = vadd.f32 %v1728_v45, %v1079_v24  ;;  %v3311_v21 = vrot.slane %v3309_v32, 4  ;;  %v4729_v24 = vrot.slane %v3951_v13, 5  ;;  %v4389_v45 = vunpack.c.l.b16 %v4165_v42 }
 0x1f0   : > { %v2151_v9 = vpop.f32.mrf.mxu2  ;;  %v4169_v55 = vrot.slane %v4167_v23, 4 }
 0x1f1   : > { %v2189_v27 = vadd.f32 %v2151_v9, %v7645_v37  ;;  %3534 = vmatmul.bf16.gmra.mxu1 %v3418_v2  ;;  %v4180_v37 = vshrl.u32 %v3951_v13, 16  ;;  %v8030_v2 = vld [vmem:[#allocation18_spill] sm:$0xff]  ;;  %v3313_v61 = vsel %vm6620_vm13, %v3311_v21, %v3312_v52  ;;  %v3952_v9 = vld [vmem:[#allocation2 + $0x80] sm:$0x1]  ;;  %v4172_v13 = vrot.slane %v4170_v14, 5 }
 0x1f2   : > { %v2464_v19 = vpop.f32.mrf.mxu3  ;;  %v1080_v46 = vadd.f32 %v7638_v35, %v8030_v2  ;;  %v4178_v35 = vrot.slane %v4176_v16, 5  ;;  %v4731_v40 = vrot.slane %v4729_v24, 4  ;;  %v4732_v25 = vrot.slane %v3952_v9, 5 }
 0x1f3   : > { %v2502_v39 = vadd.f32 %v2464_v19, %v2189_v27  ;;  %v4182_v19 = vrot.slane %v4180_v37, 4  ;;  %v3395_v2 = vunpack.c.l.b16 %v3310_v56  ;;  %v3396_v32 = vunpack.c.l.b16 %v3313_v61 }
 0x1f4   : > { %v7689_v44 = vpop.f32.mrf.mxu0  ;;  %v4413_v21 = vpack.c.b16 %v4389_v45, %v4388_v8  ;;  %v4186_v23 = vshll.u32 %v3952_v9, 16  ;;  %v4733_v16 = vsel %vm6620_vm13, %v4731_v40, %v4732_v25  ;;  %v3953_v45 = vld [vmem:[#allocation2 + $0x84] sm:$0xf]  ;;  %v3196_v9 = vld [vmem:[#allocation2 + $0x78] sm:$0xe] }
 0x1f5   : > { %v7694_v10 = vadd.f32 %v7653_v36, %v2502_v39  ;;  %v5789_v36 = vrot.slane %v4615_v54, 9  ;;  %v5920_v39 = vld [vmem:[#allocation2 + $0x6c] sm:$0xff]  ;;  %v3419_v37 = vpack.c.b16 %v3396_v32, %v3395_v2  ;;  %v4816_v61 = vunpack.c.l.b16 %v4733_v16 }
 0x1f6   : > { %v1730_v60 = vpop.f32.mrf.mxu1  ;;  %v4191_v40 = vshrl.u32 %v3953_v45, 16  ;;  %v5614_v25 = vrot.slane %v3196_v9, 9 }
 0x1f7   : > { %8031 = vst [vmem:[#allocation5_spill] sm:$0xff] %v7694_v10  ;;  %4954 = vmatmul.bf16.gmra.mxu0 %v4838_v48  ;;  %v7700_v0 = vadd.f32 %v1730_v60, %v1080_v46  ;;  %v4173_v48 = vor.u32 %v4172_v13, %v4169_v55  ;;  %v4183_v46 = vor.u32 %v4182_v19, %v4178_v35  ;;  %v6102_v60 = vld [vmem:[#allocation2 + $0x7c] sm:$0xf]  ;;  %v3954_v19 = vld [vmem:[#allocation2 + $0x88] sm:$0xf] }
 0x1f8   : > { %v2153_v27 = vpop.f32.mrf.mxu2  ;;  %v4730_v14 = vsel %vm6620_vm13, %v5789_v36, %v4729_v24  ;;  %v3316_v8 = vrot.slane %v6102_v60, 5  ;;  %v4616_v60 = vld [vmem:[#allocation2 + $0x84] sm:$0xe] }
 0x1f9   : > { %v2190_v42 = vadd.f32 %v2153_v27, %v7666_v1  ;;  %v4815_v56 = vunpack.c.l.b16 %v4730_v14  ;;  %v4174_v13 = vrot.slane %v4173_v48, 4  ;;  %v4184_v24 = vrot.slane %v4183_v46, 4 }
 0x1fa   : > { %v2466_v53 = vpop.f32.mrf.mxu3  ;;  %v4188_v27 = vrot.slane %v4186_v23, 5  ;;  %v4204_v14 = vshrl.u32 %v3954_v19, 16  ;;  %v4736_v46 = vrot.slane %v3954_v19, 5  ;;  %v4193_v23 = vrot.slane %v4191_v40, 4 }
 0x1fb   : > { %v2503_v10 = vadd.f32 %v2466_v53, %v2190_v42  ;;  %v3318_v42 = vrot.slane %v3316_v8, 4  ;;  %v4839_v53 = vpack.c.b16 %v4816_v61, %v4815_v56  ;;  %v4179_v48 = vsel %vm6591_vm10, %v4174_v13, %v4178_v35  ;;  %v3955_v13 = vld [vmem:[#allocation2 + $0x8c] sm:$0x1] }
 0x1fc   : > { %v7703_v52 = vpop.f32.mrf.mxu0  ;;  %v3317_v56 = vsel %vm6620_vm13, %v5614_v25, %v3316_v8  ;;  %v4738_v40 = vrot.slane %v4736_v46, 4 }
 0x1fd   : > { %3848 = vmatmul.bf16.gmra.mxu2 %v5920_v39  ;;  %v7710_v1 = vadd.f32 %v7676_v4, %v2503_v10  ;;  %v4194_v4 = vshll.u32 %v3953_v45, 16  ;;  %v6103_v39 = vld [vmem:[#allocation2 + $0x80] sm:$0x1] }
 0x1fe   : > { %v7712_v54 = vpop.f32.mrf.mxu1  ;;  %v3319_v2 = vrot.slane %v6103_v39, 5  ;;  %v3397_v39 = vunpack.c.l.b16 %v3317_v56 }
 0x1ff   : > { %8032 = vst [vmem:[#allocation7_spill] sm:$0xff] %v7710_v1  ;;  %4529 = vmatmul.bf16.gmra.mxu3 %v4413_v21  ;;  %v4200_v21 = vshll.u32 %v3954_v19, 16 }
 0x200   : > { %v2156_v55 = vpop.f32.mrf.mxu2  ;;  %v3320_v61 = vsel %vm6620_vm13, %v3318_v42, %v3319_v2  ;;  %v4210_v2 = vshll.u32 %v3955_v13, 16 }
 0x201   : > { %v2191_v36 = vadd.f32 %v2156_v55, %v7681_v12  ;;  %3539 = vmatmul.bf16.gmra.mxu1 %v3419_v37  ;;  %v4189_v12 = vsel %vm6591_vm10, %v4184_v24, %v4188_v27  ;;  %v4196_v37 = vrot.slane %v4194_v4, 5  ;;  %v4390_v55 = vunpack.c.l.b16 %v4179_v48 }
 0x202   : > { %v2469_v10 = vpop.f32.mrf.mxu3  ;;  %v4391_v35 = vunpack.c.l.b16 %v4189_v12  ;;  %v4202_v24 = vrot.slane %v4200_v21, 5  ;;  %v4206_v27 = vrot.slane %v4204_v14, 4  ;;  %v4739_v4 = vrot.slane %v3955_v13, 5  ;;  %v3956_v12 = vld [vmem:[#allocation2 + $0x90] sm:$0xf] }
 0x203   : > { %v2504_v32 = vadd.f32 %v2469_v10, %v2191_v36  ;;  %v5790_v36 = vrot.slane %v4616_v60, 9  ;;  %v5921_v10 = vld [vmem:[#allocation2 + $0x78] sm:$0xff] }
 0x204   : > { %v7715_v16 = vpop.f32.mrf.mxu0  ;;  %v4414_v1 = vpack.c.b16 %v4391_v35, %v4390_v55  ;;  %v4207_v42 = vor.u32 %v4206_v27, %v4202_v24  ;;  %v4740_v21 = vsel %vm6620_vm13, %v4738_v40, %v4739_v4  ;;  %v4212_v35 = vrot.slane %v4210_v2, 5 }
 0x205   : > { %v7722_v45 = vadd.f32 %v7689_v44, %v2504_v32  ;;  %v3398_v32 = vunpack.c.l.b16 %v3320_v61  ;;  %v3957_v61 = vld [vmem:[#allocation2 + $0x94] sm:$0xf]  ;;  %v4818_v27 = vunpack.c.l.b16 %v4740_v21  ;;  %v4215_v40 = vshrl.u32 %v3956_v12, 16 }
 0x206   : > { %v7724_v9 = vpop.f32.mrf.mxu1  ;;  %v4208_v55 = vrot.slane %v4207_v42, 4  ;;  %v4224_v4 = vshll.u32 %v3957_v61, 16 }
 0x207   : > { %8033 = vst [vmem:[#allocation9_spill] sm:$0xff] %v7722_v45  ;;  %4959 = vmatmul.bf16.gmra.mxu0 %v4839_v53  ;;  %v4197_v45 = vor.u32 %v4196_v37, %v4193_v23  ;;  %v4737_v53 = vsel %vm6620_vm13, %v5790_v36, %v4736_v46  ;;  %v3420_v14 = vpack.c.b16 %v3398_v32, %v3397_v39  ;;  %v6104_v37 = vld [vmem:[#allocation2 + $0x88] sm:$0xf]  ;;  %v3197_v46 = vld [vmem:[#allocation2 + $0x84] sm:$0xe] }
 0x208   : > { %v2158_v19 = vpop.f32.mrf.mxu2  ;;  %v3323_v56 = vrot.slane %v6104_v37, 5  ;;  %v4817_v13 = vunpack.c.l.b16 %v4737_v53  ;;  %v4213_v42 = vsel %vm6591_vm10, %v4208_v55, %v4212_v35  ;;  %v4217_v53 = vrot.slane %v4215_v40, 4 }
 0x209   : > { %v2192_v44 = vadd.f32 %v2158_v19, %v7700_v0  ;;  %v4198_v0 = vrot.slane %v4197_v45, 4  ;;  %v3580_v19 = vadd.f32 %v7712_v54, %v7101_v31  ;;  %v4218_v45 = vshll.u32 %v3956_v12, 16 }
 0x20a   : > { %v2471_v8 = vpop.f32.mrf.mxu3  ;;  %v3325_v32 = vrot.slane %v3323_v56, 4  ;;  %v4840_v2 = vpack.c.b16 %v4818_v27, %v4817_v13  ;;  %v4743_v31 = vrot.slane %v3957_v61, 5  ;;  %v3581_v55 = vadd.f32 %v7724_v9, %v7104_v57 }
 0x20b   : > { %v2505_v25 = vadd.f32 %v2471_v8, %v2192_v44  ;;  %v4228_v44 = vshrl.u32 %v3957_v61, 16  ;;  %v6105_v8 = vld [vmem:[#allocation2 + $0x8c] sm:$0x1]  ;;  %v4220_v21 = vrot.slane %v4218_v45, 5 }
 0x20c   : > { %v7731_v48 = vpop.f32.mrf.mxu0  ;;  %v4745_v13 = vrot.slane %v4743_v31, 4 }
 0x20d   : > { %3853 = vmatmul.bf16.gmra.mxu2 %v5921_v10  ;;  %v7738_v60 = vadd.f32 %v7703_v52, %v2505_v25  ;;  %v4203_v52 = vsel %vm6591_vm10, %v4198_v0, %v4202_v24  ;;  %v3326_v25 = vrot.slane %v6105_v8, 5  ;;  %v3958_v24 = vld [vmem:[#allocation2 + $0x98] sm:$0x1]  ;;  %v7748_v0 = vrot.slane %v4224_v4, 5 }
 0x20e   : > { %v3505_v23 = vpop.f32.mrf.mxu1  ;;  %v4392_v12 = vunpack.c.l.b16 %v4203_v52  ;;  %v4230_v37 = vrot.slane %v4228_v44, 4  ;;  %v4746_v27 = vrot.slane %v3958_v24, 5  ;;  %v4221_v45 = vor.u32 %v4220_v21, %v4217_v53  ;;  %v5922_v44 = vld [vmem:[#allocation2 + $0x84] sm:$0xff] }
 0x20f   : > { %8034 = vst [vmem:[#allocation11_spill] sm:$0xff] %v7738_v60  ;;  %4534 = vmatmul.bf16.gmra.mxu3 %v4414_v1  ;;  %v5615_v1 = vrot.slane %v3197_v46, 9  ;;  %v4393_v46 = vunpack.c.l.b16 %v4213_v42  ;;  %v3327_v61 = vsel %vm6620_vm13, %v3325_v32, %v3326_v25  ;;  %v4234_v52 = vshll.u32 %v3958_v24, 16 }
 0x210   : > { %v3814_v36 = vpop.f32.mrf.mxu2  ;;  %v4231_v42 = vor.u32 %v4230_v37, %v7748_v0  ;;  %v4747_v9 = vsel %vm6620_vm13, %v4745_v13, %v4746_v27  ;;  %v3582_v53 = vadd.f32 %v3505_v23, %v7153_v63  ;;  %v3198_v27 = vld [vmem:[#allocation2 + $0x90] sm:$0xe] }
 0x211   : > { %3544 = vmatmul.bf16.gmra.mxu1 %v3420_v14  ;;  %v3894_v10 = vadd.f32 %v3814_v36, %v3580_v19  ;;  %v4617_v14 = vld [vmem:[#allocation2 + $0x90] sm:$0xe]  ;;  %v3324_v8 = vsel %vm6620_vm13, %v5615_v1, %v3323_v56  ;;  %v4415_v25 = vpack.c.b16 %v4393_v46, %v4392_v12 }
 0x212   : > { %v4495_v39 = vpop.f32.mrf.mxu3  ;;  %v5791_v35 = vrot.slane %v4617_v14, 9  ;;  %v4222_v14 = vrot.slane %v4221_v45, 4  ;;  %v4232_v37 = vrot.slane %v4231_v42, 4 }
 0x213   : > { %v4575_v19 = vadd.f32 %v4495_v39, %v3894_v10  ;;  %v3399_v10 = vunpack.c.l.b16 %v3324_v8  ;;  %v3400_v39 = vunpack.c.l.b16 %v3327_v61  ;;  %v7768_v8 = vld [vmem:[#allocation2 + $0xa0] sm:$0xf] }
 0x214   : > { %v7746_v54 = vpop.f32.mrf.mxu0  ;;  %v4744_v57 = vsel %vm6620_vm13, %v5791_v35, %v4743_v31  ;;  %v4820_v31 = vunpack.c.l.b16 %v4747_v9 }
 0x215   : > { %v5000_v56 = vadd.f32 %v7715_v16, %v4575_v19  ;;  %v3421_v16 = vpack.c.b16 %v3400_v39, %v3399_v10  ;;  %v4236_v19 = vrot.slane %v4234_v52, 5  ;;  %v4819_v23 = vunpack.c.l.b16 %v4744_v57 }
 0x216   : > { %v7750_v36 = vpop.f32.mrf.mxu1  ;;  %v4248_v52 = vshll.u32 %v7768_v8, 16  ;;  %v4227_v39 = vsel %vm6591_vm10, %v4222_v14, %v7748_v0  ;;  %v4750_v0 = vrot.slane %v7768_v8, 5 }
 0x217   : > { %4964 = vmatmul.bf16.gmra.mxu0 %v4840_v2  ;;  %v3959_v2 = vld [vmem:[#allocation2 + $0x9c] sm:$0xf]  ;;  %v5133_v12 = vmul.f32 %v5000_v56, %v5000_v56 }
 0x218   : > { %v3816_v40 = vpop.f32.mrf.mxu2  ;;  %v4239_v46 = vshrl.u32 %v3959_v2, 16  ;;  %v4242_v35 = vshll.u32 %v3959_v2, 16  ;;  %v4841_v2 = vpack.c.b16 %v4820_v31, %v4819_v23 }
 0x219   : > { %v3895_v4 = vadd.f32 %v3816_v40, %v3581_v55  ;;  %v6106_v40 = vld [vmem:[#allocation2 + $0x94] sm:$0xf] }
 0x21a   : > { %v4497_v1 = vpop.f32.mrf.mxu3  ;;  %v3330_v45 = vrot.slane %v6106_v40, 5  ;;  %v4244_v40 = vrot.slane %v4242_v35, 5 }
 0x21b   : > { %v4576_v32 = vadd.f32 %v4497_v1, %v3895_v4  ;;  %v4252_v4 = vshrl.u32 %v7768_v8, 16  ;;  %v5616_v1 = vrot.slane %v3198_v27, 9 }
 0x21c   : > { %v7765_v21 = vpop.f32.mrf.mxu0 }
 0x21d   : > { %v5001_v24 = vadd.f32 %v7731_v48, %v4576_v32  ;;  %3858 = vmatmul.bf16.gmra.mxu2 %v5922_v44  ;;  %v3332_v32 = vrot.slane %v3330_v45, 4  ;;  %v3331_v23 = vsel %vm6620_vm13, %v5616_v1, %v3330_v45 }
 0x21e   : > { %v7777_v63 = vpop.f32.mrf.mxu1 }
 0x21f   : > { %v5956_v48 = vpack.c.bf16 %v5001_v24, %v5000_v56  ;;  %v5096_v61 = vadd.f32 %v5001_v24, %v5000_v56  ;;  %v5134_v55 = vmul.f32 %v5001_v24, %v5001_v24  ;;  %4539 = vmatmul.bf16.gmra.mxu3 %v4415_v25  ;;  %v4237_v56 = vsel %vm6591_vm10, %v4232_v37, %v4236_v19  ;;  %v6107_v25 = vld [vmem:[#allocation2 + $0x98] sm:$0x1]  ;;  %v3961_v37 = vld [vmem:[#allocation2 + $0xa4] sm:$0x1] }
 0x220   : > { %v3819_v13 = vpop.f32.mrf.mxu2  ;;  %v3333_v57 = vrot.slane %v6107_v25, 5  ;;  %v4241_v24 = vrot.slane %v4239_v46, 4  ;;  %v3583_v19 = vadd.f32 %v7750_v36, %v7156_v20  ;;  %v4753_v20 = vrot.slane %v3961_v37, 5 }
 0x221   : > { %5957 = vst [vmem:[%s7775_s17] sm:$0xff] %v5956_v48   ;;  %v5165_v44 = vadd.f32 %v5134_v55, %v5133_v12  ;;  %v3896_v10 = vadd.f32 %v3819_v13, %v3582_v53  ;;  %3549 = vmatmul.bf16.gmra.mxu1 %v3421_v16  ;;  %v7789_v53 = vrot.slane %v4248_v52, 5  ;;  %v4254_v16 = vrot.slane %v4252_v4, 4  ;;  %v4618_v12 = vld [vmem:[#allocation2 + $0x9c] sm:$0xe] }
 0x222   : > { %v4500_v42 = vpop.f32.mrf.mxu3  ;;  %v4394_v55 = vunpack.c.l.b16 %v4227_v39  ;;  %v4395_v13 = vunpack.c.l.b16 %v4237_v56  ;;  %v3334_v31 = vsel %vm6620_vm13, %v3332_v32, %v3333_v57  ;;  %v4245_v8 = vor.u32 %v4244_v40, %v4241_v24  ;;  %v5923_v56 = vld [vmem:[#allocation2 + $0x90] sm:$0xff] }
 0x223   : > { %v4577_v9 = vadd.f32 %v4500_v42, %v3896_v10  ;;  %v5792_v52 = vrot.slane %v4618_v12, 9  ;;  %v4255_v4 = vor.u32 %v4254_v16, %v7789_v53  ;;  %v4258_v10 = vshll.u32 %v3961_v37, 16  ;;  %v3962_v12 = vld [vmem:[#allocation2 + $0xa8] sm:$0xf] }
 0x224   : > { %v7787_v48 = vpop.f32.mrf.mxu0  ;;  %v4752_v39 = vrot.slane %v4750_v0, 4  ;;  %v3401_v25 = vunpack.c.l.b16 %v3331_v23  ;;  %v4416_v60 = vpack.c.b16 %v4395_v13, %v4394_v55  ;;  %v4246_v57 = vrot.slane %v4245_v8, 4 }
 0x225   : > { %v5002_v14 = vadd.f32 %v7746_v54, %v4577_v9  ;;  %v3402_v9 = vunpack.c.l.b16 %v3334_v31  ;;  %v4256_v40 = vrot.slane %v4255_v4, 4  ;;  %v4260_v16 = vrot.slane %v4258_v10, 5 }
 0x226   : > { %v7795_v27 = vpop.f32.mrf.mxu1  ;;  %v3584_v37 = vadd.f32 %v7777_v63, %v7217_v30  ;;  %v4263_v10 = vshrl.u32 %v3962_v12, 16  ;;  %v4266_v30 = vshll.u32 %v3962_v12, 16 }
 0x227   : > { %v5097_v46 = vadd.f32 %v5096_v61, %v5002_v14  ;;  %v5135_v35 = vmul.f32 %v5002_v14, %v5002_v14  ;;  %4969 = vmatmul.bf16.gmra.mxu0 %v4841_v2  ;;  %v4751_v61 = vsel %vm6620_vm13, %v5792_v52, %v4750_v0  ;;  %v4754_v2 = vsel %vm6620_vm13, %v4752_v39, %v4753_v20  ;;  %v3199_v52 = vld [vmem:[#allocation2 + $0x9c] sm:$0xe] }
 0x228   : > { %v3821_v54 = vpop.f32.mrf.mxu2  ;;  %v4821_v0 = vunpack.c.l.b16 %v4751_v61  ;;  %v5617_v20 = vrot.slane %v3199_v52, 9 }
 0x229   : > { %v5166_v36 = vadd.f32 %v5165_v44, %v5135_v35  ;;  %v3897_v42 = vadd.f32 %v3821_v54, %v3583_v19  ;;  %v3422_v44 = vpack.c.b16 %v3402_v9, %v3401_v25  ;;  %v3963_v19 = vld [vmem:[#allocation2 + $0xac] sm:$0xf]  ;;  %v4822_v35 = vunpack.c.l.b16 %v4754_v2  ;;  %v6108_v54 = vld [vmem:[#allocation2 + $0xa0] sm:$0xf] }
 0x22a   : > { %v4502_v45 = vpop.f32.mrf.mxu3  ;;  %v3337_v4 = vrot.slane %v6108_v54, 5  ;;  %v4276_v9 = vshrl.u32 %v3963_v19, 16  ;;  %v4757_v61 = vrot.slane %v3963_v19, 5 }
 0x22b   : > { %v4578_v1 = vadd.f32 %v4502_v45, %v3897_v42  ;;  %v4842_v45 = vpack.c.b16 %v4822_v35, %v4821_v0 }
 0x22c   : > { %v7804_v32 = vpop.f32.mrf.mxu0  ;;  %v3339_v42 = vrot.slane %v3337_v4, 4  ;;  %v3338_v0 = vsel %vm6620_vm13, %v5617_v20, %v3337_v4 }
 0x22d   : > { %v5003_v24 = vadd.f32 %v7765_v21, %v4578_v1  ;;  %3863 = vmatmul.bf16.gmra.mxu2 %v5923_v56  ;;  %v4251_v21 = vsel %vm6591_vm10, %v4246_v57, %v7789_v53  ;;  %v6109_v56 = vld [vmem:[#allocation2 + $0xa4] sm:$0x1]  ;;  %v4619_v1 = vld [vmem:[#allocation2 + $0xa8] sm:$0xe] }
 0x22e   : > { %v7811_v55 = vpop.f32.mrf.mxu1  ;;  %v3340_v25 = vrot.slane %v6109_v56, 5  ;;  %v4396_v2 = vunpack.c.l.b16 %v4251_v21  ;;  %v5793_v35 = vrot.slane %v4619_v1, 9 }
 0x22f   : > { %v5961_v13 = vpack.c.bf16 %v5003_v24, %v5002_v14  ;;  %v5098_v23 = vadd.f32 %v5097_v46, %v5003_v24  ;;  %v5136_v31 = vmul.f32 %v5003_v24, %v5003_v24  ;;  %4544 = vmatmul.bf16.gmra.mxu3 %v4416_v60  ;;  %v4261_v14 = vsel %vm6591_vm10, %v4256_v40, %v4260_v16 }
 0x230   : > { %v3824_v8 = vpop.f32.mrf.mxu2  ;;  %v4272_v46 = vshll.u32 %v3963_v19, 16  ;;  %v4268_v24 = vrot.slane %v4266_v30, 5  ;;  %v3585_v40 = vadd.f32 %v7795_v27, %v7220_v6  ;;  %v4397_v16 = vunpack.c.l.b16 %v4261_v14  ;;  %v5924_v30 = vld [vmem:[#allocation2 + $0x9c] sm:$0xff] }
 0x231   : > { %6033 = vst [vmem:[%s7775_s17 + $0x8] sm:$0xff] %v5961_v13   ;;  %v5167_v63 = vadd.f32 %v5166_v36, %v5136_v31  ;;  %v3898_v39 = vadd.f32 %v3824_v8, %v3584_v37  ;;  %3554 = vmatmul.bf16.gmra.mxu1 %v3422_v44  ;;  %v4265_v36 = vrot.slane %v4263_v10, 4  ;;  %v3341_v19 = vsel %vm6620_vm13, %v3339_v42, %v3340_v25  ;;  %v3964_v13 = vld [vmem:[#allocation2 + $0xb0] sm:$0x1] }
 0x232   : > { %v4505_v60 = vpop.f32.mrf.mxu3  ;;  %v7824_v12 = vrot.slane %v4272_v46, 5  ;;  %v4278_v31 = vrot.slane %v4276_v9, 4  ;;  %v4760_v52 = vrot.slane %v3964_v13, 5  ;;  %v3404_v14 = vunpack.c.l.b16 %v3341_v19  ;;  %v3965_v9 = vld [vmem:[#allocation2 + $0xb4] sm:$0xf] }
 0x233   : > { %v4579_v53 = vadd.f32 %v4505_v60, %v3898_v39  ;;  %v4269_v27 = vor.u32 %v4268_v24, %v4265_v36  ;;  %v3403_v39 = vunpack.c.l.b16 %v3338_v0  ;;  %v4282_v60 = vshll.u32 %v3964_v13, 16  ;;  %v7842_v36 = vld [vmem:[#allocation2 + $0xb8] sm:$0xf] }
 0x234   : > { %v7819_v57 = vpop.f32.mrf.mxu0  ;;  %v4279_v4 = vor.u32 %v4278_v31, %v7824_v12  ;;  %v4417_v42 = vpack.c.b16 %v4397_v16, %v4396_v2 }
 0x235   : > { %v5004_v44 = vadd.f32 %v7787_v48, %v4579_v53  ;;  %v4759_v48 = vrot.slane %v4757_v61, 4  ;;  %v3586_v53 = vadd.f32 %v7811_v55, %v7291_v7  ;;  %v4270_v1 = vrot.slane %v4269_v27, 4  ;;  %v6110_v7 = vld [vmem:[#allocation2 + $0xac] sm:$0xf] }
 0x236   : > { %v7826_v37 = vpop.f32.mrf.mxu1  ;;  %v4280_v24 = vrot.slane %v4279_v4, 4  ;;  %v3344_v55 = vrot.slane %v6110_v7, 5 }
 0x237   : > { %v5099_v8 = vadd.f32 %v5098_v23, %v5004_v44  ;;  %v5137_v21 = vmul.f32 %v5004_v44, %v5004_v44  ;;  %4974 = vmatmul.bf16.gmra.mxu0 %v4842_v45  ;;  %v4758_v23 = vsel %vm6620_vm13, %v5793_v35, %v4757_v61  ;;  %v4761_v56 = vsel %vm6620_vm13, %v4759_v48, %v4760_v52  ;;  %v3200_v35 = vld [vmem:[#allocation2 + $0xa8] sm:$0xe] }
 0x238   : > { %v3826_v6 = vpop.f32.mrf.mxu2  ;;  %v3423_v45 = vpack.c.b16 %v3404_v14, %v3403_v39  ;;  %v4284_v61 = vrot.slane %v4282_v60, 5  ;;  %v4824_v16 = vunpack.c.l.b16 %v4761_v56  ;;  %v4296_v48 = vshll.u32 %v7842_v36, 16  ;;  %v6111_v14 = vld [vmem:[#allocation2 + $0xb0] sm:$0x1] }
 0x239   : > { %v5168_v54 = vadd.f32 %v5167_v63, %v5137_v21  ;;  %v3899_v10 = vadd.f32 %v3826_v6, %v3585_v40  ;;  %v4823_v40 = vunpack.c.l.b16 %v4758_v23  ;;  %v4290_v21 = vshll.u32 %v3965_v9, 16 }
 0x23a   : > { %v4507_v46 = vpop.f32.mrf.mxu3  ;;  %v4300_v52 = vshrl.u32 %v7842_v36, 16  ;;  %v3346_v39 = vrot.slane %v3344_v55, 4 }
 0x23b   : > { %v4580_v20 = vadd.f32 %v4507_v46, %v3899_v10  ;;  %v4285_v10 = vsel %vm6591_vm10, %v4280_v24, %v4284_v61  ;;  %v3347_v46 = vrot.slane %v6111_v14, 5  ;;  %v4843_v60 = vpack.c.b16 %v4824_v16, %v4823_v40  ;;  %v3967_v40 = vld [vmem:[#allocation2 + $0xbc] sm:$0x1] }
 0x23c   : > { %v7837_v25 = vpop.f32.mrf.mxu0  ;;  %v4292_v56 = vrot.slane %v4290_v21, 5  ;;  %v5925_v21 = vld [vmem:[#allocation2 + $0xa8] sm:$0xff] }
 0x23d   : > { %v5005_v63 = vadd.f32 %v7804_v32, %v4580_v20  ;;  %3868 = vmatmul.bf16.gmra.mxu2 %v5924_v30  ;;  %v4287_v32 = vshrl.u32 %v3965_v9, 16  ;;  %v5618_v30 = vrot.slane %v3200_v35, 9  ;;  %v4620_v20 = vld [vmem:[#allocation2 + $0xb4] sm:$0xe]  ;;  %v7857_v9 = vrot.slane %v4296_v48, 5 }
 0x23e   : > { %v7844_v2 = vpop.f32.mrf.mxu1  ;;  %v5794_v16 = vrot.slane %v4620_v20, 9  ;;  %v7878_v20 = vld [vmem:[#allocation2 + $0xc4] sm:$0xf] }
 0x23f   : > { %v5966_v0 = vpack.c.bf16 %v5005_v63, %v5004_v44  ;;  %v5100_v19 = vadd.f32 %v5099_v8, %v5005_v63  ;;  %v5138_v13 = vmul.f32 %v5005_v63, %v5005_v63  ;;  %4549 = vmatmul.bf16.gmra.mxu3 %v4417_v42  ;;  %v4275_v44 = vsel %vm6591_vm10, %v4270_v1, %v7824_v12 }
 0x240   : > { %v3829_v31 = vpop.f32.mrf.mxu2  ;;  %v4764_v42 = vrot.slane %v7842_v36, 5  ;;  %v4289_v23 = vrot.slane %v4287_v32, 4  ;;  %v4302_v12 = vrot.slane %v4300_v52, 4  ;;  %v3587_v1 = vadd.f32 %v7826_v37, %v7295_v41 }
 0x241   : > { %6034 = vst [vmem:[%s7775_s17 + $0x10] sm:$0xff] %v5966_v0   ;;  %v5169_v6 = vadd.f32 %v5168_v54, %v5138_v13  ;;  %v3900_v27 = vadd.f32 %v3829_v31, %v3586_v53  ;;  %3559 = vmatmul.bf16.gmra.mxu1 %v3423_v45  ;;  %v4398_v53 = vunpack.c.l.b16 %v4275_v44  ;;  %v4399_v45 = vunpack.c.l.b16 %v4285_v10 }
 0x242   : > { %v4510_v8 = vpop.f32.mrf.mxu3  ;;  %v3345_v61 = vsel %vm6620_vm13, %v5618_v30, %v3344_v55  ;;  %v3348_v36 = vsel %vm6620_vm13, %v3346_v39, %v3347_v46  ;;  %v4766_v32 = vrot.slane %v4764_v42, 4  ;;  %v4293_v35 = vor.u32 %v4292_v56, %v4289_v23  ;;  %v3968_v30 = vld [vmem:[#allocation2 + $0xc0] sm:$0xf] }
 0x243   : > { %v4581_v4 = vadd.f32 %v4510_v8, %v3900_v27  ;;  %v4303_v7 = vor.u32 %v4302_v12, %v7857_v9  ;;  %v3405_v48 = vunpack.c.l.b16 %v3345_v61  ;;  %v3406_v52 = vunpack.c.l.b16 %v3348_v36  ;;  %v6112_v36 = vld [vmem:[#allocation2 + $0xb8] sm:$0xf] }
 0x244   : > { %v7855_v54 = vpop.f32.mrf.mxu0  ;;  %v4306_v27 = vshll.u32 %v3967_v40, 16  ;;  %v4418_v8 = vpack.c.b16 %v4399_v45, %v4398_v53  ;;  %v3588_v39 = vadd.f32 %v7844_v2, %v7329_v11  ;;  %v4311_v53 = vshrl.u32 %v3968_v30, 16 }
 0x245   : > { %v5006_v63 = vadd.f32 %v7819_v57, %v4581_v4  ;;  %v4767_v57 = vrot.slane %v3967_v40, 5  ;;  %v3424_v46 = vpack.c.b16 %v3406_v52, %v3405_v48  ;;  %v4294_v4 = vrot.slane %v4293_v35, 4 }
 0x246   : > { %v7862_v24 = vpop.f32.mrf.mxu1  ;;  %v4314_v2 = vshll.u32 %v3968_v30, 16  ;;  %v3351_v40 = vrot.slane %v6112_v36, 5 }
 0x247   : > { %v5101_v0 = vadd.f32 %v5100_v19, %v5006_v63  ;;  %v5139_v13 = vmul.f32 %v5006_v63, %v5006_v63  ;;  %4979 = vmatmul.bf16.gmra.mxu0 %v4843_v60  ;;  %v4765_v19 = vsel %vm6620_vm13, %v5794_v16, %v4764_v42  ;;  %v4768_v10 = vsel %vm6620_vm13, %v4766_v32, %v4767_v57 }
 0x248   : > { %v3831_v31 = vpop.f32.mrf.mxu2  ;;  %v4304_v60 = vrot.slane %v4303_v7, 4  ;;  %v4308_v42 = vrot.slane %v4306_v27, 5  ;;  %v4825_v56 = vunpack.c.l.b16 %v4765_v19  ;;  %v4826_v12 = vunpack.c.l.b16 %v4768_v10  ;;  %v4621_v19 = vld [vmem:[#allocation2 + $0xc0] sm:$0xe] }
 0x249   : > { %v5170_v41 = vadd.f32 %v5169_v6, %v5139_v13  ;;  %v3901_v37 = vadd.f32 %v3831_v31, %v3587_v1  ;;  %v4320_v16 = vshll.u32 %v7878_v20, 16  ;;  %v4324_v13 = vshrl.u32 %v7878_v20, 16 }
 0x24a   : > { %v4512_v55 = vpop.f32.mrf.mxu3  ;;  %v4309_v31 = vsel %vm6591_vm10, %v4304_v60, %v4308_v42  ;;  %v3353_v7 = vrot.slane %v3351_v40, 4  ;;  %v4844_v52 = vpack.c.b16 %v4826_v12, %v4825_v56  ;;  %v4316_v27 = vrot.slane %v4314_v2, 5 }
 0x24b   : > { %v4582_v44 = vadd.f32 %v4512_v55, %v3901_v37  ;;  %v6113_v37 = vld [vmem:[#allocation2 + $0xbc] sm:$0x1]  ;;  %v4313_v55 = vrot.slane %v4311_v53, 4  ;;  %v5795_v53 = vrot.slane %v4621_v19, 9 }
 0x24c   : > { %v7875_v14 = vpop.f32.mrf.mxu0 }
 0x24d   : > { %v5007_v6 = vadd.f32 %v7837_v25, %v4582_v44  ;;  %3873 = vmatmul.bf16.gmra.mxu2 %v5925_v21  ;;  %v3201_v25 = vld [vmem:[#allocation2 + $0xb4] sm:$0xe]  ;;  %v3354_v21 = vrot.slane %v6113_v37, 5 }
 0x24e   : > { %v7880_v23 = vpop.f32.mrf.mxu1  ;;  %v5619_v35 = vrot.slane %v3201_v25, 9  ;;  %v5926_v25 = vld [vmem:[#allocation2 + $0xb4] sm:$0xff] }
 0x24f   : > { %v5971_v45 = vpack.c.bf16 %v5007_v6, %v5006_v63  ;;  %v5102_v1 = vadd.f32 %v5101_v0, %v5007_v6  ;;  %v5140_v11 = vmul.f32 %v5007_v6, %v5007_v6  ;;  %4554 = vmatmul.bf16.gmra.mxu3 %v4418_v8  ;;  %v4299_v63 = vsel %vm6591_vm10, %v4294_v4, %v7857_v9 }
 0x250   : > { %v3834_v61 = vpop.f32.mrf.mxu2  ;;  %v4326_v8 = vrot.slane %v4324_v13, 4  ;;  %v4771_v9 = vrot.slane %v7878_v20, 5  ;;  %v4400_v30 = vunpack.c.l.b16 %v4299_v63  ;;  %v3589_v6 = vadd.f32 %v7862_v24, %v7351_v18 }
 0x251   : > { %6035 = vst [vmem:[%s7775_s17 + $0x18] sm:$0xff] %v5971_v45   ;;  %v5171_v32 = vadd.f32 %v5170_v41, %v5140_v11  ;;  %v3902_v57 = vadd.f32 %v3834_v61, %v3588_v39  ;;  %3564 = vmatmul.bf16.gmra.mxu1 %v3424_v46  ;;  %v7892_v41 = vrot.slane %v4320_v16, 5  ;;  %v3970_v39 = vld [vmem:[#allocation2 + $0xc8] sm:$0x1]  ;;  %v4401_v46 = vunpack.c.l.b16 %v4309_v31 }
 0x252   : > { %v4515_v0 = vpop.f32.mrf.mxu3  ;;  %v3352_v60 = vsel %vm6620_vm13, %v5619_v35, %v3351_v40  ;;  %v3355_v42 = vsel %vm6620_vm13, %v3353_v7, %v3354_v21  ;;  %v4317_v20 = vor.u32 %v4316_v27, %v4313_v55  ;;  %v4330_v11 = vshll.u32 %v3970_v39, 16  ;;  %v3971_v55 = vld [vmem:[#allocation2 + $0xcc] sm:$0xf] }
 0x253   : > { %v4583_v48 = vadd.f32 %v4515_v0, %v3902_v57  ;;  %v4327_v45 = vor.u32 %v4326_v8, %v7892_v41  ;;  %v4773_v2 = vrot.slane %v4771_v9, 4  ;;  %v4774_v18 = vrot.slane %v3970_v39, 5  ;;  %v3202_v39 = vld [vmem:[#allocation2 + $0xc0] sm:$0xe] }
 0x254   : > { %v7890_v44 = vpop.f32.mrf.mxu0  ;;  %v3407_v36 = vunpack.c.l.b16 %v3352_v60  ;;  %v3408_v16 = vunpack.c.l.b16 %v3355_v42  ;;  %v4419_v57 = vpack.c.b16 %v4401_v46, %v4400_v30  ;;  %v4318_v0 = vrot.slane %v4317_v20, 4 }
 0x255   : > { %v5008_v10 = vadd.f32 %v7855_v54, %v4583_v48  ;;  %v4775_v31 = vsel %vm6620_vm13, %v4773_v2, %v4774_v18  ;;  %v4328_v7 = vrot.slane %v4327_v45, 4  ;;  %v4332_v37 = vrot.slane %v4330_v11, 5 }
 0x256   : > { %v7898_v4 = vpop.f32.mrf.mxu1  ;;  %v3590_v21 = vadd.f32 %v7880_v23, %v7367_v62  ;;  %v4335_v42 = vshrl.u32 %v3971_v55, 16  ;;  %v4338_v45 = vshll.u32 %v3971_v55, 16 }
 0x257   : > { %v5103_v56 = vadd.f32 %v5102_v1, %v5008_v10  ;;  %v5141_v12 = vmul.f32 %v5008_v10, %v5008_v10  ;;  %4984 = vmatmul.bf16.gmra.mxu0 %v4844_v52  ;;  %v4772_v1 = vsel %vm6620_vm13, %v5795_v53, %v4771_v9  ;;  %v4828_v9 = vunpack.c.l.b16 %v4775_v31  ;;  %v6115_v53 = vld [vmem:[#allocation2 + $0xc8] sm:$0x1] }
 0x258   : > { %v3836_v54 = vpop.f32.mrf.mxu2  ;;  %v4827_v52 = vunpack.c.l.b16 %v4772_v1  ;;  %v4333_v23 = vsel %vm6591_vm10, %v4328_v7, %v4332_v37  ;;  %v4340_v31 = vrot.slane %v4338_v45, 5  ;;  %v3591_v7 = vadd.f32 %v7898_v4, %v7394_v49  ;;  %v3973_v37 = vld [vmem:[#allocation2 + $0xd4] sm:$0x1] }
 0x259   : > { %v5172_v24 = vadd.f32 %v5171_v32, %v5141_v12  ;;  %v3903_v61 = vadd.f32 %v3836_v54, %v3589_v6  ;;  %v3425_v32 = vpack.c.b16 %v3408_v16, %v3407_v36  ;;  %v6114_v6 = vld [vmem:[#allocation2 + $0xc4] sm:$0xf]  ;;  %v5620_v12 = vrot.slane %v3202_v39, 9 }
 0x25a   : > { %v4517_v40 = vpop.f32.mrf.mxu3  ;;  %v3358_v46 = vrot.slane %v6114_v6, 5  ;;  %v3361_v54 = vrot.slane %v6115_v53, 5 }
 0x25b   : > { %v4584_v13 = vadd.f32 %v4517_v40, %v3903_v61  ;;  %v4403_v40 = vunpack.c.l.b16 %v4333_v23 }
 0x25c   : > { %v7907_v63 = vpop.f32.mrf.mxu0  ;;  %v3360_v20 = vrot.slane %v3358_v46, 4 }
 0x25d   : > { %v5009_v35 = vadd.f32 %v7875_v14, %v4584_v13  ;;  %3878 = vmatmul.bf16.gmra.mxu2 %v5926_v25  ;;  %v4323_v14 = vsel %vm6591_vm10, %v4318_v0, %v7892_v41  ;;  %v4845_v41 = vpack.c.b16 %v4828_v9, %v4827_v52  ;;  %v4337_v0 = vrot.slane %v4335_v42, 4 }
 0x25e   : > { %v7914_v48 = vpop.f32.mrf.mxu1  ;;  %v4402_v16 = vunpack.c.l.b16 %v4323_v14  ;;  %v3362_v1 = vsel %vm6620_vm13, %v3360_v20, %v3361_v54  ;;  %v5927_v14 = vld [vmem:[#allocation2 + $0xc0] sm:$0xff]  ;;  %v4354_v42 = vshll.u32 %v3973_v37, 16 }
 0x25f   : > { %v5976_v27 = vpack.c.bf16 %v5009_v35, %v5008_v10  ;;  %v5104_v8 = vadd.f32 %v5103_v56, %v5009_v35  ;;  %v5142_v19 = vmul.f32 %v5009_v35, %v5009_v35  ;;  %4559 = vmatmul.bf16.gmra.mxu3 %v4419_v57  ;;  %v3972_v10 = vld [vmem:[#allocation2 + $0xd0] sm:$0xf]  ;;  %v3359_v57 = vsel %vm6620_vm13, %v5620_v12, %v3358_v46 }
 0x260   : > { %v3839_v30 = vpop.f32.mrf.mxu2  ;;  %v4344_v18 = vshll.u32 %v3972_v10, 16  ;;  %v4348_v61 = vshrl.u32 %v3972_v10, 16  ;;  %v4778_v25 = vrot.slane %v3972_v10, 5  ;;  %v3409_v39 = vunpack.c.l.b16 %v3359_v57 }
 0x261   : > { %6036 = vst [vmem:[%s7775_s17 + $0x20] sm:$0xff] %v5976_v27   ;;  %v5173_v60 = vadd.f32 %v5172_v24, %v5142_v19  ;;  %v3904_v62 = vadd.f32 %v3839_v30, %v3590_v21  ;;  %3569 = vmatmul.bf16.gmra.mxu1 %v3425_v32  ;;  %v4622_v24 = vld [vmem:[#allocation2 + $0xcc] sm:$0xe]  ;;  %v4781_v19 = vrot.slane %v3973_v37, 5  ;;  %v3410_v6 = vunpack.c.l.b16 %v3362_v1 }
 0x262   : > { %v4520_v56 = vpop.f32.mrf.mxu3  ;;  %v5796_v21 = vrot.slane %v4622_v24, 9  ;;  %v4346_v52 = vrot.slane %v4344_v18, 5  ;;  %v4350_v55 = vrot.slane %v4348_v61, 4  ;;  %v4780_v27 = vrot.slane %v4778_v25, 4 }
 0x263   : > { %v4585_v11 = vadd.f32 %v4520_v56, %v3904_v62  ;;  %v4341_v62 = vor.u32 %v4340_v31, %v4337_v0  ;;  %v4420_v23 = vpack.c.b16 %v4403_v40, %v4402_v16  ;;  %v3426_v12 = vpack.c.b16 %v3410_v6, %v3409_v39 }
 0x264   : > { %v7922_v2 = vpop.f32.mrf.mxu0  ;;  %v4779_v49 = vsel %vm6620_vm13, %v5796_v21, %v4778_v25  ;;  %v4351_v10 = vor.u32 %v4350_v55, %v4346_v52  ;;  %v4782_v56 = vsel %vm6620_vm13, %v4780_v27, %v4781_v19  ;;  %v3592_v20 = vadd.f32 %v7914_v48, %v7408_v28 }
 0x265   : > { %v5010_v36 = vadd.f32 %v7890_v44, %v4585_v11  ;;  %v4342_v54 = vrot.slane %v4341_v62, 4  ;;  %v4829_v45 = vunpack.c.l.b16 %v4779_v49  ;;  %v4830_v61 = vunpack.c.l.b16 %v4782_v56 }
 0x266   : > { %v3532_v13 = vpop.f32.mrf.mxu1  ;;  %v4352_v25 = vrot.slane %v4351_v10, 4  ;;  %v4356_v34 = vrot.slane %v4354_v42, 5 }
 0x267   : > { %v5105_v35 = vadd.f32 %v5104_v8, %v5010_v36  ;;  %v5143_v32 = vmul.f32 %v5010_v36, %v5010_v36  ;;  %4989 = vmatmul.bf16.gmra.mxu0 %v4845_v41  ;;  %v4347_v28 = vsel %vm6591_vm10, %v4342_v54, %v4346_v52  ;;  %v4846_v48 = vpack.c.b16 %v4830_v61, %v4829_v45  ;;  %v5928_v52 = vld [vmem:[#allocation2 + $0xcc] sm:$0xff] }
 0x268   : > { %v3841_v44 = vpop.f32.mrf.mxu2  ;;  %v4404_v31 = vunpack.c.l.b16 %v4347_v28  ;;  %v3593_v37 = vadd.f32 %v3532_v13, %v7422_v5 }
 0x269   : > { %v5174_v9 = vadd.f32 %v5173_v60, %v5143_v32  ;;  %v3905_v30 = vadd.f32 %v3841_v44, %v3591_v7 }
 0x26a   : > { %v4522_v46 = vpop.f32.mrf.mxu3 }
 0x26b   : > { %v4586_v8 = vadd.f32 %v4522_v46, %v3905_v30 }
 0x26c   : > { %v4952_v4 = vpop.f32.mrf.mxu0 }
 0x26d   : > { %v5011_v60 = vadd.f32 %v7907_v63, %v4586_v8  ;;  %3883 = vmatmul.bf16.gmra.mxu2 %v5927_v14 }
 0x26e   : > { %v3535_v53 = vpop.f32.mrf.mxu1 }
 0x26f   : > { %v5981_v11 = vpack.c.bf16 %v5011_v60, %v5010_v36  ;;  %v5106_v41 = vadd.f32 %v5105_v35, %v5011_v60  ;;  %v5144_v18 = vmul.f32 %v5011_v60, %v5011_v60  ;;  %4564 = vmatmul.bf16.gmra.mxu3 %v4420_v23  ;;  %v4357_v36 = vsel %vm6591_vm10, %v4352_v25, %v4356_v34 }
 0x270   : > { %v3844_v24 = vpop.f32.mrf.mxu2  ;;  %v4405_v21 = vunpack.c.l.b16 %v4357_v36  ;;  %v3594_v62 = vadd.f32 %v3535_v53, %v7439_v38 }
 0x271   : > { %6037 = vst [vmem:[%s7775_s17 + $0x28] sm:$0xff] %v5981_v11   ;;  %v5175_v16 = vadd.f32 %v5174_v9, %v5144_v18  ;;  %v3906_v40 = vadd.f32 %v3844_v24, %v3592_v20  ;;  %3574 = vmatmul.bf16.gmra.mxu1 %v3426_v12 }
 0x272   : > { %v4525_v63 = vpop.f32.mrf.mxu3  ;;  %v4421_v30 = vpack.c.b16 %v4405_v21, %v4404_v31 }
 0x273   : > { %v4587_v57 = vadd.f32 %v4525_v63, %v3906_v40 }
 0x274   : > { %v4955_v1 = vpop.f32.mrf.mxu0 }
 0x275   : > { %v5012_v0 = vadd.f32 %v7922_v2, %v4587_v57 }
 0x276   : > { %v3537_v35 = vpop.f32.mrf.mxu1 }
 0x277   : > { %v5107_v32 = vadd.f32 %v5106_v41, %v5012_v0  ;;  %v5145_v7 = vmul.f32 %v5012_v0, %v5012_v0  ;;  %4994 = vmatmul.bf16.gmra.mxu0 %v4846_v48  ;;  %v3595_v12 = vadd.f32 %v3537_v35, %v7458_v3 }
 0x278   : > { %v3846_v44 = vpop.f32.mrf.mxu2 }
 0x279   : > { %v5176_v55 = vadd.f32 %v5175_v16, %v5145_v7  ;;  %v3907_v27 = vadd.f32 %v3846_v44, %v3593_v37 }
 0x27a   : > { %v4527_v19 = vpop.f32.mrf.mxu3 }
 0x27b   : > { %v4588_v9 = vadd.f32 %v4527_v19, %v3907_v27 }
 0x27c   : > { %v4957_v29 = vpop.f32.mrf.mxu0 }
 0x27d   : > { %v5013_v14 = vadd.f32 %v4952_v4, %v4588_v9  ;;  %3888 = vmatmul.bf16.gmra.mxu2 %v5928_v52 }
 0x27e   : > { %v3540_v2 = vpop.f32.mrf.mxu1 }
 0x27f   : > { %v5986_v39 = vpack.c.bf16 %v5013_v14, %v5012_v0  ;;  %v5108_v6 = vadd.f32 %v5107_v32, %v5013_v14  ;;  %v5146_v46 = vmul.f32 %v5013_v14, %v5013_v14  ;;  %4569 = vmatmul.bf16.gmra.mxu3 %v4421_v30  ;;  %v3596_v34 = vadd.f32 %v3540_v2, %v7473_v59 }
 0x280   : > { %v3849_v5 = vpop.f32.mrf.mxu2 }
 0x281   : > { %6038 = vst [vmem:[%s7775_s17 + $0x30] sm:$0xff] %v5986_v39   ;;  %v5177_v13 = vadd.f32 %v5176_v55, %v5146_v46  ;;  %v3908_v8 = vadd.f32 %v3849_v5, %v3594_v62 }
 0x282   : > { %v4530_v23 = vpop.f32.mrf.mxu3 }
 0x283   : > { %v4589_v49 = vadd.f32 %v4530_v23, %v3908_v8 }
 0x284   : > { %v4960_v10 = vpop.f32.mrf.mxu0 }
 0x285   : > { %v5014_v42 = vadd.f32 %v4955_v1, %v4589_v49 }
 0x286   : > { %v3542_v56 = vpop.f32.mrf.mxu1 }
 0x287   : > { %v5109_v60 = vadd.f32 %v5108_v6, %v5014_v42  ;;  %v5147_v4 = vmul.f32 %v5014_v42, %v5014_v42  ;;  %v3597_v31 = vadd.f32 %v3542_v56, %v7494_v22 }
 0x288   : > { %v3851_v20 = vpop.f32.mrf.mxu2 }
 0x289   : > { %v5178_v54 = vadd.f32 %v5177_v13, %v5147_v4  ;;  %v3909_v45 = vadd.f32 %v3851_v20, %v3595_v12 }
 0x28a   : > { %v4532_v11 = vpop.f32.mrf.mxu3 }
 0x28b   : > { %v4590_v38 = vadd.f32 %v4532_v11, %v3909_v45 }
 0x28c   : > { %v4962_v53 = vpop.f32.mrf.mxu0 }
 0x28d   : > { %v5015_v41 = vadd.f32 %v4957_v29, %v4590_v38 }
 0x28e   : > { %v3545_v18 = vpop.f32.mrf.mxu1 }
 0x28f   : > { %v5991_v61 = vpack.c.bf16 %v5015_v41, %v5014_v42  ;;  %v5110_v24 = vadd.f32 %v5109_v60, %v5015_v41  ;;  %v5148_v25 = vmul.f32 %v5015_v41, %v5015_v41  ;;  %v3598_v9 = vadd.f32 %v3545_v18, %v7509_v43 }
 0x290   : > { %v3854_v16 = vpop.f32.mrf.mxu2 }
 0x291   : > { %6039 = vst [vmem:[%s7775_s17 + $0x38] sm:$0xff] %v5991_v61   ;;  %v5179_v40 = vadd.f32 %v5178_v54, %v5148_v25  ;;  %v3910_v63 = vadd.f32 %v3854_v16, %v3596_v34 }
 0x292   : > { %v4535_v57 = vpop.f32.mrf.mxu3 }
 0x293   : > { %v4591_v28 = vadd.f32 %v4535_v57, %v3910_v63 }
 0x294   : > { %v4965_v3 = vpop.f32.mrf.mxu0 }
 0x295   : > { %v5016_v48 = vadd.f32 %v4960_v10, %v4591_v28 }
 0x296   : > { %v3547_v1 = vpop.f32.mrf.mxu1 }
 0x297   : > { %v5111_v36 = vadd.f32 %v5110_v24, %v5016_v48  ;;  %v5149_v0 = vmul.f32 %v5016_v48, %v5016_v48  ;;  %v3599_v13 = vadd.f32 %v3547_v1, %v7530_v58 }
 0x298   : > { %v3856_v35 = vpop.f32.mrf.mxu2 }
 0x299   : > { %v5180_v32 = vadd.f32 %v5179_v40, %v5149_v0  ;;  %v3911_v7 = vadd.f32 %v3856_v35, %v3597_v31 }
 0x29a   : > { %v4537_v37 = vpop.f32.mrf.mxu3 }
 0x29b   : > { %v4592_v21 = vadd.f32 %v4537_v37, %v3911_v7 }
 0x29c   : > { %v4967_v59 = vpop.f32.mrf.mxu0 }
 0x29d   : > { %v5017_v44 = vadd.f32 %v4962_v53, %v4592_v21 }
 0x29e   : > { %v3550_v55 = vpop.f32.mrf.mxu1 }
 0x29f   : > { %v5996_v27 = vpack.c.bf16 %v5017_v44, %v5016_v48  ;;  %v5112_v52 = vadd.f32 %v5111_v36, %v5017_v44  ;;  %v5150_v19 = vmul.f32 %v5017_v44, %v5017_v44  ;;  %v3600_v54 = vadd.f32 %v3550_v55, %v7547_v47 }
 0x2a0   : > { %v3859_v30 = vpop.f32.mrf.mxu2 }
 0x2a1   : > { %6040 = vst [vmem:[%s7775_s17 + $0x40] sm:$0xff] %v5996_v27   ;;  %v5181_v29 = vadd.f32 %v5180_v32, %v5150_v19  ;;  %v3912_v14 = vadd.f32 %v3859_v30, %v3598_v9 }
 0x2a2   : > { %v4540_v2 = vpop.f32.mrf.mxu3 }
 0x2a3   : > { %v4593_v39 = vadd.f32 %v4540_v2, %v3912_v14 }
 0x2a4   : > { %v4970_v22 = vpop.f32.mrf.mxu0 }
 0x2a5   : > { %v5018_v6 = vadd.f32 %v4965_v3, %v4593_v39 }
 0x2a6   : > { %v3552_v46 = vpop.f32.mrf.mxu1 }
 0x2a7   : > { %v5113_v62 = vadd.f32 %v5112_v52, %v5018_v6  ;;  %v5151_v5 = vmul.f32 %v5018_v6, %v5018_v6  ;;  %v3601_v34 = vadd.f32 %v3552_v46, %v7566_v33 }
 0x2a8   : > { %v3861_v8 = vpop.f32.mrf.mxu2 }
 0x2a9   : > { %v5182_v23 = vadd.f32 %v5181_v29, %v5151_v5  ;;  %v3913_v49 = vadd.f32 %v3861_v8, %v3599_v13 }
 0x2aa   : > { %v4542_v10 = vpop.f32.mrf.mxu3 }
 0x2ab   : > { %v4594_v42 = vadd.f32 %v4542_v10, %v3913_v49 }
 0x2ac   : > { %v4972_v43 = vpop.f32.mrf.mxu0 }
 0x2ad   : > { %v5019_v56 = vadd.f32 %v4967_v59, %v4594_v42 }
 0x2ae   : > { %v3555_v60 = vpop.f32.mrf.mxu1 }
 0x2af   : > { %v6001_v4 = vpack.c.bf16 %v5019_v56, %v5018_v6  ;;  %v5114_v12 = vadd.f32 %v5113_v62, %v5019_v56  ;;  %v5152_v20 = vmul.f32 %v5019_v56, %v5019_v56  ;;  %v3602_v31 = vadd.f32 %v3555_v60, %v7581_v15 }
 0x2b0   : > { %v3864_v45 = vpop.f32.mrf.mxu2 }
 0x2b1   : > { %6041 = vst [vmem:[%s7775_s17 + $0x48] sm:$0xff] %v6001_v4   ;;  %v5183_v11 = vadd.f32 %v5182_v23, %v5152_v20  ;;  %v3914_v38 = vadd.f32 %v3864_v45, %v3600_v54 }
 0x2b2   : > { %v4545_v53 = vpop.f32.mrf.mxu3 }
 0x2b3   : > { %v4595_v41 = vadd.f32 %v4545_v53, %v3914_v38 }
 0x2b4   : > { %v4975_v58 = vpop.f32.mrf.mxu0 }
 0x2b5   : > { %v5020_v18 = vadd.f32 %v4970_v22, %v4595_v41  ;;  %v8035_v41 = vld [vmem:[#allocation3_spill] sm:$0xff] }
 0x2b6   : > { %v3557_v61 = vpop.f32.mrf.mxu1 }
 0x2b7   : > { %v5115_v24 = vadd.f32 %v5114_v12, %v5020_v18  ;;  %v5153_v25 = vmul.f32 %v5020_v18, %v5020_v18  ;;  %v3603_v27 = vadd.f32 %v3557_v61, %v7602_v50 }
 0x2b8   : > { %v3866_v16 = vpop.f32.mrf.mxu2 }
 0x2b9   : > { %v5184_v40 = vadd.f32 %v5183_v11, %v5153_v25  ;;  %v3915_v63 = vadd.f32 %v3866_v16, %v3601_v34 }
 0x2ba   : > { %v4547_v57 = vpop.f32.mrf.mxu3 }
 0x2bb   : > { %v4596_v28 = vadd.f32 %v4547_v57, %v3915_v63 }
 0x2bc   : > { %v4977_v47 = vpop.f32.mrf.mxu0 }
 0x2bd   : > { %v5021_v3 = vadd.f32 %v4972_v43, %v4596_v28 }
 0x2be   : > { %v3560_v48 = vpop.f32.mrf.mxu1 }
 0x2bf   : > { %v6006_v1 = vpack.c.bf16 %v5021_v3, %v5020_v18  ;;  %v5116_v36 = vadd.f32 %v5115_v24, %v5021_v3  ;;  %v5154_v0 = vmul.f32 %v5021_v3, %v5021_v3  ;;  %v3604_v6 = vadd.f32 %v3560_v48, %v7617_v17 }
 0x2c0   : > { %v3869_v35 = vpop.f32.mrf.mxu2 }
 0x2c1   : > { %6042 = vst [vmem:[%s7775_s17 + $0x50] sm:$0xff] %v6006_v1   ;;  %v5185_v32 = vadd.f32 %v5184_v40, %v5154_v0  ;;  %v3916_v7 = vadd.f32 %v3869_v35, %v3602_v31 }
 0x2c2   : > { %v4550_v37 = vpop.f32.mrf.mxu3 }
 0x2c3   : > { %v4597_v21 = vadd.f32 %v4550_v37, %v3916_v7  ;;  %v8036_v37 = vld [vmem:[#allocation5_spill] sm:$0xff] }
 0x2c4   : > { %v4980_v59 = vpop.f32.mrf.mxu0 }
 0x2c5   : > { %v5022_v33 = vadd.f32 %v4975_v58, %v4597_v21 }
 0x2c6   : > { %v3562_v19 = vpop.f32.mrf.mxu1 }
 0x2c7   : > { %v5117_v44 = vadd.f32 %v5116_v36, %v5022_v33  ;;  %v5155_v55 = vmul.f32 %v5022_v33, %v5022_v33  ;;  %v3605_v43 = vadd.f32 %v3562_v19, %v7643_v51 }
 0x2c8   : > { %v3871_v52 = vpop.f32.mrf.mxu2 }
 0x2c9   : > { %v5186_v9 = vadd.f32 %v5185_v32, %v5155_v55  ;;  %v3917_v30 = vadd.f32 %v3871_v52, %v3603_v27 }
 0x2ca   : > { %v4552_v29 = vpop.f32.mrf.mxu3 }
 0x2cb   : > { %v4598_v14 = vadd.f32 %v4552_v29, %v3917_v30  ;;  %v8037_v30 = vld [vmem:[#allocation7_spill] sm:$0xff] }
 0x2cc   : > { %v4982_v62 = vpop.f32.mrf.mxu0 }
 0x2cd   : > { %v5023_v15 = vadd.f32 %v4977_v47, %v4598_v14 }
 0x2ce   : > { %v3565_v23 = vpop.f32.mrf.mxu1 }
 0x2cf   : > { %v6011_v2 = vpack.c.bf16 %v5023_v15, %v5022_v33  ;;  %v5118_v39 = vadd.f32 %v5117_v44, %v5023_v15  ;;  %v5156_v22 = vmul.f32 %v5023_v15, %v5023_v15  ;;  %v3606_v58 = vadd.f32 %v3565_v23, %v8035_v41  ;;  %v8038_v23 = vld [vmem:[#allocation9_spill] sm:$0xff] }
 0x2d0   : > { %v3874_v46 = vpop.f32.mrf.mxu2 }
 0x2d1   : > { %6043 = vst [vmem:[%s7775_s17 + $0x58] sm:$0xff] %v6011_v2   ;;  %v5187_v5 = vadd.f32 %v5186_v9, %v5156_v22  ;;  %v3918_v13 = vadd.f32 %v3874_v46, %v3604_v6 }
 0x2d2   : > { %v4555_v8 = vpop.f32.mrf.mxu3 }
 0x2d3   : > { %v4599_v50 = vadd.f32 %v4555_v8, %v3918_v13 }
 0x2d4   : > { %v4985_v20 = vpop.f32.mrf.mxu0 }
 0x2d5   : > { %v5024_v49 = vadd.f32 %v4980_v59, %v4599_v50 }
 0x2d6   : > { %v3567_v54 = vpop.f32.mrf.mxu1 }
 0x2d7   : > { %v5119_v10 = vadd.f32 %v5118_v39, %v5024_v49  ;;  %v5157_v42 = vmul.f32 %v5024_v49, %v5024_v49  ;;  %v3607_v28 = vadd.f32 %v3567_v54, %v7679_v26  ;;  %v8039_v54 = vld [vmem:[#allocation11_spill] sm:$0xff] }
 0x2d8   : > { %v3876_v56 = vpop.f32.mrf.mxu2 }
 0x2d9   : > { %v5188_v60 = vadd.f32 %v5187_v5, %v5157_v42  ;;  %v3919_v4 = vadd.f32 %v3876_v56, %v3605_v43 }
 0x2da   : > { %v4557_v12 = vpop.f32.mrf.mxu3 }
 0x2db   : > { %v4600_v17 = vadd.f32 %v4557_v12, %v3919_v4 }
 0x2dc   : > { %v4987_v51 = vpop.f32.mrf.mxu0 }
 0x2dd   : > { %v5025_v45 = vadd.f32 %v4982_v62, %v4600_v17 }
 0x2de   : > { %v3570_v40 = vpop.f32.mrf.mxu1 }
 0x2df   : > { %v6016_v11 = vpack.c.bf16 %v5025_v45, %v5024_v49  ;;  %v5120_v38 = vadd.f32 %v5119_v10, %v5025_v45  ;;  %v5158_v53 = vmul.f32 %v5025_v45, %v5025_v45  ;;  %v3608_v21 = vadd.f32 %v3570_v40, %v8036_v37 }
 0x2e0   : > { %v3879_v18 = vpop.f32.mrf.mxu2 }
 0x2e1   : > { %6044 = vst [vmem:[%s7775_s17 + $0x60] sm:$0xff] %v6016_v11   ;;  %v5189_v61 = vadd.f32 %v5188_v60, %v5158_v53  ;;  %v3920_v24 = vadd.f32 %v3879_v18, %v3606_v58 }
 0x2e2   : > { %v4560_v25 = vpop.f32.mrf.mxu3 }
 0x2e3   : > { %v4601_v34 = vadd.f32 %v4560_v25, %v3920_v24 }
 0x2e4   : > { %v4990_v31 = vpop.f32.mrf.mxu0 }
 0x2e5   : > { %v5026_v16 = vadd.f32 %v4985_v20, %v4601_v34 }
 0x2e6   : > { %v3572_v59 = vpop.f32.mrf.mxu1 }
 0x2e7   : > { %v5121_v63 = vadd.f32 %v5120_v38, %v5026_v16  ;;  %v5159_v57 = vmul.f32 %v5026_v16, %v5026_v16  ;;  %v3609_v29 = vadd.f32 %v3572_v59, %v8037_v30 }
 0x2e8   : > { %v3881_v47 = vpop.f32.mrf.mxu2 }
 0x2e9   : > { %v5190_v3 = vadd.f32 %v5189_v61, %v5159_v57  ;;  %v3921_v48 = vadd.f32 %v3881_v47, %v3607_v28 }
 0x2ea   : > { %v4562_v1 = vpop.f32.mrf.mxu3 }
 0x2eb   : > { %v4602_v36 = vadd.f32 %v4562_v1, %v3921_v48 }
 0x2ec   : > { %v4992_v14 = vpop.f32.mrf.mxu0 }
 0x2ed   : > { %v5027_v0 = vadd.f32 %v4987_v51, %v4602_v36 }
 0x2ee   : > { %v3575_v6 = vpop.f32.mrf.mxu1 }
 0x2ef   : > { %v6021_v35 = vpack.c.bf16 %v5027_v0, %v5026_v16  ;;  %v5122_v32 = vadd.f32 %v5121_v63, %v5027_v0  ;;  %v5160_v7 = vmul.f32 %v5027_v0, %v5027_v0  ;;  %v3610_v50 = vadd.f32 %v3575_v6, %v8038_v23 }
 0x2f0   : > { %v3884_v33 = vpop.f32.mrf.mxu2 }
 0x2f1   : > { %6045 = vst [vmem:[%s7775_s17 + $0x68] sm:$0xff] %v6021_v35   ;;  %v5191_v44 = vadd.f32 %v5190_v3, %v5160_v7  ;;  %v3922_v55 = vadd.f32 %v3884_v33, %v3608_v21 }
 0x2f2   : > { %v4565_v27 = vpop.f32.mrf.mxu3 }
 0x2f3   : > { %v4603_v52 = vadd.f32 %v4565_v27, %v3922_v55 }
 0x2f4   : > { %v4995_v43 = vpop.f32.mrf.mxu0 }
 0x2f5   : > { %v5028_v26 = vadd.f32 %v4990_v31, %v4603_v52 }
 0x2f6   : > { %v3577_v4 = vpop.f32.mrf.mxu1 }
 0x2f7   : > { %v5123_v19 = vadd.f32 %v5122_v32, %v5028_v26  ;;  %v5161_v9 = vmul.f32 %v5028_v26, %v5028_v26  ;;  %v3611_v45 = vadd.f32 %v3577_v4, %v8039_v54 }
 0x2f8   : > { %v3886_v15 = vpop.f32.mrf.mxu2 }
 0x2f9   : > { %v5192_v2 = vadd.f32 %v5191_v44, %v5161_v9  ;;  %v3923_v39 = vadd.f32 %v3886_v15, %v3609_v29 }
 0x2fa   : > { %v4567_v22 = vpop.f32.mrf.mxu3 }
 0x2fb   : > { %v4604_v46 = vadd.f32 %v4567_v22, %v3923_v39 }
 0x2fc   : > { %v4997_v18 = vpop.f32.mrf.mxu0 }
 0x2fd   : > { %v5029_v62 = vadd.f32 %v4992_v14, %v4604_v46 }
 0x2ff   : > { %v6026_v5 = vpack.c.bf16 %v5029_v62, %v5028_v26  ;;  %v5124_v13 = vadd.f32 %v5123_v19, %v5029_v62  ;;  %v5162_v8 = vmul.f32 %v5029_v62, %v5029_v62 }
 0x300   : > { %v3889_v49 = vpop.f32.mrf.mxu2 }
 0x301   : > { %6046 = vst [vmem:[%s7775_s17 + $0x70] sm:$0xff] %v6026_v5   ;;  %v5193_v10 = vadd.f32 %v5192_v2, %v5162_v8  ;;  %v3924_v42 = vadd.f32 %v3889_v49, %v3610_v50 }
 0x302   : > { %v4570_v56 = vpop.f32.mrf.mxu3 }
 0x303   : > { %v4605_v60 = vadd.f32 %v4570_v56, %v3924_v42 }
 0x305   : > { %v5030_v12 = vadd.f32 %v4995_v43, %v4605_v60 }
 0x307   : > { %v5125_v20 = vadd.f32 %v5124_v13, %v5030_v12  ;;  %v5163_v17 = vmul.f32 %v5030_v12, %v5030_v12 }
 0x308   : > { %v3891_v11 = vpop.f32.mrf.mxu2 }
 0x309   : > { %v5194_v38 = vadd.f32 %v5193_v10, %v5163_v17  ;;  %v3925_v53 = vadd.f32 %v3891_v11, %v3611_v45 }
 0x30a   : > { %v4572_v41 = vpop.f32.mrf.mxu3 }
 0x30b   : > { %v4606_v58 = vadd.f32 %v4572_v41, %v3925_v53 }
 0x30d   : > { %v5031_v61 = vadd.f32 %v4997_v18, %v4606_v58 }
 0x30f   : > { %v6031_v24 = vpack.c.bf16 %v5031_v61, %v5030_v12  ;;  %v5126_v25 = vadd.f32 %v5125_v20, %v5031_v61  ;;  %v5164_v34 = vmul.f32 %v5031_v61, %v5031_v61 }
 0x311   : > { %6047 = vst [vmem:[%s7775_s17 + $0x78] sm:$0xff] %v6031_v24   ;;  %v5127_v51 = vrot.slane %v5126_v25, 4  ;;  %v5195_v16 = vadd.f32 %v5194_v38, %v5164_v34 }
 0x313   : > { %v5128_v40 = vadd.f32 %v5127_v51, %v5126_v25  ;;  %v5196_v63 = vrot.slane %v5195_v16, 4 }
 0x315   : > { %v5129_v57 = vrot.slane %v5128_v40, 2  ;;  %v5197_v28 = vadd.f32 %v5196_v63, %v5195_v16 }
 0x317   : > { %v5130_v47 = vadd.f32 %v5129_v57, %v5128_v40  ;;  %v5198_v3 = vrot.slane %v5197_v28, 2 }
 0x319   : > { %v5131_v48 = vrot.slane %v5130_v47, 1  ;;  %v5199_v1 = vadd.f32 %v5198_v3, %v5197_v28 }
 0x31b   : > { %v5200_v36 = vrot.slane %v5199_v1, 1  ;;  %v5132_v0 = vadd.f32 %v5131_v48, %v5130_v47 }
 0x31d   : > { %v5201_v31 = vadd.f32 %v5200_v36, %v5199_v1 }
 0x31f   : > { %v5203_v35 = vsel %vm654_vm6, %v5132_v0, %v5201_v31 }
 0x320   : > { %5204 = vst [vmem:[%s235_s21] sm:$0x3] %v5203_v35 }
 0x321 PF: > { %s16_s18 = sadd.s32 1, %s6122_s18  }
 0x322   : > { %p13_p4 = scmp.ge.s32.totalorder %s16_s18, 4  }
 0x324   :  { %15 = sbr.rel (!%p13_p4) target bundleno = 1 (0x1), region = 80 }

</bundles_post_ra>
